<compile_context>
chip_gen: v7x
topology: tpu7x:2x2x1
jax: 0.10.0
libtpu: 0.0.40
codegen_flags: <defaults>
</compile_context>

<pallas_src>
import functools
import math

import jax
import jax.numpy as jnp
from jax import lax
from jax.experimental import pallas as pl
from jax.experimental.pallas import tpu as pltpu

# ----------------------------- model config ---------------------------------
CHIN = 1
CHOUT = 1
HIDDEN = 16
DEPTH = 2
KERNEL = 8
STRIDE = 4
GROWTH = 2
FLOOR = 1e-3
LSTM_LAYERS = 2
BPAD = 8          # padded batch axis for the tiny row-stat selector matmuls

assert KERNEL == 2 * STRIDE, "phase-folded conv formulation assumes kernel == 2*stride"
assert DEPTH == 2 and CHIN == 1 and CHOUT == 1, "kernel is specialized to the reference config"


def _model_dims():
    enc_ch, dec_ch = [], []
    chin, chout, hidden = CHIN, CHOUT, HIDDEN
    for _ in range(DEPTH):
        enc_ch.append((chin, hidden))
        dec_ch.insert(0, (hidden, chout))
        chout = hidden
        chin = hidden
        hidden = int(GROWTH * hidden)
    return tuple(enc_ch), tuple(dec_ch), chin          # chin == LSTM width


def valid_length(length):
    for _ in range(DEPTH):
        length = math.ceil((length - KERNEL) / STRIDE) + 1
        length = max(length, 1)
    for _ in range(DEPTH):
        length = (length - 1) * STRIDE + KERNEL
    return int(length)


# ------------------------------ fused kernel ---------------------------------
def _fused_forward_kernel(*refs, dims, weight_names):
    nw = len(weight_names)
    a0_ref, tgt_ref, lens_ref, tbase_ref, sel_ref, selt_ref = refs[:6]
    wrefs = refs[6:6 + nw]
    pred_ref, loss_ref = refs[6 + nw], refs[7 + nw]
    W = {n: r[...] for n, r in zip(weight_names, wrefs)}

    B, T = dims["B"], dims["T"]
    H0, H1 = dims["H0"], dims["H1"]
    L1, L2, M0 = dims["L1"], dims["L2"], dims["M0"]
    S, K = STRIDE, KERNEL
    F = S * S                       # 16: time fold factor of the input/output
    ncol = M0 * B                   # lanes of the folded input/output slabs
    nb = L1 // S                    # time blocks of the enc1 input / dec1 skip

    def mm(a, b):
        return jnp.dot(a, b, preferred_element_type=jnp.float32)

    a0 = a0_ref[...]                # (F, ncol) raw wav, fold-by-16, time-major cols
    sel = sel_ref[...]              # (ncol, BPAD): col -> batch-row selector
    selt = selt_ref[...]            # (BPAD, ncol)

    # --- normalize: per-row mean/std (torch.std, unbiased) over the T samples ---
    sums = jnp.sum(mm(a0, sel), axis=0, keepdims=True)            # (1, BPAD)
    sumsq = jnp.sum(mm(a0 * a0, sel), axis=0, keepdims=True)      # (1, BPAD)
    mean = sums / T
    var = jnp.maximum((sumsq - T * mean * mean) / (T - 1), 0.0)
    std_row = jnp.sqrt(var)
    scale_row = pl.reciprocal(FLOOR + std_row, approx=True)       # EUP slot
    scale_cols = mm(scale_row, selt)                              # (1, ncol)
    std_cols = mm(std_row, selt)                                  # (1, ncol)
    x0 = a0 * scale_cols                                          # normalized input

    # --- encoder layer 0: all 8 taps + 4 output phases + batch -> ONE matmul ---
    phase_blocks = [x0[S * s:S * s + K, :nb * B] for s in range(S - 1)]
    phase_blocks.append(jnp.concatenate(
        [x0[S * (S - 1):F, :nb * B], x0[0:S, B:(nb + 1) * B]], axis=0))
    x0col = jnp.concatenate(phase_blocks, axis=1)                 # (K, L1*B)
    y0 = jnp.maximum(mm(W["enc0_w"], x0col) + W["enc0_b"], 0.0)   # (H0, L1*B)
    g0 = mm(W["enc0g_w"], y0) + W["enc0g_b"]                      # (2H0, L1*B)
    glu0 = g0[:H0] * jax.nn.sigmoid(g0[H0:])                      # (H0, L1*B)

    # re-fold (phase lane-blocks -> sublanes): enc1 input layout, dec1 skip
    a1 = jnp.concatenate(
        [glu0[:, s * nb * B:(s + 1) * nb * B] for s in range(S)], axis=0)  # (S*H0, nb*B)
    skip0 = a1

    # --- encoder layer 1: im2col matmul with contraction K*H0 = 128 ----------
    x1col = jnp.concatenate([a1[:, :L2 * B], a1[:, B:(L2 + 1) * B]], axis=0)  # (K*H0, L2*B)
    y1 = jnp.maximum(mm(W["enc1_w"], x1col) + W["enc1_b"], 0.0)   # (H1, L2*B)
    g1 = mm(W["enc1g_w"], y1) + W["enc1g_b"]
    glu1 = g1[:H1] * jax.nn.sigmoid(g1[H1:])                      # (H1, L2*B)
    skip1 = glu1

    # --- 2-layer uni-directional LSTM: state (H1, B), gates [i,f,o | g] ------
    x = glu1
    for l in range(LSTM_LAYERS):
        pin = mm(W[f"lstm{l}_wih"], x) + W[f"lstm{l}_b"]          # (4H1, L2*B), hoisted
        h = jnp.zeros((H1, B), jnp.float32)
        c = jnp.zeros((H1, B), jnp.float32)
        outs = []
        for t in range(L2):                                       # serial recurrence
            g = pin[:, t * B:(t + 1) * B] + mm(W[f"lstm{l}_whh"], h)
            sig = jax.nn.sigmoid(g[:3 * H1])                      # i, f, o in one call
            gg = jnp.tanh(g[3 * H1:])
            c = sig[H1:2 * H1] * c + sig[:H1] * gg
            h = sig[2 * H1:3 * H1] * jnp.tanh(c)
            outs.append(h)
        x = jnp.concatenate(outs, axis=1)                         # (H1, L2*B), time-major
    lstm_out = x

    # --- decoder layer 0: skip add, 1x1+GLU, ConvT emitted in fold-by-4 ------
    xin0 = lstm_out + skip1
    gd0 = mm(W["dec0g_w"], xin0) + W["dec0g_b"]
    gl0 = gd0[:H1] * jax.nn.sigmoid(gd0[H1:])                     # (H1, L2*B)
    zpad0 = jnp.zeros((H1, B), jnp.float32)
    xr = jnp.concatenate([gl0, zpad0], axis=1)                    # (H1, (L2+1)*B)
    xl = jnp.concatenate([zpad0, gl0], axis=1)
    of0 = mm(W["dec0t_lo"], xr) + mm(W["dec0t_hi"], xl) + W["dec0t_b"]  # (S*H0, nb*B)
    of0 = jnp.maximum(of0, 0.0)                                   # ReLU (not last layer)

    # --- decoder layer 1: skip add + block-diag 1x1+GLU + ConvT to fold-by-16
    xin1 = of0 + skip0                                            # (S*H0, nb*B)
    gd1 = mm(W["dec1g_w"], xin1) + W["dec1g_b"]                   # (2*S*H0, nb*B)
    gl1 = gd1[:S * H0] * jax.nn.sigmoid(gd1[S * H0:])             # (S*H0, nb*B)
    zpad1 = jnp.zeros((S * H0, B), jnp.float32)
    xc = jnp.concatenate([gl1, zpad1], axis=1)                    # (S*H0, ncol)
    xp = jnp.concatenate([zpad1, gl1], axis=1)
    o16 = mm(W["dec1t_cur"], xc) + mm(W["dec1t_prev"], xp) + W["dec1t_b"]   # (F, ncol)

    # --- un-normalize, length mask, lane-dense store, L1 loss -----------------
    pred = o16 * std_cols
    p_pos = lax.broadcasted_iota(jnp.int32, (F, ncol), 0).astype(jnp.float32)
    times = tbase_ref[...] + p_pos                                # absolute sample index
    mask = (times < lens_ref[...]).astype(jnp.float32)
    pred = pred * mask
    pred_ref[...] = pred
    # L1(predicted_masked, target) averaged over B*T; padded positions are
    # exactly zero on both sides so they contribute nothing to the sum.
    diff = jnp.abs(pred - tgt_ref[...])
    loss_ref[...] = jnp.sum(jnp.sum(diff, axis=1, keepdims=True),
                            axis=0, keepdims=True) / float(B * T)


# ------------------------------ parameters -----------------------------------
def _xavier_uniform(key, shape):
    receptive = 1
    for s in shape[2:]:
        receptive *= s
    fan_in = shape[1] * receptive
    fan_out = shape[0] * receptive
    bound = math.sqrt(6.0 / (fan_in + fan_out))
    return jax.random.uniform(key, shape, jnp.float32, -bound, bound)


def _orthogonal(key, shape):
    a = jax.random.normal(key, shape, jnp.float32)
    q, r = jnp.linalg.qr(a)
    return q * jnp.sign(jnp.diagonal(r))


def init_params(key):
    keys = iter(jax.random.split(key, 64))
    enc_ch, dec_ch, lstm_dim = _model_dims()
    p = {}
    for i, (cin, h) in enumerate(enc_ch):
        p[f"enc{i}_w"] = _xavier_uniform(next(keys), (h, cin, KERNEL))
        p[f"enc{i}_b"] = jnp.zeros((h,), jnp.float32)
        p[f"enc{i}g_w"] = _xavier_uniform(next(keys), (2 * h, h, 1))      # 1x1 conv -> GLU
        p[f"enc{i}g_b"] = jnp.zeros((2 * h,), jnp.float32)
    for d, (h, cout) in enumerate(dec_ch):
        p[f"dec{d}g_w"] = _xavier_uniform(next(keys), (2 * h, h, 1))
        p[f"dec{d}g_b"] = jnp.zeros((2 * h,), jnp.float32)
        p[f"dec{d}t_w"] = _xavier_uniform(next(keys), (h, cout, KERNEL))  # ConvT: (Cin,Cout,K)
        p[f"dec{d}t_b"] = jnp.zeros((cout,), jnp.float32)
    for l in range(LSTM_LAYERS):
        p[f"lstm{l}_wih"] = _xavier_uniform(next(keys), (4 * lstm_dim, lstm_dim))
        p[f"lstm{l}_whh"] = _orthogonal(next(keys), (4 * lstm_dim, lstm_dim))
        p[f"lstm{l}_b"] = jnp.zeros((4 * lstm_dim,), jnp.float32)         # b_ih + b_hh = 0
    return p


# -------------------------- kernel input preparation --------------------------
def _prepare_inputs(wav, target, lengths, params, dims):
    """One-time data fold + weight re-layout (all outside the kernel)."""
    B, T = dims["B"], dims["T"]
    H0, H1 = dims["H0"], dims["H1"]
    L2, M0 = dims["L2"], dims["M0"]
    S, K = STRIDE, KERNEL
    F = S * S
    ncol = M0 * B
    tfold = M0 * F

    names, arrays = [], []

    def put(name, arr):
        names.append(name)
        arrays.append(arr.astype(jnp.float32))

    # encoder 0: (H0, CHIN, K) -> (H0, K*CHIN), columns tap-major
    put("enc0_w", jnp.transpose(params["enc0_w"], (0, 2, 1)).reshape(H0, K * CHIN))
    put("enc0_b", params["enc0_b"].reshape(H0, 1))
    put("enc0g_w", params["enc0g_w"][:, :, 0])
    put("enc0g_b", params["enc0g_b"].reshape(2 * H0, 1))

    # encoder 1: (H1, H0, K) -> (H1, K*H0): [taps 0..3 per phase | taps 4..7]
    w1 = params["enc1_w"]
    w1lo = jnp.transpose(w1[:, :, :S], (0, 2, 1)).reshape(H1, S * H0)
    w1hi = jnp.transpose(w1[:, :, S:], (0, 2, 1)).reshape(H1, S * H0)
    put("enc1_w", jnp.concatenate([w1lo, w1hi], axis=1))
    put("enc1_b", params["enc1_b"].reshape(H1, 1))
    put("enc1g_w", params["enc1g_w"][:, :, 0])
    put("enc1g_b", params["enc1g_b"].reshape(2 * H1, 1))

    # LSTM: PyTorch gate order [i, f, g, o] -> [i, f, o, g]
    def reorder(w):
        return jnp.concatenate(
            [w[0:H1], w[H1:2 * H1], w[3 * H1:4 * H1], w[2 * H1:3 * H1]], axis=0)

    for l in range(LSTM_LAYERS):
        put(f"lstm{l}_wih", reorder(params[f"lstm{l}_wih"]))
        put(f"lstm{l}_whh", reorder(params[f"lstm{l}_whh"]))
        # TODO(synk): for real checkpoints this must be b_ih + b_hh (both 0 here).
        put(f"lstm{l}_b", reorder(params[f"lstm{l}_b"].reshape(4 * H1, 1)))

    # decoder 0: 1x1 GLU + ConvT emitting fold-by-4 output
    put("dec0g_w", params["dec0g_w"][:, :, 0])
    put("dec0g_b", params["dec0g_b"].reshape(2 * H1, 1))
    wt0 = jnp.transpose(params["dec0t_w"], (2, 1, 0))             # (K, H0, H1): [t, co, ci]
    put("dec0t_lo", wt0[:S].reshape(S * H0, H1))
    put("dec0t_hi", wt0[S:].reshape(S * H0, H1))
    put("dec0t_b", jnp.tile(params["dec0t_b"], S).reshape(S * H0, 1))

    # decoder 1: block-diagonal 1x1+GLU weight acting on the fold-by-4 layout
    wg1 = params["dec1g_w"][:, :, 0]                              # (2*H0, H0)
    eye = jnp.eye(S, dtype=jnp.float32)
    put("dec1g_w", jnp.concatenate([jnp.kron(eye, wg1[:H0]),
                                    jnp.kron(eye, wg1[H0:])], axis=0))
    bg1 = params["dec1g_b"]
    put("dec1g_b", jnp.concatenate([jnp.tile(bg1[:H0], S),
                                    jnp.tile(bg1[H0:], S)]).reshape(2 * S * H0, 1))

    # decoder-1 ConvT (H0 -> 1): tap matrices that emit a fold-by-16 output
    wt1 = params["dec1t_w"]                                       # (H0, 1, K)
    m_cur = jnp.zeros((F, S * H0), jnp.float32)
    m_prev = jnp.zeros((F, S * H0), jnp.float32)
    for p in range(F):
        for r in range(S):
            t = p - S * r
            if 0 <= t < K:
                m_cur = m_cur.at[p, r * H0:(r + 1) * H0].set(wt1[:, 0, t])
            t2 = F + p - S * r
            if 0 <= t2 < K:
                m_prev = m_prev.at[p, r * H0:(r + 1) * H0].set(wt1[:, 0, t2])
    put("dec1t_cur", m_cur)
    put("dec1t_prev", m_prev)
    put("dec1t_b", params["dec1t_b"].reshape(1, 1))

    # ---- data: fold by 16 with time-major columns (col = block*B + b) --------
    wav_f = jnp.pad(wav.astype(jnp.float32), ((0, 0), (0, tfold - T)))
    a0 = wav_f.reshape(B, M0, F).transpose(2, 1, 0).reshape(F, ncol)
    tgt_f = jnp.pad(target.astype(jnp.float32), ((0, 0), (0, tfold - T)))
    tgt_f = tgt_f.reshape(B, M0, F).transpose(2, 1, 0).reshape(F, ncol)
    lens_cols = jnp.tile(lengths.astype(jnp.float32), M0).reshape(1, ncol)
    time_base = jnp.repeat(jnp.arange(M0, dtype=jnp.float32) * float(F), B).reshape(1, ncol)
    colmod = jnp.arange(ncol, dtype=jnp.int32) % B
    sel = (colmod[:, None] == jnp.arange(BPAD, dtype=jnp.int32)[None, :]).astype(jnp.float32)
    selt = jnp.transpose(sel)

    data = [a0, tgt_f, lens_cols, time_base, sel, selt]
    return data + arrays, tuple(names), L2  # L2 unused by caller except sanity


# ------------------------------ forward (jit) ----------------------------------
@jax.jit
def denoise_forward(wav, target, lengths, params):
    B, T = wav.shape
    enc_ch, dec_ch, lstm_dim = _model_dims()
    H0, H1 = enc_ch[0][1], enc_ch[1][1]
    assert lstm_dim == H1

    lv = valid_length(T)
    L1 = (lv - KERNEL) // STRIDE + 1
    L2 = (L1 - KERNEL) // STRIDE + 1
    assert (L2 - 1) * STRIDE + KERNEL == L1 and (L1 - 1) * STRIDE + KERNEL == lv
    assert L1 % STRIDE == 0
    M0 = L1 // STRIDE + 1
    F = STRIDE * STRIDE
    assert M0 * F >= lv

    dims = dict(B=B, T=T, H0=H0, H1=H1, L1=L1, L2=L2, M0=M0)
    inputs, weight_names, _ = _prepare_inputs(wav, target, lengths, params, dims)
    kernel = functools.partial(_fused_forward_kernel, dims=dims,
                               weight_names=weight_names)

    ncol = M0 * B
    pred_folded, loss = pl.pallas_call(
        kernel,
        out_shape=(jax.ShapeDtypeStruct((F, ncol), jnp.float32),
                   jax.ShapeDtypeStruct((1, 1), jnp.float32)),
        in_specs=[pl.BlockSpec(memory_space=pltpu.MemorySpace.VMEM)] * len(inputs),
        out_specs=(pl.BlockSpec(memory_space=pltpu.MemorySpace.VMEM),
                   pl.BlockSpec(memory_space=pltpu.MemorySpace.VMEM)),
    )(*inputs)

    # un-fold the fold-by-16 prediction back to (B, T) (trivial XLA layout op)
    predicted = pred_folded.reshape(F, M0, B).transpose(2, 1, 0).reshape(B, M0 * F)[:, :T]
    return loss[0, 0], predicted


# ----------------------------------- main --------------------------------------
if __name__ == "__main__":
    B, T = 2, 128
    key = jax.random.PRNGKey(0)
    k_wav, k_tgt = jax.random.split(key)
    wav = jax.random.normal(k_wav, (B, T), jnp.float32)
    target = jax.random.normal(k_tgt, (B, T), jnp.float32)
    lengths = jnp.array([128, 100], jnp.int32)            # max(lengths) == T
    params = init_params(jax.random.PRNGKey(42))

    loss, predicted = denoise_forward(wav, target, lengths, params)
    jax.block_until_ready((loss, predicted))
    assert predicted.shape == (B, T)
    assert bool(jnp.isfinite(loss))
    print("KERNEL_OK")
</pallas_src>

<mosaic_0001>
module attributes {stable_mosaic.version = 11 : i64} {
  func.func @_fused_forward_kernel(%arg0: memref<16x18xf32, #tpu.memory_space<vmem>>, %arg1: memref<16x18xf32, #tpu.memory_space<vmem>>, %arg2: memref<1x18xf32, #tpu.memory_space<vmem>>, %arg3: memref<1x18xf32, #tpu.memory_space<vmem>>, %arg4: memref<18x8xf32, #tpu.memory_space<vmem>>, %arg5: memref<8x18xf32, #tpu.memory_space<vmem>>, %arg6: memref<16x8xf32, #tpu.memory_space<vmem>>, %arg7: memref<16x1xf32, #tpu.memory_space<vmem>>, %arg8: memref<32x16xf32, #tpu.memory_space<vmem>>, %arg9: memref<32x1xf32, #tpu.memory_space<vmem>>, %arg10: memref<32x128xf32, #tpu.memory_space<vmem>>, %arg11: memref<32x1xf32, #tpu.memory_space<vmem>>, %arg12: memref<64x32xf32, #tpu.memory_space<vmem>>, %arg13: memref<64x1xf32, #tpu.memory_space<vmem>>, %arg14: memref<128x32xf32, #tpu.memory_space<vmem>>, %arg15: memref<128x32xf32, #tpu.memory_space<vmem>>, %arg16: memref<128x1xf32, #tpu.memory_space<vmem>>, %arg17: memref<128x32xf32, #tpu.memory_space<vmem>>, %arg18: memref<128x32xf32, #tpu.memory_space<vmem>>, %arg19: memref<128x1xf32, #tpu.memory_space<vmem>>, %arg20: memref<64x32xf32, #tpu.memory_space<vmem>>, %arg21: memref<64x1xf32, #tpu.memory_space<vmem>>, %arg22: memref<64x32xf32, #tpu.memory_space<vmem>>, %arg23: memref<64x32xf32, #tpu.memory_space<vmem>>, %arg24: memref<64x1xf32, #tpu.memory_space<vmem>>, %arg25: memref<128x64xf32, #tpu.memory_space<vmem>>, %arg26: memref<128x1xf32, #tpu.memory_space<vmem>>, %arg27: memref<16x64xf32, #tpu.memory_space<vmem>>, %arg28: memref<16x64xf32, #tpu.memory_space<vmem>>, %arg29: memref<1x1xf32, #tpu.memory_space<vmem>>, %arg30: memref<16x18xf32, #tpu.memory_space<vmem>>, %arg31: memref<1x1xf32, #tpu.memory_space<vmem>>) attributes {dimension_semantics = [], scalar_prefetch = 0 : i64, scratch_operands = 0 : i64, tpu.core_type = #tpu.core_type<tc>} {
    %c0 = arith.constant 0 : index
    %c0_0 = arith.constant 0 : index
    %0 = vector.load %arg6[%c0, %c0_0] : memref<16x8xf32, #tpu.memory_space<vmem>>, vector<16x8xf32>
    %c0_1 = arith.constant 0 : index
    %c0_2 = arith.constant 0 : index
    %1 = vector.load %arg7[%c0_1, %c0_2] : memref<16x1xf32, #tpu.memory_space<vmem>>, vector<16x1xf32>
    %c0_3 = arith.constant 0 : index
    %c0_4 = arith.constant 0 : index
    %2 = vector.load %arg8[%c0_3, %c0_4] : memref<32x16xf32, #tpu.memory_space<vmem>>, vector<32x16xf32>
    %c0_5 = arith.constant 0 : index
    %c0_6 = arith.constant 0 : index
    %3 = vector.load %arg9[%c0_5, %c0_6] : memref<32x1xf32, #tpu.memory_space<vmem>>, vector<32x1xf32>
    %c0_7 = arith.constant 0 : index
    %c0_8 = arith.constant 0 : index
    %4 = vector.load %arg10[%c0_7, %c0_8] : memref<32x128xf32, #tpu.memory_space<vmem>>, vector<32x128xf32>
    %c0_9 = arith.constant 0 : index
    %c0_10 = arith.constant 0 : index
    %5 = vector.load %arg11[%c0_9, %c0_10] : memref<32x1xf32, #tpu.memory_space<vmem>>, vector<32x1xf32>
    %c0_11 = arith.constant 0 : index
    %c0_12 = arith.constant 0 : index
    %6 = vector.load %arg12[%c0_11, %c0_12] : memref<64x32xf32, #tpu.memory_space<vmem>>, vector<64x32xf32>
    %c0_13 = arith.constant 0 : index
    %c0_14 = arith.constant 0 : index
    %7 = vector.load %arg13[%c0_13, %c0_14] : memref<64x1xf32, #tpu.memory_space<vmem>>, vector<64x1xf32>
    %c0_15 = arith.constant 0 : index
    %c0_16 = arith.constant 0 : index
    %8 = vector.load %arg14[%c0_15, %c0_16] : memref<128x32xf32, #tpu.memory_space<vmem>>, vector<128x32xf32>
    %c0_17 = arith.constant 0 : index
    %c0_18 = arith.constant 0 : index
    %9 = vector.load %arg15[%c0_17, %c0_18] : memref<128x32xf32, #tpu.memory_space<vmem>>, vector<128x32xf32>
    %c0_19 = arith.constant 0 : index
    %c0_20 = arith.constant 0 : index
    %10 = vector.load %arg16[%c0_19, %c0_20] : memref<128x1xf32, #tpu.memory_space<vmem>>, vector<128x1xf32>
    %c0_21 = arith.constant 0 : index
    %c0_22 = arith.constant 0 : index
    %11 = vector.load %arg17[%c0_21, %c0_22] : memref<128x32xf32, #tpu.memory_space<vmem>>, vector<128x32xf32>
    %c0_23 = arith.constant 0 : index
    %c0_24 = arith.constant 0 : index
    %12 = vector.load %arg18[%c0_23, %c0_24] : memref<128x32xf32, #tpu.memory_space<vmem>>, vector<128x32xf32>
    %c0_25 = arith.constant 0 : index
    %c0_26 = arith.constant 0 : index
    %13 = vector.load %arg19[%c0_25, %c0_26] : memref<128x1xf32, #tpu.memory_space<vmem>>, vector<128x1xf32>
    %c0_27 = arith.constant 0 : index
    %c0_28 = arith.constant 0 : index
    %14 = vector.load %arg20[%c0_27, %c0_28] : memref<64x32xf32, #tpu.memory_space<vmem>>, vector<64x32xf32>
    %c0_29 = arith.constant 0 : index
    %c0_30 = arith.constant 0 : index
    %15 = vector.load %arg21[%c0_29, %c0_30] : memref<64x1xf32, #tpu.memory_space<vmem>>, vector<64x1xf32>
    %c0_31 = arith.constant 0 : index
    %c0_32 = arith.constant 0 : index
    %16 = vector.load %arg22[%c0_31, %c0_32] : memref<64x32xf32, #tpu.memory_space<vmem>>, vector<64x32xf32>
    %c0_33 = arith.constant 0 : index
    %c0_34 = arith.constant 0 : index
    %17 = vector.load %arg23[%c0_33, %c0_34] : memref<64x32xf32, #tpu.memory_space<vmem>>, vector<64x32xf32>
    %c0_35 = arith.constant 0 : index
    %c0_36 = arith.constant 0 : index
    %18 = vector.load %arg24[%c0_35, %c0_36] : memref<64x1xf32, #tpu.memory_space<vmem>>, vector<64x1xf32>
    %c0_37 = arith.constant 0 : index
    %c0_38 = arith.constant 0 : index
    %19 = vector.load %arg25[%c0_37, %c0_38] : memref<128x64xf32, #tpu.memory_space<vmem>>, vector<128x64xf32>
    %c0_39 = arith.constant 0 : index
    %c0_40 = arith.constant 0 : index
    %20 = vector.load %arg26[%c0_39, %c0_40] : memref<128x1xf32, #tpu.memory_space<vmem>>, vector<128x1xf32>
    %c0_41 = arith.constant 0 : index
    %c0_42 = arith.constant 0 : index
    %21 = vector.load %arg27[%c0_41, %c0_42] : memref<16x64xf32, #tpu.memory_space<vmem>>, vector<16x64xf32>
    %c0_43 = arith.constant 0 : index
    %c0_44 = arith.constant 0 : index
    %22 = vector.load %arg28[%c0_43, %c0_44] : memref<16x64xf32, #tpu.memory_space<vmem>>, vector<16x64xf32>
    %c0_45 = arith.constant 0 : index
    %c0_46 = arith.constant 0 : index
    %23 = vector.load %arg29[%c0_45, %c0_46] : memref<1x1xf32, #tpu.memory_space<vmem>>, vector<1x1xf32>
    %c0_47 = arith.constant 0 : index
    %c0_48 = arith.constant 0 : index
    %24 = vector.load %arg0[%c0_47, %c0_48] : memref<16x18xf32, #tpu.memory_space<vmem>>, vector<16x18xf32>
    %c0_49 = arith.constant 0 : index
    %c0_50 = arith.constant 0 : index
    %25 = vector.load %arg4[%c0_49, %c0_50] : memref<18x8xf32, #tpu.memory_space<vmem>>, vector<18x8xf32>
    %c0_51 = arith.constant 0 : index
    %c0_52 = arith.constant 0 : index
    %26 = vector.load %arg5[%c0_51, %c0_52] : memref<8x18xf32, #tpu.memory_space<vmem>>, vector<8x18xf32>
    %cst = arith.constant dense<0.000000e+00> : vector<16x8xf32>
    %27 = tpu.matmul %24, %25, %cst {dimension_numbers = #tpu.dot_dimension_numbers<[1], [0], [0], [1], [0, 0, 1, 1], [], []>} : vector<16x18xf32>, vector<18x8xf32>, vector<16x8xf32> -> vector<16x8xf32>
    %cst_53 = arith.constant dense<0.000000e+00> : vector<8xf32>
    %28 = vector.multi_reduction <add>, %27, %cst_53 [0] : vector<16x8xf32> to vector<8xf32>
    %29 = vector.shape_cast %28 : vector<8xf32> to vector<1x8xf32>
    %30 = arith.mulf %24, %24 : vector<16x18xf32>
    %cst_54 = arith.constant dense<0.000000e+00> : vector<16x8xf32>
    %31 = tpu.matmul %30, %25, %cst_54 {dimension_numbers = #tpu.dot_dimension_numbers<[1], [0], [0], [1], [0, 0, 1, 1], [], []>} : vector<16x18xf32>, vector<18x8xf32>, vector<16x8xf32> -> vector<16x8xf32>
    %cst_55 = arith.constant dense<0.000000e+00> : vector<8xf32>
    %32 = vector.multi_reduction <add>, %31, %cst_55 [0] : vector<16x8xf32> to vector<8xf32>
    %33 = vector.shape_cast %32 : vector<8xf32> to vector<1x8xf32>
    %cst_56 = arith.constant 1.280000e+02 : f32
    %34 = vector.broadcast %cst_56 : f32 to vector<1x8xf32>
    %35 = arith.divf %29, %34 : vector<1x8xf32>
    %cst_57 = arith.constant 1.280000e+02 : f32
    %36 = vector.broadcast %cst_57 : f32 to vector<1x8xf32>
    %37 = arith.mulf %36, %35 : vector<1x8xf32>
    %38 = arith.mulf %37, %35 : vector<1x8xf32>
    %39 = arith.subf %33, %38 : vector<1x8xf32>
    %cst_58 = arith.constant 1.270000e+02 : f32
    %40 = vector.broadcast %cst_58 : f32 to vector<1x8xf32>
    %41 = arith.divf %39, %40 : vector<1x8xf32>
    %cst_59 = arith.constant 0.000000e+00 : f32
    %42 = vector.broadcast %cst_59 : f32 to vector<1x8xf32>
    %43 = arith.maximumf %41, %42 : vector<1x8xf32>
    %44 = math.sqrt %43 : vector<1x8xf32>
    %cst_60 = arith.constant 1.000000e-03 : f32
    %45 = vector.broadcast %cst_60 : f32 to vector<1x8xf32>
    %46 = arith.addf %45, %44 : vector<1x8xf32>
    %47 = tpu.reciprocal %46 {approx = true} : vector<1x8xf32> -> vector<1x8xf32>
    %cst_61 = arith.constant dense<0.000000e+00> : vector<1x18xf32>
    %48 = tpu.matmul %47, %26, %cst_61 {dimension_numbers = #tpu.dot_dimension_numbers<[1], [0], [0], [1], [0, 0, 1, 1], [], []>} : vector<1x8xf32>, vector<8x18xf32>, vector<1x18xf32> -> vector<1x18xf32>
    %cst_62 = arith.constant dense<0.000000e+00> : vector<1x18xf32>
    %49 = tpu.matmul %44, %26, %cst_62 {dimension_numbers = #tpu.dot_dimension_numbers<[1], [0], [0], [1], [0, 0, 1, 1], [], []>} : vector<1x8xf32>, vector<8x18xf32>, vector<1x18xf32> -> vector<1x18xf32>
    %50 = vector.broadcast %48 : vector<1x18xf32> to vector<16x18xf32>
    %51 = arith.mulf %24, %50 : vector<16x18xf32>
    %52 = vector.extract_strided_slice %51 {offsets = [0, 0], sizes = [8, 16], strides = [1, 1]} : vector<16x18xf32> to vector<8x16xf32>
    %53 = vector.extract_strided_slice %51 {offsets = [4, 0], sizes = [8, 16], strides = [1, 1]} : vector<16x18xf32> to vector<8x16xf32>
    %54 = vector.extract_strided_slice %51 {offsets = [8, 0], sizes = [8, 16], strides = [1, 1]} : vector<16x18xf32> to vector<8x16xf32>
    %55 = vector.extract_strided_slice %51 {offsets = [12, 0], sizes = [4, 16], strides = [1, 1]} : vector<16x18xf32> to vector<4x16xf32>
    %56 = vector.extract_strided_slice %51 {offsets = [0, 2], sizes = [4, 16], strides = [1, 1]} : vector<16x18xf32> to vector<4x16xf32>
    %57 = tpu.concatenate %55, %56 in 0 : vector<4x16xf32>, vector<4x16xf32> -> vector<8x16xf32>
    %58 = tpu.concatenate %52, %53, %54, %57 in 1 : vector<8x16xf32>, vector<8x16xf32>, vector<8x16xf32>, vector<8x16xf32> -> vector<8x64xf32>
    %cst_63 = arith.constant dense<0.000000e+00> : vector<16x64xf32>
    %59 = tpu.matmul %0, %58, %cst_63 {dimension_numbers = #tpu.dot_dimension_numbers<[1], [0], [0], [1], [0, 0, 1, 1], [], []>} : vector<16x8xf32>, vector<8x64xf32>, vector<16x64xf32> -> vector<16x64xf32>
    %60 = vector.broadcast %1 : vector<16x1xf32> to vector<16x64xf32>
    %61 = arith.addf %59, %60 : vector<16x64xf32>
    %cst_64 = arith.constant 0.000000e+00 : f32
    %62 = vector.broadcast %cst_64 : f32 to vector<16x64xf32>
    %63 = arith.maximumf %61, %62 : vector<16x64xf32>
    %cst_65 = arith.constant dense<0.000000e+00> : vector<32x64xf32>
    %64 = tpu.matmul %2, %63, %cst_65 {dimension_numbers = #tpu.dot_dimension_numbers<[1], [0], [0], [1], [0, 0, 1, 1], [], []>} : vector<32x16xf32>, vector<16x64xf32>, vector<32x64xf32> -> vector<32x64xf32>
    %65 = vector.broadcast %3 : vector<32x1xf32> to vector<32x64xf32>
    %66 = arith.addf %64, %65 : vector<32x64xf32>
    %67 = vector.extract_strided_slice %66 {offsets = [0, 0], sizes = [16, 64], strides = [1, 1]} : vector<32x64xf32> to vector<16x64xf32>
    %68 = vector.extract_strided_slice %66 {offsets = [16, 0], sizes = [16, 64], strides = [1, 1]} : vector<32x64xf32> to vector<16x64xf32>
    %69 = arith.negf %68 : vector<16x64xf32>
    %70 = math.exp %69 : vector<16x64xf32>
    %cst_66 = arith.constant 1.000000e+00 : f32
    %71 = vector.broadcast %cst_66 : f32 to vector<16x64xf32>
    %72 = arith.addf %71, %70 : vector<16x64xf32>
    %73 = arith.divf %71, %72 : vector<16x64xf32>
    %74 = arith.mulf %67, %73 : vector<16x64xf32>
    %75 = vector.extract_strided_slice %74 {offsets = [0, 0], sizes = [16, 16], strides = [1, 1]} : vector<16x64xf32> to vector<16x16xf32>
    %76 = vector.extract_strided_slice %74 {offsets = [0, 16], sizes = [16, 16], strides = [1, 1]} : vector<16x64xf32> to vector<16x16xf32>
    %77 = vector.extract_strided_slice %74 {offsets = [0, 32], sizes = [16, 16], strides = [1, 1]} : vector<16x64xf32> to vector<16x16xf32>
    %78 = vector.extract_strided_slice %74 {offsets = [0, 48], sizes = [16, 16], strides = [1, 1]} : vector<16x64xf32> to vector<16x16xf32>
    %79 = tpu.concatenate %75, %76, %77, %78 in 0 : vector<16x16xf32>, vector<16x16xf32>, vector<16x16xf32>, vector<16x16xf32> -> vector<64x16xf32>
    %80 = vector.extract_strided_slice %79 {offsets = [0, 0], sizes = [64, 14], strides = [1, 1]} : vector<64x16xf32> to vector<64x14xf32>
    %81 = vector.extract_strided_slice %79 {offsets = [0, 2], sizes = [64, 14], strides = [1, 1]} : vector<64x16xf32> to vector<64x14xf32>
    %82 = tpu.concatenate %80, %81 in 0 : vector<64x14xf32>, vector<64x14xf32> -> vector<128x14xf32>
    %cst_67 = arith.constant dense<0.000000e+00> : vector<32x14xf32>
    %83 = tpu.matmul %4, %82, %cst_67 {dimension_numbers = #tpu.dot_dimension_numbers<[1], [0], [0], [1], [0, 0, 1, 1], [], []>} : vector<32x128xf32>, vector<128x14xf32>, vector<32x14xf32> -> vector<32x14xf32>
    %84 = vector.broadcast %5 : vector<32x1xf32> to vector<32x14xf32>
    %85 = arith.addf %83, %84 : vector<32x14xf32>
    %cst_68 = arith.constant 0.000000e+00 : f32
    %86 = vector.broadcast %cst_68 : f32 to vector<32x14xf32>
    %87 = arith.maximumf %85, %86 : vector<32x14xf32>
    %cst_69 = arith.constant dense<0.000000e+00> : vector<64x14xf32>
    %88 = tpu.matmul %6, %87, %cst_69 {dimension_numbers = #tpu.dot_dimension_numbers<[1], [0], [0], [1], [0, 0, 1, 1], [], []>} : vector<64x32xf32>, vector<32x14xf32>, vector<64x14xf32> -> vector<64x14xf32>
    %89 = vector.broadcast %7 : vector<64x1xf32> to vector<64x14xf32>
    %90 = arith.addf %88, %89 : vector<64x14xf32>
    %91 = vector.extract_strided_slice %90 {offsets = [0, 0], sizes = [32, 14], strides = [1, 1]} : vector<64x14xf32> to vector<32x14xf32>
    %92 = vector.extract_strided_slice %90 {offsets = [32, 0], sizes = [32, 14], strides = [1, 1]} : vector<64x14xf32> to vector<32x14xf32>
    %93 = arith.negf %92 : vector<32x14xf32>
    %94 = math.exp %93 : vector<32x14xf32>
    %cst_70 = arith.constant 1.000000e+00 : f32
    %95 = vector.broadcast %cst_70 : f32 to vector<32x14xf32>
    %96 = arith.addf %95, %94 : vector<32x14xf32>
    %97 = arith.divf %95, %96 : vector<32x14xf32>
    %98 = arith.mulf %91, %97 : vector<32x14xf32>
    %cst_71 = arith.constant dense<0.000000e+00> : vector<128x14xf32>
    %99 = tpu.matmul %8, %98, %cst_71 {dimension_numbers = #tpu.dot_dimension_numbers<[1], [0], [0], [1], [0, 0, 1, 1], [], []>} : vector<128x32xf32>, vector<32x14xf32>, vector<128x14xf32> -> vector<128x14xf32>
    %100 = vector.broadcast %10 : vector<128x1xf32> to vector<128x14xf32>
    %101 = arith.addf %99, %100 : vector<128x14xf32>
    %cst_72 = arith.constant 0.000000e+00 : f32
    %102 = vector.broadcast %cst_72 : f32 to vector<32x2xf32>
    %cst_73 = arith.constant 0.000000e+00 : f32
    %103 = vector.broadcast %cst_73 : f32 to vector<32x2xf32>
    %104 = vector.extract_strided_slice %101 {offsets = [0, 0], sizes = [128, 2], strides = [1, 1]} : vector<128x14xf32> to vector<128x2xf32>
    %cst_74 = arith.constant dense<0.000000e+00> : vector<128x2xf32>
    %105 = tpu.matmul %9, %102, %cst_74 {dimension_numbers = #tpu.dot_dimension_numbers<[1], [0], [0], [1], [0, 0, 1, 1], [], []>} : vector<128x32xf32>, vector<32x2xf32>, vector<128x2xf32> -> vector<128x2xf32>
    %106 = arith.addf %104, %105 : vector<128x2xf32>
    %107 = vector.extract_strided_slice %106 {offsets = [0, 0], sizes = [96, 2], strides = [1, 1]} : vector<128x2xf32> to vector<96x2xf32>
    %108 = arith.negf %107 : vector<96x2xf32>
    %109 = math.exp %108 : vector<96x2xf32>
    %cst_75 = arith.constant 1.000000e+00 : f32
    %110 = vector.broadcast %cst_75 : f32 to vector<96x2xf32>
    %111 = arith.addf %110, %109 : vector<96x2xf32>
    %112 = arith.divf %110, %111 : vector<96x2xf32>
    %113 = vector.extract_strided_slice %106 {offsets = [96, 0], sizes = [32, 2], strides = [1, 1]} : vector<128x2xf32> to vector<32x2xf32>
    %114 = math.tanh %113 : vector<32x2xf32>
    %115 = vector.extract_strided_slice %112 {offsets = [32, 0], sizes = [32, 2], strides = [1, 1]} : vector<96x2xf32> to vector<32x2xf32>
    %116 = arith.mulf %115, %103 : vector<32x2xf32>
    %117 = vector.extract_strided_slice %112 {offsets = [0, 0], sizes = [32, 2], strides = [1, 1]} : vector<96x2xf32> to vector<32x2xf32>
    %118 = arith.mulf %117, %114 : vector<32x2xf32>
    %119 = arith.addf %116, %118 : vector<32x2xf32>
    %120 = vector.extract_strided_slice %112 {offsets = [64, 0], sizes = [32, 2], strides = [1, 1]} : vector<96x2xf32> to vector<32x2xf32>
    %121 = math.tanh %119 : vector<32x2xf32>
    %122 = arith.mulf %120, %121 : vector<32x2xf32>
    %123 = vector.extract_strided_slice %101 {offsets = [0, 2], sizes = [128, 2], strides = [1, 1]} : vector<128x14xf32> to vector<128x2xf32>
    %cst_76 = arith.constant dense<0.000000e+00> : vector<128x2xf32>
    %124 = tpu.matmul %9, %122, %cst_76 {dimension_numbers = #tpu.dot_dimension_numbers<[1], [0], [0], [1], [0, 0, 1, 1], [], []>} : vector<128x32xf32>, vector<32x2xf32>, vector<128x2xf32> -> vector<128x2xf32>
    %125 = arith.addf %123, %124 : vector<128x2xf32>
    %126 = vector.extract_strided_slice %125 {offsets = [0, 0], sizes = [96, 2], strides = [1, 1]} : vector<128x2xf32> to vector<96x2xf32>
    %127 = arith.negf %126 : vector<96x2xf32>
    %128 = math.exp %127 : vector<96x2xf32>
    %cst_77 = arith.constant 1.000000e+00 : f32
    %129 = vector.broadcast %cst_77 : f32 to vector<96x2xf32>
    %130 = arith.addf %129, %128 : vector<96x2xf32>
    %131 = arith.divf %129, %130 : vector<96x2xf32>
    %132 = vector.extract_strided_slice %125 {offsets = [96, 0], sizes = [32, 2], strides = [1, 1]} : vector<128x2xf32> to vector<32x2xf32>
    %133 = math.tanh %132 : vector<32x2xf32>
    %134 = vector.extract_strided_slice %131 {offsets = [32, 0], sizes = [32, 2], strides = [1, 1]} : vector<96x2xf32> to vector<32x2xf32>
    %135 = arith.mulf %134, %119 : vector<32x2xf32>
    %136 = vector.extract_strided_slice %131 {offsets = [0, 0], sizes = [32, 2], strides = [1, 1]} : vector<96x2xf32> to vector<32x2xf32>
    %137 = arith.mulf %136, %133 : vector<32x2xf32>
    %138 = arith.addf %135, %137 : vector<32x2xf32>
    %139 = vector.extract_strided_slice %131 {offsets = [64, 0], sizes = [32, 2], strides = [1, 1]} : vector<96x2xf32> to vector<32x2xf32>
    %140 = math.tanh %138 : vector<32x2xf32>
    %141 = arith.mulf %139, %140 : vector<32x2xf32>
    %142 = vector.extract_strided_slice %101 {offsets = [0, 4], sizes = [128, 2], strides = [1, 1]} : vector<128x14xf32> to vector<128x2xf32>
    %cst_78 = arith.constant dense<0.000000e+00> : vector<128x2xf32>
    %143 = tpu.matmul %9, %141, %cst_78 {dimension_numbers = #tpu.dot_dimension_numbers<[1], [0], [0], [1], [0, 0, 1, 1], [], []>} : vector<128x32xf32>, vector<32x2xf32>, vector<128x2xf32> -> vector<128x2xf32>
    %144 = arith.addf %142, %143 : vector<128x2xf32>
    %145 = vector.extract_strided_slice %144 {offsets = [0, 0], sizes = [96, 2], strides = [1, 1]} : vector<128x2xf32> to vector<96x2xf32>
    %146 = arith.negf %145 : vector<96x2xf32>
    %147 = math.exp %146 : vector<96x2xf32>
    %cst_79 = arith.constant 1.000000e+00 : f32
    %148 = vector.broadcast %cst_79 : f32 to vector<96x2xf32>
    %149 = arith.addf %148, %147 : vector<96x2xf32>
    %150 = arith.divf %148, %149 : vector<96x2xf32>
    %151 = vector.extract_strided_slice %144 {offsets = [96, 0], sizes = [32, 2], strides = [1, 1]} : vector<128x2xf32> to vector<32x2xf32>
    %152 = math.tanh %151 : vector<32x2xf32>
    %153 = vector.extract_strided_slice %150 {offsets = [32, 0], sizes = [32, 2], strides = [1, 1]} : vector<96x2xf32> to vector<32x2xf32>
    %154 = arith.mulf %153, %138 : vector<32x2xf32>
    %155 = vector.extract_strided_slice %150 {offsets = [0, 0], sizes = [32, 2], strides = [1, 1]} : vector<96x2xf32> to vector<32x2xf32>
    %156 = arith.mulf %155, %152 : vector<32x2xf32>
    %157 = arith.addf %154, %156 : vector<32x2xf32>
    %158 = vector.extract_strided_slice %150 {offsets = [64, 0], sizes = [32, 2], strides = [1, 1]} : vector<96x2xf32> to vector<32x2xf32>
    %159 = math.tanh %157 : vector<32x2xf32>
    %160 = arith.mulf %158, %159 : vector<32x2xf32>
    %161 = vector.extract_strided_slice %101 {offsets = [0, 6], sizes = [128, 2], strides = [1, 1]} : vector<128x14xf32> to vector<128x2xf32>
    %cst_80 = arith.constant dense<0.000000e+00> : vector<128x2xf32>
    %162 = tpu.matmul %9, %160, %cst_80 {dimension_numbers = #tpu.dot_dimension_numbers<[1], [0], [0], [1], [0, 0, 1, 1], [], []>} : vector<128x32xf32>, vector<32x2xf32>, vector<128x2xf32> -> vector<128x2xf32>
    %163 = arith.addf %161, %162 : vector<128x2xf32>
    %164 = vector.extract_strided_slice %163 {offsets = [0, 0], sizes = [96, 2], strides = [1, 1]} : vector<128x2xf32> to vector<96x2xf32>
    %165 = arith.negf %164 : vector<96x2xf32>
    %166 = math.exp %165 : vector<96x2xf32>
    %cst_81 = arith.constant 1.000000e+00 : f32
    %167 = vector.broadcast %cst_81 : f32 to vector<96x2xf32>
    %168 = arith.addf %167, %166 : vector<96x2xf32>
    %169 = arith.divf %167, %168 : vector<96x2xf32>
    %170 = vector.extract_strided_slice %163 {offsets = [96, 0], sizes = [32, 2], strides = [1, 1]} : vector<128x2xf32> to vector<32x2xf32>
    %171 = math.tanh %170 : vector<32x2xf32>
    %172 = vector.extract_strided_slice %169 {offsets = [32, 0], sizes = [32, 2], strides = [1, 1]} : vector<96x2xf32> to vector<32x2xf32>
    %173 = arith.mulf %172, %157 : vector<32x2xf32>
    %174 = vector.extract_strided_slice %169 {offsets = [0, 0], sizes = [32, 2], strides = [1, 1]} : vector<96x2xf32> to vector<32x2xf32>
    %175 = arith.mulf %174, %171 : vector<32x2xf32>
    %176 = arith.addf %173, %175 : vector<32x2xf32>
    %177 = vector.extract_strided_slice %169 {offsets = [64, 0], sizes = [32, 2], strides = [1, 1]} : vector<96x2xf32> to vector<32x2xf32>
    %178 = math.tanh %176 : vector<32x2xf32>
    %179 = arith.mulf %177, %178 : vector<32x2xf32>
    %180 = vector.extract_strided_slice %101 {offsets = [0, 8], sizes = [128, 2], strides = [1, 1]} : vector<128x14xf32> to vector<128x2xf32>
    %cst_82 = arith.constant dense<0.000000e+00> : vector<128x2xf32>
    %181 = tpu.matmul %9, %179, %cst_82 {dimension_numbers = #tpu.dot_dimension_numbers<[1], [0], [0], [1], [0, 0, 1, 1], [], []>} : vector<128x32xf32>, vector<32x2xf32>, vector<128x2xf32> -> vector<128x2xf32>
    %182 = arith.addf %180, %181 : vector<128x2xf32>
    %183 = vector.extract_strided_slice %182 {offsets = [0, 0], sizes = [96, 2], strides = [1, 1]} : vector<128x2xf32> to vector<96x2xf32>
    %184 = arith.negf %183 : vector<96x2xf32>
    %185 = math.exp %184 : vector<96x2xf32>
    %cst_83 = arith.constant 1.000000e+00 : f32
    %186 = vector.broadcast %cst_83 : f32 to vector<96x2xf32>
    %187 = arith.addf %186, %185 : vector<96x2xf32>
    %188 = arith.divf %186, %187 : vector<96x2xf32>
    %189 = vector.extract_strided_slice %182 {offsets = [96, 0], sizes = [32, 2], strides = [1, 1]} : vector<128x2xf32> to vector<32x2xf32>
    %190 = math.tanh %189 : vector<32x2xf32>
    %191 = vector.extract_strided_slice %188 {offsets = [32, 0], sizes = [32, 2], strides = [1, 1]} : vector<96x2xf32> to vector<32x2xf32>
    %192 = arith.mulf %191, %176 : vector<32x2xf32>
    %193 = vector.extract_strided_slice %188 {offsets = [0, 0], sizes = [32, 2], strides = [1, 1]} : vector<96x2xf32> to vector<32x2xf32>
    %194 = arith.mulf %193, %190 : vector<32x2xf32>
    %195 = arith.addf %192, %194 : vector<32x2xf32>
    %196 = vector.extract_strided_slice %188 {offsets = [64, 0], sizes = [32, 2], strides = [1, 1]} : vector<96x2xf32> to vector<32x2xf32>
    %197 = math.tanh %195 : vector<32x2xf32>
    %198 = arith.mulf %196, %197 : vector<32x2xf32>
    %199 = vector.extract_strided_slice %101 {offsets = [0, 10], sizes = [128, 2], strides = [1, 1]} : vector<128x14xf32> to vector<128x2xf32>
    %cst_84 = arith.constant dense<0.000000e+00> : vector<128x2xf32>
    %200 = tpu.matmul %9, %198, %cst_84 {dimension_numbers = #tpu.dot_dimension_numbers<[1], [0], [0], [1], [0, 0, 1, 1], [], []>} : vector<128x32xf32>, vector<32x2xf32>, vector<128x2xf32> -> vector<128x2xf32>
    %201 = arith.addf %199, %200 : vector<128x2xf32>
    %202 = vector.extract_strided_slice %201 {offsets = [0, 0], sizes = [96, 2], strides = [1, 1]} : vector<128x2xf32> to vector<96x2xf32>
    %203 = arith.negf %202 : vector<96x2xf32>
    %204 = math.exp %203 : vector<96x2xf32>
    %cst_85 = arith.constant 1.000000e+00 : f32
    %205 = vector.broadcast %cst_85 : f32 to vector<96x2xf32>
    %206 = arith.addf %205, %204 : vector<96x2xf32>
    %207 = arith.divf %205, %206 : vector<96x2xf32>
    %208 = vector.extract_strided_slice %201 {offsets = [96, 0], sizes = [32, 2], strides = [1, 1]} : vector<128x2xf32> to vector<32x2xf32>
    %209 = math.tanh %208 : vector<32x2xf32>
    %210 = vector.extract_strided_slice %207 {offsets = [32, 0], sizes = [32, 2], strides = [1, 1]} : vector<96x2xf32> to vector<32x2xf32>
    %211 = arith.mulf %210, %195 : vector<32x2xf32>
    %212 = vector.extract_strided_slice %207 {offsets = [0, 0], sizes = [32, 2], strides = [1, 1]} : vector<96x2xf32> to vector<32x2xf32>
    %213 = arith.mulf %212, %209 : vector<32x2xf32>
    %214 = arith.addf %211, %213 : vector<32x2xf32>
    %215 = vector.extract_strided_slice %207 {offsets = [64, 0], sizes = [32, 2], strides = [1, 1]} : vector<96x2xf32> to vector<32x2xf32>
    %216 = math.tanh %214 : vector<32x2xf32>
    %217 = arith.mulf %215, %216 : vector<32x2xf32>
    %218 = vector.extract_strided_slice %101 {offsets = [0, 12], sizes = [128, 2], strides = [1, 1]} : vector<128x14xf32> to vector<128x2xf32>
    %cst_86 = arith.constant dense<0.000000e+00> : vector<128x2xf32>
    %219 = tpu.matmul %9, %217, %cst_86 {dimension_numbers = #tpu.dot_dimension_numbers<[1], [0], [0], [1], [0, 0, 1, 1], [], []>} : vector<128x32xf32>, vector<32x2xf32>, vector<128x2xf32> -> vector<128x2xf32>
    %220 = arith.addf %218, %219 : vector<128x2xf32>
    %221 = vector.extract_strided_slice %220 {offsets = [0, 0], sizes = [96, 2], strides = [1, 1]} : vector<128x2xf32> to vector<96x2xf32>
    %222 = arith.negf %221 : vector<96x2xf32>
    %223 = math.exp %222 : vector<96x2xf32>
    %cst_87 = arith.constant 1.000000e+00 : f32
    %224 = vector.broadcast %cst_87 : f32 to vector<96x2xf32>
    %225 = arith.addf %224, %223 : vector<96x2xf32>
    %226 = arith.divf %224, %225 : vector<96x2xf32>
    %227 = vector.extract_strided_slice %220 {offsets = [96, 0], sizes = [32, 2], strides = [1, 1]} : vector<128x2xf32> to vector<32x2xf32>
    %228 = math.tanh %227 : vector<32x2xf32>
    %229 = vector.extract_strided_slice %226 {offsets = [32, 0], sizes = [32, 2], strides = [1, 1]} : vector<96x2xf32> to vector<32x2xf32>
    %230 = arith.mulf %229, %214 : vector<32x2xf32>
    %231 = vector.extract_strided_slice %226 {offsets = [0, 0], sizes = [32, 2], strides = [1, 1]} : vector<96x2xf32> to vector<32x2xf32>
    %232 = arith.mulf %231, %228 : vector<32x2xf32>
    %233 = arith.addf %230, %232 : vector<32x2xf32>
    %234 = vector.extract_strided_slice %226 {offsets = [64, 0], sizes = [32, 2], strides = [1, 1]} : vector<96x2xf32> to vector<32x2xf32>
    %235 = math.tanh %233 : vector<32x2xf32>
    %236 = arith.mulf %234, %235 : vector<32x2xf32>
    %237 = tpu.concatenate %122, %141, %160, %179, %198, %217, %236 in 1 : vector<32x2xf32>, vector<32x2xf32>, vector<32x2xf32>, vector<32x2xf32>, vector<32x2xf32>, vector<32x2xf32>, vector<32x2xf32> -> vector<32x14xf32>
    %cst_88 = arith.constant dense<0.000000e+00> : vector<128x14xf32>
    %238 = tpu.matmul %11, %237, %cst_88 {dimension_numbers = #tpu.dot_dimension_numbers<[1], [0], [0], [1], [0, 0, 1, 1], [], []>} : vector<128x32xf32>, vector<32x14xf32>, vector<128x14xf32> -> vector<128x14xf32>
    %239 = vector.broadcast %13 : vector<128x1xf32> to vector<128x14xf32>
    %240 = arith.addf %238, %239 : vector<128x14xf32>
    %cst_89 = arith.constant 0.000000e+00 : f32
    %241 = vector.broadcast %cst_89 : f32 to vector<32x2xf32>
    %cst_90 = arith.constant 0.000000e+00 : f32
    %242 = vector.broadcast %cst_90 : f32 to vector<32x2xf32>
    %243 = vector.extract_strided_slice %240 {offsets = [0, 0], sizes = [128, 2], strides = [1, 1]} : vector<128x14xf32> to vector<128x2xf32>
    %cst_91 = arith.constant dense<0.000000e+00> : vector<128x2xf32>
    %244 = tpu.matmul %12, %241, %cst_91 {dimension_numbers = #tpu.dot_dimension_numbers<[1], [0], [0], [1], [0, 0, 1, 1], [], []>} : vector<128x32xf32>, vector<32x2xf32>, vector<128x2xf32> -> vector<128x2xf32>
    %245 = arith.addf %243, %244 : vector<128x2xf32>
    %246 = vector.extract_strided_slice %245 {offsets = [0, 0], sizes = [96, 2], strides = [1, 1]} : vector<128x2xf32> to vector<96x2xf32>
    %247 = arith.negf %246 : vector<96x2xf32>
    %248 = math.exp %247 : vector<96x2xf32>
    %cst_92 = arith.constant 1.000000e+00 : f32
    %249 = vector.broadcast %cst_92 : f32 to vector<96x2xf32>
    %250 = arith.addf %249, %248 : vector<96x2xf32>
    %251 = arith.divf %249, %250 : vector<96x2xf32>
    %252 = vector.extract_strided_slice %245 {offsets = [96, 0], sizes = [32, 2], strides = [1, 1]} : vector<128x2xf32> to vector<32x2xf32>
    %253 = math.tanh %252 : vector<32x2xf32>
    %254 = vector.extract_strided_slice %251 {offsets = [32, 0], sizes = [32, 2], strides = [1, 1]} : vector<96x2xf32> to vector<32x2xf32>
    %255 = arith.mulf %254, %242 : vector<32x2xf32>
    %256 = vector.extract_strided_slice %251 {offsets = [0, 0], sizes = [32, 2], strides = [1, 1]} : vector<96x2xf32> to vector<32x2xf32>
    %257 = arith.mulf %256, %253 : vector<32x2xf32>
    %258 = arith.addf %255, %257 : vector<32x2xf32>
    %259 = vector.extract_strided_slice %251 {offsets = [64, 0], sizes = [32, 2], strides = [1, 1]} : vector<96x2xf32> to vector<32x2xf32>
    %260 = math.tanh %258 : vector<32x2xf32>
    %261 = arith.mulf %259, %260 : vector<32x2xf32>
    %262 = vector.extract_strided_slice %240 {offsets = [0, 2], sizes = [128, 2], strides = [1, 1]} : vector<128x14xf32> to vector<128x2xf32>
    %cst_93 = arith.constant dense<0.000000e+00> : vector<128x2xf32>
    %263 = tpu.matmul %12, %261, %cst_93 {dimension_numbers = #tpu.dot_dimension_numbers<[1], [0], [0], [1], [0, 0, 1, 1], [], []>} : vector<128x32xf32>, vector<32x2xf32>, vector<128x2xf32> -> vector<128x2xf32>
    %264 = arith.addf %262, %263 : vector<128x2xf32>
    %265 = vector.extract_strided_slice %264 {offsets = [0, 0], sizes = [96, 2], strides = [1, 1]} : vector<128x2xf32> to vector<96x2xf32>
    %266 = arith.negf %265 : vector<96x2xf32>
    %267 = math.exp %266 : vector<96x2xf32>
    %cst_94 = arith.constant 1.000000e+00 : f32
    %268 = vector.broadcast %cst_94 : f32 to vector<96x2xf32>
    %269 = arith.addf %268, %267 : vector<96x2xf32>
    %270 = arith.divf %268, %269 : vector<96x2xf32>
    %271 = vector.extract_strided_slice %264 {offsets = [96, 0], sizes = [32, 2], strides = [1, 1]} : vector<128x2xf32> to vector<32x2xf32>
    %272 = math.tanh %271 : vector<32x2xf32>
    %273 = vector.extract_strided_slice %270 {offsets = [32, 0], sizes = [32, 2], strides = [1, 1]} : vector<96x2xf32> to vector<32x2xf32>
    %274 = arith.mulf %273, %258 : vector<32x2xf32>
    %275 = vector.extract_strided_slice %270 {offsets = [0, 0], sizes = [32, 2], strides = [1, 1]} : vector<96x2xf32> to vector<32x2xf32>
    %276 = arith.mulf %275, %272 : vector<32x2xf32>
    %277 = arith.addf %274, %276 : vector<32x2xf32>
    %278 = vector.extract_strided_slice %270 {offsets = [64, 0], sizes = [32, 2], strides = [1, 1]} : vector<96x2xf32> to vector<32x2xf32>
    %279 = math.tanh %277 : vector<32x2xf32>
    %280 = arith.mulf %278, %279 : vector<32x2xf32>
    %281 = vector.extract_strided_slice %240 {offsets = [0, 4], sizes = [128, 2], strides = [1, 1]} : vector<128x14xf32> to vector<128x2xf32>
    %cst_95 = arith.constant dense<0.000000e+00> : vector<128x2xf32>
    %282 = tpu.matmul %12, %280, %cst_95 {dimension_numbers = #tpu.dot_dimension_numbers<[1], [0], [0], [1], [0, 0, 1, 1], [], []>} : vector<128x32xf32>, vector<32x2xf32>, vector<128x2xf32> -> vector<128x2xf32>
    %283 = arith.addf %281, %282 : vector<128x2xf32>
    %284 = vector.extract_strided_slice %283 {offsets = [0, 0], sizes = [96, 2], strides = [1, 1]} : vector<128x2xf32> to vector<96x2xf32>
    %285 = arith.negf %284 : vector<96x2xf32>
    %286 = math.exp %285 : vector<96x2xf32>
    %cst_96 = arith.constant 1.000000e+00 : f32
    %287 = vector.broadcast %cst_96 : f32 to vector<96x2xf32>
    %288 = arith.addf %287, %286 : vector<96x2xf32>
    %289 = arith.divf %287, %288 : vector<96x2xf32>
    %290 = vector.extract_strided_slice %283 {offsets = [96, 0], sizes = [32, 2], strides = [1, 1]} : vector<128x2xf32> to vector<32x2xf32>
    %291 = math.tanh %290 : vector<32x2xf32>
    %292 = vector.extract_strided_slice %289 {offsets = [32, 0], sizes = [32, 2], strides = [1, 1]} : vector<96x2xf32> to vector<32x2xf32>
    %293 = arith.mulf %292, %277 : vector<32x2xf32>
    %294 = vector.extract_strided_slice %289 {offsets = [0, 0], sizes = [32, 2], strides = [1, 1]} : vector<96x2xf32> to vector<32x2xf32>
    %295 = arith.mulf %294, %291 : vector<32x2xf32>
    %296 = arith.addf %293, %295 : vector<32x2xf32>
    %297 = vector.extract_strided_slice %289 {offsets = [64, 0], sizes = [32, 2], strides = [1, 1]} : vector<96x2xf32> to vector<32x2xf32>
    %298 = math.tanh %296 : vector<32x2xf32>
    %299 = arith.mulf %297, %298 : vector<32x2xf32>
    %300 = vector.extract_strided_slice %240 {offsets = [0, 6], sizes = [128, 2], strides = [1, 1]} : vector<128x14xf32> to vector<128x2xf32>
    %cst_97 = arith.constant dense<0.000000e+00> : vector<128x2xf32>
    %301 = tpu.matmul %12, %299, %cst_97 {dimension_numbers = #tpu.dot_dimension_numbers<[1], [0], [0], [1], [0, 0, 1, 1], [], []>} : vector<128x32xf32>, vector<32x2xf32>, vector<128x2xf32> -> vector<128x2xf32>
    %302 = arith.addf %300, %301 : vector<128x2xf32>
    %303 = vector.extract_strided_slice %302 {offsets = [0, 0], sizes = [96, 2], strides = [1, 1]} : vector<128x2xf32> to vector<96x2xf32>
    %304 = arith.negf %303 : vector<96x2xf32>
    %305 = math.exp %304 : vector<96x2xf32>
    %cst_98 = arith.constant 1.000000e+00 : f32
    %306 = vector.broadcast %cst_98 : f32 to vector<96x2xf32>
    %307 = arith.addf %306, %305 : vector<96x2xf32>
    %308 = arith.divf %306, %307 : vector<96x2xf32>
    %309 = vector.extract_strided_slice %302 {offsets = [96, 0], sizes = [32, 2], strides = [1, 1]} : vector<128x2xf32> to vector<32x2xf32>
    %310 = math.tanh %309 : vector<32x2xf32>
    %311 = vector.extract_strided_slice %308 {offsets = [32, 0], sizes = [32, 2], strides = [1, 1]} : vector<96x2xf32> to vector<32x2xf32>
    %312 = arith.mulf %311, %296 : vector<32x2xf32>
    %313 = vector.extract_strided_slice %308 {offsets = [0, 0], sizes = [32, 2], strides = [1, 1]} : vector<96x2xf32> to vector<32x2xf32>
    %314 = arith.mulf %313, %310 : vector<32x2xf32>
    %315 = arith.addf %312, %314 : vector<32x2xf32>
    %316 = vector.extract_strided_slice %308 {offsets = [64, 0], sizes = [32, 2], strides = [1, 1]} : vector<96x2xf32> to vector<32x2xf32>
    %317 = math.tanh %315 : vector<32x2xf32>
    %318 = arith.mulf %316, %317 : vector<32x2xf32>
    %319 = vector.extract_strided_slice %240 {offsets = [0, 8], sizes = [128, 2], strides = [1, 1]} : vector<128x14xf32> to vector<128x2xf32>
    %cst_99 = arith.constant dense<0.000000e+00> : vector<128x2xf32>
    %320 = tpu.matmul %12, %318, %cst_99 {dimension_numbers = #tpu.dot_dimension_numbers<[1], [0], [0], [1], [0, 0, 1, 1], [], []>} : vector<128x32xf32>, vector<32x2xf32>, vector<128x2xf32> -> vector<128x2xf32>
    %321 = arith.addf %319, %320 : vector<128x2xf32>
    %322 = vector.extract_strided_slice %321 {offsets = [0, 0], sizes = [96, 2], strides = [1, 1]} : vector<128x2xf32> to vector<96x2xf32>
    %323 = arith.negf %322 : vector<96x2xf32>
    %324 = math.exp %323 : vector<96x2xf32>
    %cst_100 = arith.constant 1.000000e+00 : f32
    %325 = vector.broadcast %cst_100 : f32 to vector<96x2xf32>
    %326 = arith.addf %325, %324 : vector<96x2xf32>
    %327 = arith.divf %325, %326 : vector<96x2xf32>
    %328 = vector.extract_strided_slice %321 {offsets = [96, 0], sizes = [32, 2], strides = [1, 1]} : vector<128x2xf32> to vector<32x2xf32>
    %329 = math.tanh %328 : vector<32x2xf32>
    %330 = vector.extract_strided_slice %327 {offsets = [32, 0], sizes = [32, 2], strides = [1, 1]} : vector<96x2xf32> to vector<32x2xf32>
    %331 = arith.mulf %330, %315 : vector<32x2xf32>
    %332 = vector.extract_strided_slice %327 {offsets = [0, 0], sizes = [32, 2], strides = [1, 1]} : vector<96x2xf32> to vector<32x2xf32>
    %333 = arith.mulf %332, %329 : vector<32x2xf32>
    %334 = arith.addf %331, %333 : vector<32x2xf32>
    %335 = vector.extract_strided_slice %327 {offsets = [64, 0], sizes = [32, 2], strides = [1, 1]} : vector<96x2xf32> to vector<32x2xf32>
    %336 = math.tanh %334 : vector<32x2xf32>
    %337 = arith.mulf %335, %336 : vector<32x2xf32>
    %338 = vector.extract_strided_slice %240 {offsets = [0, 10], sizes = [128, 2], strides = [1, 1]} : vector<128x14xf32> to vector<128x2xf32>
    %cst_101 = arith.constant dense<0.000000e+00> : vector<128x2xf32>
    %339 = tpu.matmul %12, %337, %cst_101 {dimension_numbers = #tpu.dot_dimension_numbers<[1], [0], [0], [1], [0, 0, 1, 1], [], []>} : vector<128x32xf32>, vector<32x2xf32>, vector<128x2xf32> -> vector<128x2xf32>
    %340 = arith.addf %338, %339 : vector<128x2xf32>
    %341 = vector.extract_strided_slice %340 {offsets = [0, 0], sizes = [96, 2], strides = [1, 1]} : vector<128x2xf32> to vector<96x2xf32>
    %342 = arith.negf %341 : vector<96x2xf32>
    %343 = math.exp %342 : vector<96x2xf32>
    %cst_102 = arith.constant 1.000000e+00 : f32
    %344 = vector.broadcast %cst_102 : f32 to vector<96x2xf32>
    %345 = arith.addf %344, %343 : vector<96x2xf32>
    %346 = arith.divf %344, %345 : vector<96x2xf32>
    %347 = vector.extract_strided_slice %340 {offsets = [96, 0], sizes = [32, 2], strides = [1, 1]} : vector<128x2xf32> to vector<32x2xf32>
    %348 = math.tanh %347 : vector<32x2xf32>
    %349 = vector.extract_strided_slice %346 {offsets = [32, 0], sizes = [32, 2], strides = [1, 1]} : vector<96x2xf32> to vector<32x2xf32>
    %350 = arith.mulf %349, %334 : vector<32x2xf32>
    %351 = vector.extract_strided_slice %346 {offsets = [0, 0], sizes = [32, 2], strides = [1, 1]} : vector<96x2xf32> to vector<32x2xf32>
    %352 = arith.mulf %351, %348 : vector<32x2xf32>
    %353 = arith.addf %350, %352 : vector<32x2xf32>
    %354 = vector.extract_strided_slice %346 {offsets = [64, 0], sizes = [32, 2], strides = [1, 1]} : vector<96x2xf32> to vector<32x2xf32>
    %355 = math.tanh %353 : vector<32x2xf32>
    %356 = arith.mulf %354, %355 : vector<32x2xf32>
    %357 = vector.extract_strided_slice %240 {offsets = [0, 12], sizes = [128, 2], strides = [1, 1]} : vector<128x14xf32> to vector<128x2xf32>
    %cst_103 = arith.constant dense<0.000000e+00> : vector<128x2xf32>
    %358 = tpu.matmul %12, %356, %cst_103 {dimension_numbers = #tpu.dot_dimension_numbers<[1], [0], [0], [1], [0, 0, 1, 1], [], []>} : vector<128x32xf32>, vector<32x2xf32>, vector<128x2xf32> -> vector<128x2xf32>
    %359 = arith.addf %357, %358 : vector<128x2xf32>
    %360 = vector.extract_strided_slice %359 {offsets = [0, 0], sizes = [96, 2], strides = [1, 1]} : vector<128x2xf32> to vector<96x2xf32>
    %361 = arith.negf %360 : vector<96x2xf32>
    %362 = math.exp %361 : vector<96x2xf32>
    %cst_104 = arith.constant 1.000000e+00 : f32
    %363 = vector.broadcast %cst_104 : f32 to vector<96x2xf32>
    %364 = arith.addf %363, %362 : vector<96x2xf32>
    %365 = arith.divf %363, %364 : vector<96x2xf32>
    %366 = vector.extract_strided_slice %359 {offsets = [96, 0], sizes = [32, 2], strides = [1, 1]} : vector<128x2xf32> to vector<32x2xf32>
    %367 = math.tanh %366 : vector<32x2xf32>
    %368 = vector.extract_strided_slice %365 {offsets = [32, 0], sizes = [32, 2], strides = [1, 1]} : vector<96x2xf32> to vector<32x2xf32>
    %369 = arith.mulf %368, %353 : vector<32x2xf32>
    %370 = vector.extract_strided_slice %365 {offsets = [0, 0], sizes = [32, 2], strides = [1, 1]} : vector<96x2xf32> to vector<32x2xf32>
    %371 = arith.mulf %370, %367 : vector<32x2xf32>
    %372 = arith.addf %369, %371 : vector<32x2xf32>
    %373 = vector.extract_strided_slice %365 {offsets = [64, 0], sizes = [32, 2], strides = [1, 1]} : vector<96x2xf32> to vector<32x2xf32>
    %374 = math.tanh %372 : vector<32x2xf32>
    %375 = arith.mulf %373, %374 : vector<32x2xf32>
    %376 = tpu.concatenate %261, %280, %299, %318, %337, %356, %375 in 1 : vector<32x2xf32>, vector<32x2xf32>, vector<32x2xf32>, vector<32x2xf32>, vector<32x2xf32>, vector<32x2xf32>, vector<32x2xf32> -> vector<32x14xf32>
    %377 = arith.addf %376, %98 : vector<32x14xf32>
    %cst_105 = arith.constant dense<0.000000e+00> : vector<64x14xf32>
    %378 = tpu.matmul %14, %377, %cst_105 {dimension_numbers = #tpu.dot_dimension_numbers<[1], [0], [0], [1], [0, 0, 1, 1], [], []>} : vector<64x32xf32>, vector<32x14xf32>, vector<64x14xf32> -> vector<64x14xf32>
    %379 = vector.broadcast %15 : vector<64x1xf32> to vector<64x14xf32>
    %380 = arith.addf %378, %379 : vector<64x14xf32>
    %381 = vector.extract_strided_slice %380 {offsets = [0, 0], sizes = [32, 14], strides = [1, 1]} : vector<64x14xf32> to vector<32x14xf32>
    %382 = vector.extract_strided_slice %380 {offsets = [32, 0], sizes = [32, 14], strides = [1, 1]} : vector<64x14xf32> to vector<32x14xf32>
    %383 = arith.negf %382 : vector<32x14xf32>
    %384 = math.exp %383 : vector<32x14xf32>
    %cst_106 = arith.constant 1.000000e+00 : f32
    %385 = vector.broadcast %cst_106 : f32 to vector<32x14xf32>
    %386 = arith.addf %385, %384 : vector<32x14xf32>
    %387 = arith.divf %385, %386 : vector<32x14xf32>
    %388 = arith.mulf %381, %387 : vector<32x14xf32>
    %cst_107 = arith.constant 0.000000e+00 : f32
    %389 = vector.broadcast %cst_107 : f32 to vector<32x2xf32>
    %390 = tpu.concatenate %388, %389 in 1 : vector<32x14xf32>, vector<32x2xf32> -> vector<32x16xf32>
    %391 = tpu.concatenate %389, %388 in 1 : vector<32x2xf32>, vector<32x14xf32> -> vector<32x16xf32>
    %cst_108 = arith.constant dense<0.000000e+00> : vector<64x16xf32>
    %392 = tpu.matmul %16, %390, %cst_108 {dimension_numbers = #tpu.dot_dimension_numbers<[1], [0], [0], [1], [0, 0, 1, 1], [], []>} : vector<64x32xf32>, vector<32x16xf32>, vector<64x16xf32> -> vector<64x16xf32>
    %cst_109 = arith.constant dense<0.000000e+00> : vector<64x16xf32>
    %393 = tpu.matmul %17, %391, %cst_109 {dimension_numbers = #tpu.dot_dimension_numbers<[1], [0], [0], [1], [0, 0, 1, 1], [], []>} : vector<64x32xf32>, vector<32x16xf32>, vector<64x16xf32> -> vector<64x16xf32>
    %394 = arith.addf %392, %393 : vector<64x16xf32>
    %395 = vector.broadcast %18 : vector<64x1xf32> to vector<64x16xf32>
    %396 = arith.addf %394, %395 : vector<64x16xf32>
    %cst_110 = arith.constant 0.000000e+00 : f32
    %397 = vector.broadcast %cst_110 : f32 to vector<64x16xf32>
    %398 = arith.maximumf %396, %397 : vector<64x16xf32>
    %399 = arith.addf %398, %79 : vector<64x16xf32>
    %cst_111 = arith.constant dense<0.000000e+00> : vector<128x16xf32>
    %400 = tpu.matmul %19, %399, %cst_111 {dimension_numbers = #tpu.dot_dimension_numbers<[1], [0], [0], [1], [0, 0, 1, 1], [], []>} : vector<128x64xf32>, vector<64x16xf32>, vector<128x16xf32> -> vector<128x16xf32>
    %401 = vector.broadcast %20 : vector<128x1xf32> to vector<128x16xf32>
    %402 = arith.addf %400, %401 : vector<128x16xf32>
    %403 = vector.extract_strided_slice %402 {offsets = [0, 0], sizes = [64, 16], strides = [1, 1]} : vector<128x16xf32> to vector<64x16xf32>
    %404 = vector.extract_strided_slice %402 {offsets = [64, 0], sizes = [64, 16], strides = [1, 1]} : vector<128x16xf32> to vector<64x16xf32>
    %405 = arith.negf %404 : vector<64x16xf32>
    %406 = math.exp %405 : vector<64x16xf32>
    %cst_112 = arith.constant 1.000000e+00 : f32
    %407 = vector.broadcast %cst_112 : f32 to vector<64x16xf32>
    %408 = arith.addf %407, %406 : vector<64x16xf32>
    %409 = arith.divf %407, %408 : vector<64x16xf32>
    %410 = arith.mulf %403, %409 : vector<64x16xf32>
    %cst_113 = arith.constant 0.000000e+00 : f32
    %411 = vector.broadcast %cst_113 : f32 to vector<64x2xf32>
    %412 = tpu.concatenate %410, %411 in 1 : vector<64x16xf32>, vector<64x2xf32> -> vector<64x18xf32>
    %413 = tpu.concatenate %411, %410 in 1 : vector<64x2xf32>, vector<64x16xf32> -> vector<64x18xf32>
    %cst_114 = arith.constant dense<0.000000e+00> : vector<16x18xf32>
    %414 = tpu.matmul %21, %412, %cst_114 {dimension_numbers = #tpu.dot_dimension_numbers<[1], [0], [0], [1], [0, 0, 1, 1], [], []>} : vector<16x64xf32>, vector<64x18xf32>, vector<16x18xf32> -> vector<16x18xf32>
    %cst_115 = arith.constant dense<0.000000e+00> : vector<16x18xf32>
    %415 = tpu.matmul %22, %413, %cst_115 {dimension_numbers = #tpu.dot_dimension_numbers<[1], [0], [0], [1], [0, 0, 1, 1], [], []>} : vector<16x64xf32>, vector<64x18xf32>, vector<16x18xf32> -> vector<16x18xf32>
    %416 = arith.addf %414, %415 : vector<16x18xf32>
    %417 = vector.broadcast %23 : vector<1x1xf32> to vector<16x18xf32>
    %418 = arith.addf %416, %417 : vector<16x18xf32>
    %419 = vector.broadcast %49 : vector<1x18xf32> to vector<16x18xf32>
    %420 = arith.mulf %418, %419 : vector<16x18xf32>
    %421 = tpu.iota {dimensions = array<i32: 0>} : vector<16x18xi32>
    %422 = arith.sitofp %421 : vector<16x18xi32> to vector<16x18xf32>
    %c0_116 = arith.constant 0 : index
    %c0_117 = arith.constant 0 : index
    %423 = vector.load %arg3[%c0_116, %c0_117] : memref<1x18xf32, #tpu.memory_space<vmem>>, vector<1x18xf32>
    %424 = vector.broadcast %423 : vector<1x18xf32> to vector<16x18xf32>
    %425 = arith.addf %424, %422 : vector<16x18xf32>
    %c0_118 = arith.constant 0 : index
    %c0_119 = arith.constant 0 : index
    %426 = vector.load %arg2[%c0_118, %c0_119] : memref<1x18xf32, #tpu.memory_space<vmem>>, vector<1x18xf32>
    %427 = vector.broadcast %426 : vector<1x18xf32> to vector<16x18xf32>
    %428 = arith.cmpf olt, %425, %427 : vector<16x18xf32>
    %429 = arith.extui %428 : vector<16x18xi1> to vector<16x18xi32>
    %430 = arith.sitofp %429 : vector<16x18xi32> to vector<16x18xf32>
    %431 = arith.mulf %420, %430 : vector<16x18xf32>
    %c0_120 = arith.constant 0 : index
    %c0_121 = arith.constant 0 : index
    %432 = vector.load %arg30[%c0_120, %c0_121] : memref<16x18xf32, #tpu.memory_space<vmem>>, vector<16x18xf32>
    tpu.vector_store %arg30[%c0_120, %c0_121], %431 {strides = array<i32>} : memref<16x18xf32, #tpu.memory_space<vmem>>, vector<16x18xf32>,
    %c0_122 = arith.constant 0 : index
    %c0_123 = arith.constant 0 : index
    %433 = vector.load %arg1[%c0_122, %c0_123] : memref<16x18xf32, #tpu.memory_space<vmem>>, vector<16x18xf32>
    %434 = arith.subf %431, %433 : vector<16x18xf32>
    %435 = math.absf %434 : vector<16x18xf32>
    %cst_124 = arith.constant dense<0.000000e+00> : vector<16xf32>
    %436 = vector.multi_reduction <add>, %435, %cst_124 [1] : vector<16x18xf32> to vector<16xf32>
    %437 = vector.shape_cast %436 : vector<16xf32> to vector<16x1xf32>
    %cst_125 = arith.constant dense<0.000000e+00> : vector<1xf32>
    %438 = vector.multi_reduction <add>, %437, %cst_125 [0] : vector<16x1xf32> to vector<1xf32>
    %439 = vector.shape_cast %438 : vector<1xf32> to vector<1x1xf32>
    %cst_126 = arith.constant 2.560000e+02 : f32
    %440 = vector.broadcast %cst_126 : f32 to vector<1x1xf32>
    %441 = arith.divf %439, %440 : vector<1x1xf32>
    %c0_127 = arith.constant 0 : index
    %c0_128 = arith.constant 0 : index
    %442 = vector.load %arg31[%c0_127, %c0_128] : memref<1x1xf32, #tpu.memory_space<vmem>>, vector<1x1xf32>
    tpu.vector_store %arg31[%c0_127, %c0_128], %441 {strides = array<i32>} : memref<1x1xf32, #tpu.memory_space<vmem>>, vector<1x1xf32>,
    return
  }
}

</mosaic_0001>

<bundles_post_ra>
// kernel: tile.28
= control target key start
LH: loop header
LB: loop body
LE: loop exit
PB: predicated region body
PF: predicated region fallthrough
CT: control target
= control target key end

     0   :  { %s22_s0 = inlined_call_operand.vmem [shape: f32[16], index: 0, kind: input, shape index: {}]   ;;  %s23_s1 = inlined_call_operand.vmem [shape: f32[4,16], index: 1, kind: output, shape index: {}]  }
   0x1   :  { %v4_v0 = vld [vmem:[%s22_s0] ss:$0 sm:$0xff] }
   0x2   :  { %5 = vst [vmem:[%s23_s1] sm:$0xf] %v4_v0 }

// kernel: tile.29
= control target key start
LH: loop header
LB: loop body
LE: loop exit
PB: predicated region body
PF: predicated region fallthrough
CT: control target
= control target key end

     0   :  { %vm7_vm0 = vcmask 130048   ;;  %s37_s8 = smov 16   ;;  %s38_s9 = smov 32   ;;  %vm13_vm1 = vcmask 523648   ;;  %vm19_vm2 = vcmask 392448   ;;  %vm25_vm3 = vcmask 261248   ;;  %s55_s0 = inlined_call_operand.vmem [shape: f32[4,16], index: 0, kind: input, shape index: {}]   ;;  %s56_s1 = inlined_call_operand.vmem [shape: f32[64], index: 1, kind: output, shape index: {}]  }
   0x1   :  { %v4_v0 = vld [vmem:[%s55_s0] sm:$0xf]  ;;  %s36_s0 = smov 48  }
   0x2   :  { %5 = vst [vmem:[#allocation1] sm:$0xf] %v4_v0 }
   0x9   :  { %v10_v1 = vld [vmem:[#allocation1 + $0x3] sm:$0x1]   ;;  %v22_v2 = vld [vmem:[#allocation1 + $0x1] sm:$0x1]   ;;  %v6_v3 = vld [vmem:[#allocation1] sm:$0x1]  }
   0xa   :  { %11 = vrot.lane.b32.xlu0 %v10_v1, %s36_s0  ;;  %23 = vrot.lane.b32.xlu1 %v22_v2, %s37_s8  ;;  %v16_v4 = vld [vmem:[#allocation1 + $0x2] sm:$0x1]   ;;  %8 = vst.msk [vmem:[#allocation0] sm:$0x1] %vm7_vm0, %v6_v3  }
   0xe   :  { %17 = vrot.lane.b32.xlu0 %v16_v4, %s38_s9 }
  0x7c   :  { %v12_v5 = vpop.permute.xlu0 %11   ;;  %v24_v6 = vpop.permute.xlu1 %23  }
  0x7d   :  { %14 = vst.msk [vmem:[#allocation0] sm:$0x1] %vm13_vm1, %v12_v5  }
  0x80   :  { %v18_v7 = vpop.permute.xlu0 %17  }
  0x81   :  { %20 = vst.msk [vmem:[#allocation0] sm:$0x1] %vm19_vm2, %v18_v7  }
  0x82   :  { %26 = vst.msk [vmem:[#allocation0] sm:$0x1] %vm25_vm3, %v24_v6  }
  0x89   :  { %v30_v8 = vld [vmem:[#allocation0] sm:$0x1] }
  0x8a   :  { %32 = vst [vmem:[%s56_s1] sm:$0x1] %v30_v8 }

// kernel: tile.0
= control target key start
LH: loop header
LB: loop body
LE: loop exit
PB: predicated region body
PF: predicated region fallthrough
CT: control target
= control target key end

     0   :  { %s176_s8 = smov 125   ;;  %s177_s9 = smov 126   ;;  %vm7_vm0 = vcmask 7168   ;;  %s331_s0 = inlined_call_operand.vmem [shape: f32[4,16], index: 0, kind: input, shape index: {}]   ;;  %s332_s1 = inlined_call_operand.vmem [shape: f32[64,1], index: 1, kind: output, shape index: {}]  }
   0x1   :  { %v4_v0 = vld [vmem:[%s331_s0] sm:$0xf]  ;;  %s175_s0 = smov 127   ;;  %s178_s10 = smov 124  }
   0x2   :  { %5 = vst [vmem:[#allocation0] sm:$0xf] %v4_v0  ;;  %s179_s11 = smov 123   ;;  %s180_s12 = smov 122  }
   0x3   :  { %s181_s13 = smov 121   ;;  %s182_s14 = smov 120  }
   0x4   :  { %s183_s19 = smov 119   ;;  %s184_s20 = smov 118  }
   0x5   :  { %s185_s21 = smov 117   ;;  %s186_s22 = smov 116  }
   0x6   :  { %s187_s23 = smov 115   ;;  %s188_s24 = smov 114  }
   0x7   :  { %s189_s25 = smov 113  }
   0x9   :  { %v10_v1 = vld [vmem:[#allocation0] sm:$0xf]  }
   0xa   :  { %v26_v2 = vld [vmem:[#allocation0] sm:$0xf]   ;;  %11 = vrot.lane.b32.xlu0 %v10_v1, %s175_s0 }
   0xb   :  { %27 = vrot.lane.b32.xlu1 %v26_v2, %s176_s8  ;;  %v18_v3 = vld [vmem:[#allocation0] sm:$0xf]  }
   0xc   :  { %v34_v4 = vld [vmem:[#allocation0] sm:$0xf]  }
   0xd   :  { %v42_v5 = vld [vmem:[#allocation0] sm:$0xf]  }
   0xe   :  { %19 = vrot.lane.b32.xlu0 %v18_v3, %s177_s9  ;;  %v50_v6 = vld [vmem:[#allocation0] sm:$0xf]  }
   0xf   :  { %35 = vrot.lane.b32.xlu1 %v34_v4, %s178_s10  ;;  %v58_v7 = vld [vmem:[#allocation0] sm:$0xf]  }
  0x10   :  { %v66_v8 = vld [vmem:[#allocation0] sm:$0xf]  }
  0x11   :  { %v74_v9 = vld [vmem:[#allocation0] sm:$0xf]  }
  0x12   :  { %43 = vrot.lane.b32.xlu0 %v42_v5, %s179_s11  ;;  %v82_v10 = vld [vmem:[#allocation0] sm:$0xf]  }
  0x13   :  { %51 = vrot.lane.b32.xlu1 %v50_v6, %s180_s12  ;;  %v6_v11 = vld [vmem:[#allocation0] sm:$0xf]  }
  0x14   :  { %8 = vst.msk [vmem:[%s332_s1] ss:$16 sm:$0x3] %vm7_vm0, %v6_v11   ;;  %9 = vst.msk [vmem:[%s332_s1] ss:$16 sm:$0xc] %vm7_vm0, %v6_v11  }
  0x15   :  { %v90_v12 = vld [vmem:[#allocation0] sm:$0xf]  }
  0x16   :  { %59 = vrot.lane.b32.xlu0 %v58_v7, %s181_s13  ;;  %v98_v13 = vld [vmem:[#allocation0] sm:$0xf]  }
  0x17   :  { %67 = vrot.lane.b32.xlu1 %v66_v8, %s182_s14  ;;  %v106_v14 = vld [vmem:[#allocation0] sm:$0xf]  }
  0x18   :  { %v114_v15 = vld [vmem:[#allocation0] sm:$0xf]  }
  0x19   :  { %v122_v16 = vld [vmem:[#allocation0] sm:$0xf]  }
  0x1a   :  { %75 = vrot.lane.b32.xlu0 %v74_v9, %s183_s19 }
  0x1b   :  { %83 = vrot.lane.b32.xlu1 %v82_v10, %s184_s20 }
  0x1e   :  { %91 = vrot.lane.b32.xlu0 %v90_v12, %s185_s21 }
  0x1f   :  { %99 = vrot.lane.b32.xlu1 %v98_v13, %s186_s22 }
  0x22   :  { %107 = vrot.lane.b32.xlu0 %v106_v14, %s187_s23 }
  0x23   :  { %115 = vrot.lane.b32.xlu1 %v114_v15, %s188_s24 }
  0x26   :  { %123 = vrot.lane.b32.xlu0 %v122_v16, %s189_s25 }
  0x7c   :  { %v12_v17 = vpop.permute.xlu0 %11  }
  0x7d   :  { %v28_v18 = vpop.permute.xlu1 %27   ;;  %130 = vst.msk [vmem:[%s332_s1 + $0x1] ss:$16 sm:$0x3] %vm7_vm0, %v12_v17   ;;  %131 = vst.msk [vmem:[%s332_s1 + $0x1] ss:$16 sm:$0xc] %vm7_vm0, %v12_v17  }
  0x7e   :  { %134 = vst.msk [vmem:[%s332_s1 + $0x3] ss:$16 sm:$0x3] %vm7_vm0, %v28_v18   ;;  %135 = vst.msk [vmem:[%s332_s1 + $0x3] ss:$16 sm:$0xc] %vm7_vm0, %v28_v18  }
  0x80   :  { %v20_v19 = vpop.permute.xlu0 %19  }
  0x81   :  { %v36_v20 = vpop.permute.xlu1 %35   ;;  %132 = vst.msk [vmem:[%s332_s1 + $0x2] ss:$16 sm:$0x3] %vm7_vm0, %v20_v19   ;;  %133 = vst.msk [vmem:[%s332_s1 + $0x2] ss:$16 sm:$0xc] %vm7_vm0, %v20_v19  }
  0x82   :  { %136 = vst.msk [vmem:[%s332_s1 + $0x4] ss:$16 sm:$0x3] %vm7_vm0, %v36_v20   ;;  %137 = vst.msk [vmem:[%s332_s1 + $0x4] ss:$16 sm:$0xc] %vm7_vm0, %v36_v20  }
  0x84   :  { %v44_v21 = vpop.permute.xlu0 %43  }
  0x85   :  { %v52_v22 = vpop.permute.xlu1 %51   ;;  %138 = vst.msk [vmem:[%s332_s1 + $0x5] ss:$16 sm:$0x3] %vm7_vm0, %v44_v21   ;;  %139 = vst.msk [vmem:[%s332_s1 + $0x5] ss:$16 sm:$0xc] %vm7_vm0, %v44_v21  }
  0x86   :  { %140 = vst.msk [vmem:[%s332_s1 + $0x6] ss:$16 sm:$0x3] %vm7_vm0, %v52_v22   ;;  %141 = vst.msk [vmem:[%s332_s1 + $0x6] ss:$16 sm:$0xc] %vm7_vm0, %v52_v22  }
  0x88   :  { %v60_v23 = vpop.permute.xlu0 %59  }
  0x89   :  { %v68_v24 = vpop.permute.xlu1 %67   ;;  %142 = vst.msk [vmem:[%s332_s1 + $0x7] ss:$16 sm:$0x3] %vm7_vm0, %v60_v23   ;;  %143 = vst.msk [vmem:[%s332_s1 + $0x7] ss:$16 sm:$0xc] %vm7_vm0, %v60_v23  }
  0x8a   :  { %144 = vst.msk [vmem:[%s332_s1 + $0x8] ss:$16 sm:$0x3] %vm7_vm0, %v68_v24   ;;  %145 = vst.msk [vmem:[%s332_s1 + $0x8] ss:$16 sm:$0xc] %vm7_vm0, %v68_v24  }
  0x8c   :  { %v76_v25 = vpop.permute.xlu0 %75  }
  0x8d   :  { %v84_v26 = vpop.permute.xlu1 %83   ;;  %146 = vst.msk [vmem:[%s332_s1 + $0x9] ss:$16 sm:$0x3] %vm7_vm0, %v76_v25   ;;  %147 = vst.msk [vmem:[%s332_s1 + $0x9] ss:$16 sm:$0xc] %vm7_vm0, %v76_v25  }
  0x8e   :  { %148 = vst.msk [vmem:[%s332_s1 + $0xa] ss:$16 sm:$0x3] %vm7_vm0, %v84_v26   ;;  %149 = vst.msk [vmem:[%s332_s1 + $0xa] ss:$16 sm:$0xc] %vm7_vm0, %v84_v26  }
  0x90   :  { %v92_v27 = vpop.permute.xlu0 %91  }
  0x91   :  { %v100_v28 = vpop.permute.xlu1 %99   ;;  %150 = vst.msk [vmem:[%s332_s1 + $0xb] ss:$16 sm:$0x3] %vm7_vm0, %v92_v27   ;;  %151 = vst.msk [vmem:[%s332_s1 + $0xb] ss:$16 sm:$0xc] %vm7_vm0, %v92_v27  }
  0x92   :  { %152 = vst.msk [vmem:[%s332_s1 + $0xc] ss:$16 sm:$0x3] %vm7_vm0, %v100_v28   ;;  %153 = vst.msk [vmem:[%s332_s1 + $0xc] ss:$16 sm:$0xc] %vm7_vm0, %v100_v28  }
  0x94   :  { %v108_v29 = vpop.permute.xlu0 %107  }
  0x95   :  { %v116_v30 = vpop.permute.xlu1 %115   ;;  %154 = vst.msk [vmem:[%s332_s1 + $0xd] ss:$16 sm:$0x3] %vm7_vm0, %v108_v29   ;;  %155 = vst.msk [vmem:[%s332_s1 + $0xd] ss:$16 sm:$0xc] %vm7_vm0, %v108_v29  }
  0x96   :  { %156 = vst.msk [vmem:[%s332_s1 + $0xe] ss:$16 sm:$0x3] %vm7_vm0, %v116_v30   ;;  %157 = vst.msk [vmem:[%s332_s1 + $0xe] ss:$16 sm:$0xc] %vm7_vm0, %v116_v30  }
  0x98   :  { %v124_v31 = vpop.permute.xlu0 %123  }
  0x99   :  { %158 = vst.msk [vmem:[%s332_s1 + $0xf] ss:$16 sm:$0x3] %vm7_vm0, %v124_v31   ;;  %159 = vst.msk [vmem:[%s332_s1 + $0xf] ss:$16 sm:$0xc] %vm7_vm0, %v124_v31  }

// kernel: tile.38
= control target key start
LH: loop header
LB: loop body
LE: loop exit
PB: predicated region body
PF: predicated region fallthrough
CT: control target
= control target key end

     0   :  { %s28_s0 = inlined_call_operand.vmem [shape: f32[2], index: 0, kind: input, shape index: {}]   ;;  %s29_s1 = inlined_call_operand.vmem [shape: f32[9,2], index: 1, kind: output, shape index: {}]  }
   0x1   :  { %v4_v0 = vld [vmem:[%s28_s0] ss:$0 sm:$0xff] }
   0x2   :  { %5 = vst [vmem:[%s29_s1] sm:$0xff] %v4_v0  ;;  %8 = vst [vmem:[%s29_s1 + $0x8] sm:$0xff] %v4_v0 }

// kernel: denoise_forward.1
= control target key start
LH: loop header
LB: loop body
LE: loop exit
PB: predicated region body
PF: predicated region fallthrough
CT: control target
= control target key end

     0   :  { %s11195_s6 = smov 1   ;;  %s11196_s10 = smov 2   ;;  %s13603_s0 = inlined_call_operand.smem [shape: u32[32], index: -1, kind: input, shape index: {}] }
   0x1   :  { %s11255_s5 = sld [smem:[%s13603_s0]]   ;;  %s11197_s14 = smov 3  }
   0x2   :  { %s11260_s9 = sld [smem:[%s13603_s0 + %s11195_s6]]   ;;  %s11198_s18 = smov 4  }
   0x3   :  { %s11265_s13 = sld [smem:[%s13603_s0 + %s11196_s10]]   ;;  %s11199_s22 = smov 5  }
   0x4   :  { %s11270_s17 = sld [smem:[%s13603_s0 + %s11197_s14]]   ;;  %s11200_s26 = smov 6  }
   0x5   :  { %s11275_s21 = sld [smem:[%s13603_s0 + %s11198_s18]]   ;;  %s11201_s30 = smov 7  }
   0x6   :  { %s11280_s25 = sld [smem:[%s13603_s0 + %s11199_s22]]   ;;  %s11202_s4 = smov 8  }
   0x7   :  { %s11285_s29 = sld [smem:[%s13603_s0 + %s11200_s26]]   ;;  %s11203_s10 = smov 9  }
   0x8   :  { %13642 = sst [smem:[#allocation6_spill]] %s11260_s9  ;;  %s11204_s15 = smov 10  }
   0x9   :  { %13643 = sst [smem:[#allocation7_spill]] %s11265_s13  ;;  %s11205_s20 = smov 11  }
   0xa   :  { %13644 = sst [smem:[#allocation8_spill]] %s11270_s17  ;;  %s11206_s26 = smov 12  }
   0xb   :  { %s11290_s3 = sld [smem:[%s13603_s0 + %s11201_s30]]   ;;  %s11207_s1 = smov 13  }
   0xc   :  { %s11295_s8 = sld [smem:[%s13603_s0 + %s11202_s4]]   ;;  %s11208_s7 = smov 14  }
   0xd   :  { %s11300_s14 = sld [smem:[%s13603_s0 + %s11203_s10]]   ;;  %s11210_s22 = smov 16  }
   0xe   :  { %s11305_s19 = sld [smem:[%s13603_s0 + %s11204_s15]]   ;;  %s11209_s15 = smov 15  }
   0xf   :  { %s11310_s24 = sld [smem:[%s13603_s0 + %s11205_s20]]   ;;  %s11211_s28 = smov 17  }
  0x10   :  { %s11315_s30 = sld [smem:[%s13603_s0 + %s11206_s26]]   ;;  %s11224_s10 = smov 30  }
  0x11   :  { %s11320_s6 = sld [smem:[%s13603_s0 + %s11207_s1]]   ;;  %s11225_s16 = smov 31  }
  0x12   :  { %s11325_s12 = sld [smem:[%s13603_s0 + %s11208_s7]]   ;;  %s11212_s7 = smov 18  }
  0x13   :  { %s11330_s20 = sld [smem:[%s13603_s0 + %s11209_s15]]   ;;  %s11213_s15 = smov 19  }
  0x14   :  { %s11335_s27 = sld [smem:[%s13603_s0 + %s11210_s22]]   ;;  %s11214_s22 = smov 20  }
  0x15   :  { %s11340_s4 = sld [smem:[%s13603_s0 + %s11211_s28]]   ;;  %s11215_s28 = smov 21  }
  0x16   :  { %s11345_s9 = sld [smem:[%s13603_s0 + %s11212_s7]]   ;;  %s11216_s7 = smov 22  }
  0x17   :  { %s11350_s13 = sld [smem:[%s13603_s0 + %s11213_s15]]   ;;  %s11217_s15 = smov 23  }
  0x18   :  { %s11355_s17 = sld [smem:[%s13603_s0 + %s11214_s22]]   ;;  %s11218_s22 = smov 24  }
  0x1b   :  { %13645 = sst [smem:[#allocation9_spill]] %s11340_s4 }
  0x1c   :  { %13646 = sst [smem:[#allocation10_spill]] %s11345_s9 }
  0x1d   :  { %13647 = sst [smem:[#allocation11_spill]] %s11350_s13 }
  0x1e   :  { %13648 = sst [smem:[#allocation12_spill]] %s11355_s17 }
  0x1f   :  { %s11360_s4 = sld [smem:[%s13603_s0 + %s11215_s28]]   ;;  %s11219_s28 = smov 25  }
  0x20   :  { %s11365_s9 = sld [smem:[%s13603_s0 + %s11216_s7]]   ;;  %s11220_s7 = smov 26  }
  0x21   :  { %s11370_s13 = sld [smem:[%s13603_s0 + %s11217_s15]]   ;;  %s11221_s15 = smov 27  }
  0x22   :  { %s11375_s17 = sld [smem:[%s13603_s0 + %s11218_s22]]   ;;  %s11222_s22 = smov 28  }
  0x25   :  { %13649 = sst [smem:[#allocation13_spill]] %s11360_s4 }
  0x26   :  { %13650 = sst [smem:[#allocation14_spill]] %s11365_s9 }
  0x27   :  { %13651 = sst [smem:[#allocation15_spill]] %s11370_s13 }
  0x28   :  { %13652 = sst [smem:[#allocation16_spill]] %s11375_s17 }
  0x29   :  { %s11380_s4 = sld [smem:[%s13603_s0 + %s11219_s28]]   ;;  %s11223_s28 = smov 29  }
  0x2a   :  { %s11385_s9 = sld [smem:[%s13603_s0 + %s11220_s7]]  }
  0x2b   :  { %s11390_s13 = sld [smem:[%s13603_s0 + %s11221_s15]]  }
  0x2c   :  { %s11395_s17 = sld [smem:[%s13603_s0 + %s11222_s22]]  }
  0x2f   :  { %13653 = sst [smem:[#allocation17_spill]] %s11380_s4 }
  0x30   :  { %13654 = sst [smem:[#allocation18_spill]] %s11385_s9 }
  0x31   :  { %13655 = sst [smem:[#allocation19_spill]] %s11390_s13 }
  0x32   :  { %s7923_s4 = sld [smem:[%s13603_s0 + %s11223_s28]]  }
  0x33   :  { %s11403_s9 = sld [smem:[%s13603_s0 + %s11224_s10]]  }
  0x34   :  { %s11408_s13 = sld [smem:[%s13603_s0 + %s11225_s16]]  }
  0x38   :  { %v69_v0 = vstv %s7923_s4 }
  0x39   :  { %70 = vst [vmem:[#allocation2] sm:$0x1] %v69_v0 }
  0x3a   :  { %v343_v1 = vld [vmem:[%s11275_s21] sm:$0xff]  ;;  %v344_v2 = vld [vmem:[%s11275_s21 + $0x8] sm:$0xff]  ;;  %vm347_vm0 = vcmask 146432  }
  0x3b   :  { %v9663_v3 = vpack.c.bf16 %v344_v2, %v343_v1  ;;  %v11413_v4 = vld [vmem:[%s11255_s5] sm:$0xff] }
  0x3c   :  { %71 = vsyncpa [#allocation4], 0  ;;  %v345_v5 = vld [vmem:[%s11275_s21 + $0x10] sm:$0x3]  ;;  %vm354_vm1 = vcmask 1041408   ;;  %8930 = vmatprep.mubr.msk.f32.mxu0 %vm347_vm0, %v11413_v4  ;;  %v443_v6 = vmul.f32 %v11413_v4, %v11413_v4  ;;  %v11421_v7 = vld [vmem:[%s11255_s5 + $0x8] sm:$0xff]  ;;  %v698_v46 = vlaneseq }
  0x3d   :  { %9664 = vmatprep.subr.bf16.mxu0 %v9663_v3  ;;  %9668 = vmatprep.subr.bf16.mxu1 %v9663_v3  ;;  %v444_v8 = vmul.f32 %v11421_v7, %v11421_v7  ;;  %v346_v9 = vld [vmem:[%s11280_s25] sm:$0xff]  ;;  %v13616_v10 = vmov 0.0   ;;  %vm11227_vm2 = vmmov 0   ;;  %vm433_vm3 = vcmask 64512   ;;  %s11228_s0 = smov 32   ;;  %s11229_s5 = smov 126  }
  0x3e   :  { %9666 = vmatpush3.bf16.msra.mxu0 %v9663_v3  ;;  %9670 = vmatpush3.bf16.msra.mxu1 %v9663_v3  ;;  %v11440_v47 = vshrl.u32 %v698_v46, 7  ;;  %vm712_vm6 = vcmask 1043456   ;;  %s11230_s21 = smov 16   ;;  %v132_v60 = vld [vmem:[%s11285_s29] sm:$0xff]  ;;  %v11231_v62 = vmov 0   ;;  %v143_v63 = vld [vmem:[%s11300_s14 + $0x18] sm:$0xff] }
  0x3f   :  { %8928 = vmatprep.subr.msk.mxu0 %vm354_vm1, %v345_v5  ;;  %8937 = vmatprep.subr.msk.mxu1 %vm354_vm1, %v345_v5  ;;  %v134_v61 = vld [vmem:[%s11290_s3] sm:$0xff]  ;;  %v141_v0 = vld [vmem:[%s11300_s14 + $0x8] sm:$0xff]  ;;  %s11232_s25 = smov 48   ;;  %vm725_vm7 = vcmask 130048   ;;  %vm727_vm8 = vcmask 261120   ;;  %vm729_vm9 = vcmask 392192  }
  0x40   :  { %8939 = vmatprep.mubr.msk.f32.mxu1 %vm347_vm0, %v443_v6  ;;  %13656 = vst [vmem:[#allocation20_spill] sm:$0xff] %v11440_v47  ;;  %v700_v48 = vsub.s32 0, %v11440_v47  ;;  %9986 = vset.pattern.permute.xlu1 %v11231_v62  ;;  %v135_v3 = vld [vmem:[%s11290_s3 + $0x8] sm:$0xff]  ;;  %s11234_s3 = smov 96   ;;  %vm3985_vm10 = vcmask 15360   ;;  %vm3990_vm11 = vcmask 31744  }
  0x41   :  { %9985 = vset.pattern.permute.xlu0 %v11231_v62  ;;  %vm3995_vm12 = vcmask 48128   ;;  %s11243_s4 = smov 10   ;;  %vm4004_vm13 = vcmask 80896   ;;  %s11244_s22 = smov 118   ;;  %vm4009_vm14 = vcmask 97280   ;;  %vm8390_vm15 = vmneg %vm3985_vm10 }
  0x42   :  { %8929 = vmatpush3.msk.msra.mxu0 %vm354_vm1, %v345_v5  ;;  %8938 = vmatpush3.msk.msra.mxu1 %vm354_vm1, %v345_v5  ;;  %v140_v5 = vld [vmem:[%s11300_s14] sm:$0xff]  ;;  %s11245_s23 = smov 12   ;;  %s13672_s26 = sld [smem:[#allocation9_spill]]  ;;  %vm13423_vm1 = vmpackc.low %vm8390_vm15, %vm8390_vm15 }
  0x43   :  { %8931 = vmatmul.mubr.msk.f32.vlgmr.msra.gmra.mrb[0].mxu0 %vm347_vm0, %v11421_v7  ;;  %8940 = vmatmul.mubr.msk.f32.vlgmr.msra.gmra.mrb[0].mxu1 %vm347_vm0, %v444_v8  ;;  %s13673_s28 = sld [smem:[#allocation10_spill]]  ;;  %s13682_s1 = sld [smem:[#allocation13_spill]] }
  0x44   :  { %8947 = vmatprep.subr.mxu1 %v13616_v10  ;;  %8949 = vmatprep.mubr.msk.f32.mxu1 %vm11227_vm2, %v13616_v10  ;;  %s13683_s2 = sld [smem:[#allocation12_spill]]  ;;  %s13688_s10 = sld [smem:[#allocation15_spill]] }
  0x45   :  { %8948 = vmatpush3.msra.mxu1 %v346_v9  ;;  %8942 = vmatprep.subr.mxu0 %v13616_v10  ;;  %s13689_s7 = sld [smem:[#allocation16_spill]]  ;;  %s13690_s11 = sld [smem:[#allocation18_spill]] }
  0x46   :  { %8943 = vmatpush3.msra.mxu0 %v346_v9  ;;  %8944 = vmatprep.mubr.msk.f32.mxu0 %vm11227_vm2, %v13616_v10  ;;  %vm6919_vm2 = vcmask 113664   ;;  %s13693_s16 = sld [smem:[#allocation14_spill]]  ;;  %s13694_s15 = sld [smem:[#allocation17_spill]] }
  0x47   :  { %s13705_s18 = sld [smem:[#allocation19_spill]] }
 0x116   :  { %v8932_v11 = vpop.f32.mrb[0].mxu0  ;;  %v8941_v12 = vpop.f32.mrb[0].mxu1 }
 0x117   :  { %v435_v13 = vsel %vm433_vm3, %v8932_v11, 0.0  ;;  %v527_v14 = vsel %vm433_vm3, %v8941_v12, 0.0  ;;  %v424_v15 = vpop.f32.mrb[1].mxu0  ;;  %v517_v16 = vpop.f32.mrb[1].mxu1 }
 0x118   :  { %v434_v17 = vsel %vm433_vm3, %v424_v15, 0.0  ;;  %v526_v18 = vsel %vm433_vm3, %v517_v16, 0.0 }
 0x119   :  { %v436_v19 = vadd.f32 %v435_v13, %v434_v17  ;;  %v528_v20 = vadd.f32 %v527_v14, %v526_v18  ;;  %v133_v13 = vld [vmem:[%s11285_s29 + $0x8] sm:$0xff]  ;;  %v136_v14 = vld [vmem:[%s11295_s8] sm:$0xff]  ;;  %s11233_s29 = smov 112  }
 0x11b   :  { %v437_v21 = vrot.slane %v436_v19, 4  ;;  %v529_v22 = vrot.slane %v528_v20, 4 }
 0x11d   :  { %v438_v23 = vadd.f32 %v437_v21, %v436_v19  ;;  %v530_v24 = vadd.f32 %v529_v22, %v528_v20 }
 0x11f   :  { %v439_v25 = vrot.slane %v438_v23, 2  ;;  %v531_v26 = vrot.slane %v530_v24, 2 }
 0x121   :  { %v440_v27 = vadd.f32 %v439_v25, %v438_v23  ;;  %v532_v29 = vadd.f32 %v531_v26, %v530_v24  ;;  %v137_v24 = vld [vmem:[%s11295_s8 + $0x8] sm:$0xff]  ;;  %v138_v25 = vld [vmem:[%s11295_s8 + $0x10] sm:$0xff]  ;;  %v139_v26 = vld [vmem:[%s11295_s8 + $0x18] sm:$0xff]  ;;  %s11235_s8 = smov 80  }
 0x123   :  { %v441_v28 = vrot.slane %v440_v27, 1  ;;  %v533_v32 = vrot.slane %v532_v29, 1 }
 0x125   :  { %v442_v30 = vadd.f32 %v441_v28, %v440_v27  ;;  %v534_v35 = vadd.f32 %v533_v32, %v532_v29 }
 0x127   :  { %v536_v31 = vmul.f32 0.0078125, %v442_v30 }
 0x129   :  { %v537_v33 = vmul.f32 128.0, %v536_v31 }
 0x12b   :  { %v538_v34 = vmul.f32 %v537_v33, %v536_v31 }
 0x12d   :  { %v539_v36 = vsub.f32 %v534_v35, %v538_v34 }
 0x12f   :  { %v541_v37 = vmul.f32 0.007874016, %v539_v36 }
 0x131   :  { %v542_v38 = vmax.f32 %v541_v37, 0.0 }
 0x133   :  { %10137 = vrsqrt.f32 %v542_v38  ;;  %vm545_vm4 = vcmp.eq.f32.partialorder %v542_v38, inf  ;;  %v548_v41 = vand.u32 2147483648, %v542_v38  ;;  %vm547_vm5 = vcmp.eq.f32.partialorder %v542_v38, 0.0 }
 0x13d   :  { %v10138_v39 = vpop.eup %10137 }
 0x13e   :  { %v544_v40 = vmul.f32 %v10138_v39, %v542_v38 }
 0x140   :  { %v546_v42 = vsel %vm545_vm4, %v542_v38, %v544_v40  ;;  %vm7346_vm4 = vcmask 523264  }
 0x141   :  { %v549_v43 = vsel %vm547_vm5, %v548_v41, %v546_v42  ;;  %vm13530_vm5 = vmpackc.low %vm725_vm7, %vm725_vm7 }
 0x142   :  { %v550_v44 = vadd.f32 0.001, %v549_v43  ;;  %8950 = vmatmul.mubr.msk.f32.vlgmr.msra.gmra.mrb[2].mxu1 %vm433_vm3, %v549_v43 }
 0x143   :  { %8961 = vmatprep.mubr.msk.f32.mxu1 %vm725_vm7, %v136_v14  ;;  %v160_v14 = vld [vmem:[%s11320_s6] sm:$0xff] }
 0x144   :  { %10139 = vrcp.f32 %v550_v44 }
 0x14e   :  { %v10140_v45 = vpop.eup %10139 }
 0x14f   :  { %8945 = vmatmul.mubr.msk.f32.vlgmr.msra.gmra.mrb[2].mxu0 %vm433_vm3, %v10140_v45 }
 0x150   :  { %8954 = vmatprep.mubr.msk.f32.mxu0 %vm433_vm3, %v132_v60 }
 0x215   :  { %v694_v49 = vpop.f32.mrb[2].mxu1 }
 0x216   :  { %v11443_v50 = vrot.slane %v694_v49, %v700_v48  ;;  %v8951_v51 = vpop.f32.mrb[3].mxu1 }
 0x218   :  { %13657 = vst [vmem:[#allocation21_spill] sm:$0xff] %v11443_v50 }
 0x222   :  { %v621_v52 = vpop.f32.mrb[2].mxu0 }
 0x223   :  { %v701_v53 = vrot.slane %v621_v52, %v700_v48  ;;  %v8946_v54 = vpop.f32.mrb[3].mxu0 }
 0x225   :  { %v702_v55 = vmul.f32 %v701_v53, %v11413_v4  ;;  %v703_v56 = vmul.f32 %v701_v53, %v11421_v7  ;;  %v142_v4 = vld [vmem:[%s11300_s14 + $0x10] sm:$0xff]  ;;  %s11236_s14 = smov 2  }
 0x227   :  { %718 = vrot.lane.b32.xlu1 %v703_v56, %s11228_s0  ;;  %v708_v57 = vrot.slane %v702_v55, 4  ;;  %v705_v58 = vrot.slane %v703_v56, 4  ;;  %s13706_s0 = sld [smem:[#allocation8_spill]] }
 0x229   :  { %709 = vrot.lane.b32.xlu0 %v708_v57, %s11229_s5  ;;  %v714_v59 = vsel %vm712_vm6, %v708_v57, %v705_v58 }
 0x22d   :  { %715 = vrot.lane.b32.xlu0 %v714_v59, %s11230_s21  ;;  %s13709_s21 = sld [smem:[#allocation6_spill]] }
 0x231   :  { %733 = vperm.xlu0 %9985, %v134_v61  }
 0x235   :  { %841 = vperm.xlu0 %9985, %v143_v63  }
 0x239   :  { %831 = vperm.xlu0 %9985, %v141_v0   ;;  %v148_v0 = vld [vmem:[%s11310_s24] sm:$0xff] }
 0x299   :  { %v719_v7 = vpop.permute.xlu1 %718 }
 0x29b   :  { %v710_v1 = vpop.permute.xlu0 %709 }
 0x29c   :  { %v713_v2 = vsel %vm712_vm6, %v705_v58, %v710_v1  ;;  %v144_v58 = vld [vmem:[%s11305_s19] sm:$0xff] }
 0x29d   :  { %722 = vrot.lane.b32.xlu1 %v713_v2, %s11232_s25 }
 0x29f   :  { %v716_v6 = vpop.permute.xlu0 %715 }
 0x2a0   :  { %v726_v8 = vsel %vm725_vm7, %v702_v55, %v716_v6 }
 0x2a1   :  { %738 = vperm.xlu1 %9986, %v135_v3   ;;  %v728_v11 = vsel %vm727_vm8, %v726_v8, %v719_v7 }
 0x2a5   :  { %836 = vperm.xlu1 %9986, %v142_v4   ;;  %v150_v4 = vld [vmem:[%s11310_s24 + $0x10] sm:$0xff] }
 0x2a9   :  { %826 = vperm.xlu1 %9986, %v140_v5   ;;  %v149_v5 = vld [vmem:[%s11310_s24 + $0x8] sm:$0xff] }
 0x2b0   :  { %v734_v17 = vpop.permute.xlu0 %733 }
 0x2b4   :  { %v842_v29 = vpop.permute.xlu0 %841 }
 0x2b8   :  { %v832_v41 = vpop.permute.xlu0 %831 }
 0x30f   :  { %v723_v9 = vpop.permute.xlu1 %722 }
 0x310   :  { %v730_v12 = vsel %vm729_vm9, %v728_v11, %v723_v9  ;;  %v164_v9 = vld [vmem:[%s11320_s6 + $0x20] sm:$0xff]  ;;  %v151_v11 = vld [vmem:[%s11310_s24 + $0x18] sm:$0xff]  ;;  %s11238_s24 = smov 124  }
 0x311   :  { %8952 = vmatprep.subr.mxu0 %v730_v12 }
 0x312   :  { %8953 = vmatpush3.msra.mxu0 %v730_v12  ;;  %v166_v12 = vld [vmem:[%s11320_s6 + $0x30] sm:$0xff] }
 0x313   :  { %8955 = vmatmul.mubr.msk.f32.vlgmr.msra.gmra.mrb[4].mxu0 %vm433_vm3, %v133_v13  ;;  %v165_v13 = vld [vmem:[%s11320_s6 + $0x28] sm:$0xff] }
 0x314   :  { %8999 = vmatprep.mubr.f32.mxu0 %v144_v58 }
 0x320   :  { %v739_v15 = vpop.permute.xlu1 %738 }
 0x324   :  { %v837_v31 = vpop.permute.xlu1 %836 }
 0x328   :  { %v827_v42 = vpop.permute.xlu1 %826 }
 0x3e6   :  { %v8956_v16 = vpop.f32.mrb[4].mxu0 }
 0x3e7   :  { %v819_v18 = vadd.f32 %v8956_v16, %v739_v15  ;;  %v813_v19 = vpop.f32.mrb[5].mxu0  ;;  %v167_v15 = vld [vmem:[%s11320_s6 + $0x38] sm:$0xff]  ;;  %v162_v16 = vld [vmem:[%s11320_s6 + $0x10] sm:$0xff] }
 0x3e8   :  { %v814_v20 = vadd.f32 %v813_v19, %v734_v17  ;;  %v161_v17 = vld [vmem:[%s11320_s6 + $0x8] sm:$0xff]  ;;  %v163_v19 = vld [vmem:[%s11320_s6 + $0x18] sm:$0xff]  ;;  %s11240_s6 = smov 122  }
 0x3e9   :  { %v823_v21 = vmax.f32 %v819_v18, 0.0  ;;  %v200_v18 = vld [vmem:[%s11335_s27] sm:$0xff] }
 0x3ea   :  { %v822_v22 = vmax.f32 %v814_v20, 0.0  ;;  %v204_v20 = vld [vmem:[%s11335_s27 + $0x20] sm:$0xff] }
 0x3ec   :  { %v9671_v23 = vpack.c.bf16 %v823_v21, %v822_v22  ;;  %v201_v21 = vld [vmem:[%s11335_s27 + $0x8] sm:$0xff]  ;;  %v202_v22 = vld [vmem:[%s11335_s27 + $0x10] sm:$0xff] }
 0x3ee   :  { %9672 = vmatprep.subr.bf16.mxu1 %v9671_v23 }
 0x3ef   :  { %9674 = vmatpush3.bf16.msra.mxu1 %v9671_v23  ;;  %v205_v23 = vld [vmem:[%s11335_s27 + $0x28] sm:$0xff] }
 0x3f2   :  { %8962 = vmatmul.mubr.msk.f32.vlgmr.msra.gmra.mrb[4].mxu1 %vm725_vm7, %v137_v24  ;;  %v206_v24 = vld [vmem:[%s11335_s27 + $0x30] sm:$0xff] }
 0x3f3   :  { %8964 = vmatprep.mubr.msk.f32.mxu1 %vm725_vm7, %v138_v25  ;;  %v203_v25 = vld [vmem:[%s11335_s27 + $0x18] sm:$0xff] }
 0x3f6   :  { %8965 = vmatmul.mubr.msk.f32.gmra.mrb[6].mxu1 %vm725_vm7, %v139_v26  ;;  %v208_v26 = vld [vmem:[%s11335_s27 + $0x40] sm:$0xff] }
 0x4c5   :  { %v8963_v27 = vpop.f32.mrb[4].mxu1 }
 0x4c6   :  { %v922_v28 = vpop.f32.mrb[5].mxu1  ;;  %v928_v43 = vadd.f32 %v8963_v27, %v832_v41  ;;  %v207_v27 = vld [vmem:[%s11335_s27 + $0x38] sm:$0xff] }
 0x4c7   :  { %v923_v45 = vadd.f32 %v922_v28, %v827_v42  ;;  %v212_v28 = vld [vmem:[%s11335_s27 + $0x60] sm:$0xff] }
 0x4c9   :  { %v8966_v30 = vpop.f32.mrb[6].mxu1 }
 0x4ca   :  { %v938_v32 = vadd.f32 %v8966_v30, %v842_v29  ;;  %v932_v33 = vpop.f32.mrb[7].mxu1  ;;  %v209_v29 = vld [vmem:[%s11335_s27 + $0x48] sm:$0xff]  ;;  %v210_v30 = vld [vmem:[%s11335_s27 + $0x50] sm:$0xff] }
 0x4cb   :  { %v933_v34 = vadd.f32 %v932_v33, %v837_v31  ;;  %v213_v31 = vld [vmem:[%s11335_s27 + $0x68] sm:$0xff]  ;;  %v211_v33 = vld [vmem:[%s11335_s27 + $0x58] sm:$0xff] }
 0x4cc   :  { %v7941_v35 = vmul.f32 -1.442695, %v938_v32  ;;  %v214_v32 = vld [vmem:[%s11335_s27 + $0x70] sm:$0xff] }
 0x4cd   :  { %v7940_v36 = vmul.f32 -1.442695, %v933_v34  ;;  %v215_v34 = vld [vmem:[%s11335_s27 + $0x78] sm:$0xff]  ;;  %s11242_s27 = smov 120  }
 0x4ce   :  { %10141 = vpow2.f32 %v7941_v35 }
 0x4cf   :  { %10143 = vpow2.f32 %v7940_v36 }
 0x4d8   :  { %v10142_v37 = vpop.eup %10141 }
 0x4d9   :  { %v10144_v38 = vpop.eup %10143  ;;  %v948_v39 = vadd.f32 1.0, %v10142_v37 }
 0x4da   :  { %v947_v40 = vadd.f32 1.0, %v10144_v38 }
 0x4db   :  { %10145 = vrcp.f32 %v948_v39 }
 0x4dc   :  { %10147 = vrcp.f32 %v947_v40 }
 0x4e5   :  { %v10146_v44 = vpop.eup %10145 }
 0x4e6   :  { %v10148_v46 = vpop.eup %10147  ;;  %v11468_v48 = vmul.f32 %v10146_v44, %v928_v43 }
 0x4e7   :  { %v11470_v49 = vmul.f32 %v10148_v46, %v923_v45 }
 0x4e8   :  { %13658 = vst [vmem:[#allocation22_spill] sm:$0xff] %v11468_v48  ;;  %959 = vrot.lane.b32.xlu0 %v11468_v48, %s11233_s29 }
 0x4e9   :  { %13659 = vst [vmem:[#allocation23_spill] sm:$0xff] %v11470_v49  ;;  %957 = vrot.lane.b32.xlu1 %v11470_v49, %s11233_s29  ;;  %v9675_v51 = vpack.c.bf16 %v11468_v48, %v11470_v49  ;;  %v9987_v52 = vpack.i.bf16 %v11468_v48, %v11470_v49 }
 0x4eb   :  { %9676 = vmatprep.subr.bf16.mxu0 %v9675_v51 }
 0x4ec   :  { %965 = vrot.lane.b32.xlu0 %v11468_v48, %s11234_s3  ;;  %9678 = vmatpush3.bf16.msra.mxu0 %v9675_v51  ;;  %v145_v51 = vld [vmem:[%s11305_s19 + $0x8] sm:$0xff] }
 0x4ed   :  { %963 = vrot.lane.b32.xlu1 %v11470_v49, %s11234_s3 }
 0x4f0   :  { %971 = vrot.lane.b32.xlu0 %v11468_v48, %s11235_s8 }
 0x4f1   :  { %969 = vrot.lane.b32.xlu1 %v11470_v49, %s11235_s8 }
 0x4f5   :  { %9988 = vrot.lane.b32.xlu1 %v9987_v52, %s11229_s5  ;;  %v146_v52 = vld [vmem:[%s11305_s19 + $0x10] sm:$0xff] }
 0x55a   :  { %v11483_v53 = vpop.permute.xlu0 %959 }
 0x55b   :  { %13660 = vst [vmem:[#allocation24_spill] sm:$0xff] %v11483_v53  ;;  %v11485_v54 = vpop.permute.xlu1 %957 }
 0x55c   :  { %13661 = vst [vmem:[#allocation25_spill] sm:$0xff] %v11485_v54  ;;  %v9992_v55 = vpack.i.bf16 %v11483_v53, %v11485_v54  ;;  %v9679_v56 = vpack.c.bf16 %v11483_v53, %v11485_v54 }
 0x55e   :  { %v11491_v57 = vpop.permute.xlu0 %965  ;;  %9993 = vrot.lane.b32.xlu0 %v9992_v55, %s11229_s5  ;;  %9680 = vmatprep.subr.bf16.mxu0 %v9679_v56  ;;  %v147_v55 = vld [vmem:[%s11305_s19 + $0x18] sm:$0xff]  ;;  %s11237_s19 = smov 4  }
 0x55f   :  { %13662 = vst [vmem:[#allocation26_spill] sm:$0xff] %v11491_v57  ;;  %v11495_v59 = vpop.permute.xlu1 %963  ;;  %9682 = vmatpush3.bf16.msra.mxu0 %v9679_v56  ;;  %v152_v56 = vld [vmem:[%s11315_s30] sm:$0xff] }
 0x560   :  { %13663 = vst [vmem:[#allocation27_spill] sm:$0xff] %v11495_v59  ;;  %v9997_v60 = vpack.i.bf16 %v11491_v57, %v11495_v59  ;;  %v9683_v61 = vpack.c.bf16 %v11491_v57, %v11495_v59  ;;  %9013 = vmatprep.mubr.msk.f32.mxu1 %vm727_vm8, %v152_v56 }
 0x562   :  { %v11501_v62 = vpop.permute.xlu0 %971  ;;  %9998 = vrot.lane.b32.xlu1 %v9997_v60, %s11229_s5  ;;  %9684 = vmatprep.subr.bf16.mxu0 %v9683_v61 }
 0x563   :  { %13664 = vst [vmem:[#allocation28_spill] sm:$0xff] %v11501_v62  ;;  %v11504_v63 = vpop.permute.xlu1 %969  ;;  %9686 = vmatpush3.bf16.msra.mxu0 %v9683_v61 }
 0x564   :  { %13665 = vst [vmem:[#allocation29_spill] sm:$0xff] %v11504_v63  ;;  %v10002_v1 = vpack.i.bf16 %v11501_v62, %v11504_v63  ;;  %v9687_v2 = vpack.c.bf16 %v11501_v62, %v11504_v63 }
 0x566   :  { %1001 = vperm.xlu1 %9986, %v148_v0   ;;  %10003 = vrot.lane.b32.xlu0 %v10002_v1, %s11229_s5 }
 0x567   :  { %9688 = vmatprep.subr.bf16.mxu0 %v9687_v2  ;;  %v9989_v3 = vpop.permute.xlu1 %9988 }
 0x568   :  { %v9991_v6 = vunpack.i.h.bf16 %v9989_v3  ;;  %v9990_v7 = vunpack.i.l.bf16 %v9989_v3  ;;  %9690 = vmatpush3.bf16.msra.mxu0 %v9687_v2 }
 0x56a   :  { %1011 = vperm.xlu1 %9986, %v150_v4   ;;  %1006 = vperm.xlu0 %9985, %v149_v5   ;;  %v9691_v8 = vpack.c.bf16 %v9991_v6, %v9990_v7 }
 0x56c   :  { %9692 = vmatprep.subr.bf16.mxu0 %v9691_v8 }
 0x56d   :  { %9694 = vmatpush3.bf16.msra.mxu0 %v9691_v8 }
 0x56e   :  { %1130 = vperm.xlu1 %9986, %v164_v9   ;;  %1016 = vperm.xlu0 %9985, %v151_v11  }
 0x572   :  { %1140 = vperm.xlu1 %9986, %v166_v12   ;;  %1135 = vperm.xlu0 %9985, %v165_v13  }
 0x576   :  { %1110 = vperm.xlu1 %9986, %v160_v14   ;;  %1145 = vperm.xlu0 %9985, %v167_v15  }
 0x57a   :  { %1120 = vperm.xlu1 %9986, %v162_v16   ;;  %1115 = vperm.xlu0 %9985, %v161_v17   ;;  %v153_v16 = vld [vmem:[%s11315_s30 + $0x8] sm:$0xff]  ;;  %v154_v17 = vld [vmem:[%s11315_s30 + $0x10] sm:$0xff] }
 0x57e   :  { %1307 = vperm.xlu1 %9986, %v200_v18   ;;  %1125 = vperm.xlu0 %9985, %v163_v19   ;;  %v155_v18 = vld [vmem:[%s11315_s30 + $0x18] sm:$0xff]  ;;  %v156_v19 = vld [vmem:[%s11315_s30 + $0x20] sm:$0xff] }
 0x582   :  { %1327 = vperm.xlu1 %9986, %v204_v20   ;;  %1312 = vperm.xlu0 %9985, %v201_v21   ;;  %v157_v20 = vld [vmem:[%s11315_s30 + $0x28] sm:$0xff]  ;;  %v158_v21 = vld [vmem:[%s11315_s30 + $0x30] sm:$0xff] }
 0x586   :  { %1317 = vperm.xlu1 %9986, %v202_v22   ;;  %1332 = vperm.xlu0 %9985, %v205_v23   ;;  %v159_v22 = vld [vmem:[%s11315_s30 + $0x38] sm:$0xff]  ;;  %v168_v23 = vld [vmem:[%s11325_s12] sm:$0xff]  ;;  %s11239_s30 = smov 6  }
 0x58a   :  { %1337 = vperm.xlu1 %9986, %v206_v24   ;;  %1322 = vperm.xlu0 %9985, %v203_v25   ;;  %v11563_v24 = vld [vmem:[%s11330_s20] sm:$0xff]  ;;  %v11566_v25 = vld [vmem:[%s11330_s20 + $0x8] sm:$0xff] }
 0x58e   :  { %1347 = vperm.xlu1 %9986, %v208_v26   ;;  %1342 = vperm.xlu0 %9985, %v207_v27   ;;  %v11573_v26 = vld [vmem:[%s11330_s20 + $0x10] sm:$0xff]  ;;  %v11576_v27 = vld [vmem:[%s11330_s20 + $0x18] sm:$0xff] }
 0x592   :  { %1367 = vperm.xlu1 %9986, %v212_v28   ;;  %1352 = vperm.xlu0 %9985, %v209_v29   ;;  %v11583_v28 = vld [vmem:[%s11330_s20 + $0x20] sm:$0xff]  ;;  %v11586_v29 = vld [vmem:[%s11330_s20 + $0x28] sm:$0xff] }
 0x596   :  { %1357 = vperm.xlu1 %9986, %v210_v30   ;;  %1372 = vperm.xlu0 %9985, %v213_v31   ;;  %v11593_v30 = vld [vmem:[%s11330_s20 + $0x30] sm:$0xff]  ;;  %v11596_v31 = vld [vmem:[%s11330_s20 + $0x38] sm:$0xff] }
 0x59a   :  { %1377 = vperm.xlu1 %9986, %v214_v32   ;;  %1362 = vperm.xlu0 %9985, %v211_v33   ;;  %v11603_v32 = vld [vmem:[%s11330_s20 + $0x40] sm:$0xff]  ;;  %v11606_v33 = vld [vmem:[%s11330_s20 + $0x48] sm:$0xff] }
 0x59e   :  { %1382 = vperm.xlu0 %9985, %v215_v34   ;;  %v11613_v34 = vld [vmem:[%s11330_s20 + $0x50] sm:$0xff] }
 0x5d0   :  { %v9994_v35 = vpop.permute.xlu0 %9993 }
 0x5d1   :  { %v9996_v36 = vunpack.i.h.bf16 %v9994_v35  ;;  %v9995_v37 = vunpack.i.l.bf16 %v9994_v35  ;;  %v11616_v35 = vld [vmem:[%s11330_s20 + $0x58] sm:$0xff] }
 0x5d3   :  { %v9695_v38 = vpack.c.bf16 %v9996_v36, %v9995_v37  ;;  %v11623_v36 = vld [vmem:[%s11330_s20 + $0x60] sm:$0xff]  ;;  %v11626_v37 = vld [vmem:[%s11330_s20 + $0x68] sm:$0xff] }
 0x5d4   :  { %v9999_v39 = vpop.permute.xlu1 %9998 }
 0x5d5   :  { %v10001_v40 = vunpack.i.h.bf16 %v9999_v39  ;;  %v10000_v41 = vunpack.i.l.bf16 %v9999_v39  ;;  %9696 = vmatprep.subr.bf16.mxu0 %v9695_v38  ;;  %v11636_v39 = vld [vmem:[%s11330_s20 + $0x78] sm:$0xff] }
 0x5d6   :  { %9698 = vmatpush3.bf16.msra.mxu0 %v9695_v38  ;;  %v11633_v38 = vld [vmem:[%s11330_s20 + $0x70] sm:$0xff] }
 0x5d7   :  { %v9699_v42 = vpack.c.bf16 %v10001_v40, %v10000_v41 }
 0x5d8   :  { %v10004_v43 = vpop.permute.xlu0 %10003 }
 0x5d9   :  { %v10006_v44 = vunpack.i.h.bf16 %v10004_v43  ;;  %v10005_v45 = vunpack.i.l.bf16 %v10004_v43  ;;  %9700 = vmatprep.subr.bf16.mxu0 %v9699_v42 }
 0x5da   :  { %9702 = vmatpush3.bf16.msra.mxu0 %v9699_v42 }
 0x5db   :  { %v9703_v46 = vpack.c.bf16 %v10006_v44, %v10005_v45 }
 0x5dd   :  { %9704 = vmatprep.subr.bf16.mxu0 %v9703_v46 }
 0x5de   :  { %9706 = vmatpush3.bf16.msra.mxu0 %v9703_v46 }
 0x5df   :  { %9057 = vmatprep.subr.mxu0 %v13616_v10 }
 0x5e1   :  { %9000 = vmatmul.mubr.f32.vlgmr.msra.gmra.mrb[6].mxu0 %v145_v51 }
 0x5e2   :  { %9002 = vmatprep.mubr.f32.mxu0 %v146_v52  ;;  %9058 = vmatpush3.msra.mxu0 %v13616_v10 }
 0x5e5   :  { %9003 = vmatmul.mubr.f32.gmra.mrb[8].mxu0 %v147_v55  ;;  %v1002_v60 = vpop.permute.xlu1 %1001 }
 0x5e6   :  { %9059 = vmatprep.mubr.msk.f32.mxu0 %vm727_vm8, %v11563_v24 }
 0x5e9   :  { %v1007_v58 = vpop.permute.xlu0 %1006  ;;  %v1012_v7 = vpop.permute.xlu1 %1011  ;;  %9060 = vmatmul.mubr.msk.f32.vlgmr.msra.gmra.mrb[10].mxu0 %vm727_vm8, %v11566_v25 }
 0x5ea   :  { %9062 = vmatprep.mubr.msk.f32.mxu0 %vm727_vm8, %v11573_v26 }
 0x5ed   :  { %v1017_v4 = vpop.permute.xlu0 %1016  ;;  %9063 = vmatmul.mubr.msk.f32.gmra.mrb[12].mxu0 %vm727_vm8, %v11576_v27  ;;  %v1131_v45 = vpop.permute.xlu1 %1130 }
 0x5ee   :  { %9065 = vmatprep.mubr.msk.f32.mxu0 %vm727_vm8, %v11583_v28 }
 0x5f1   :  { %9066 = vmatmul.mubr.msk.f32.gmra.mrb[14].mxu0 %vm727_vm8, %v11586_v29  ;;  %v1136_v44 = vpop.permute.xlu0 %1135 }
 0x5f2   :  { %9068 = vmatprep.mubr.msk.f32.mxu0 %vm727_vm8, %v11593_v30 }
 0x5f5   :  { %9069 = vmatmul.mubr.msk.f32.gmra.mrb[16].mxu0 %vm727_vm8, %v11596_v31 }
 0x5f6   :  { %9071 = vmatprep.mubr.msk.f32.mxu0 %vm727_vm8, %v11603_v32 }
 0x5f9   :  { %9072 = vmatmul.mubr.msk.f32.gmra.mrb[18].mxu0 %vm727_vm8, %v11606_v33 }
 0x5fa   :  { %9074 = vmatprep.mubr.msk.f32.mxu0 %vm727_vm8, %v11613_v34 }
 0x5fd   :  { %9075 = vmatmul.mubr.msk.f32.gmra.mrb[20].mxu0 %vm727_vm8, %v11616_v35 }
 0x5fe   :  { %9077 = vmatprep.mubr.msk.f32.mxu0 %vm727_vm8, %v11623_v36 }
 0x601   :  { %9078 = vmatmul.mubr.msk.f32.gmra.mrb[22].mxu0 %vm727_vm8, %v11626_v37 }
 0x602   :  { %9080 = vmatprep.mubr.msk.f32.mxu0 %vm727_vm8, %v11633_v38 }
 0x605   :  { %9081 = vmatmul.mubr.msk.f32.gmra.mrb[24].mxu0 %vm727_vm8, %v11636_v39 }
 0x606   :  { %9123 = vmatprep.mubr.msk.f32.mxu0 %vm727_vm8, %v11563_v24 }
 0x6b4   :  { %v9001_v61 = vpop.f32.mrb[6].mxu0 }
 0x6b5   :  { %v1091_v0 = vadd.f32 %v9001_v61, %v1007_v58  ;;  %v1085_v1 = vpop.f32.mrb[7].mxu0  ;;  %v1146_v58 = vpop.permute.xlu0 %1145 }
 0x6b6   :  { %v1086_v2 = vadd.f32 %v1085_v1, %v1002_v60 }
 0x6b7   :  { %v1105_v3 = vmax.f32 %v1091_v0, 0.0  ;;  %v1141_v0 = vpop.permute.xlu1 %1140 }
 0x6b8   :  { %v1104_v5 = vmax.f32 %v1086_v2, 0.0  ;;  %v9004_v6 = vpop.f32.mrb[8].mxu0 }
 0x6b9   :  { %v1101_v8 = vadd.f32 %v9004_v6, %v1017_v4  ;;  %v1095_v9 = vpop.f32.mrb[9].mxu0 }
 0x6ba   :  { %v9707_v11 = vpack.c.bf16 %v1105_v3, %v1104_v5  ;;  %v1096_v12 = vadd.f32 %v1095_v9, %v1012_v7 }
 0x6bb   :  { %v1107_v13 = vmax.f32 %v1101_v8, 0.0 }
 0x6bc   :  { %v1106_v14 = vmax.f32 %v1096_v12, 0.0  ;;  %9708 = vmatprep.subr.bf16.mxu1 %v9707_v11 }
 0x6bd   :  { %9710 = vmatpush3.bf16.msra.mxu1 %v9707_v11 }
 0x6be   :  { %v9711_v15 = vpack.c.bf16 %v1107_v13, %v1106_v14 }
 0x6c0   :  { %9712 = vmatprep.subr.bf16.mxu1 %v9711_v15 }
 0x6c1   :  { %9714 = vmatpush3.bf16.msra.mxu1 %v9711_v15  ;;  %v1116_v15 = vpop.permute.xlu0 %1115 }
 0x6c4   :  { %9014 = vmatmul.mubr.msk.f32.vlgmr.msra.gmra.mrb[8].mxu1 %vm727_vm8, %v153_v16  ;;  %v1111_v16 = vpop.permute.xlu1 %1110 }
 0x6c5   :  { %9016 = vmatprep.mubr.msk.f32.mxu1 %vm727_vm8, %v154_v17 }
 0x6c8   :  { %9017 = vmatmul.mubr.msk.f32.gmra.mrb[10].mxu1 %vm727_vm8, %v155_v18 }
 0x6c9   :  { %9019 = vmatprep.mubr.msk.f32.mxu1 %vm727_vm8, %v156_v19 }
 0x6cc   :  { %9020 = vmatmul.mubr.msk.f32.gmra.mrb[12].mxu1 %vm727_vm8, %v157_v20 }
 0x6cd   :  { %9022 = vmatprep.mubr.msk.f32.mxu1 %vm727_vm8, %v158_v21 }
 0x6d0   :  { %9023 = vmatmul.mubr.msk.f32.gmra.mrb[14].mxu1 %vm727_vm8, %v159_v22  ;;  %v1126_v22 = vpop.permute.xlu0 %1125 }
 0x6d1   :  { %9033 = vmatprep.mubr.msk.f32.mxu1 %vm727_vm8, %v168_v23 }
 0x797   :  { %v9015_v40 = vpop.f32.mrb[8].mxu1 }
 0x798   :  { %v1238_v41 = vpop.f32.mrb[9].mxu1  ;;  %v1244_v17 = vadd.f32 %v9015_v40, %v1116_v15 }
 0x799   :  { %v1239_v19 = vadd.f32 %v1238_v41, %v1111_v16 }
 0x79b   :  { %v9018_v42 = vpop.f32.mrb[10].mxu1 }
 0x79c   :  { %v1248_v43 = vpop.f32.mrb[11].mxu1 }
 0x79f   :  { %v9021_v46 = vpop.f32.mrb[12].mxu1 }
 0x7a0   :  { %v1264_v51 = vadd.f32 %v9021_v46, %v1136_v44  ;;  %v1258_v52 = vpop.f32.mrb[13].mxu1  ;;  %v1121_v44 = vpop.permute.xlu1 %1120 }
 0x7a1   :  { %v1259_v55 = vadd.f32 %v1258_v52, %v1131_v45  ;;  %v1254_v45 = vadd.f32 %v9018_v42, %v1126_v22 }
 0x7a2   :  { %v7951_v56 = vmul.f32 -1.442695, %v1264_v51  ;;  %v1249_v51 = vadd.f32 %v1248_v43, %v1121_v44  ;;  %v169_v43 = vld [vmem:[%s11325_s12 + $0x8] sm:$0xff] }
 0x7a3   :  { %v7950_v60 = vmul.f32 -1.442695, %v1259_v55  ;;  %v9024_v61 = vpop.f32.mrb[14].mxu1 }
 0x7a4   :  { %10149 = vpow2.f32 %v7951_v56  ;;  %v1274_v1 = vadd.f32 %v9024_v61, %v1146_v58  ;;  %v1268_v2 = vpop.f32.mrb[15].mxu1  ;;  %v170_v56 = vld [vmem:[%s11325_s12 + $0x10] sm:$0xff]  ;;  %v171_v58 = vld [vmem:[%s11325_s12 + $0x18] sm:$0xff]  ;;  %v173_v61 = vld [vmem:[%s11325_s12 + $0x28] sm:$0xff] }
 0x7a5   :  { %10151 = vpow2.f32 %v7950_v60  ;;  %v1269_v3 = vadd.f32 %v1268_v2, %v1141_v0  ;;  %v172_v60 = vld [vmem:[%s11325_s12 + $0x20] sm:$0xff]  ;;  %v174_v0 = vld [vmem:[%s11325_s12 + $0x30] sm:$0xff] }
 0x7a6   :  { %v7953_v4 = vmul.f32 -1.442695, %v1274_v1  ;;  %v175_v1 = vld [vmem:[%s11325_s12 + $0x38] sm:$0xff]  ;;  %v176_v2 = vld [vmem:[%s11325_s12 + $0x40] sm:$0xff] }
 0x7a7   :  { %v7952_v5 = vmul.f32 -1.442695, %v1269_v3  ;;  %v177_v3 = vld [vmem:[%s11325_s12 + $0x48] sm:$0xff] }
 0x7a8   :  { %10153 = vpow2.f32 %v7953_v4  ;;  %v178_v4 = vld [vmem:[%s11325_s12 + $0x50] sm:$0xff] }
 0x7a9   :  { %10155 = vpow2.f32 %v7952_v5  ;;  %v179_v5 = vld [vmem:[%s11325_s12 + $0x58] sm:$0xff] }
 0x7ae   :  { %v10150_v6 = vpop.eup %10149 }
 0x7af   :  { %v10152_v7 = vpop.eup %10151  ;;  %v1290_v8 = vadd.f32 1.0, %v10150_v6  ;;  %v180_v6 = vld [vmem:[%s11325_s12 + $0x60] sm:$0xff] }
 0x7b0   :  { %v1289_v9 = vadd.f32 1.0, %v10152_v7  ;;  %v181_v7 = vld [vmem:[%s11325_s12 + $0x68] sm:$0xff] }
 0x7b1   :  { %10157 = vrcp.f32 %v1290_v8  ;;  %v182_v8 = vld [vmem:[%s11325_s12 + $0x70] sm:$0xff] }
 0x7b2   :  { %v10154_v11 = vpop.eup %10153  ;;  %10159 = vrcp.f32 %v1289_v9  ;;  %v183_v9 = vld [vmem:[%s11325_s12 + $0x78] sm:$0xff]  ;;  %s11241_s12 = smov 8  }
 0x7b3   :  { %v10156_v12 = vpop.eup %10155  ;;  %v1292_v13 = vadd.f32 1.0, %v10154_v11  ;;  %v9061_v11 = vpop.f32.mrb[10].mxu0 }
 0x7b4   :  { %v1291_v14 = vadd.f32 1.0, %v10156_v12  ;;  %v1692_v12 = vpop.f32.mrb[11].mxu0 }
 0x7b5   :  { %10161 = vrcp.f32 %v1292_v13  ;;  %v9064_v13 = vpop.f32.mrb[12].mxu0 }
 0x7b6   :  { %10163 = vrcp.f32 %v1291_v14  ;;  %v1702_v14 = vpop.f32.mrb[13].mxu0 }
 0x7b7   :  { %v9067_v15 = vpop.f32.mrb[14].mxu0 }
 0x7b8   :  { %v1712_v16 = vpop.f32.mrb[15].mxu0 }
 0x7bb   :  { %v10158_v18 = vpop.eup %10157 }
 0x7bc   :  { %v10160_v20 = vpop.eup %10159  ;;  %v11644_v21 = vmul.f32 %v10158_v18, %v1244_v17  ;;  %v9070_v17 = vpop.f32.mrb[16].mxu0 }
 0x7bd   :  { %v11646_v23 = vmul.f32 %v10160_v20, %v1239_v19  ;;  %v1722_v18 = vpop.f32.mrb[17].mxu0 }
 0x7be   :  { %13666 = vst [vmem:[#allocation30_spill] sm:$0xff] %v11644_v21  ;;  %v11688_v19 = vpop.f32.mrb[18].mxu0 }
 0x7bf   :  { %13667 = vst [vmem:[#allocation31_spill] sm:$0xff] %v11646_v23  ;;  %v10162_v46 = vpop.eup %10161  ;;  %v9715_v52 = vpack.c.bf16 %v11644_v21, %v11646_v23  ;;  %v11690_v20 = vpop.f32.mrb[19].mxu0 }
 0x7c0   :  { %v10164_v40 = vpop.eup %10163  ;;  %v11650_v41 = vmul.f32 %v10162_v46, %v1254_v45  ;;  %v11692_v22 = vpop.f32.mrb[20].mxu0 }
 0x7c1   :  { %9716 = vmatprep.subr.bf16.mxu1 %v9715_v52  ;;  %v11652_v55 = vmul.f32 %v10164_v40, %v1249_v51  ;;  %v11694_v44 = vpop.f32.mrb[21].mxu0  ;;  %v1313_v40 = vpop.permute.xlu0 %1312 }
 0x7c2   :  { %13668 = vst [vmem:[#allocation32_spill] sm:$0xff] %v11650_v41  ;;  %9718 = vmatpush3.bf16.msra.mxu1 %v9715_v52  ;;  %v11696_v45 = vpop.f32.mrb[22].mxu0 }
 0x7c3   :  { %13669 = vst [vmem:[#allocation33_spill] sm:$0xff] %v11652_v55  ;;  %v9719_v42 = vpack.c.bf16 %v11650_v41, %v11652_v55  ;;  %v11698_v46 = vpop.f32.mrb[23].mxu0 }
 0x7c4   :  { %v11700_v51 = vpop.f32.mrb[24].mxu0 }
 0x7c5   :  { %9720 = vmatprep.subr.bf16.mxu1 %v9719_v42  ;;  %v11702_v52 = vpop.f32.mrb[25].mxu0 }
 0x7c6   :  { %9722 = vmatpush3.bf16.msra.mxu1 %v9719_v42  ;;  %v1308_v42 = vpop.permute.xlu1 %1307 }
 0x7c9   :  { %9034 = vmatmul.mubr.msk.f32.vlgmr.msra.gmra.mrb[16].mxu1 %vm727_vm8, %v169_v43  ;;  %v1333_v43 = vpop.permute.xlu0 %1332 }
 0x7ca   :  { %9036 = vmatprep.mubr.msk.f32.mxu1 %vm727_vm8, %v170_v56  ;;  %v1328_v56 = vpop.permute.xlu1 %1327 }
 0x7cd   :  { %9037 = vmatmul.mubr.msk.f32.gmra.mrb[18].mxu1 %vm727_vm8, %v171_v58  ;;  %v1323_v58 = vpop.permute.xlu0 %1322 }
 0x7ce   :  { %9039 = vmatprep.mubr.msk.f32.mxu1 %vm727_vm8, %v172_v60  ;;  %v1318_v60 = vpop.permute.xlu1 %1317 }
 0x7d1   :  { %9040 = vmatmul.mubr.msk.f32.gmra.mrb[20].mxu1 %vm727_vm8, %v173_v61 }
 0x7d2   :  { %9042 = vmatprep.mubr.msk.f32.mxu1 %vm727_vm8, %v174_v0 }
 0x7d5   :  { %9043 = vmatmul.mubr.msk.f32.gmra.mrb[22].mxu1 %vm727_vm8, %v175_v1 }
 0x7d6   :  { %9045 = vmatprep.mubr.msk.f32.mxu1 %vm727_vm8, %v176_v2  ;;  %v1343_v2 = vpop.permute.xlu0 %1342 }
 0x7d9   :  { %9046 = vmatmul.mubr.msk.f32.gmra.mrb[24].mxu1 %vm727_vm8, %v177_v3 }
 0x7da   :  { %9048 = vmatprep.mubr.msk.f32.mxu1 %vm727_vm8, %v178_v4  ;;  %v1338_v4 = vpop.permute.xlu1 %1337 }
 0x7dd   :  { %9049 = vmatmul.mubr.msk.f32.gmra.mrb[26].mxu1 %vm727_vm8, %v179_v5 }
 0x7de   :  { %9051 = vmatprep.mubr.msk.f32.mxu1 %vm727_vm8, %v180_v6 }
 0x7e1   :  { %9052 = vmatmul.mubr.msk.f32.gmra.mrb[28].mxu1 %vm727_vm8, %v181_v7 }
 0x7e2   :  { %9054 = vmatprep.mubr.msk.f32.mxu1 %vm727_vm8, %v182_v8 }
 0x7e5   :  { %9055 = vmatmul.mubr.msk.f32.gmra.mrb[30].mxu1 %vm727_vm8, %v183_v9 }
 0x7e6   :  { %9091 = vmatprep.mubr.msk.f32.mxu1 %vm727_vm8, %v11563_v24 }
 0x89c   :  { %v9035_v61 = vpop.f32.mrb[16].mxu1 }
 0x89d   :  { %v11704_v0 = vadd.f32 %v9035_v61, %v1313_v40  ;;  %v1499_v1 = vpop.f32.mrb[17].mxu1  ;;  %v1353_v61 = vpop.permute.xlu0 %1352 }
 0x89e   :  { %v11706_v3 = vadd.f32 %v1499_v1, %v1308_v42  ;;  %v1348_v1 = vpop.permute.xlu1 %1347 }
 0x89f   :  { %v1772_v5 = vadd.f32 %v9061_v11, %v11704_v0 }
 0x8a0   :  { %v1771_v6 = vadd.f32 %v1692_v12, %v11706_v3  ;;  %v9038_v7 = vpop.f32.mrb[18].mxu1 }
 0x8a1   :  { %v7987_v8 = vmul.f32 -1.442695, %v1772_v5  ;;  %v11710_v9 = vadd.f32 %v9038_v7, %v1323_v58  ;;  %v1509_v10 = vpop.f32.mrb[19].mxu1  ;;  %v1373_v7 = vpop.permute.xlu0 %1372 }
 0x8a2   :  { %v7986_v50 = vmul.f32 -1.442695, %v1771_v6  ;;  %v11712_v47 = vadd.f32 %v1509_v10, %v1318_v60 }
 0x8a3   :  { %10165 = vpow2.f32 %v7987_v8  ;;  %v1774_v40 = vadd.f32 %v9064_v13, %v11710_v9 }
 0x8a4   :  { %10167 = vpow2.f32 %v7986_v50  ;;  %v9041_v42 = vpop.f32.mrb[20].mxu1  ;;  %v1773_v12 = vadd.f32 %v1702_v14, %v11712_v47 }
 0x8a5   :  { %v7989_v63 = vmul.f32 -1.442695, %v1774_v40  ;;  %v11715_v62 = vadd.f32 %v9041_v42, %v1333_v43  ;;  %v1519_v11 = vpop.f32.mrb[21].mxu1  ;;  %v1368_v42 = vpop.permute.xlu1 %1367 }
 0x8a6   :  { %v11718_v5 = vadd.f32 %v1519_v11, %v1328_v56  ;;  %v7988_v8 = vmul.f32 -1.442695, %v1773_v12 }
 0x8a7   :  { %10169 = vpow2.f32 %v7989_v63  ;;  %v1776_v58 = vadd.f32 %v9067_v15, %v11715_v62 }
 0x8a8   :  { %v1775_v10 = vadd.f32 %v1712_v16, %v11718_v5  ;;  %v9044_v60 = vpop.f32.mrb[22].mxu1 }
 0x8a9   :  { %v7991_v6 = vmul.f32 -1.442695, %v1776_v58  ;;  %v11722_v13 = vadd.f32 %v9044_v60, %v1343_v2  ;;  %v1529_v50 = vpop.f32.mrb[23].mxu1 }
 0x8aa   :  { %v7990_v40 = vmul.f32 -1.442695, %v1775_v10  ;;  %v11724_v43 = vadd.f32 %v1529_v50, %v1338_v4 }
 0x8ab   :  { %10171 = vpow2.f32 %v7991_v6  ;;  %v1778_v14 = vadd.f32 %v9070_v17, %v11722_v13  ;;  %v1363_v6 = vpop.permute.xlu0 %1362 }
 0x8ac   :  { %10173 = vpow2.f32 %v7990_v40  ;;  %v1777_v63 = vadd.f32 %v1722_v18, %v11724_v43  ;;  %v9047_v15 = vpop.f32.mrb[24].mxu1 }
 0x8ad   :  { %v10166_v56 = vpop.eup %10165  ;;  %v7993_v16 = vmul.f32 -1.442695, %v1778_v14  ;;  %v11728_v11 = vadd.f32 %v9047_v15, %v1353_v61  ;;  %v1539_v2 = vpop.f32.mrb[25].mxu1  ;;  %10175 = vpow2.f32 %v7988_v8 }
 0x8ae   :  { %v10168_v58 = vpop.eup %10167  ;;  %v1824_v60 = vadd.f32 1.0, %v10166_v56  ;;  %v7992_v12 = vmul.f32 -1.442695, %v1777_v63  ;;  %v11730_v10 = vadd.f32 %v1539_v2, %v1348_v1  ;;  %v1358_v61 = vpop.permute.xlu1 %1357 }
 0x8af   :  { %v1823_v4 = vadd.f32 1.0, %v10168_v58  ;;  %10177 = vpow2.f32 %v7993_v16  ;;  %v1780_v17 = vadd.f32 %v11688_v19, %v11728_v11 }
 0x8b0   :  { %v1779_v18 = vadd.f32 %v11690_v20, %v11730_v10  ;;  %v9050_v50 = vpop.f32.mrb[26].mxu1  ;;  %10179 = vrcp.f32 %v1824_v60 }
 0x8b1   :  { %v10170_v40 = vpop.eup %10169  ;;  %v7995_v14 = vmul.f32 -1.442695, %v1780_v17  ;;  %v11736_v15 = vadd.f32 %v9050_v50, %v1363_v6  ;;  %v1549_v8 = vpop.f32.mrb[27].mxu1  ;;  %10181 = vpow2.f32 %v7992_v12 }
 0x8b2   :  { %v1826_v63 = vadd.f32 1.0, %v10170_v40  ;;  %v7994_v1 = vmul.f32 -1.442695, %v1779_v18  ;;  %v11738_v56 = vadd.f32 %v1549_v8, %v1358_v61  ;;  %10183 = vrcp.f32 %v1823_v4  ;;  %v1378_v8 = vpop.permute.xlu1 %1377 }
 0x8b3   :  { %v1782_v19 = vadd.f32 %v11692_v22, %v11736_v15  ;;  %10185 = vpow2.f32 %v7995_v14 }
 0x8b4   :  { %v1781_v20 = vadd.f32 %v11694_v44, %v11738_v56  ;;  %v9053_v16 = vpop.f32.mrb[28].mxu1  ;;  %10187 = vrcp.f32 %v1826_v63  ;;  %v1383_v44 = vpop.permute.xlu0 %1382 }
 0x8b5   :  { %v10172_v2 = vpop.eup %10171  ;;  %v7997_v58 = vmul.f32 -1.442695, %v1782_v19  ;;  %v11744_v60 = vadd.f32 %v9053_v16, %v1373_v7  ;;  %v1559_v17 = vpop.f32.mrb[29].mxu1  ;;  %10189 = vpow2.f32 %v7994_v1 }
 0x8b6   :  { %v10174_v6 = vpop.eup %10173  ;;  %v1828_v12 = vadd.f32 1.0, %v10172_v2  ;;  %v7996_v18 = vmul.f32 -1.442695, %v1781_v20  ;;  %v11746_v50 = vadd.f32 %v1559_v17, %v1368_v42 }
 0x8b7   :  { %v1827_v4 = vadd.f32 1.0, %v10174_v6  ;;  %10191 = vpow2.f32 %v7997_v58  ;;  %v1784_v22 = vadd.f32 %v11696_v45, %v11744_v60  ;;  %v10176_v40 = vpop.eup %10175 }
 0x8b8   :  { %10193 = vrcp.f32 %v1828_v12  ;;  %v9056_v61 = vpop.f32.mrb[30].mxu1  ;;  %v1783_v7 = vadd.f32 %v11698_v46, %v11746_v50  ;;  %v1825_v2 = vadd.f32 1.0, %v10176_v40 }
 0x8b9   :  { %v10178_v14 = vpop.eup %10177  ;;  %10195 = vrcp.f32 %v1827_v4  ;;  %v11752_v63 = vadd.f32 %v9056_v61, %v1383_v44  ;;  %v1569_v1 = vpop.f32.mrb[31].mxu1 }
 0x8ba   :  { %v1830_v42 = vadd.f32 1.0, %v10178_v14  ;;  %10197 = vpow2.f32 %v7996_v18  ;;  %v11754_v19 = vadd.f32 %v1569_v1, %v1378_v8  ;;  %v10180_v20 = vpop.eup %10179 }
 0x8bb   :  { %10199 = vtanh.f32 %v1784_v22  ;;  %v1786_v45 = vadd.f32 %v11700_v51, %v11752_v63  ;;  %v10182_v16 = vpop.eup %10181 }
 0x8bc   :  { %10201 = vrcp.f32 %v1830_v42  ;;  %v10184_v58 = vpop.eup %10183  ;;  %v1829_v17 = vadd.f32 1.0, %v10182_v16  ;;  %v1785_v46 = vadd.f32 %v11702_v52, %v11754_v19 }
 0x8bd   :  { %10203 = vtanh.f32 %v1783_v7  ;;  %v10186_v6 = vpop.eup %10185 }
 0x8be   :  { %10205 = vtanh.f32 %v1786_v45  ;;  %v10188_v12 = vpop.eup %10187  ;;  %v1832_v14 = vadd.f32 1.0, %v10186_v6 }
 0x8bf   :  { %10207 = vrcp.f32 %v1829_v17  ;;  %v10190_v18 = vpop.eup %10189 }
 0x8c0   :  { %10209 = vrcp.f32 %v1825_v2  ;;  %v1831_v52 = vadd.f32 1.0, %v10190_v18 }
 0x8c1   :  { %v10192_v4 = vpop.eup %10191  ;;  %10211 = vtanh.f32 %v1785_v46 }
 0x8c2   :  { %v10194_v22 = vpop.eup %10193  ;;  %10213 = vrcp.f32 %v1832_v14  ;;  %v1834_v53 = vadd.f32 1.0, %v10192_v4 }
 0x8c3   :  { %v10196_v44 = vpop.eup %10195  ;;  %v1864_v61 = vmul.f32 0.0, %v10194_v22 }
 0x8c4   :  { %v10198_v51 = vpop.eup %10197  ;;  %v1863_v1 = vmul.f32 0.0, %v10196_v44 }
 0x8c5   :  { %v10200_v40 = vpop.eup %10199 }
 0x8c6   :  { %v10202_v8 = vpop.eup %10201  ;;  %v1868_v7 = vmul.f32 %v10200_v40, %v10180_v20  ;;  %v1833_v20 = vadd.f32 1.0, %v10198_v51 }
 0x8c7   :  { %v10204_v42 = vpop.eup %10203  ;;  %v1866_v16 = vmul.f32 0.0, %v10202_v8 }
 0x8c8   :  { %v10206_v59 = vpop.eup %10205  ;;  %v11760_v45 = vadd.f32 %v1868_v7, %v1864_v61  ;;  %v1867_v17 = vmul.f32 %v10204_v42, %v10184_v58 }
 0x8c9   :  { %v10208_v57 = vpop.eup %10207  ;;  %v1870_v2 = vmul.f32 %v10206_v59, %v10188_v12 }
 0x8ca   :  { %v10210_v46 = vpop.eup %10209  ;;  %v1865_v54 = vmul.f32 0.0, %v10208_v57  ;;  %10215 = vtanh.f32 %v11760_v45  ;;  %v11763_v22 = vadd.f32 %v1867_v17, %v1863_v1 }
 0x8cb   :  { %v10212_v6 = vpop.eup %10211  ;;  %10217 = vrcp.f32 %v1831_v52  ;;  %v11765_v44 = vadd.f32 %v1870_v2, %v1866_v16 }
 0x8cc   :  { %10219 = vtanh.f32 %v11763_v22  ;;  %v1869_v18 = vmul.f32 %v10212_v6, %v10210_v46  ;;  %v10214_v57 = vpop.eup %10213 }
 0x8cd   :  { %10221 = vtanh.f32 %v11765_v44 }
 0x8ce   :  { %10223 = vrcp.f32 %v1834_v53  ;;  %v11769_v58 = vadd.f32 %v1869_v18, %v1865_v54 }
 0x8cf   :  { %10225 = vrcp.f32 %v1833_v20 }
 0x8d0   :  { %10227 = vtanh.f32 %v11769_v58 }
 0x8d4   :  { %v10216_v59 = vpop.eup %10215 }
 0x8d5   :  { %v10218_v12 = vpop.eup %10217  ;;  %v11772_v4 = vmul.f32 %v10216_v59, %v10214_v57 }
 0x8d6   :  { %v10220_v61 = vpop.eup %10219 }
 0x8d7   :  { %v10222_v51 = vpop.eup %10221  ;;  %v11774_v40 = vmul.f32 %v10220_v61, %v10218_v12 }
 0x8d8   :  { %v10224_v14 = vpop.eup %10223 }
 0x8d9   :  { %v10226_v8 = vpop.eup %10225  ;;  %v9723_v1 = vpack.c.bf16 %v11772_v4, %v11774_v40  ;;  %v11778_v53 = vmul.f32 %v10224_v14, %v10222_v51 }
 0x8da   :  { %v10228_v54 = vpop.eup %10227 }
 0x8db   :  { %9724 = vmatprep.subr.bf16.mxu1 %v9723_v1  ;;  %v11780_v7 = vmul.f32 %v10228_v54, %v10226_v8 }
 0x8dc   :  { %9726 = vmatpush3.bf16.msra.mxu1 %v9723_v1 }
 0x8dd   :  { %v9727_v42 = vpack.c.bf16 %v11778_v53, %v11780_v7 }
 0x8df   :  { %9728 = vmatprep.subr.bf16.mxu1 %v9727_v42 }
 0x8e0   :  { %9730 = vmatpush3.bf16.msra.mxu1 %v9727_v42 }
 0x8e3   :  { %9092 = vmatmul.mubr.msk.f32.vlgmr.msra.gmra.mrb[32].mxu1 %vm727_vm8, %v11566_v25 }
 0x8e4   :  { %9094 = vmatprep.mubr.msk.f32.mxu1 %vm727_vm8, %v11573_v26 }
 0x8e7   :  { %9095 = vmatmul.mubr.msk.f32.gmra.mrb[34].mxu1 %vm727_vm8, %v11576_v27 }
 0x8e8   :  { %9097 = vmatprep.mubr.msk.f32.mxu1 %vm727_vm8, %v11583_v28 }
 0x8eb   :  { %9098 = vmatmul.mubr.msk.f32.gmra.mrb[36].mxu1 %vm727_vm8, %v11586_v29 }
 0x8ec   :  { %9100 = vmatprep.mubr.msk.f32.mxu1 %vm727_vm8, %v11593_v30 }
 0x8ef   :  { %9101 = vmatmul.mubr.msk.f32.gmra.mrb[38].mxu1 %vm727_vm8, %v11596_v31 }
 0x8f0   :  { %9103 = vmatprep.mubr.msk.f32.mxu1 %vm727_vm8, %v11603_v32 }
 0x8f3   :  { %9104 = vmatmul.mubr.msk.f32.gmra.mrb[40].mxu1 %vm727_vm8, %v11606_v33 }
 0x8f4   :  { %9106 = vmatprep.mubr.msk.f32.mxu1 %vm727_vm8, %v11613_v34 }
 0x8f7   :  { %9107 = vmatmul.mubr.msk.f32.gmra.mrb[42].mxu1 %vm727_vm8, %v11616_v35 }
 0x8f8   :  { %9109 = vmatprep.mubr.msk.f32.mxu1 %vm727_vm8, %v11623_v36 }
 0x8fb   :  { %9110 = vmatmul.mubr.msk.f32.gmra.mrb[44].mxu1 %vm727_vm8, %v11626_v37 }
 0x8fc   :  { %9112 = vmatprep.mubr.msk.f32.mxu1 %vm727_vm8, %v11633_v38 }
 0x8ff   :  { %9113 = vmatmul.mubr.msk.f32.gmra.mrb[46].mxu1 %vm727_vm8, %v11636_v39 }
 0x900   :  { %9155 = vmatprep.mubr.msk.f32.mxu1 %vm727_vm8, %v11563_v24 }
 0x9b6   :  { %v9093_v25 = vpop.f32.mrb[32].mxu1 }
 0x9b7   :  { %2046 = vrot.lane.b32.xlu0 %v9093_v25, %s11236_s14  ;;  %v1949_v26 = vpop.f32.mrb[33].mxu1 }
 0x9b8   :  { %2044 = vrot.lane.b32.xlu1 %v1949_v26, %s11236_s14 }
 0x9ba   :  { %v9096_v27 = vpop.f32.mrb[34].mxu1 }
 0x9bb   :  { %2050 = vrot.lane.b32.xlu0 %v9096_v27, %s11236_s14  ;;  %v1959_v28 = vpop.f32.mrb[35].mxu1 }
 0x9bc   :  { %2048 = vrot.lane.b32.xlu1 %v1959_v28, %s11236_s14 }
 0x9be   :  { %v9099_v29 = vpop.f32.mrb[36].mxu1 }
 0x9bf   :  { %2054 = vrot.lane.b32.xlu0 %v9099_v29, %s11236_s14  ;;  %v1969_v30 = vpop.f32.mrb[37].mxu1 }
 0x9c0   :  { %2052 = vrot.lane.b32.xlu1 %v1969_v30, %s11236_s14 }
 0x9c2   :  { %v9102_v24 = vpop.f32.mrb[38].mxu1 }
 0x9c3   :  { %2058 = vrot.lane.b32.xlu0 %v9102_v24, %s11236_s14  ;;  %v1979_v31 = vpop.f32.mrb[39].mxu1 }
 0x9c4   :  { %2056 = vrot.lane.b32.xlu1 %v1979_v31, %s11236_s14 }
 0x9c6   :  { %v9105_v32 = vpop.f32.mrb[40].mxu1 }
 0x9c7   :  { %2062 = vrot.lane.b32.xlu0 %v9105_v32, %s11236_s14  ;;  %v1989_v33 = vpop.f32.mrb[41].mxu1 }
 0x9c8   :  { %2060 = vrot.lane.b32.xlu1 %v1989_v33, %s11236_s14 }
 0x9ca   :  { %v9108_v16 = vpop.f32.mrb[42].mxu1 }
 0x9cb   :  { %2066 = vrot.lane.b32.xlu0 %v9108_v16, %s11236_s14  ;;  %v1999_v52 = vpop.f32.mrb[43].mxu1 }
 0x9cc   :  { %2064 = vrot.lane.b32.xlu1 %v1999_v52, %s11236_s14 }
 0x9ce   :  { %v9111_v17 = vpop.f32.mrb[44].mxu1 }
 0x9cf   :  { %2070 = vrot.lane.b32.xlu0 %v9111_v17, %s11236_s14  ;;  %v2009_v2 = vpop.f32.mrb[45].mxu1 }
 0x9d0   :  { %2068 = vrot.lane.b32.xlu1 %v2009_v2, %s11236_s14 }
 0x9d2   :  { %v9114_v46 = vpop.f32.mrb[46].mxu1 }
 0x9d3   :  { %2074 = vrot.lane.b32.xlu0 %v9114_v46, %s11236_s14  ;;  %v2019_v6 = vpop.f32.mrb[47].mxu1 }
 0x9d4   :  { %2072 = vrot.lane.b32.xlu1 %v2019_v6, %s11236_s14 }
 0x9d7   :  { %2190 = vrot.lane.b32.xlu0 %v11760_v45, %s11236_s14 }
 0x9d8   :  { %2188 = vrot.lane.b32.xlu1 %v11763_v22, %s11236_s14 }
 0x9db   :  { %2194 = vrot.lane.b32.xlu0 %v11765_v44, %s11236_s14 }
 0x9dc   :  { %2192 = vrot.lane.b32.xlu1 %v11769_v58, %s11236_s14 }
 0xa29   :  { %v2047_v20 = vpop.permute.xlu0 %2046 }
 0xa2a   :  { %v2093_v18 = vadd.f32 %v2047_v20, %v11704_v0  ;;  %v2045_v57 = vpop.permute.xlu1 %2044 }
 0xa2b   :  { %v2092_v59 = vadd.f32 %v2045_v57, %v11706_v3 }
 0xa2c   :  { %v8015_v12 = vmul.f32 -1.442695, %v2093_v18 }
 0xa2d   :  { %v8014_v61 = vmul.f32 -1.442695, %v2092_v59  ;;  %v2051_v51 = vpop.permute.xlu0 %2050 }
 0xa2e   :  { %10229 = vpow2.f32 %v8015_v12  ;;  %v2095_v45 = vadd.f32 %v2051_v51, %v11710_v9  ;;  %v2049_v14 = vpop.permute.xlu1 %2048 }
 0xa2f   :  { %10231 = vpow2.f32 %v8014_v61  ;;  %v2094_v44 = vadd.f32 %v2049_v14, %v11712_v47 }
 0xa30   :  { %v8017_v22 = vmul.f32 -1.442695, %v2095_v45 }
 0xa31   :  { %v2055_v8 = vpop.permute.xlu0 %2054  ;;  %v8016_v25 = vmul.f32 -1.442695, %v2094_v44 }
 0xa32   :  { %10233 = vpow2.f32 %v8017_v22  ;;  %v2097_v58 = vadd.f32 %v2055_v8, %v11715_v62  ;;  %v2053_v1 = vpop.permute.xlu1 %2052 }
 0xa33   :  { %v2096_v54 = vadd.f32 %v2053_v1, %v11718_v5 }
 0xa34   :  { %v8019_v42 = vmul.f32 -1.442695, %v2097_v58 }
 0xa35   :  { %v8018_v26 = vmul.f32 -1.442695, %v2096_v54  ;;  %v2059_v27 = vpop.permute.xlu0 %2058 }
 0xa36   :  { %10235 = vpow2.f32 %v8019_v42  ;;  %v2099_v28 = vadd.f32 %v2059_v27, %v11722_v13  ;;  %v2057_v29 = vpop.permute.xlu1 %2056 }
 0xa37   :  { %10237 = vpow2.f32 %v8018_v26  ;;  %v2098_v30 = vadd.f32 %v2057_v29, %v11724_v43 }
 0xa38   :  { %v10230_v24 = vpop.eup %10229  ;;  %v8021_v31 = vmul.f32 -1.442695, %v2099_v28  ;;  %10239 = vpow2.f32 %v8016_v25 }
 0xa39   :  { %v10232_v32 = vpop.eup %10231  ;;  %v2145_v33 = vadd.f32 1.0, %v10230_v24  ;;  %v8020_v16 = vmul.f32 -1.442695, %v2098_v30  ;;  %v2063_v52 = vpop.permute.xlu0 %2062 }
 0xa3a   :  { %v2144_v17 = vadd.f32 1.0, %v10232_v32  ;;  %10241 = vpow2.f32 %v8021_v31  ;;  %v2101_v2 = vadd.f32 %v2063_v52, %v11728_v11  ;;  %v2061_v46 = vpop.permute.xlu1 %2060 }
 0xa3b   :  { %v2100_v6 = vadd.f32 %v2061_v46, %v11730_v10  ;;  %10243 = vrcp.f32 %v2145_v33 }
 0xa3c   :  { %v10234_v20 = vpop.eup %10233  ;;  %v8023_v18 = vmul.f32 -1.442695, %v2101_v2  ;;  %10245 = vpow2.f32 %v8020_v16 }
 0xa3d   :  { %v2147_v57 = vadd.f32 1.0, %v10234_v20  ;;  %v8022_v59 = vmul.f32 -1.442695, %v2100_v6  ;;  %v2067_v12 = vpop.permute.xlu0 %2066  ;;  %10247 = vrcp.f32 %v2144_v17 }
 0xa3e   :  { %v2103_v61 = vadd.f32 %v2067_v12, %v11736_v15  ;;  %v2065_v51 = vpop.permute.xlu1 %2064  ;;  %10249 = vpow2.f32 %v8023_v18 }
 0xa3f   :  { %v2102_v45 = vadd.f32 %v2065_v51, %v11738_v56  ;;  %10251 = vrcp.f32 %v2147_v57 }
 0xa40   :  { %v10236_v14 = vpop.eup %10235  ;;  %v8025_v22 = vmul.f32 -1.442695, %v2103_v61  ;;  %10253 = vpow2.f32 %v8022_v59 }
 0xa41   :  { %v10238_v44 = vpop.eup %10237  ;;  %v2149_v8 = vadd.f32 1.0, %v10236_v14  ;;  %v8024_v58 = vmul.f32 -1.442695, %v2102_v45  ;;  %v2071_v1 = vpop.permute.xlu0 %2070 }
 0xa42   :  { %v2148_v54 = vadd.f32 1.0, %v10238_v44  ;;  %10255 = vpow2.f32 %v8025_v22  ;;  %v2105_v42 = vadd.f32 %v2071_v1, %v11744_v60  ;;  %v2069_v25 = vpop.permute.xlu1 %2068  ;;  %v10240_v26 = vpop.eup %10239 }
 0xa43   :  { %10257 = vrcp.f32 %v2149_v8  ;;  %v2104_v28 = vadd.f32 %v2069_v25, %v11746_v50  ;;  %v2146_v16 = vadd.f32 1.0, %v10240_v26 }
 0xa44   :  { %v10242_v27 = vpop.eup %10241  ;;  %10259 = vrcp.f32 %v2148_v54 }
 0xa45   :  { %v2151_v29 = vadd.f32 1.0, %v10242_v27  ;;  %10261 = vpow2.f32 %v8024_v58  ;;  %v2075_v30 = vpop.permute.xlu0 %2074  ;;  %v10244_v24 = vpop.eup %10243 }
 0xa46   :  { %10263 = vtanh.f32 %v2105_v42  ;;  %v2107_v31 = vadd.f32 %v2075_v30, %v11752_v63  ;;  %v2073_v32 = vpop.permute.xlu1 %2072  ;;  %v10246_v33 = vpop.eup %10245 }
 0xa47   :  { %10265 = vrcp.f32 %v2151_v29  ;;  %v10248_v52 = vpop.eup %10247  ;;  %v2150_v17 = vadd.f32 1.0, %v10246_v33  ;;  %v2106_v2 = vadd.f32 %v2073_v32, %v11754_v19 }
 0xa48   :  { %10267 = vtanh.f32 %v2104_v28  ;;  %v10250_v46 = vpop.eup %10249 }
 0xa49   :  { %10269 = vtanh.f32 %v2107_v31  ;;  %v10252_v6 = vpop.eup %10251  ;;  %v2191_v18 = vpop.permute.xlu0 %2190  ;;  %v2153_v22 = vadd.f32 1.0, %v10250_v46 }
 0xa4a   :  { %10271 = vrcp.f32 %v2150_v17  ;;  %v10254_v20 = vpop.eup %10253  ;;  %v2189_v61 = vpop.permute.xlu1 %2188 }
 0xa4b   :  { %10273 = vrcp.f32 %v2146_v16  ;;  %v2152_v42 = vadd.f32 1.0, %v10254_v20 }
 0xa4c   :  { %v10256_v57 = vpop.eup %10255  ;;  %10275 = vtanh.f32 %v2106_v2 }
 0xa4d   :  { %v10258_v59 = vpop.eup %10257  ;;  %v2195_v1 = vpop.permute.xlu0 %2194  ;;  %10277 = vrcp.f32 %v2153_v22  ;;  %v2155_v33 = vadd.f32 1.0, %v10256_v57 }
 0xa4e   :  { %v10260_v12 = vpop.eup %10259  ;;  %v2201_v45 = vmul.f32 %v10258_v59, %v2191_v18  ;;  %v2193_v31 = vpop.permute.xlu1 %2192 }
 0xa4f   :  { %v10262_v51 = vpop.eup %10261  ;;  %v2200_v58 = vmul.f32 %v10260_v12, %v2189_v61 }
 0xa50   :  { %v10264_v14 = vpop.eup %10263  ;;  %v2154_v2 = vadd.f32 1.0, %v10262_v51 }
 0xa51   :  { %v10266_v44 = vpop.eup %10265  ;;  %v2205_v8 = vmul.f32 %v10264_v14, %v10244_v24 }
 0xa52   :  { %v10268_v54 = vpop.eup %10267  ;;  %v2203_v25 = vmul.f32 %v10266_v44, %v2195_v1 }
 0xa53   :  { %v10270_v26 = vpop.eup %10269  ;;  %v11856_v27 = vadd.f32 %v2205_v8, %v2201_v45  ;;  %v2204_v28 = vmul.f32 %v10268_v54, %v10248_v52 }
 0xa54   :  { %v10272_v29 = vpop.eup %10271  ;;  %v2207_v30 = vmul.f32 %v10270_v26, %v10252_v6 }
 0xa55   :  { %v10274_v32 = vpop.eup %10273  ;;  %10279 = vtanh.f32 %v11856_v27  ;;  %v11859_v16 = vadd.f32 %v2204_v28, %v2200_v58  ;;  %v2202_v24 = vmul.f32 %v10272_v29, %v2193_v31 }
 0xa56   :  { %v10276_v17 = vpop.eup %10275  ;;  %10281 = vrcp.f32 %v2152_v42  ;;  %v11861_v46 = vadd.f32 %v2207_v30, %v2203_v25 }
 0xa57   :  { %10283 = vtanh.f32 %v11859_v16  ;;  %v2206_v20 = vmul.f32 %v10276_v17, %v10274_v32  ;;  %v10278_v6 = vpop.eup %10277  ;;  %v11883_v32 = vld [vmem:[%s11330_s20 + $0x8] sm:$0xff]  ;;  %v11898_v17 = vld [vmem:[%s11330_s20 + $0x20] sm:$0xff] }
 0xa58   :  { %10285 = vtanh.f32 %v11861_v46 }
 0xa59   :  { %10287 = vrcp.f32 %v2155_v33  ;;  %v11865_v52 = vadd.f32 %v2206_v20, %v2202_v24  ;;  %v11888_v33 = vld [vmem:[%s11330_s20 + $0x10] sm:$0xff]  ;;  %v11893_v24 = vld [vmem:[%s11330_s20 + $0x18] sm:$0xff] }
 0xa5a   :  { %10289 = vrcp.f32 %v2154_v2  ;;  %v11903_v2 = vld [vmem:[%s11330_s20 + $0x28] sm:$0xff]  ;;  %v11908_v20 = vld [vmem:[%s11330_s20 + $0x30] sm:$0xff] }
 0xa5b   :  { %10291 = vtanh.f32 %v11865_v52 }
 0xa5f   :  { %v10280_v18 = vpop.eup %10279 }
 0xa60   :  { %v10282_v57 = vpop.eup %10281  ;;  %v11868_v59 = vmul.f32 %v10280_v18, %v10278_v6  ;;  %v11913_v6 = vld [vmem:[%s11330_s20 + $0x38] sm:$0xff]  ;;  %v11918_v18 = vld [vmem:[%s11330_s20 + $0x40] sm:$0xff] }
 0xa61   :  { %v10284_v12 = vpop.eup %10283 }
 0xa62   :  { %v10286_v61 = vpop.eup %10285  ;;  %v11870_v51 = vmul.f32 %v10284_v12, %v10282_v57  ;;  %v11923_v57 = vld [vmem:[%s11330_s20 + $0x48] sm:$0xff]  ;;  %v11940_v12 = vld [vmem:[%s11330_s20] sm:$0xff] }
 0xa63   :  { %v10288_v45 = vpop.eup %10287 }
 0xa64   :  { %v10290_v14 = vpop.eup %10289  ;;  %v10007_v22 = vpack.i.bf16 %v11868_v59, %v11870_v51  ;;  %v11874_v44 = vmul.f32 %v10288_v45, %v10286_v61 }
 0xa65   :  { %v10292_v8 = vpop.eup %10291 }
 0xa66   :  { %10008 = vrot.lane.b32.xlu1 %v10007_v22, %s11229_s5  ;;  %v11877_v58 = vmul.f32 %v10292_v8, %v10290_v14 }
 0xa68   :  { %v10012_v1 = vpack.i.bf16 %v11874_v44, %v11877_v58 }
 0xa6a   :  { %10013 = vrot.lane.b32.xlu0 %v10012_v1, %s11229_s5 }
 0xad8   :  { %v10009_v54 = vpop.permute.xlu1 %10008 }
 0xad9   :  { %v10011_v42 = vunpack.i.h.bf16 %v10009_v54  ;;  %v10010_v25 = vunpack.i.l.bf16 %v10009_v54 }
 0xadb   :  { %v9731_v26 = vpack.c.bf16 %v10011_v42, %v10010_v25 }
 0xadc   :  { %v10014_v28 = vpop.permute.xlu0 %10013 }
 0xadd   :  { %v10016_v29 = vunpack.i.h.bf16 %v10014_v28  ;;  %v10015_v30 = vunpack.i.l.bf16 %v10014_v28  ;;  %9732 = vmatprep.subr.bf16.mxu0 %v9731_v26 }
 0xade   :  { %9734 = vmatpush3.bf16.msra.mxu0 %v9731_v26 }
 0xadf   :  { %v9735_v31 = vpack.c.bf16 %v10016_v29, %v10015_v30 }
 0xae1   :  { %9736 = vmatprep.subr.bf16.mxu0 %v9735_v31 }
 0xae2   :  { %9738 = vmatpush3.bf16.msra.mxu0 %v9735_v31 }
 0xae5   :  { %9124 = vmatmul.mubr.msk.f32.vlgmr.msra.gmra.mrb[26].mxu0 %vm727_vm8, %v11883_v32 }
 0xae6   :  { %9126 = vmatprep.mubr.msk.f32.mxu0 %vm727_vm8, %v11888_v33 }
 0xae9   :  { %9127 = vmatmul.mubr.msk.f32.gmra.mrb[28].mxu0 %vm727_vm8, %v11893_v24 }
 0xaea   :  { %9129 = vmatprep.mubr.msk.f32.mxu0 %vm727_vm8, %v11898_v17 }
 0xaed   :  { %9130 = vmatmul.mubr.msk.f32.gmra.mrb[30].mxu0 %vm727_vm8, %v11903_v2 }
 0xaee   :  { %9132 = vmatprep.mubr.msk.f32.mxu0 %vm727_vm8, %v11908_v20 }
 0xaf1   :  { %9133 = vmatmul.mubr.msk.f32.gmra.mrb[32].mxu0 %vm727_vm8, %v11913_v6 }
 0xaf2   :  { %9135 = vmatprep.mubr.msk.f32.mxu0 %vm727_vm8, %v11918_v18 }
 0xaf5   :  { %9136 = vmatmul.mubr.msk.f32.gmra.mrb[34].mxu0 %vm727_vm8, %v11923_v57 }
 0xaf6   :  { %9138 = vmatprep.mubr.msk.f32.mxu0 %vm727_vm8, %v11613_v34 }
 0xaf9   :  { %9139 = vmatmul.mubr.msk.f32.gmra.mrb[36].mxu0 %vm727_vm8, %v11616_v35 }
 0xafa   :  { %9141 = vmatprep.mubr.msk.f32.mxu0 %vm727_vm8, %v11623_v36 }
 0xafd   :  { %9142 = vmatmul.mubr.msk.f32.gmra.mrb[38].mxu0 %vm727_vm8, %v11626_v37 }
 0xafe   :  { %9144 = vmatprep.mubr.msk.f32.mxu0 %vm727_vm8, %v11633_v38 }
 0xb01   :  { %9145 = vmatmul.mubr.msk.f32.gmra.mrb[40].mxu0 %vm727_vm8, %v11636_v39 }
 0xb02   :  { %9187 = vmatprep.mubr.msk.f32.mxu0 %vm727_vm8, %v11940_v12 }
 0xbb8   :  { %v9125_v34 = vpop.f32.mrb[26].mxu0 }
 0xbb9   :  { %2399 = vrot.lane.b32.xlu0 %v9125_v34, %s11237_s19  ;;  %v2302_v35 = vpop.f32.mrb[27].mxu0 }
 0xbba   :  { %2397 = vrot.lane.b32.xlu1 %v2302_v35, %s11237_s19 }
 0xbbc   :  { %v9128_v36 = vpop.f32.mrb[28].mxu0 }
 0xbbd   :  { %2403 = vrot.lane.b32.xlu0 %v9128_v36, %s11237_s19  ;;  %v2312_v37 = vpop.f32.mrb[29].mxu0 }
 0xbbe   :  { %2401 = vrot.lane.b32.xlu1 %v2312_v37, %s11237_s19 }
 0xbc0   :  { %v9131_v38 = vpop.f32.mrb[30].mxu0 }
 0xbc1   :  { %2407 = vrot.lane.b32.xlu0 %v9131_v38, %s11237_s19  ;;  %v2322_v39 = vpop.f32.mrb[31].mxu0 }
 0xbc2   :  { %2405 = vrot.lane.b32.xlu1 %v2322_v39, %s11237_s19 }
 0xbc4   :  { %v9134_v61 = vpop.f32.mrb[32].mxu0 }
 0xbc5   :  { %2411 = vrot.lane.b32.xlu0 %v9134_v61, %s11237_s19  ;;  %v2332_v45 = vpop.f32.mrb[33].mxu0 }
 0xbc6   :  { %2409 = vrot.lane.b32.xlu1 %v2332_v45, %s11237_s19 }
 0xbc8   :  { %v9137_v14 = vpop.f32.mrb[34].mxu0 }
 0xbc9   :  { %2415 = vrot.lane.b32.xlu0 %v9137_v14, %s11237_s19  ;;  %v2342_v22 = vpop.f32.mrb[35].mxu0 }
 0xbca   :  { %2413 = vrot.lane.b32.xlu1 %v2342_v22, %s11237_s19 }
 0xbcc   :  { %v9140_v8 = vpop.f32.mrb[36].mxu0 }
 0xbcd   :  { %2419 = vrot.lane.b32.xlu0 %v9140_v8, %s11237_s19  ;;  %v2352_v1 = vpop.f32.mrb[37].mxu0 }
 0xbce   :  { %2417 = vrot.lane.b32.xlu1 %v2352_v1, %s11237_s19 }
 0xbd0   :  { %v9143_v54 = vpop.f32.mrb[38].mxu0 }
 0xbd1   :  { %2423 = vrot.lane.b32.xlu0 %v9143_v54, %s11237_s19  ;;  %v2362_v42 = vpop.f32.mrb[39].mxu0 }
 0xbd2   :  { %2421 = vrot.lane.b32.xlu1 %v2362_v42, %s11237_s19 }
 0xbd4   :  { %v9146_v25 = vpop.f32.mrb[40].mxu0 }
 0xbd5   :  { %2427 = vrot.lane.b32.xlu0 %v9146_v25, %s11237_s19  ;;  %v2372_v26 = vpop.f32.mrb[41].mxu0 }
 0xbd6   :  { %2425 = vrot.lane.b32.xlu1 %v2372_v26, %s11237_s19 }
 0xbd9   :  { %2543 = vrot.lane.b32.xlu0 %v11856_v27, %s11236_s14 }
 0xbda   :  { %2541 = vrot.lane.b32.xlu1 %v11859_v16, %s11236_s14 }
 0xbdd   :  { %2547 = vrot.lane.b32.xlu0 %v11861_v46, %s11236_s14 }
 0xbde   :  { %2545 = vrot.lane.b32.xlu1 %v11865_v52, %s11236_s14 }
 0xc2b   :  { %v2400_v28 = vpop.permute.xlu0 %2399 }
 0xc2c   :  { %v2446_v29 = vadd.f32 %v2400_v28, %v11704_v0  ;;  %v2398_v30 = vpop.permute.xlu1 %2397 }
 0xc2d   :  { %v2445_v31 = vadd.f32 %v2398_v30, %v11706_v3 }
 0xc2e   :  { %v8043_v34 = vmul.f32 -1.442695, %v2446_v29 }
 0xc2f   :  { %v8042_v35 = vmul.f32 -1.442695, %v2445_v31  ;;  %v2404_v36 = vpop.permute.xlu0 %2403 }
 0xc30   :  { %10293 = vpow2.f32 %v8043_v34  ;;  %v2448_v27 = vadd.f32 %v2404_v36, %v11710_v9  ;;  %v2402_v37 = vpop.permute.xlu1 %2401 }
 0xc31   :  { %10295 = vpow2.f32 %v8042_v35  ;;  %v2447_v46 = vadd.f32 %v2402_v37, %v11712_v47 }
 0xc32   :  { %v8045_v16 = vmul.f32 -1.442695, %v2448_v27 }
 0xc33   :  { %v2408_v38 = vpop.permute.xlu0 %2407  ;;  %v8044_v14 = vmul.f32 -1.442695, %v2447_v46 }
 0xc34   :  { %10297 = vpow2.f32 %v8045_v16  ;;  %v2450_v52 = vadd.f32 %v2408_v38, %v11715_v62  ;;  %v2406_v39 = vpop.permute.xlu1 %2405 }
 0xc35   :  { %v2449_v61 = vadd.f32 %v2406_v39, %v11718_v5 }
 0xc36   :  { %v8047_v45 = vmul.f32 -1.442695, %v2450_v52 }
 0xc37   :  { %v8046_v22 = vmul.f32 -1.442695, %v2449_v61  ;;  %v2412_v8 = vpop.permute.xlu0 %2411 }
 0xc38   :  { %10299 = vpow2.f32 %v8047_v45  ;;  %v2452_v1 = vadd.f32 %v2412_v8, %v11722_v13  ;;  %v2410_v54 = vpop.permute.xlu1 %2409 }
 0xc39   :  { %10301 = vpow2.f32 %v8046_v22  ;;  %v2451_v42 = vadd.f32 %v2410_v54, %v11724_v43 }
 0xc3a   :  { %v10294_v25 = vpop.eup %10293  ;;  %v8049_v26 = vmul.f32 -1.442695, %v2452_v1  ;;  %10303 = vpow2.f32 %v8044_v14 }
 0xc3b   :  { %v10296_v28 = vpop.eup %10295  ;;  %v2498_v29 = vadd.f32 1.0, %v10294_v25  ;;  %v8048_v30 = vmul.f32 -1.442695, %v2451_v42  ;;  %v2416_v31 = vpop.permute.xlu0 %2415 }
 0xc3c   :  { %v2497_v34 = vadd.f32 1.0, %v10296_v28  ;;  %10305 = vpow2.f32 %v8049_v26  ;;  %v2454_v35 = vadd.f32 %v2416_v31, %v11728_v11  ;;  %v2414_v36 = vpop.permute.xlu1 %2413 }
 0xc3d   :  { %v2453_v27 = vadd.f32 %v2414_v36, %v11730_v10  ;;  %10307 = vrcp.f32 %v2498_v29 }
 0xc3e   :  { %v10298_v37 = vpop.eup %10297  ;;  %v8051_v16 = vmul.f32 -1.442695, %v2454_v35  ;;  %10309 = vpow2.f32 %v8048_v30 }
 0xc3f   :  { %v2500_v46 = vadd.f32 1.0, %v10298_v37  ;;  %v8050_v38 = vmul.f32 -1.442695, %v2453_v27  ;;  %v2420_v52 = vpop.permute.xlu0 %2419  ;;  %10311 = vrcp.f32 %v2497_v34 }
 0xc40   :  { %v2456_v39 = vadd.f32 %v2420_v52, %v11736_v15  ;;  %v2418_v61 = vpop.permute.xlu1 %2417  ;;  %10313 = vpow2.f32 %v8051_v16 }
 0xc41   :  { %v2455_v45 = vadd.f32 %v2418_v61, %v11738_v56  ;;  %10315 = vrcp.f32 %v2500_v46 }
 0xc42   :  { %v10300_v14 = vpop.eup %10299  ;;  %v8053_v22 = vmul.f32 -1.442695, %v2456_v39  ;;  %10317 = vpow2.f32 %v8050_v38 }
 0xc43   :  { %v10302_v8 = vpop.eup %10301  ;;  %v2502_v1 = vadd.f32 1.0, %v10300_v14  ;;  %v8052_v54 = vmul.f32 -1.442695, %v2455_v45  ;;  %v2424_v42 = vpop.permute.xlu0 %2423 }
 0xc44   :  { %v2501_v25 = vadd.f32 1.0, %v10302_v8  ;;  %10319 = vpow2.f32 %v8053_v22  ;;  %v2458_v26 = vadd.f32 %v2424_v42, %v11744_v60  ;;  %v2422_v28 = vpop.permute.xlu1 %2421  ;;  %v10304_v29 = vpop.eup %10303 }
 0xc45   :  { %10321 = vrcp.f32 %v2502_v1  ;;  %v2457_v31 = vadd.f32 %v2422_v28, %v11746_v50  ;;  %v2499_v46 = vadd.f32 1.0, %v10304_v29 }
 0xc46   :  { %v10306_v30 = vpop.eup %10305  ;;  %10323 = vrcp.f32 %v2501_v25 }
 0xc47   :  { %v2504_v34 = vadd.f32 1.0, %v10306_v30  ;;  %10325 = vpow2.f32 %v8052_v54  ;;  %v2428_v35 = vpop.permute.xlu0 %2427  ;;  %v10308_v36 = vpop.eup %10307 }
 0xc48   :  { %10327 = vtanh.f32 %v2458_v26  ;;  %v2460_v27 = vadd.f32 %v2428_v35, %v11752_v63  ;;  %v2426_v37 = vpop.permute.xlu1 %2425  ;;  %v10310_v16 = vpop.eup %10309 }
 0xc49   :  { %10329 = vrcp.f32 %v2504_v34  ;;  %v10312_v38 = vpop.eup %10311  ;;  %v2503_v52 = vadd.f32 1.0, %v10310_v16  ;;  %v2459_v39 = vadd.f32 %v2426_v37, %v11754_v19 }
 0xc4a   :  { %10331 = vtanh.f32 %v2457_v31  ;;  %v10314_v61 = vpop.eup %10313 }
 0xc4b   :  { %10333 = vtanh.f32 %v2460_v27  ;;  %v10316_v45 = vpop.eup %10315  ;;  %v2544_v22 = vpop.permute.xlu0 %2543  ;;  %v2506_v26 = vadd.f32 1.0, %v10314_v61 }
 0xc4c   :  { %10335 = vrcp.f32 %v2503_v52  ;;  %v10318_v14 = vpop.eup %10317  ;;  %v2542_v42 = vpop.permute.xlu1 %2541 }
 0xc4d   :  { %10337 = vrcp.f32 %v2499_v46  ;;  %v2505_v30 = vadd.f32 1.0, %v10318_v14 }
 0xc4e   :  { %v10320_v8 = vpop.eup %10319  ;;  %10339 = vtanh.f32 %v2459_v39 }
 0xc4f   :  { %v10322_v1 = vpop.eup %10321  ;;  %v2548_v37 = vpop.permute.xlu0 %2547  ;;  %v2508_v16 = vadd.f32 1.0, %v10320_v8  ;;  %10341 = vrcp.f32 %v2506_v26 }
 0xc50   :  { %v10324_v54 = vpop.eup %10323  ;;  %v2554_v28 = vmul.f32 %v10322_v1, %v2544_v22  ;;  %10343 = vrcp.f32 %v2505_v30  ;;  %v2546_v41 = vpop.permute.xlu1 %2545  ;;  %v3986_v30 = vsel %vm3985_vm10, %v11774_v40, %v11870_v51  ;;  %v3988_v40 = vsel %vm3985_vm10, %v11780_v7, %v11877_v58  ;;  %v12041_v7 = vld [vmem:[%s11330_s20 + $0x50] sm:$0xff]  ;;  %v12046_v58 = vld [vmem:[%s11330_s20 + $0x58] sm:$0xff] }
 0xc51   :  { %v10326_v25 = vpop.eup %10325  ;;  %v2553_v35 = vmul.f32 %v10324_v54, %v2542_v42 }
 0xc52   :  { %v10328_v29 = vpop.eup %10327  ;;  %v2507_v1 = vadd.f32 1.0, %v10326_v25 }
 0xc53   :  { %v10330_v31 = vpop.eup %10329  ;;  %v2558_v34 = vmul.f32 %v10328_v29, %v10308_v36 }
 0xc54   :  { %v10332_v27 = vpop.eup %10331  ;;  %v2556_v52 = vmul.f32 %v10330_v31, %v2548_v37 }
 0xc55   :  { %v10334_v49 = vpop.eup %10333  ;;  %v11984_v46 = vadd.f32 %v2558_v34, %v2554_v28  ;;  %v2557_v39 = vmul.f32 %v10332_v27, %v10312_v38 }
 0xc56   :  { %v10336_v48 = vpop.eup %10335  ;;  %v2560_v55 = vmul.f32 %v10334_v49, %v10316_v45 }
 0xc57   :  { %v10338_v61 = vpop.eup %10337  ;;  %10345 = vtanh.f32 %v11984_v46  ;;  %v11987_v14 = vadd.f32 %v2557_v39, %v2553_v35  ;;  %v2555_v36 = vmul.f32 %v10336_v48, %v2546_v41  ;;  %v3989_v35 = vsel %vm3985_vm10, %v11778_v53, %v11874_v44 }
 0xc58   :  { %v10340_v22 = vpop.eup %10339  ;;  %10347 = vrcp.f32 %v2508_v16  ;;  %v11989_v8 = vadd.f32 %v2560_v55, %v2556_v52  ;;  %v3987_v55 = vsel %vm3985_vm10, %v11772_v4, %v11868_v59 }
 0xc59   :  { %10349 = vtanh.f32 %v11987_v14  ;;  %v2559_v54 = vmul.f32 %v10340_v22, %v10338_v61  ;;  %v10342_v49 = vpop.eup %10341 }
 0xc5a   :  { %10351 = vtanh.f32 %v11989_v8  ;;  %v10344_v45 = vpop.eup %10343 }
 0xc5b   :  { %v11993_v38 = vadd.f32 %v2559_v54, %v2555_v36  ;;  %10353 = vrcp.f32 %v2507_v1 }
 0xc5d   :  { %10355 = vtanh.f32 %v11993_v38 }
 0xc61   :  { %v10346_v42 = vpop.eup %10345 }
 0xc62   :  { %v10348_v48 = vpop.eup %10347  ;;  %v2570_v41 = vmul.f32 %v10346_v42, %v10342_v49  ;;  %v12051_v49 = vld [vmem:[%s11330_s20 + $0x60] sm:$0xff]  ;;  %v12061_v42 = vld [vmem:[%s11330_s20 + $0x70] sm:$0xff] }
 0xc63   :  { %v10350_v25 = vpop.eup %10349 }
 0xc64   :  { %v10352_v26 = vpop.eup %10351  ;;  %v2569_v28 = vmul.f32 %v10350_v25, %v10344_v45  ;;  %v12000_v29 = vsel %vm3990_vm11, %v3987_v55, %v2570_v41  ;;  %v12056_v45 = vld [vmem:[%s11330_s20 + $0x68] sm:$0xff] }
 0xc65   :  { %v2572_v31 = vmul.f32 %v10352_v26, %v10348_v48  ;;  %v10354_v34 = vpop.eup %10353  ;;  %v12066_v48 = vld [vmem:[%s11330_s20 + $0x78] sm:$0xff] }
 0xc66   :  { %v10017_v37 = vpack.i.bf16 %v2570_v41, %v2569_v28  ;;  %v12009_v27 = vsel %vm3990_vm11, %v3986_v30, %v2569_v28 }
 0xc67   :  { %v10356_v4 = vpop.eup %10355  ;;  %v12012_v59 = vsel %vm3990_vm11, %v3989_v35, %v2572_v31 }
 0xc68   :  { %10018 = vrot.lane.b32.xlu1 %v10017_v37, %s11238_s24  ;;  %v2571_v16 = vmul.f32 %v10356_v4, %v10354_v34 }
 0xc6a   :  { %v10022_v51 = vpack.i.bf16 %v2572_v31, %v2571_v16  ;;  %v12019_v52 = vsel %vm3990_vm11, %v3988_v40, %v2571_v16 }
 0xc6c   :  { %10023 = vrot.lane.b32.xlu0 %v10022_v51, %s11238_s24 }
 0xcda   :  { %v10019_v53 = vpop.permute.xlu1 %10018 }
 0xcdb   :  { %v10021_v44 = vunpack.i.h.bf16 %v10019_v53  ;;  %v10020_v39 = vunpack.i.l.bf16 %v10019_v53 }
 0xcdd   :  { %v9739_v61 = vpack.c.bf16 %v10021_v44, %v10020_v39 }
 0xcde   :  { %v10024_v36 = vpop.permute.xlu0 %10023 }
 0xcdf   :  { %v10026_v22 = vunpack.i.h.bf16 %v10024_v36  ;;  %v10025_v1 = vunpack.i.l.bf16 %v10024_v36  ;;  %9740 = vmatprep.subr.bf16.mxu1 %v9739_v61 }
 0xce0   :  { %9742 = vmatpush3.bf16.msra.mxu1 %v9739_v61 }
 0xce1   :  { %v9743_v54 = vpack.c.bf16 %v10026_v22, %v10025_v1 }
 0xce3   :  { %9744 = vmatprep.subr.bf16.mxu1 %v9743_v54 }
 0xce4   :  { %9746 = vmatpush3.bf16.msra.mxu1 %v9743_v54 }
 0xce7   :  { %9156 = vmatmul.mubr.msk.f32.vlgmr.msra.gmra.mrb[48].mxu1 %vm727_vm8, %v11883_v32 }
 0xce8   :  { %9158 = vmatprep.mubr.msk.f32.mxu1 %vm727_vm8, %v11888_v33 }
 0xceb   :  { %9159 = vmatmul.mubr.msk.f32.gmra.mrb[50].mxu1 %vm727_vm8, %v11893_v24 }
 0xcec   :  { %9161 = vmatprep.mubr.msk.f32.mxu1 %vm727_vm8, %v11898_v17 }
 0xcef   :  { %9162 = vmatmul.mubr.msk.f32.gmra.mrb[52].mxu1 %vm727_vm8, %v11903_v2 }
 0xcf0   :  { %9164 = vmatprep.mubr.msk.f32.mxu1 %vm727_vm8, %v11908_v20 }
 0xcf3   :  { %9165 = vmatmul.mubr.msk.f32.gmra.mrb[54].mxu1 %vm727_vm8, %v11913_v6 }
 0xcf4   :  { %9167 = vmatprep.mubr.msk.f32.mxu1 %vm727_vm8, %v11918_v18 }
 0xcf7   :  { %9168 = vmatmul.mubr.msk.f32.gmra.mrb[56].mxu1 %vm727_vm8, %v11923_v57 }
 0xcf8   :  { %9170 = vmatprep.mubr.msk.f32.mxu1 %vm727_vm8, %v12041_v7 }
 0xcfb   :  { %9171 = vmatmul.mubr.msk.f32.gmra.mrb[58].mxu1 %vm727_vm8, %v12046_v58 }
 0xcfc   :  { %9173 = vmatprep.mubr.msk.f32.mxu1 %vm727_vm8, %v12051_v49 }
 0xcff   :  { %9174 = vmatmul.mubr.msk.f32.gmra.mrb[60].mxu1 %vm727_vm8, %v12056_v45 }
 0xd00   :  { %9176 = vmatprep.mubr.msk.f32.mxu1 %vm727_vm8, %v12061_v42 }
 0xd03   :  { %9177 = vmatmul.mubr.msk.f32.gmra.mrb[62].mxu1 %vm727_vm8, %v12066_v48 }
 0xd04   :  { %9219 = vmatprep.mubr.msk.f32.mxu1 %vm727_vm8, %v11940_v12 }
 0xdba   :  { %v9157_v41 = vpop.f32.mrb[48].mxu1 }
 0xdbb   :  { %2752 = vrot.lane.b32.xlu0 %v9157_v41, %s11239_s30  ;;  %v2655_v25 = vpop.f32.mrb[49].mxu1 }
 0xdbc   :  { %2750 = vrot.lane.b32.xlu1 %v2655_v25, %s11239_s30 }
 0xdbe   :  { %v9160_v55 = vpop.f32.mrb[50].mxu1 }
 0xdbf   :  { %2756 = vrot.lane.b32.xlu0 %v9160_v55, %s11239_s30  ;;  %v2665_v26 = vpop.f32.mrb[51].mxu1 }
 0xdc0   :  { %2754 = vrot.lane.b32.xlu1 %v2665_v26, %s11239_s30 }
 0xdc2   :  { %v9163_v28 = vpop.f32.mrb[52].mxu1 }
 0xdc3   :  { %2760 = vrot.lane.b32.xlu0 %v9163_v28, %s11239_s30  ;;  %v2675_v30 = vpop.f32.mrb[53].mxu1 }
 0xdc4   :  { %2758 = vrot.lane.b32.xlu1 %v2675_v30, %s11239_s30 }
 0xdc6   :  { %v9166_v31 = vpop.f32.mrb[54].mxu1 }
 0xdc7   :  { %2764 = vrot.lane.b32.xlu0 %v9166_v31, %s11239_s30  ;;  %v2685_v34 = vpop.f32.mrb[55].mxu1 }
 0xdc8   :  { %2762 = vrot.lane.b32.xlu1 %v2685_v34, %s11239_s30 }
 0xdca   :  { %v9169_v35 = vpop.f32.mrb[56].mxu1 }
 0xdcb   :  { %2768 = vrot.lane.b32.xlu0 %v9169_v35, %s11239_s30  ;;  %v2695_v37 = vpop.f32.mrb[57].mxu1 }
 0xdcc   :  { %2766 = vrot.lane.b32.xlu1 %v2695_v37, %s11239_s30 }
 0xdce   :  { %v9172_v4 = vpop.f32.mrb[58].mxu1 }
 0xdcf   :  { %2772 = vrot.lane.b32.xlu0 %v9172_v4, %s11239_s30  ;;  %v2705_v16 = vpop.f32.mrb[59].mxu1 }
 0xdd0   :  { %2770 = vrot.lane.b32.xlu1 %v2705_v16, %s11239_s30 }
 0xdd2   :  { %v9175_v40 = vpop.f32.mrb[60].mxu1 }
 0xdd3   :  { %2776 = vrot.lane.b32.xlu0 %v9175_v40, %s11239_s30  ;;  %v2715_v51 = vpop.f32.mrb[61].mxu1 }
 0xdd4   :  { %2774 = vrot.lane.b32.xlu1 %v2715_v51, %s11239_s30 }
 0xdd6   :  { %v9178_v53 = vpop.f32.mrb[62].mxu1 }
 0xdd7   :  { %2780 = vrot.lane.b32.xlu0 %v9178_v53, %s11239_s30  ;;  %v2725_v44 = vpop.f32.mrb[63].mxu1 }
 0xdd8   :  { %2778 = vrot.lane.b32.xlu1 %v2725_v44, %s11239_s30 }
 0xddb   :  { %2896 = vrot.lane.b32.xlu0 %v11984_v46, %s11236_s14 }
 0xddc   :  { %2894 = vrot.lane.b32.xlu1 %v11987_v14, %s11236_s14 }
 0xddf   :  { %2900 = vrot.lane.b32.xlu0 %v11989_v8, %s11236_s14 }
 0xde0   :  { %2898 = vrot.lane.b32.xlu1 %v11993_v38, %s11236_s14 }
 0xe2d   :  { %v2753_v39 = vpop.permute.xlu0 %2752 }
 0xe2e   :  { %v2799_v61 = vadd.f32 %v2753_v39, %v11704_v0  ;;  %v2751_v36 = vpop.permute.xlu1 %2750 }
 0xe2f   :  { %v2798_v22 = vadd.f32 %v2751_v36, %v11706_v3 }
 0xe30   :  { %v8071_v1 = vmul.f32 -1.442695, %v2799_v61 }
 0xe31   :  { %v8070_v54 = vmul.f32 -1.442695, %v2798_v22  ;;  %v2757_v41 = vpop.permute.xlu0 %2756 }
 0xe32   :  { %10357 = vpow2.f32 %v8071_v1  ;;  %v2801_v46 = vadd.f32 %v2757_v41, %v11710_v9  ;;  %v2755_v25 = vpop.permute.xlu1 %2754 }
 0xe33   :  { %10359 = vpow2.f32 %v8070_v54  ;;  %v2800_v8 = vadd.f32 %v2755_v25, %v11712_v47 }
 0xe34   :  { %v8073_v14 = vmul.f32 -1.442695, %v2801_v46 }
 0xe35   :  { %v2761_v55 = vpop.permute.xlu0 %2760  ;;  %v8072_v31 = vmul.f32 -1.442695, %v2800_v8 }
 0xe36   :  { %10361 = vpow2.f32 %v8073_v14  ;;  %v2803_v38 = vadd.f32 %v2761_v55, %v11715_v62  ;;  %v2759_v26 = vpop.permute.xlu1 %2758 }
 0xe37   :  { %v2802_v28 = vadd.f32 %v2759_v26, %v11718_v5 }
 0xe38   :  { %v8075_v30 = vmul.f32 -1.442695, %v2803_v38 }
 0xe39   :  { %v8074_v34 = vmul.f32 -1.442695, %v2802_v28  ;;  %v2765_v35 = vpop.permute.xlu0 %2764 }
 0xe3a   :  { %10363 = vpow2.f32 %v8075_v30  ;;  %v2805_v37 = vadd.f32 %v2765_v35, %v11722_v13  ;;  %v2763_v4 = vpop.permute.xlu1 %2762 }
 0xe3b   :  { %10365 = vpow2.f32 %v8074_v34  ;;  %v2804_v16 = vadd.f32 %v2763_v4, %v11724_v43 }
 0xe3c   :  { %v10358_v40 = vpop.eup %10357  ;;  %v8077_v51 = vmul.f32 -1.442695, %v2805_v37  ;;  %10367 = vpow2.f32 %v8072_v31 }
 0xe3d   :  { %v10360_v53 = vpop.eup %10359  ;;  %v2851_v44 = vadd.f32 1.0, %v10358_v40  ;;  %v8076_v39 = vmul.f32 -1.442695, %v2804_v16  ;;  %v2769_v61 = vpop.permute.xlu0 %2768 }
 0xe3e   :  { %v2850_v36 = vadd.f32 1.0, %v10360_v53  ;;  %10369 = vpow2.f32 %v8077_v51  ;;  %v2807_v22 = vadd.f32 %v2769_v61, %v11728_v11  ;;  %v2767_v1 = vpop.permute.xlu1 %2766 }
 0xe3f   :  { %v2806_v54 = vadd.f32 %v2767_v1, %v11730_v10  ;;  %10371 = vrcp.f32 %v2851_v44 }
 0xe40   :  { %v10362_v41 = vpop.eup %10361  ;;  %v8079_v46 = vmul.f32 -1.442695, %v2807_v22  ;;  %10373 = vpow2.f32 %v8076_v39 }
 0xe41   :  { %v2853_v25 = vadd.f32 1.0, %v10362_v41  ;;  %v8078_v14 = vmul.f32 -1.442695, %v2806_v54  ;;  %v2773_v8 = vpop.permute.xlu0 %2772  ;;  %10375 = vrcp.f32 %v2850_v36 }
 0xe42   :  { %v2809_v55 = vadd.f32 %v2773_v8, %v11736_v15  ;;  %v2771_v38 = vpop.permute.xlu1 %2770  ;;  %10377 = vpow2.f32 %v8079_v46 }
 0xe43   :  { %v2808_v26 = vadd.f32 %v2771_v38, %v11738_v56  ;;  %10379 = vrcp.f32 %v2853_v25 }
 0xe44   :  { %v10364_v28 = vpop.eup %10363  ;;  %v8081_v30 = vmul.f32 -1.442695, %v2809_v55  ;;  %10381 = vpow2.f32 %v8078_v14 }
 0xe45   :  { %v10366_v31 = vpop.eup %10365  ;;  %v2855_v34 = vadd.f32 1.0, %v10364_v28  ;;  %v8080_v35 = vmul.f32 -1.442695, %v2808_v26  ;;  %v2777_v37 = vpop.permute.xlu0 %2776 }
 0xe46   :  { %v2854_v4 = vadd.f32 1.0, %v10366_v31  ;;  %10383 = vpow2.f32 %v8081_v30  ;;  %v2811_v16 = vadd.f32 %v2777_v37, %v11744_v60  ;;  %v2775_v40 = vpop.permute.xlu1 %2774  ;;  %v10368_v51 = vpop.eup %10367 }
 0xe47   :  { %10385 = vrcp.f32 %v2855_v34  ;;  %v2810_v44 = vadd.f32 %v2775_v40, %v11746_v50  ;;  %v2852_v41 = vadd.f32 1.0, %v10368_v51 }
 0xe48   :  { %v10370_v53 = vpop.eup %10369  ;;  %10387 = vrcp.f32 %v2854_v4 }
 0xe49   :  { %v2857_v39 = vadd.f32 1.0, %v10370_v53  ;;  %10389 = vpow2.f32 %v8080_v35  ;;  %v2781_v61 = vpop.permute.xlu0 %2780  ;;  %v10372_v36 = vpop.eup %10371 }
 0xe4a   :  { %10391 = vtanh.f32 %v2811_v16  ;;  %v2813_v22 = vadd.f32 %v2781_v61, %v11752_v63  ;;  %v2779_v1 = vpop.permute.xlu1 %2778  ;;  %v10374_v54 = vpop.eup %10373 }
 0xe4b   :  { %10393 = vrcp.f32 %v2857_v39  ;;  %v10376_v46 = vpop.eup %10375  ;;  %v2856_v25 = vadd.f32 1.0, %v10374_v54  ;;  %v2812_v14 = vadd.f32 %v2779_v1, %v11754_v19 }
 0xe4c   :  { %10395 = vtanh.f32 %v2810_v44  ;;  %v10378_v8 = vpop.eup %10377 }
 0xe4d   :  { %10397 = vtanh.f32 %v2813_v22  ;;  %v10380_v55 = vpop.eup %10379  ;;  %v2897_v26 = vpop.permute.xlu0 %2896  ;;  %v2859_v37 = vadd.f32 1.0, %v10378_v8 }
 0xe4e   :  { %10399 = vrcp.f32 %v2856_v25  ;;  %v10382_v38 = vpop.eup %10381  ;;  %v2895_v34 = vpop.permute.xlu1 %2894 }
 0xe4f   :  { %10401 = vrcp.f32 %v2852_v41  ;;  %v2858_v40 = vadd.f32 1.0, %v10382_v38 }
 0xe50   :  { %v10384_v28 = vpop.eup %10383  ;;  %10403 = vtanh.f32 %v2812_v14 }
 0xe51   :  { %v10386_v30 = vpop.eup %10385  ;;  %v2901_v39 = vpop.permute.xlu0 %2900  ;;  %v2861_v22 = vadd.f32 1.0, %v10384_v28  ;;  %10405 = vrcp.f32 %v2859_v37 }
 0xe52   :  { %v10388_v31 = vpop.eup %10387  ;;  %v2907_v4 = vmul.f32 %v10386_v30, %v2897_v26  ;;  %10407 = vrcp.f32 %v2858_v40  ;;  %v2899_v21 = vpop.permute.xlu1 %2898 }
 0xe53   :  { %v10390_v35 = vpop.eup %10389  ;;  %v2906_v44 = vmul.f32 %v10388_v31, %v2895_v34 }
 0xe54   :  { %v10392_v16 = vpop.eup %10391  ;;  %v2860_v30 = vadd.f32 1.0, %v10390_v35 }
 0xe55   :  { %v10394_v51 = vpop.eup %10393  ;;  %v2911_v53 = vmul.f32 %v10392_v16, %v10372_v36 }
 0xe56   :  { %v10396_v61 = vpop.eup %10395  ;;  %v2909_v1 = vmul.f32 %v10394_v51, %v2901_v39 }
 0xe57   :  { %v10398_v54 = vpop.eup %10397  ;;  %v12112_v41 = vadd.f32 %v2911_v53, %v2907_v4  ;;  %v2910_v25 = vmul.f32 %v10396_v61, %v10376_v46 }
 0xe58   :  { %v10400_v14 = vpop.eup %10399  ;;  %v2913_v23 = vmul.f32 %v10398_v54, %v10380_v55 }
 0xe59   :  { %v10402_v8 = vpop.eup %10401  ;;  %10409 = vtanh.f32 %v12112_v41  ;;  %v12115_v38 = vadd.f32 %v2910_v25, %v2906_v44  ;;  %v2908_v36 = vmul.f32 %v10400_v14, %v2899_v21 }
 0xe5a   :  { %v10404_v26 = vpop.eup %10403  ;;  %10411 = vrcp.f32 %v2861_v22  ;;  %v12117_v28 = vadd.f32 %v2913_v23, %v2909_v1 }
 0xe5b   :  { %10413 = vtanh.f32 %v12115_v38  ;;  %v2912_v31 = vmul.f32 %v10404_v26, %v10402_v8  ;;  %v10406_v55 = vpop.eup %10405 }
 0xe5c   :  { %10415 = vtanh.f32 %v12117_v28  ;;  %v10408_v34 = vpop.eup %10407 }
 0xe5d   :  { %v12121_v46 = vadd.f32 %v2912_v31, %v2908_v36  ;;  %10417 = vrcp.f32 %v2860_v30 }
 0xe5f   :  { %10419 = vtanh.f32 %v12121_v46 }
 0xe63   :  { %v10410_v37 = vpop.eup %10409 }
 0xe64   :  { %v10412_v21 = vpop.eup %10411  ;;  %v2923_v4 = vmul.f32 %v10410_v37, %v10406_v55 }
 0xe65   :  { %v10414_v16 = vpop.eup %10413 }
 0xe66   :  { %v10416_v35 = vpop.eup %10415  ;;  %v2922_v23 = vmul.f32 %v10414_v16, %v10408_v34  ;;  %v12126_v40 = vsel %vm3995_vm12, %v12000_v29, %v2923_v4 }
 0xe67   :  { %v2925_v51 = vmul.f32 %v10416_v35, %v10412_v21  ;;  %v10418_v53 = vpop.eup %10417 }
 0xe68   :  { %v10027_v44 = vpack.i.bf16 %v2923_v4, %v2922_v23  ;;  %v12130_v39 = vsel %vm3995_vm12, %v12009_v27, %v2922_v23 }
 0xe69   :  { %v10420_v61 = vpop.eup %10419  ;;  %v12134_v22 = vsel %vm3995_vm12, %v12012_v59, %v2925_v51 }
 0xe6a   :  { %10028 = vrot.lane.b32.xlu1 %v10027_v44, %s11240_s6  ;;  %v2924_v1 = vmul.f32 %v10420_v61, %v10418_v53 }
 0xe6c   :  { %v10032_v54 = vpack.i.bf16 %v2925_v51, %v2924_v1  ;;  %v12139_v29 = vsel %vm3995_vm12, %v12019_v52, %v2924_v1 }
 0xe6e   :  { %10033 = vrot.lane.b32.xlu0 %v10032_v54, %s11240_s6 }
 0xedc   :  { %v10029_v25 = vpop.permute.xlu1 %10028 }
 0xedd   :  { %v10031_v14 = vunpack.i.h.bf16 %v10029_v25  ;;  %v10030_v27 = vunpack.i.l.bf16 %v10029_v25 }
 0xedf   :  { %v9747_v8 = vpack.c.bf16 %v10031_v14, %v10030_v27 }
 0xee0   :  { %v10034_v36 = vpop.permute.xlu0 %10033 }
 0xee1   :  { %v10036_v26 = vunpack.i.h.bf16 %v10034_v36  ;;  %v10035_v30 = vunpack.i.l.bf16 %v10034_v36  ;;  %9748 = vmatprep.subr.bf16.mxu0 %v9747_v8 }
 0xee2   :  { %9750 = vmatpush3.bf16.msra.mxu0 %v9747_v8 }
 0xee3   :  { %v9751_v59 = vpack.c.bf16 %v10036_v26, %v10035_v30 }
 0xee5   :  { %9752 = vmatprep.subr.bf16.mxu0 %v9751_v59 }
 0xee6   :  { %9754 = vmatpush3.bf16.msra.mxu0 %v9751_v59 }
 0xee9   :  { %9188 = vmatmul.mubr.msk.f32.vlgmr.msra.gmra.mrb[42].mxu0 %vm727_vm8, %v11883_v32 }
 0xeea   :  { %9190 = vmatprep.mubr.msk.f32.mxu0 %vm727_vm8, %v11888_v33 }
 0xeed   :  { %9191 = vmatmul.mubr.msk.f32.gmra.mrb[44].mxu0 %vm727_vm8, %v11893_v24 }
 0xeee   :  { %9193 = vmatprep.mubr.msk.f32.mxu0 %vm727_vm8, %v11898_v17 }
 0xef1   :  { %9194 = vmatmul.mubr.msk.f32.gmra.mrb[46].mxu0 %vm727_vm8, %v11903_v2 }
 0xef2   :  { %9196 = vmatprep.mubr.msk.f32.mxu0 %vm727_vm8, %v11908_v20 }
 0xef5   :  { %9197 = vmatmul.mubr.msk.f32.gmra.mrb[48].mxu0 %vm727_vm8, %v11913_v6 }
 0xef6   :  { %9199 = vmatprep.mubr.msk.f32.mxu0 %vm727_vm8, %v11918_v18 }
 0xef9   :  { %9200 = vmatmul.mubr.msk.f32.gmra.mrb[50].mxu0 %vm727_vm8, %v11923_v57 }
 0xefa   :  { %9202 = vmatprep.mubr.msk.f32.mxu0 %vm727_vm8, %v12041_v7 }
 0xefd   :  { %9203 = vmatmul.mubr.msk.f32.gmra.mrb[52].mxu0 %vm727_vm8, %v12046_v58 }
 0xefe   :  { %9205 = vmatprep.mubr.msk.f32.mxu0 %vm727_vm8, %v12051_v49 }
 0xf01   :  { %9206 = vmatmul.mubr.msk.f32.gmra.mrb[54].mxu0 %vm727_vm8, %v12056_v45 }
 0xf02   :  { %9208 = vmatprep.mubr.msk.f32.mxu0 %vm727_vm8, %v12061_v42 }
 0xf05   :  { %9209 = vmatmul.mubr.msk.f32.gmra.mrb[56].mxu0 %vm727_vm8, %v12066_v48 }
 0xf06   :  { %9251 = vmatprep.mubr.msk.f32.mxu0 %vm727_vm8, %v11940_v12 }
 0xfbc   :  { %v9189_v32 = vpop.f32.mrb[42].mxu0 }
 0xfbd   :  { %3105 = vrot.lane.b32.xlu0 %v9189_v32, %s11241_s12  ;;  %v3008_v33 = vpop.f32.mrb[43].mxu0 }
 0xfbe   :  { %3103 = vrot.lane.b32.xlu1 %v3008_v33, %s11241_s12 }
 0xfc0   :  { %v9192_v24 = vpop.f32.mrb[44].mxu0 }
 0xfc1   :  { %3109 = vrot.lane.b32.xlu0 %v9192_v24, %s11241_s12  ;;  %v3018_v17 = vpop.f32.mrb[45].mxu0 }
 0xfc2   :  { %3107 = vrot.lane.b32.xlu1 %v3018_v17, %s11241_s12 }
 0xfc4   :  { %v9195_v2 = vpop.f32.mrb[46].mxu0 }
 0xfc5   :  { %3113 = vrot.lane.b32.xlu0 %v9195_v2, %s11241_s12  ;;  %v3028_v20 = vpop.f32.mrb[47].mxu0 }
 0xfc6   :  { %3111 = vrot.lane.b32.xlu1 %v3028_v20, %s11241_s12 }
 0xfc8   :  { %v9198_v6 = vpop.f32.mrb[48].mxu0 }
 0xfc9   :  { %3117 = vrot.lane.b32.xlu0 %v9198_v6, %s11241_s12  ;;  %v3038_v18 = vpop.f32.mrb[49].mxu0 }
 0xfca   :  { %3115 = vrot.lane.b32.xlu1 %v3038_v18, %s11241_s12 }
 0xfcc   :  { %v9201_v57 = vpop.f32.mrb[50].mxu0 }
 0xfcd   :  { %3121 = vrot.lane.b32.xlu0 %v9201_v57, %s11241_s12  ;;  %v3048_v12 = vpop.f32.mrb[51].mxu0 }
 0xfce   :  { %3119 = vrot.lane.b32.xlu1 %v3048_v12, %s11241_s12 }
 0xfd0   :  { %v9204_v52 = vpop.f32.mrb[52].mxu0 }
 0xfd1   :  { %3125 = vrot.lane.b32.xlu0 %v9204_v52, %s11241_s12  ;;  %v3058_v31 = vpop.f32.mrb[53].mxu0 }
 0xfd2   :  { %3123 = vrot.lane.b32.xlu1 %v3058_v31, %s11241_s12 }
 0xfd4   :  { %v9207_v55 = vpop.f32.mrb[54].mxu0 }
 0xfd5   :  { %3129 = vrot.lane.b32.xlu0 %v9207_v55, %s11241_s12  ;;  %v3068_v34 = vpop.f32.mrb[55].mxu0 }
 0xfd6   :  { %3127 = vrot.lane.b32.xlu1 %v3068_v34, %s11241_s12 }
 0xfd8   :  { %v9210_v37 = vpop.f32.mrb[56].mxu0 }
 0xfd9   :  { %3133 = vrot.lane.b32.xlu0 %v9210_v37, %s11241_s12  ;;  %v3078_v21 = vpop.f32.mrb[57].mxu0 }
 0xfda   :  { %3131 = vrot.lane.b32.xlu1 %v3078_v21, %s11241_s12 }
 0xfdd   :  { %3249 = vrot.lane.b32.xlu0 %v12112_v41, %s11236_s14 }
 0xfde   :  { %3247 = vrot.lane.b32.xlu1 %v12115_v38, %s11236_s14 }
 0xfe1   :  { %3253 = vrot.lane.b32.xlu0 %v12117_v28, %s11236_s14 }
 0xfe2   :  { %3251 = vrot.lane.b32.xlu1 %v12121_v46, %s11236_s14 }
0x102f   :  { %v3106_v4 = vpop.permute.xlu0 %3105 }
0x1030   :  { %v3152_v16 = vadd.f32 %v3106_v4, %v11704_v0  ;;  %v3104_v35 = vpop.permute.xlu1 %3103 }
0x1031   :  { %v3151_v23 = vadd.f32 %v3104_v35, %v11706_v3 }
0x1032   :  { %v8099_v51 = vmul.f32 -1.442695, %v3152_v16 }
0x1033   :  { %v8098_v53 = vmul.f32 -1.442695, %v3151_v23  ;;  %v3110_v44 = vpop.permute.xlu0 %3109 }
0x1034   :  { %10421 = vpow2.f32 %v8099_v51  ;;  %v3154_v41 = vadd.f32 %v3110_v44, %v11710_v9  ;;  %v3108_v61 = vpop.permute.xlu1 %3107 }
0x1035   :  { %10423 = vpow2.f32 %v8098_v53  ;;  %v3153_v28 = vadd.f32 %v3108_v61, %v11712_v47 }
0x1036   :  { %v8101_v38 = vmul.f32 -1.442695, %v3154_v41 }
0x1037   :  { %v3114_v1 = vpop.permute.xlu0 %3113  ;;  %v8100_v27 = vmul.f32 -1.442695, %v3153_v28 }
0x1038   :  { %10425 = vpow2.f32 %v8101_v38  ;;  %v3156_v46 = vadd.f32 %v3114_v1, %v11715_v62  ;;  %v3112_v54 = vpop.permute.xlu1 %3111 }
0x1039   :  { %v3155_v25 = vadd.f32 %v3112_v54, %v11718_v5 }
0x103a   :  { %v8103_v14 = vmul.f32 -1.442695, %v3156_v46 }
0x103b   :  { %v8102_v8 = vmul.f32 -1.442695, %v3155_v25  ;;  %v3118_v36 = vpop.permute.xlu0 %3117 }
0x103c   :  { %10427 = vpow2.f32 %v8103_v14  ;;  %v3158_v26 = vadd.f32 %v3118_v36, %v11722_v13  ;;  %v3116_v30 = vpop.permute.xlu1 %3115 }
0x103d   :  { %10429 = vpow2.f32 %v8102_v8  ;;  %v3157_v59 = vadd.f32 %v3116_v30, %v11724_v43 }
0x103e   :  { %v10422_v32 = vpop.eup %10421  ;;  %v8105_v33 = vmul.f32 -1.442695, %v3158_v26  ;;  %10431 = vpow2.f32 %v8100_v27 }
0x103f   :  { %v10424_v24 = vpop.eup %10423  ;;  %v3204_v17 = vadd.f32 1.0, %v10422_v32  ;;  %v8104_v2 = vmul.f32 -1.442695, %v3157_v59  ;;  %v3122_v20 = vpop.permute.xlu0 %3121 }
0x1040   :  { %v3203_v6 = vadd.f32 1.0, %v10424_v24  ;;  %10433 = vpow2.f32 %v8105_v33  ;;  %v3160_v18 = vadd.f32 %v3122_v20, %v11728_v11  ;;  %v3120_v57 = vpop.permute.xlu1 %3119 }
0x1041   :  { %v3159_v12 = vadd.f32 %v3120_v57, %v11730_v10  ;;  %10435 = vrcp.f32 %v3204_v17 }
0x1042   :  { %v10426_v52 = vpop.eup %10425  ;;  %v8107_v31 = vmul.f32 -1.442695, %v3160_v18  ;;  %10437 = vpow2.f32 %v8104_v2 }
0x1043   :  { %v3206_v55 = vadd.f32 1.0, %v10426_v52  ;;  %v8106_v34 = vmul.f32 -1.442695, %v3159_v12  ;;  %v3126_v37 = vpop.permute.xlu0 %3125  ;;  %10439 = vrcp.f32 %v3203_v6 }
0x1044   :  { %v3162_v21 = vadd.f32 %v3126_v37, %v11736_v15  ;;  %v3124_v4 = vpop.permute.xlu1 %3123  ;;  %10441 = vpow2.f32 %v8107_v31 }
0x1045   :  { %v3161_v16 = vadd.f32 %v3124_v4, %v11738_v56  ;;  %10443 = vrcp.f32 %v3206_v55 }
0x1046   :  { %v10428_v35 = vpop.eup %10427  ;;  %v8109_v23 = vmul.f32 -1.442695, %v3162_v21  ;;  %10445 = vpow2.f32 %v8106_v34 }
0x1047   :  { %v10430_v51 = vpop.eup %10429  ;;  %v3208_v53 = vadd.f32 1.0, %v10428_v35  ;;  %v8108_v44 = vmul.f32 -1.442695, %v3161_v16  ;;  %v3130_v41 = vpop.permute.xlu0 %3129 }
0x1048   :  { %v3207_v61 = vadd.f32 1.0, %v10430_v51  ;;  %10447 = vpow2.f32 %v8109_v23  ;;  %v3164_v38 = vadd.f32 %v3130_v41, %v11744_v60  ;;  %v3128_v28 = vpop.permute.xlu1 %3127  ;;  %v10432_v1 = vpop.eup %10431 }
0x1049   :  { %10449 = vrcp.f32 %v3208_v53  ;;  %v3163_v54 = vadd.f32 %v3128_v28, %v11746_v50  ;;  %v3205_v30 = vadd.f32 1.0, %v10432_v1 }
0x104a   :  { %v10434_v46 = vpop.eup %10433  ;;  %10451 = vrcp.f32 %v3207_v61 }
0x104b   :  { %v3210_v25 = vadd.f32 1.0, %v10434_v46  ;;  %10453 = vpow2.f32 %v8108_v44  ;;  %v3134_v14 = vpop.permute.xlu0 %3133  ;;  %v10436_v27 = vpop.eup %10435 }
0x104c   :  { %10455 = vtanh.f32 %v3164_v38  ;;  %v3166_v8 = vadd.f32 %v3134_v14, %v11752_v63  ;;  %v3132_v36 = vpop.permute.xlu1 %3131  ;;  %v10438_v26 = vpop.eup %10437 }
0x104d   :  { %10457 = vrcp.f32 %v3210_v25  ;;  %v10440_v59 = vpop.eup %10439  ;;  %v3209_v32 = vadd.f32 1.0, %v10438_v26  ;;  %v3165_v33 = vadd.f32 %v3132_v36, %v11754_v19 }
0x104e   :  { %10459 = vtanh.f32 %v3163_v54  ;;  %v10442_v24 = vpop.eup %10441 }
0x104f   :  { %10461 = vtanh.f32 %v3166_v8  ;;  %v10444_v17 = vpop.eup %10443  ;;  %v3250_v20 = vpop.permute.xlu0 %3249  ;;  %v3212_v31 = vadd.f32 1.0, %v10442_v24 }
0x1050   :  { %10463 = vrcp.f32 %v3209_v32  ;;  %v10446_v2 = vpop.eup %10445  ;;  %v3248_v12 = vpop.permute.xlu1 %3247 }
0x1051   :  { %10465 = vrcp.f32 %v3205_v30  ;;  %v3211_v37 = vadd.f32 1.0, %v10446_v2 }
0x1052   :  { %v10448_v6 = vpop.eup %10447  ;;  %10467 = vtanh.f32 %v3165_v33 }
0x1053   :  { %v10450_v18 = vpop.eup %10449  ;;  %v3254_v35 = vpop.permute.xlu0 %3253  ;;  %v3214_v51 = vadd.f32 1.0, %v10448_v6  ;;  %10469 = vrcp.f32 %v3212_v31 }
0x1054   :  { %v10452_v57 = vpop.eup %10451  ;;  %v3260_v55 = vmul.f32 %v10450_v18, %v3250_v20  ;;  %10471 = vrcp.f32 %v3211_v37  ;;  %v3252_v1 = vpop.permute.xlu1 %3251 }
0x1055   :  { %v10454_v52 = vpop.eup %10453  ;;  %v3259_v16 = vmul.f32 %v10452_v57, %v3248_v12 }
0x1056   :  { %v10456_v34 = vpop.eup %10455 }
0x1057   :  { %v10458_v21 = vpop.eup %10457  ;;  %v3264_v4 = vmul.f32 %v10456_v34, %v10436_v27  ;;  %v3213_v27 = vadd.f32 1.0, %v10454_v52 }
0x1058   :  { %v10460_v23 = vpop.eup %10459  ;;  %v3262_v53 = vmul.f32 %v10458_v21, %v3254_v35 }
0x1059   :  { %v10462_v44 = vpop.eup %10461  ;;  %v12214_v41 = vadd.f32 %v3264_v4, %v3260_v55  ;;  %v3263_v61 = vmul.f32 %v10460_v23, %v10440_v59 }
0x105a   :  { %v10464_v38 = vpop.eup %10463  ;;  %v3266_v28 = vmul.f32 %v10462_v44, %v10444_v17  ;;  %v12255_v44 = vld [vmem:[%s11330_s20 + $0x18] sm:$0xff] }
0x105b   :  { %v10466_v46 = vpop.eup %10465  ;;  %10473 = vtanh.f32 %v12214_v41  ;;  %v12217_v54 = vadd.f32 %v3263_v61, %v3259_v16  ;;  %v3261_v25 = vmul.f32 %v10464_v38, %v3252_v1  ;;  %v12260_v61 = vld [vmem:[%s11330_s20 + $0x20] sm:$0xff]  ;;  %v12265_v38 = vld [vmem:[%s11330_s20 + $0x28] sm:$0xff]  ;;  %v12275_v1 = vld [vmem:[%s11330_s20 + $0x38] sm:$0xff] }
0x105c   :  { %v10468_v14 = vpop.eup %10467  ;;  %10475 = vrcp.f32 %v3214_v51  ;;  %v12219_v8 = vadd.f32 %v3266_v28, %v3262_v53  ;;  %v12250_v53 = vld [vmem:[%s11330_s20 + $0x10] sm:$0xff] }
0x105d   :  { %10477 = vtanh.f32 %v12217_v54  ;;  %v3265_v36 = vmul.f32 %v10468_v14, %v10466_v46  ;;  %v10470_v30 = vpop.eup %10469  ;;  %v12270_v28 = vld [vmem:[%s11330_s20 + $0x30] sm:$0xff]  ;;  %v12280_v46 = vld [vmem:[%s11330_s20 + $0x40] sm:$0xff] }
0x105e   :  { %10479 = vtanh.f32 %v12219_v8  ;;  %v10472_v59 = vpop.eup %10471 }
0x105f   :  { %v12223_v26 = vadd.f32 %v3265_v36, %v3261_v25  ;;  %10481 = vrcp.f32 %v3213_v27  ;;  %v12285_v25 = vld [vmem:[%s11330_s20 + $0x48] sm:$0xff] }
0x1061   :  { %10483 = vtanh.f32 %v12223_v26 }
0x1065   :  { %v10474_v32 = vpop.eup %10473 }
0x1066   :  { %v10476_v33 = vpop.eup %10475  ;;  %v3276_v24 = vmul.f32 %v10474_v32, %v10470_v30 }
0x1067   :  { %v10478_v17 = vpop.eup %10477 }
0x1068   :  { %v10480_v2 = vpop.eup %10479  ;;  %v3275_v20 = vmul.f32 %v10478_v17, %v10472_v59  ;;  %v12228_v6 = vsel %vm433_vm3, %v12126_v40, %v3276_v24 }
0x1069   :  { %v3278_v18 = vmul.f32 %v10480_v2, %v10476_v33  ;;  %v10482_v57 = vpop.eup %10481 }
0x106a   :  { %v10037_v12 = vpack.i.bf16 %v3276_v24, %v3275_v20  ;;  %v12232_v52 = vsel %vm433_vm3, %v12130_v39, %v3275_v20 }
0x106b   :  { %v10484_v31 = vpop.eup %10483  ;;  %v12236_v55 = vsel %vm433_vm3, %v12134_v22, %v3278_v18 }
0x106c   :  { %10038 = vrot.lane.b32.xlu1 %v10037_v12, %s11242_s27  ;;  %v3277_v34 = vmul.f32 %v10484_v31, %v10482_v57 }
0x106e   :  { %v10042_v37 = vpack.i.bf16 %v3278_v18, %v3277_v34  ;;  %v12241_v40 = vsel %vm433_vm3, %v12139_v29, %v3277_v34  ;;  %v12245_v29 = vld [vmem:[%s11330_s20 + $0x8] sm:$0xff] }
0x1070   :  { %10043 = vrot.lane.b32.xlu0 %v10042_v37, %s11242_s27 }
0x10de   :  { %v10039_v39 = vpop.permute.xlu1 %10038 }
0x10df   :  { %v10041_v21 = vunpack.i.h.bf16 %v10039_v39  ;;  %v10040_v4 = vunpack.i.l.bf16 %v10039_v39 }
0x10e1   :  { %v9755_v22 = vpack.c.bf16 %v10041_v21, %v10040_v4 }
0x10e2   :  { %v10044_v16 = vpop.permute.xlu0 %10043 }
0x10e3   :  { %v10046_v35 = vunpack.i.h.bf16 %v10044_v16  ;;  %v10045_v23 = vunpack.i.l.bf16 %v10044_v16  ;;  %9756 = vmatprep.subr.bf16.mxu1 %v9755_v22 }
0x10e4   :  { %9758 = vmatpush3.bf16.msra.mxu1 %v9755_v22 }
0x10e5   :  { %v9759_v51 = vpack.c.bf16 %v10046_v35, %v10045_v23 }
0x10e7   :  { %9760 = vmatprep.subr.bf16.mxu1 %v9759_v51 }
0x10e8   :  { %9762 = vmatpush3.bf16.msra.mxu1 %v9759_v51 }
0x10eb   :  { %9220 = vmatmul.mubr.msk.f32.vlgmr.msra.gmra.mrb[64].mxu1 %vm727_vm8, %v12245_v29 }
0x10ec   :  { %9222 = vmatprep.mubr.msk.f32.mxu1 %vm727_vm8, %v12250_v53 }
0x10ef   :  { %9223 = vmatmul.mubr.msk.f32.gmra.mrb[66].mxu1 %vm727_vm8, %v12255_v44 }
0x10f0   :  { %9225 = vmatprep.mubr.msk.f32.mxu1 %vm727_vm8, %v12260_v61 }
0x10f3   :  { %9226 = vmatmul.mubr.msk.f32.gmra.mrb[68].mxu1 %vm727_vm8, %v12265_v38 }
0x10f4   :  { %9228 = vmatprep.mubr.msk.f32.mxu1 %vm727_vm8, %v12270_v28 }
0x10f7   :  { %9229 = vmatmul.mubr.msk.f32.gmra.mrb[70].mxu1 %vm727_vm8, %v12275_v1 }
0x10f8   :  { %9231 = vmatprep.mubr.msk.f32.mxu1 %vm727_vm8, %v12280_v46 }
0x10fb   :  { %9232 = vmatmul.mubr.msk.f32.gmra.mrb[72].mxu1 %vm727_vm8, %v12285_v25 }
0x10fc   :  { %9234 = vmatprep.mubr.msk.f32.mxu1 %vm727_vm8, %v12041_v7 }
0x10ff   :  { %9235 = vmatmul.mubr.msk.f32.gmra.mrb[74].mxu1 %vm727_vm8, %v12046_v58 }
0x1100   :  { %9237 = vmatprep.mubr.msk.f32.mxu1 %vm727_vm8, %v12051_v49 }
0x1103   :  { %9238 = vmatmul.mubr.msk.f32.gmra.mrb[76].mxu1 %vm727_vm8, %v12056_v45 }
0x1104   :  { %9240 = vmatprep.mubr.msk.f32.mxu1 %vm727_vm8, %v12061_v42 }
0x1107   :  { %9241 = vmatmul.mubr.msk.f32.gmra.mrb[78].mxu1 %vm727_vm8, %v12066_v48 }
0x11be   :  { %v9221_v14 = vpop.f32.mrb[64].mxu1 }
0x11bf   :  { %3458 = vrot.lane.b32.xlu0 %v9221_v14, %s11243_s4  ;;  %v3361_v7 = vpop.f32.mrb[65].mxu1 }
0x11c0   :  { %3456 = vrot.lane.b32.xlu1 %v3361_v7, %s11243_s4 }
0x11c2   :  { %v9224_v58 = vpop.f32.mrb[66].mxu1 }
0x11c3   :  { %3462 = vrot.lane.b32.xlu0 %v9224_v58, %s11243_s4  ;;  %v3371_v49 = vpop.f32.mrb[67].mxu1 }
0x11c4   :  { %3460 = vrot.lane.b32.xlu1 %v3371_v49, %s11243_s4 }
0x11c6   :  { %v9227_v45 = vpop.f32.mrb[68].mxu1 }
0x11c7   :  { %3466 = vrot.lane.b32.xlu0 %v9227_v45, %s11243_s4  ;;  %v3381_v42 = vpop.f32.mrb[69].mxu1 }
0x11c8   :  { %3464 = vrot.lane.b32.xlu1 %v3381_v42, %s11243_s4 }
0x11ca   :  { %v9230_v48 = vpop.f32.mrb[70].mxu1 }
0x11cb   :  { %3470 = vrot.lane.b32.xlu0 %v9230_v48, %s11243_s4  ;;  %v3391_v27 = vpop.f32.mrb[71].mxu1 }
0x11cc   :  { %3468 = vrot.lane.b32.xlu1 %v3391_v27, %s11243_s4 }
0x11ce   :  { %v9233_v36 = vpop.f32.mrb[72].mxu1 }
0x11cf   :  { %3474 = vrot.lane.b32.xlu0 %v9233_v36, %s11243_s4  ;;  %v3401_v30 = vpop.f32.mrb[73].mxu1 }
0x11d0   :  { %3472 = vrot.lane.b32.xlu1 %v3401_v30, %s11243_s4 }
0x11d2   :  { %v9236_v59 = vpop.f32.mrb[74].mxu1 }
0x11d3   :  { %3478 = vrot.lane.b32.xlu0 %v9236_v59, %s11243_s4  ;;  %v3411_v32 = vpop.f32.mrb[75].mxu1 }
0x11d4   :  { %3476 = vrot.lane.b32.xlu1 %v3411_v32, %s11243_s4 }
0x11d6   :  { %v9239_v33 = vpop.f32.mrb[76].mxu1 }
0x11d7   :  { %3482 = vrot.lane.b32.xlu0 %v9239_v33, %s11243_s4  ;;  %v3421_v24 = vpop.f32.mrb[77].mxu1 }
0x11d8   :  { %3480 = vrot.lane.b32.xlu1 %v3421_v24, %s11243_s4 }
0x11da   :  { %v9242_v17 = vpop.f32.mrb[78].mxu1 }
0x11db   :  { %3486 = vrot.lane.b32.xlu0 %v9242_v17, %s11243_s4  ;;  %v3431_v2 = vpop.f32.mrb[79].mxu1 }
0x11dc   :  { %3484 = vrot.lane.b32.xlu1 %v3431_v2, %s11243_s4 }
0x11df   :  { %3602 = vrot.lane.b32.xlu0 %v12214_v41, %s11236_s14 }
0x11e0   :  { %3600 = vrot.lane.b32.xlu1 %v12217_v54, %s11236_s14 }
0x11e3   :  { %3606 = vrot.lane.b32.xlu0 %v12219_v8, %s11236_s14 }
0x11e4   :  { %3604 = vrot.lane.b32.xlu1 %v12223_v26, %s11236_s14 }
0x1231   :  { %v3459_v20 = vpop.permute.xlu0 %3458 }
0x1232   :  { %v3505_v18 = vadd.f32 %v3459_v20, %v11704_v0  ;;  %v3457_v57 = vpop.permute.xlu1 %3456 }
0x1233   :  { %v3504_v12 = vadd.f32 %v3457_v57, %v11706_v3 }
0x1234   :  { %v8127_v31 = vmul.f32 -1.442695, %v3505_v18 }
0x1235   :  { %v8126_v34 = vmul.f32 -1.442695, %v3504_v12  ;;  %v3463_v37 = vpop.permute.xlu0 %3462 }
0x1236   :  { %10485 = vpow2.f32 %v8127_v31  ;;  %v3507_v41 = vadd.f32 %v3463_v37, %v11710_v9  ;;  %v3461_v39 = vpop.permute.xlu1 %3460 }
0x1237   :  { %10487 = vpow2.f32 %v8126_v34  ;;  %v3506_v8 = vadd.f32 %v3461_v39, %v11712_v47 }
0x1238   :  { %v8129_v54 = vmul.f32 -1.442695, %v3507_v41 }
0x1239   :  { %v3467_v21 = vpop.permute.xlu0 %3466  ;;  %v8128_v35 = vmul.f32 -1.442695, %v3506_v8 }
0x123a   :  { %10489 = vpow2.f32 %v8129_v54  ;;  %v3509_v26 = vadd.f32 %v3467_v21, %v11715_v62  ;;  %v3465_v4 = vpop.permute.xlu1 %3464 }
0x123b   :  { %v3508_v22 = vadd.f32 %v3465_v4, %v11718_v5 }
0x123c   :  { %v8131_v16 = vmul.f32 -1.442695, %v3509_v26 }
0x123d   :  { %v8130_v23 = vmul.f32 -1.442695, %v3508_v22  ;;  %v3471_v51 = vpop.permute.xlu0 %3470 }
0x123e   :  { %10491 = vpow2.f32 %v8131_v16  ;;  %v3511_v14 = vadd.f32 %v3471_v51, %v11722_v13  ;;  %v3469_v7 = vpop.permute.xlu1 %3468 }
0x123f   :  { %10493 = vpow2.f32 %v8130_v23  ;;  %v3510_v58 = vadd.f32 %v3469_v7, %v11724_v43 }
0x1240   :  { %v10486_v49 = vpop.eup %10485  ;;  %v8133_v45 = vmul.f32 -1.442695, %v3511_v14  ;;  %10495 = vpow2.f32 %v8128_v35 }
0x1241   :  { %v10488_v42 = vpop.eup %10487  ;;  %v3557_v48 = vadd.f32 1.0, %v10486_v49  ;;  %v8132_v27 = vmul.f32 -1.442695, %v3510_v58  ;;  %v3475_v36 = vpop.permute.xlu0 %3474 }
0x1242   :  { %v3556_v30 = vadd.f32 1.0, %v10488_v42  ;;  %10497 = vpow2.f32 %v8133_v45  ;;  %v3513_v59 = vadd.f32 %v3475_v36, %v11728_v11  ;;  %v3473_v32 = vpop.permute.xlu1 %3472 }
0x1243   :  { %v3512_v33 = vadd.f32 %v3473_v32, %v11730_v10  ;;  %10499 = vrcp.f32 %v3557_v48 }
0x1244   :  { %v10490_v24 = vpop.eup %10489  ;;  %v8135_v17 = vmul.f32 -1.442695, %v3513_v59  ;;  %10501 = vpow2.f32 %v8132_v27 }
0x1245   :  { %v3559_v2 = vadd.f32 1.0, %v10490_v24  ;;  %v8134_v20 = vmul.f32 -1.442695, %v3512_v33  ;;  %v3479_v18 = vpop.permute.xlu0 %3478  ;;  %10503 = vrcp.f32 %v3556_v30 }
0x1246   :  { %v3515_v57 = vadd.f32 %v3479_v18, %v11736_v15  ;;  %v3477_v12 = vpop.permute.xlu1 %3476  ;;  %10505 = vpow2.f32 %v8135_v17 }
0x1247   :  { %v3514_v31 = vadd.f32 %v3477_v12, %v11738_v56  ;;  %10507 = vrcp.f32 %v3559_v2 }
0x1248   :  { %v10492_v34 = vpop.eup %10491  ;;  %v8137_v37 = vmul.f32 -1.442695, %v3515_v57  ;;  %10509 = vpow2.f32 %v8134_v20 }
0x1249   :  { %v10494_v41 = vpop.eup %10493  ;;  %v3561_v39 = vadd.f32 1.0, %v10492_v34  ;;  %v8136_v54 = vmul.f32 -1.442695, %v3514_v31  ;;  %v3483_v8 = vpop.permute.xlu0 %3482 }
0x124a   :  { %v3560_v21 = vadd.f32 1.0, %v10494_v41  ;;  %10511 = vpow2.f32 %v8137_v37  ;;  %v3517_v26 = vadd.f32 %v3483_v8, %v11744_v60  ;;  %v3481_v4 = vpop.permute.xlu1 %3480  ;;  %v10496_v22 = vpop.eup %10495 }
0x124b   :  { %10513 = vrcp.f32 %v3561_v39  ;;  %v3516_v35 = vadd.f32 %v3481_v4, %v11746_v50  ;;  %v3558_v45 = vadd.f32 1.0, %v10496_v22 }
0x124c   :  { %v10498_v16 = vpop.eup %10497  ;;  %10515 = vrcp.f32 %v3560_v21 }
0x124d   :  { %v3563_v23 = vadd.f32 1.0, %v10498_v16  ;;  %10517 = vpow2.f32 %v8136_v54  ;;  %v3487_v51 = vpop.permute.xlu0 %3486  ;;  %v10500_v14 = vpop.eup %10499 }
0x124e   :  { %10519 = vtanh.f32 %v3517_v26  ;;  %v3519_v7 = vadd.f32 %v3487_v51, %v11752_v63  ;;  %v3485_v58 = vpop.permute.xlu1 %3484  ;;  %v10502_v49 = vpop.eup %10501 }
0x124f   :  { %10521 = vrcp.f32 %v3563_v23  ;;  %v10504_v42 = vpop.eup %10503  ;;  %v3562_v48 = vadd.f32 1.0, %v10502_v49  ;;  %v3518_v27 = vadd.f32 %v3485_v58, %v11754_v19 }
0x1250   :  { %10523 = vtanh.f32 %v3516_v35  ;;  %v10506_v36 = vpop.eup %10505 }
0x1251   :  { %10525 = vtanh.f32 %v3519_v7  ;;  %v10508_v30 = vpop.eup %10507  ;;  %v3603_v32 = vpop.permute.xlu0 %3602  ;;  %v3565_v18 = vadd.f32 1.0, %v10506_v36 }
0x1252   :  { %10527 = vrcp.f32 %v3562_v48  ;;  %v10510_v59 = vpop.eup %10509  ;;  %v3601_v2 = vpop.permute.xlu1 %3600 }
0x1253   :  { %10529 = vrcp.f32 %v3558_v45  ;;  %v3564_v31 = vadd.f32 1.0, %v10510_v59 }
0x1254   :  { %v10512_v33 = vpop.eup %10511  ;;  %10531 = vtanh.f32 %v3518_v27 }
0x1255   :  { %v10514_v24 = vpop.eup %10513  ;;  %v3607_v39 = vpop.permute.xlu0 %3606  ;;  %v3567_v8 = vadd.f32 1.0, %v10512_v33  ;;  %10533 = vrcp.f32 %v3565_v18 }
0x1256   :  { %v10516_v17 = vpop.eup %10515  ;;  %v3613_v57 = vmul.f32 %v10514_v24, %v3603_v32  ;;  %10535 = vrcp.f32 %v3564_v31  ;;  %v3605_v23 = vpop.permute.xlu1 %3604 }
0x1257   :  { %v10518_v20 = vpop.eup %10517  ;;  %v3612_v41 = vmul.f32 %v10516_v17, %v3601_v2 }
0x1258   :  { %v10520_v12 = vpop.eup %10519  ;;  %v3566_v49 = vadd.f32 1.0, %v10518_v20 }
0x1259   :  { %v10522_v34 = vpop.eup %10521  ;;  %v3617_v37 = vmul.f32 %v10520_v12, %v10500_v14 }
0x125a   :  { %v10524_v54 = vpop.eup %10523  ;;  %v3615_v21 = vmul.f32 %v10522_v34, %v3607_v39 }
0x125b   :  { %v10526_v26 = vpop.eup %10525  ;;  %v12341_v4 = vadd.f32 %v3617_v37, %v3613_v57  ;;  %v3616_v22 = vmul.f32 %v10524_v54, %v10504_v42 }
0x125c   :  { %v10528_v16 = vpop.eup %10527  ;;  %v3619_v35 = vmul.f32 %v10526_v26, %v10508_v30 }
0x125d   :  { %v10530_v51 = vpop.eup %10529  ;;  %10537 = vtanh.f32 %v12341_v4  ;;  %v12344_v7 = vadd.f32 %v3616_v22, %v3612_v41  ;;  %v3614_v14 = vmul.f32 %v10528_v16, %v3605_v23  ;;  %v13670_v16 = vmov 0.0  }
0x125e   :  { %v10532_v58 = vpop.eup %10531  ;;  %10539 = vrcp.f32 %v3567_v8  ;;  %v12346_v45 = vadd.f32 %v3619_v35, %v3615_v21 }
0x125f   :  { %10541 = vtanh.f32 %v12344_v7  ;;  %v3618_v48 = vmul.f32 %v10532_v58, %v10530_v51  ;;  %v10534_v27 = vpop.eup %10533 }
0x1260   :  { %10543 = vtanh.f32 %v12346_v45  ;;  %v10536_v36 = vpop.eup %10535 }
0x1261   :  { %v12350_v42 = vadd.f32 %v3618_v48, %v3614_v14  ;;  %10545 = vrcp.f32 %v3566_v49 }
0x1263   :  { %10547 = vtanh.f32 %v12350_v42 }
0x1267   :  { %v10538_v30 = vpop.eup %10537 }
0x1268   :  { %v10540_v59 = vpop.eup %10539  ;;  %v3629_v32 = vmul.f32 %v10538_v30, %v10534_v27 }
0x1269   :  { %v10542_v33 = vpop.eup %10541 }
0x126a   :  { %v10544_v24 = vpop.eup %10543  ;;  %v3628_v17 = vmul.f32 %v10542_v33, %v10536_v36  ;;  %v12355_v2 = vsel %vm4004_vm13, %v12228_v6, %v3629_v32 }
0x126b   :  { %v3631_v20 = vmul.f32 %v10544_v24, %v10540_v59  ;;  %v10546_v18 = vpop.eup %10545 }
0x126c   :  { %v10047_v57 = vpack.i.bf16 %v3629_v32, %v3628_v17  ;;  %v12359_v12 = vsel %vm4004_vm13, %v12232_v52, %v3628_v17 }
0x126d   :  { %v10548_v31 = vpop.eup %10547  ;;  %v12363_v34 = vsel %vm4004_vm13, %v12236_v55, %v3631_v20 }
0x126e   :  { %10048 = vrot.lane.b32.xlu1 %v10047_v57, %s11244_s22  ;;  %v3630_v37 = vmul.f32 %v10548_v31, %v10546_v18  ;;  %v216_v57 = vld [vmem:[%s13672_s26] sm:$0xff] }
0x126f   :  { %9283 = vmatprep.mubr.msk.f32.mxu1 %vm727_vm8, %v216_v57 }
0x1270   :  { %v10052_v41 = vpack.i.bf16 %v3631_v20, %v3630_v37  ;;  %v12368_v6 = vsel %vm4004_vm13, %v12241_v40, %v3630_v37  ;;  %v11134_v40 = vld [vmem:[%s11330_s20 + $0x50] sm:$0xff]  ;;  %v12440_v37 = vld [vmem:[%s13673_s28] sm:$0xff] }
0x1272   :  { %10053 = vrot.lane.b32.xlu0 %v10052_v41, %s11244_s22  ;;  %v12445_v41 = vld [vmem:[%s13673_s28 + $0x8] sm:$0xff] }
0x12e0   :  { %v10049_v39 = vpop.permute.xlu1 %10048 }
0x12e1   :  { %v10051_v54 = vunpack.i.h.bf16 %v10049_v39  ;;  %v10050_v52 = vunpack.i.l.bf16 %v10049_v39 }
0x12e3   :  { %v9763_v8 = vpack.c.bf16 %v10051_v54, %v10050_v52  ;;  %v12452_v52 = vld [vmem:[%s13673_s28 + $0x10] sm:$0xff] }
0x12e4   :  { %v10054_v21 = vpop.permute.xlu0 %10053 }
0x12e5   :  { %v10056_v26 = vunpack.i.h.bf16 %v10054_v21  ;;  %v10055_v22 = vunpack.i.l.bf16 %v10054_v21  ;;  %9764 = vmatprep.subr.bf16.mxu0 %v9763_v8 }
0x12e6   :  { %9766 = vmatpush3.bf16.msra.mxu0 %v9763_v8  ;;  %v12457_v8 = vld [vmem:[%s13673_s28 + $0x18] sm:$0xff] }
0x12e7   :  { %v9767_v55 = vpack.c.bf16 %v10056_v26, %v10055_v22  ;;  %v12464_v22 = vld [vmem:[%s13673_s28 + $0x20] sm:$0xff] }
0x12e9   :  { %9768 = vmatprep.subr.bf16.mxu0 %v9767_v55 }
0x12ea   :  { %9770 = vmatpush3.bf16.msra.mxu0 %v9767_v55  ;;  %v12469_v55 = vld [vmem:[%s13673_s28 + $0x28] sm:$0xff] }
0x12eb   :  { %9307 = vmatprep.subr.mxu0 %v13670_v16 }
0x12ed   :  { %9252 = vmatmul.mubr.msk.f32.vlgmr.msra.gmra.mrb[58].mxu0 %vm727_vm8, %v12245_v29  ;;  %v11135_v29 = vld [vmem:[%s11330_s20 + $0x58] sm:$0xff] }
0x12ee   :  { %9254 = vmatprep.mubr.msk.f32.mxu0 %vm727_vm8, %v12250_v53  ;;  %9308 = vmatpush3.msra.mxu0 %v13670_v16  ;;  %v11136_v53 = vld [vmem:[%s11330_s20 + $0x60] sm:$0xff] }
0x12f1   :  { %9255 = vmatmul.mubr.msk.f32.gmra.mrb[60].mxu0 %vm727_vm8, %v12255_v44  ;;  %v11137_v44 = vld [vmem:[%s11330_s20 + $0x68] sm:$0xff] }
0x12f2   :  { %9257 = vmatprep.mubr.msk.f32.mxu0 %vm727_vm8, %v12260_v61  ;;  %v11138_v61 = vld [vmem:[%s11330_s20 + $0x70] sm:$0xff] }
0x12f5   :  { %9258 = vmatmul.mubr.msk.f32.gmra.mrb[62].mxu0 %vm727_vm8, %v12265_v38  ;;  %v11139_v38 = vld [vmem:[%s11330_s20 + $0x78] sm:$0xff]  ;;  %s13671_s20 = sld [smem:[#allocation11_spill]] }
0x12f6   :  { %9260 = vmatprep.mubr.msk.f32.mxu0 %vm727_vm8, %v12270_v28 }
0x12f9   :  { %9261 = vmatmul.mubr.msk.f32.gmra.mrb[64].mxu0 %vm727_vm8, %v12275_v1 }
0x12fa   :  { %9263 = vmatprep.mubr.msk.f32.mxu0 %vm727_vm8, %v12280_v46 }
0x12fb   :  { %v249_v33 = vld [vmem:[%s13671_s20 + $0x8] sm:$0xff]  ;;  %v248_v24 = vld [vmem:[%s13671_s20] sm:$0xff]  ;;  %v250_v20 = vld [vmem:[%s13671_s20 + $0x10] sm:$0xff] }
0x12fc   :  { %v253_v17 = vld [vmem:[%s13671_s20 + $0x28] sm:$0xff]  ;;  %v256_v31 = vld [vmem:[%s13671_s20 + $0x40] sm:$0xff]  ;;  %v259_v21 = vld [vmem:[%s13671_s20 + $0x58] sm:$0xff] }
0x12fd   :  { %9264 = vmatmul.mubr.msk.f32.gmra.mrb[66].mxu0 %vm727_vm8, %v12285_v25  ;;  %v257_v18 = vld [vmem:[%s13671_s20 + $0x48] sm:$0xff]  ;;  %v260_v54 = vld [vmem:[%s13671_s20 + $0x60] sm:$0xff]  ;;  %v258_v26 = vld [vmem:[%s13671_s20 + $0x50] sm:$0xff] }
0x12fe   :  { %9266 = vmatprep.mubr.msk.f32.mxu0 %vm727_vm8, %v11134_v40  ;;  %v261_v39 = vld [vmem:[%s13671_s20 + $0x68] sm:$0xff]  ;;  %v263_v40 = vld [vmem:[%s13671_s20 + $0x78] sm:$0xff] }
0x1301   :  { %9267 = vmatmul.mubr.msk.f32.gmra.mrb[68].mxu0 %vm727_vm8, %v11135_v29  ;;  %v262_v29 = vld [vmem:[%s13671_s20 + $0x70] sm:$0xff] }
0x1302   :  { %9269 = vmatprep.mubr.msk.f32.mxu0 %vm727_vm8, %v11136_v53  ;;  %v12476_v53 = vld [vmem:[%s13673_s28 + $0x30] sm:$0xff] }
0x1305   :  { %9270 = vmatmul.mubr.msk.f32.gmra.mrb[70].mxu0 %vm727_vm8, %v11137_v44  ;;  %v12481_v44 = vld [vmem:[%s13673_s28 + $0x38] sm:$0xff] }
0x1306   :  { %9272 = vmatprep.mubr.msk.f32.mxu0 %vm727_vm8, %v11138_v61  ;;  %v12486_v61 = vld [vmem:[%s13673_s28 + $0x40] sm:$0xff] }
0x1309   :  { %9273 = vmatmul.mubr.msk.f32.gmra.mrb[72].mxu0 %vm727_vm8, %v11139_v38  ;;  %v12491_v38 = vld [vmem:[%s13673_s28 + $0x48] sm:$0xff] }
0x130a   :  { %9309 = vmatprep.mubr.msk.f32.mxu0 %vm727_vm8, %v12440_v37 }
0x130d   :  { %9310 = vmatmul.mubr.msk.f32.vlgmr.msra.gmra.mrb[74].mxu0 %vm727_vm8, %v12445_v41 }
0x130e   :  { %9312 = vmatprep.mubr.msk.f32.mxu0 %vm727_vm8, %v12452_v52 }
0x1311   :  { %9313 = vmatmul.mubr.msk.f32.gmra.mrb[76].mxu0 %vm727_vm8, %v12457_v8 }
0x1312   :  { %9315 = vmatprep.mubr.msk.f32.mxu0 %vm727_vm8, %v12464_v22 }
0x1315   :  { %9316 = vmatmul.mubr.msk.f32.gmra.mrb[78].mxu0 %vm727_vm8, %v12469_v55 }
0x1316   :  { %9318 = vmatprep.mubr.msk.f32.mxu0 %vm727_vm8, %v12476_v53 }
0x1319   :  { %9319 = vmatmul.mubr.msk.f32.gmra.mrb[80].mxu0 %vm727_vm8, %v12481_v44 }
0x131a   :  { %9321 = vmatprep.mubr.msk.f32.mxu0 %vm727_vm8, %v12486_v61 }
0x131d   :  { %9322 = vmatmul.mubr.msk.f32.gmra.mrb[82].mxu0 %vm727_vm8, %v12491_v38 }
0x13c0   :  { %v9253_v28 = vpop.f32.mrb[58].mxu0 }
0x13c1   :  { %3811 = vrot.lane.b32.xlu0 %v9253_v28, %s11245_s23  ;;  %v3714_v1 = vpop.f32.mrb[59].mxu0  ;;  %v12496_v28 = vld [vmem:[%s13673_s28 + $0x50] sm:$0xff] }
0x13c2   :  { %3809 = vrot.lane.b32.xlu1 %v3714_v1, %s11245_s23  ;;  %9324 = vmatprep.mubr.msk.f32.mxu0 %vm727_vm8, %v12496_v28  ;;  %v12501_v1 = vld [vmem:[%s13673_s28 + $0x58] sm:$0xff] }
0x13c3   :  { %9325 = vmatmul.mubr.msk.f32.gmra.mrb[84].mxu0 %vm727_vm8, %v12501_v1 }
0x13c4   :  { %v9256_v46 = vpop.f32.mrb[60].mxu0 }
0x13c5   :  { %3815 = vrot.lane.b32.xlu0 %v9256_v46, %s11245_s23  ;;  %v3724_v25 = vpop.f32.mrb[61].mxu0  ;;  %v12506_v46 = vld [vmem:[%s13673_s28 + $0x60] sm:$0xff] }
0x13c6   :  { %3813 = vrot.lane.b32.xlu1 %v3724_v25, %s11245_s23  ;;  %9327 = vmatprep.mubr.msk.f32.mxu0 %vm727_vm8, %v12506_v46  ;;  %v12511_v25 = vld [vmem:[%s13673_s28 + $0x68] sm:$0xff] }
0x13c7   :  { %9328 = vmatmul.mubr.msk.f32.gmra.mrb[86].mxu0 %vm727_vm8, %v12511_v25 }
0x13c8   :  { %v9259_v35 = vpop.f32.mrb[62].mxu0 }
0x13c9   :  { %3819 = vrot.lane.b32.xlu0 %v9259_v35, %s11245_s23  ;;  %v3734_v23 = vpop.f32.mrb[63].mxu0  ;;  %v12516_v35 = vld [vmem:[%s13673_s28 + $0x70] sm:$0xff] }
0x13ca   :  { %3817 = vrot.lane.b32.xlu1 %v3734_v23, %s11245_s23  ;;  %9330 = vmatprep.mubr.msk.f32.mxu0 %vm727_vm8, %v12516_v35  ;;  %v12521_v23 = vld [vmem:[%s13673_s28 + $0x78] sm:$0xff] }
0x13cb   :  { %9331 = vmatmul.mubr.msk.f32.gmra.mrb[88].mxu0 %vm727_vm8, %v12521_v23 }
0x13cc   :  { %v9262_v51 = vpop.f32.mrb[64].mxu0  ;;  %9373 = vmatprep.mubr.msk.f32.mxu0 %vm727_vm8, %v12440_v37 }
0x13cd   :  { %3823 = vrot.lane.b32.xlu0 %v9262_v51, %s11245_s23  ;;  %v3744_v14 = vpop.f32.mrb[65].mxu0 }
0x13ce   :  { %3821 = vrot.lane.b32.xlu1 %v3744_v14, %s11245_s23 }
0x13d0   :  { %v9265_v58 = vpop.f32.mrb[66].mxu0 }
0x13d1   :  { %3827 = vrot.lane.b32.xlu0 %v9265_v58, %s11245_s23  ;;  %v3754_v49 = vpop.f32.mrb[67].mxu0 }
0x13d2   :  { %3825 = vrot.lane.b32.xlu1 %v3754_v49, %s11245_s23 }
0x13d4   :  { %v9268_v48 = vpop.f32.mrb[68].mxu0 }
0x13d5   :  { %3831 = vrot.lane.b32.xlu0 %v9268_v48, %s11245_s23  ;;  %v3764_v27 = vpop.f32.mrb[69].mxu0 }
0x13d6   :  { %3829 = vrot.lane.b32.xlu1 %v3764_v27, %s11245_s23 }
0x13d8   :  { %v9271_v36 = vpop.f32.mrb[70].mxu0 }
0x13d9   :  { %3835 = vrot.lane.b32.xlu0 %v9271_v36, %s11245_s23  ;;  %v3774_v30 = vpop.f32.mrb[71].mxu0 }
0x13da   :  { %3833 = vrot.lane.b32.xlu1 %v3774_v30, %s11245_s23 }
0x13dc   :  { %v9274_v59 = vpop.f32.mrb[72].mxu0 }
0x13dd   :  { %3839 = vrot.lane.b32.xlu0 %v9274_v59, %s11245_s23  ;;  %v3784_v32 = vpop.f32.mrb[73].mxu0 }
0x13de   :  { %3837 = vrot.lane.b32.xlu1 %v3784_v32, %s11245_s23 }
0x13e1   :  { %3955 = vrot.lane.b32.xlu0 %v12341_v4, %s11236_s14  ;;  %v252_v4 = vld [vmem:[%s13671_s20 + $0x20] sm:$0xff] }
0x13e2   :  { %3953 = vrot.lane.b32.xlu1 %v12344_v7, %s11236_s14  ;;  %v251_v7 = vld [vmem:[%s13671_s20 + $0x18] sm:$0xff] }
0x13e5   :  { %3959 = vrot.lane.b32.xlu0 %v12346_v45, %s11236_s14  ;;  %v255_v45 = vld [vmem:[%s13671_s20 + $0x38] sm:$0xff] }
0x13e6   :  { %3957 = vrot.lane.b32.xlu1 %v12350_v42, %s11236_s14  ;;  %v254_v42 = vld [vmem:[%s13671_s20 + $0x30] sm:$0xff] }
0x13e9   :  { %4021 = vperm.xlu0 %9985, %v249_v33  }
0x13ea   :  { %4016 = vperm.xlu1 %9986, %v248_v24  }
0x13ed   :  { %4041 = vperm.xlu0 %9985, %v253_v17  }
0x13ee   :  { %4036 = vperm.xlu1 %9986, %v252_v4  }
0x13f1   :  { %4031 = vperm.xlu0 %9985, %v251_v7  }
0x13f2   :  { %4026 = vperm.xlu1 %9986, %v250_v20  }
0x13f5   :  { %4051 = vperm.xlu0 %9985, %v255_v45  }
0x13f6   :  { %4046 = vperm.xlu1 %9986, %v254_v42  }
0x13f9   :  { %4061 = vperm.xlu0 %9985, %v257_v18  }
0x13fa   :  { %4056 = vperm.xlu1 %9986, %v256_v31  }
0x13fd   :  { %4081 = vperm.xlu0 %9985, %v261_v39  }
0x13fe   :  { %4076 = vperm.xlu1 %9986, %v260_v54  }
0x1401   :  { %4071 = vperm.xlu0 %9985, %v259_v21  }
0x1402   :  { %4066 = vperm.xlu1 %9986, %v258_v26  }
0x1405   :  { %4091 = vperm.xlu0 %9985, %v263_v40  }
0x1406   :  { %4086 = vperm.xlu1 %9986, %v262_v29  }
0x1433   :  { %v3812_v51 = vpop.permute.xlu0 %3811 }
0x1434   :  { %v3858_v14 = vadd.f32 %v3812_v51, %v11704_v0  ;;  %v3810_v58 = vpop.permute.xlu1 %3809 }
0x1435   :  { %v3857_v49 = vadd.f32 %v3810_v58, %v11706_v3 }
0x1436   :  { %v8155_v48 = vmul.f32 -1.442695, %v3858_v14 }
0x1437   :  { %v8154_v27 = vmul.f32 -1.442695, %v3857_v49  ;;  %v3816_v36 = vpop.permute.xlu0 %3815 }
0x1438   :  { %10549 = vpow2.f32 %v8155_v48  ;;  %v3860_v30 = vadd.f32 %v3816_v36, %v11710_v9  ;;  %v3814_v59 = vpop.permute.xlu1 %3813 }
0x1439   :  { %10551 = vpow2.f32 %v8154_v27  ;;  %v3859_v33 = vadd.f32 %v3814_v59, %v11712_v47 }
0x143a   :  { %v8157_v32 = vmul.f32 -1.442695, %v3860_v30 }
0x143b   :  { %v3820_v24 = vpop.permute.xlu0 %3819  ;;  %v8156_v3 = vmul.f32 -1.442695, %v3859_v33 }
0x143c   :  { %10553 = vpow2.f32 %v8157_v32  ;;  %v3862_v17 = vadd.f32 %v3820_v24, %v11715_v62  ;;  %v3818_v4 = vpop.permute.xlu1 %3817 }
0x143d   :  { %v3861_v0 = vadd.f32 %v3818_v4, %v11718_v5 }
0x143e   :  { %v8159_v7 = vmul.f32 -1.442695, %v3862_v17 }
0x143f   :  { %v8158_v20 = vmul.f32 -1.442695, %v3861_v0  ;;  %v3824_v45 = vpop.permute.xlu0 %3823 }
0x1440   :  { %10555 = vpow2.f32 %v8159_v7  ;;  %v3864_v42 = vadd.f32 %v3824_v45, %v11722_v13  ;;  %v3822_v9 = vpop.permute.xlu1 %3821 }
0x1441   :  { %10557 = vpow2.f32 %v8158_v20  ;;  %v3863_v18 = vadd.f32 %v3822_v9, %v11724_v43 }
0x1442   :  { %v10550_v57 = vpop.eup %10549  ;;  %v8161_v47 = vmul.f32 -1.442695, %v3864_v42  ;;  %10559 = vpow2.f32 %v8156_v3 }
0x1443   :  { %v10552_v31 = vpop.eup %10551  ;;  %v3910_v39 = vadd.f32 1.0, %v10550_v57  ;;  %v8160_v62 = vmul.f32 -1.442695, %v3863_v18  ;;  %v3828_v54 = vpop.permute.xlu0 %3827 }
0x1444   :  { %v3909_v21 = vadd.f32 1.0, %v10552_v31  ;;  %10561 = vpow2.f32 %v8161_v47  ;;  %v3866_v5 = vadd.f32 %v3828_v54, %v11728_v11  ;;  %v3826_v26 = vpop.permute.xlu1 %3825 }
0x1445   :  { %v3865_v40 = vadd.f32 %v3826_v26, %v11730_v10  ;;  %10563 = vrcp.f32 %v3910_v39 }
0x1446   :  { %v10554_v29 = vpop.eup %10553  ;;  %v8163_v13 = vmul.f32 -1.442695, %v3866_v5  ;;  %10565 = vpow2.f32 %v8160_v62 }
0x1447   :  { %v3912_v51 = vadd.f32 1.0, %v10554_v29  ;;  %v8162_v43 = vmul.f32 -1.442695, %v3865_v40  ;;  %v3832_v14 = vpop.permute.xlu0 %3831  ;;  %10567 = vrcp.f32 %v3909_v21 }
0x1448   :  { %v3868_v58 = vadd.f32 %v3832_v14, %v11736_v15  ;;  %v3830_v49 = vpop.permute.xlu1 %3829  ;;  %10569 = vpow2.f32 %v8163_v13 }
0x1449   :  { %v3867_v48 = vadd.f32 %v3830_v49, %v11738_v56  ;;  %10571 = vrcp.f32 %v3912_v51 }
0x144a   :  { %v10556_v27 = vpop.eup %10555  ;;  %v8165_v11 = vmul.f32 -1.442695, %v3868_v58  ;;  %10573 = vpow2.f32 %v8162_v43 }
0x144b   :  { %v10558_v36 = vpop.eup %10557  ;;  %v3914_v30 = vadd.f32 1.0, %v10556_v27  ;;  %v8164_v10 = vmul.f32 -1.442695, %v3867_v48  ;;  %v3836_v59 = vpop.permute.xlu0 %3835 }
0x144c   :  { %v3913_v32 = vadd.f32 1.0, %v10558_v36  ;;  %10575 = vpow2.f32 %v8165_v11  ;;  %v3870_v33 = vadd.f32 %v3836_v59, %v11744_v60  ;;  %v3834_v24 = vpop.permute.xlu1 %3833  ;;  %v10560_v17 = vpop.eup %10559 }
0x144d   :  { %10577 = vrcp.f32 %v3914_v30  ;;  %v3869_v4 = vadd.f32 %v3834_v24, %v11746_v50  ;;  %v3911_v42 = vadd.f32 1.0, %v10560_v17 }
0x144e   :  { %v10562_v15 = vpop.eup %10561  ;;  %10579 = vrcp.f32 %v3913_v32 }
0x144f   :  { %v3916_v56 = vadd.f32 1.0, %v10562_v15  ;;  %10581 = vpow2.f32 %v8164_v10  ;;  %v3840_v0 = vpop.permute.xlu0 %3839  ;;  %v10564_v7 = vpop.eup %10563 }
0x1450   :  { %10583 = vtanh.f32 %v3870_v33  ;;  %v3872_v3 = vadd.f32 %v3840_v0, %v11752_v63  ;;  %v3838_v20 = vpop.permute.xlu1 %3837  ;;  %v10566_v45 = vpop.eup %10565 }
0x1451   :  { %10585 = vrcp.f32 %v3916_v56  ;;  %v10568_v9 = vpop.eup %10567  ;;  %v3915_v60 = vadd.f32 1.0, %v10566_v45  ;;  %v3871_v18 = vadd.f32 %v3838_v20, %v11754_v19 }
0x1452   :  { %10587 = vtanh.f32 %v3869_v4  ;;  %v10570_v57 = vpop.eup %10569 }
0x1453   :  { %10589 = vtanh.f32 %v3872_v3  ;;  %v10572_v47 = vpop.eup %10571  ;;  %v3956_v31 = vpop.permute.xlu0 %3955  ;;  %v3918_v5 = vadd.f32 1.0, %v10570_v57 }
0x1454   :  { %10591 = vrcp.f32 %v3915_v60  ;;  %v10574_v50 = vpop.eup %10573  ;;  %v3954_v54 = vpop.permute.xlu1 %3953 }
0x1455   :  { %10593 = vrcp.f32 %v3911_v42  ;;  %v3917_v29 = vadd.f32 1.0, %v10574_v50 }
0x1456   :  { %v10576_v39 = vpop.eup %10575  ;;  %10595 = vtanh.f32 %v3871_v18 }
0x1457   :  { %v10578_v62 = vpop.eup %10577  ;;  %v3960_v43 = vpop.permute.xlu0 %3959  ;;  %v3920_v58 = vadd.f32 1.0, %v10576_v39  ;;  %10597 = vrcp.f32 %v3918_v5  ;;  %v220_v5 = vld [vmem:[%s13672_s26 + $0x20] sm:$0xff] }
0x1458   :  { %v10580_v63 = vpop.eup %10579  ;;  %v3966_v26 = vmul.f32 %v10578_v62, %v3956_v31  ;;  %10599 = vrcp.f32 %v3917_v29  ;;  %v3958_v10 = vpop.permute.xlu1 %3957  ;;  %v224_v29 = vld [vmem:[%s13672_s26 + $0x40] sm:$0xff] }
0x1459   :  { %v10582_v21 = vpop.eup %10581  ;;  %v3965_v19 = vmul.f32 %v10580_v63, %v3954_v54 }
0x145a   :  { %v10584_v40 = vpop.eup %10583  ;;  %v3919_v17 = vadd.f32 1.0, %v10582_v21  ;;  %v218_v21 = vld [vmem:[%s13672_s26 + $0x10] sm:$0xff] }
0x145b   :  { %v10586_v13 = vpop.eup %10585  ;;  %v3970_v51 = vmul.f32 %v10584_v40, %v10564_v7  ;;  %v223_v40 = vld [vmem:[%s13672_s26 + $0x38] sm:$0xff] }
0x145c   :  { %v10588_v14 = vpop.eup %10587  ;;  %v3968_v49 = vmul.f32 %v10586_v13, %v3960_v43  ;;  %v225_v13 = vld [vmem:[%s13672_s26 + $0x48] sm:$0xff]  ;;  %v228_v43 = vld [vmem:[%s13672_s26 + $0x60] sm:$0xff] }
0x145d   :  { %v10590_v48 = vpop.eup %10589  ;;  %v3974_v27 = vadd.f32 %v3970_v51, %v3966_v26  ;;  %v3969_v11 = vmul.f32 %v10588_v14, %v10568_v9  ;;  %v222_v26 = vld [vmem:[%s13672_s26 + $0x30] sm:$0xff]  ;;  %v229_v14 = vld [vmem:[%s13672_s26 + $0x68] sm:$0xff] }
0x145e   :  { %v10592_v36 = vpop.eup %10591  ;;  %v3972_v30 = vmul.f32 %v10590_v48, %v10572_v47  ;;  %v226_v51 = vld [vmem:[%s13672_s26 + $0x50] sm:$0xff]  ;;  %v9311_v48 = vpop.f32.mrb[74].mxu0 }
0x145f   :  { %v10594_v59 = vpop.eup %10593  ;;  %10601 = vtanh.f32 %v3974_v27  ;;  %v3973_v32 = vadd.f32 %v3969_v11, %v3965_v19  ;;  %v3967_v33 = vmul.f32 %v10592_v36, %v3958_v10  ;;  %v227_v19 = vld [vmem:[%s13672_s26 + $0x58] sm:$0xff]  ;;  %v4401_v27 = vpop.f32.mrb[75].mxu0 }
0x1460   :  { %v10596_v24 = vpop.eup %10595  ;;  %10603 = vrcp.f32 %v3920_v58  ;;  %v3976_v15 = vadd.f32 %v3972_v30, %v3968_v49  ;;  %v230_v58 = vld [vmem:[%s13672_s26 + $0x70] sm:$0xff]  ;;  %v231_v49 = vld [vmem:[%s13672_s26 + $0x78] sm:$0xff]  ;;  %v9314_v11 = vpop.f32.mrb[76].mxu0 }
0x1461   :  { %10605 = vtanh.f32 %v3973_v32  ;;  %v3971_v4 = vmul.f32 %v10596_v24, %v10594_v59  ;;  %v10598_v0 = vpop.eup %10597  ;;  %v4411_v36 = vpop.f32.mrb[77].mxu0 }
0x1462   :  { %10607 = vtanh.f32 %v3976_v15  ;;  %v10600_v7 = vpop.eup %10599  ;;  %v9317_v30 = vpop.f32.mrb[78].mxu0 }
0x1463   :  { %v3975_v56 = vadd.f32 %v3971_v4, %v3967_v33  ;;  %10609 = vrcp.f32 %v3919_v17  ;;  %v4421_v10 = vpop.f32.mrb[79].mxu0 }
0x1464   :  { %v9320_v59 = vpop.f32.mrb[80].mxu0 }
0x1465   :  { %10611 = vtanh.f32 %v3975_v56  ;;  %v4431_v32 = vpop.f32.mrb[81].mxu0 }
0x1466   :  { %v12583_v33 = vpop.f32.mrb[82].mxu0 }
0x1467   :  { %v12585_v24 = vpop.f32.mrb[83].mxu0 }
0x1469   :  { %v10602_v3 = vpop.eup %10601 }
0x146a   :  { %v10604_v20 = vpop.eup %10603  ;;  %v3982_v45 = vmul.f32 %v10602_v3, %v10598_v0  ;;  %v4022_v3 = vpop.permute.xlu0 %4021 }
0x146b   :  { %v10606_v42 = vpop.eup %10605 }
0x146c   :  { %v10608_v9 = vpop.eup %10607  ;;  %v3981_v60 = vmul.f32 %v10606_v42, %v10600_v7  ;;  %v4011_v18 = vsel %vm4009_vm14, %v12355_v2, %v3982_v45 }
0x146d   :  { %v3984_v57 = vmul.f32 %v10608_v9, %v10604_v20  ;;  %v10610_v47 = vpop.eup %10609  ;;  %v4017_v20 = vpop.permute.xlu1 %4016 }
0x146e   :  { %v4010_v50 = vsel %vm4009_vm14, %v12359_v12, %v3981_v60  ;;  %v217_v12 = vld [vmem:[%s13672_s26 + $0x8] sm:$0xff]  ;;  %v4042_v45 = vpop.permute.xlu0 %4041 }
0x146f   :  { %v10612_v31 = vpop.eup %10611  ;;  %v9771_v39 = vpack.c.bf16 %v4011_v18, %v4010_v50  ;;  %v4013_v63 = vsel %vm4009_vm14, %v12363_v34, %v3984_v57  ;;  %v219_v34 = vld [vmem:[%s13672_s26 + $0x18] sm:$0xff] }
0x1470   :  { %v3983_v62 = vmul.f32 %v10612_v31, %v10610_v47 }
0x1471   :  { %9772 = vmatprep.subr.bf16.mxu1 %v9771_v39  ;;  %v4037_v42 = vpop.permute.xlu1 %4036 }
0x1472   :  { %9774 = vmatpush3.bf16.msra.mxu1 %v9771_v39  ;;  %v4012_v2 = vsel %vm4009_vm14, %v12368_v6, %v3983_v62  ;;  %v221_v6 = vld [vmem:[%s13672_s26 + $0x28] sm:$0xff]  ;;  %v4032_v9 = vpop.permute.xlu0 %4031 }
0x1473   :  { %v9775_v54 = vpack.c.bf16 %v4013_v63, %v4012_v2 }
0x1475   :  { %9776 = vmatprep.subr.bf16.mxu1 %v9775_v54  ;;  %v4027_v60 = vpop.permute.xlu1 %4026 }
0x1476   :  { %9778 = vmatpush3.bf16.msra.mxu1 %v9775_v54  ;;  %v4052_v50 = vpop.permute.xlu0 %4051 }
0x1479   :  { %9284 = vmatmul.mubr.msk.f32.vlgmr.msra.gmra.mrb[80].mxu1 %vm727_vm8, %v217_v12  ;;  %v4047_v39 = vpop.permute.xlu1 %4046 }
0x147a   :  { %9286 = vmatprep.mubr.msk.f32.mxu1 %vm727_vm8, %v218_v21 }
0x147d   :  { %9287 = vmatmul.mubr.msk.f32.gmra.mrb[82].mxu1 %vm727_vm8, %v219_v34 }
0x147e   :  { %9289 = vmatprep.mubr.msk.f32.mxu1 %vm727_vm8, %v220_v5 }
0x1481   :  { %9290 = vmatmul.mubr.msk.f32.gmra.mrb[84].mxu1 %vm727_vm8, %v221_v6 }
0x1482   :  { %9292 = vmatprep.mubr.msk.f32.mxu1 %vm727_vm8, %v222_v26  ;;  %v4062_v26 = vpop.permute.xlu0 %4061 }
0x1485   :  { %9293 = vmatmul.mubr.msk.f32.gmra.mrb[86].mxu1 %vm727_vm8, %v223_v40 }
0x1486   :  { %9295 = vmatprep.mubr.msk.f32.mxu1 %vm727_vm8, %v224_v29  ;;  %v4057_v29 = vpop.permute.xlu1 %4056 }
0x1489   :  { %9296 = vmatmul.mubr.msk.f32.gmra.mrb[88].mxu1 %vm727_vm8, %v225_v13 }
0x148a   :  { %9298 = vmatprep.mubr.msk.f32.mxu1 %vm727_vm8, %v226_v51 }
0x148d   :  { %9299 = vmatmul.mubr.msk.f32.gmra.mrb[90].mxu1 %vm727_vm8, %v227_v19 }
0x148e   :  { %9301 = vmatprep.mubr.msk.f32.mxu1 %vm727_vm8, %v228_v43 }
0x1491   :  { %9302 = vmatmul.mubr.msk.f32.gmra.mrb[92].mxu1 %vm727_vm8, %v229_v14 }
0x1492   :  { %9304 = vmatprep.mubr.msk.f32.mxu1 %vm727_vm8, %v230_v58 }
0x1495   :  { %9305 = vmatmul.mubr.msk.f32.gmra.mrb[94].mxu1 %vm727_vm8, %v231_v49 }
0x1496   :  { %9341 = vmatprep.mubr.msk.f32.mxu1 %vm727_vm8, %v12440_v37  ;;  %v12587_v17 = vpop.f32.mrb[84].mxu0 }
0x1497   :  { %v12589_v15 = vpop.f32.mrb[85].mxu0 }
0x149a   :  { %v12591_v4 = vpop.f32.mrb[86].mxu0 }
0x149b   :  { %v12593_v56 = vpop.f32.mrb[87].mxu0 }
0x149e   :  { %v12595_v0 = vpop.f32.mrb[88].mxu0 }
0x149f   :  { %v12597_v7 = vpop.f32.mrb[89].mxu0 }
0x154c   :  { %v9285_v18 = vpop.f32.mrb[80].mxu1 }
0x154d   :  { %v12599_v57 = vadd.f32 %v9285_v18, %v4022_v3  ;;  %v4208_v47 = vpop.f32.mrb[81].mxu1  ;;  %v4077_v18 = vpop.permute.xlu1 %4076 }
0x154e   :  { %v12601_v31 = vadd.f32 %v4208_v47, %v4017_v20  ;;  %v4082_v20 = vpop.permute.xlu0 %4081 }
0x154f   :  { %v4481_v62 = vadd.f32 %v9311_v48, %v12599_v57 }
0x1550   :  { %v4480_v63 = vadd.f32 %v4401_v27, %v12601_v31  ;;  %v9288_v2 = vpop.f32.mrb[82].mxu1 }
0x1551   :  { %v8199_v54 = vmul.f32 -1.442695, %v4481_v62  ;;  %v12605_v12 = vadd.f32 %v9288_v2, %v4032_v9  ;;  %v4218_v21 = vpop.f32.mrb[83].mxu1 }
0x1552   :  { %v8198_v34 = vmul.f32 -1.442695, %v4480_v63  ;;  %v12607_v5 = vadd.f32 %v4218_v21, %v4027_v60 }
0x1553   :  { %10613 = vpow2.f32 %v8199_v54  ;;  %v4483_v6 = vadd.f32 %v9314_v11, %v12605_v12 }
0x1554   :  { %10615 = vpow2.f32 %v8198_v34  ;;  %v9291_v40 = vpop.f32.mrb[84].mxu1  ;;  %v4482_v43 = vadd.f32 %v4411_v36, %v12607_v5  ;;  %v4072_v34 = vpop.permute.xlu0 %4071 }
0x1555   :  { %v8201_v13 = vmul.f32 -1.442695, %v4483_v6  ;;  %v12610_v51 = vadd.f32 %v9291_v40, %v4042_v45  ;;  %v4228_v19 = vpop.f32.mrb[85].mxu1 }
0x1556   :  { %v12613_v14 = vadd.f32 %v4228_v19, %v4037_v42  ;;  %v8200_v9 = vmul.f32 -1.442695, %v4482_v43 }
0x1557   :  { %10617 = vpow2.f32 %v8201_v13  ;;  %v4485_v58 = vadd.f32 %v9317_v30, %v12610_v51 }
0x1558   :  { %v4484_v49 = vadd.f32 %v4421_v10, %v12613_v14  ;;  %v9294_v48 = vpop.f32.mrb[86].mxu1 }
0x1559   :  { %v8203_v27 = vmul.f32 -1.442695, %v4485_v58  ;;  %v12617_v11 = vadd.f32 %v9294_v48, %v4052_v50  ;;  %v4238_v3 = vpop.f32.mrb[87].mxu1 }
0x155a   :  { %v8202_v60 = vmul.f32 -1.442695, %v4484_v49  ;;  %v12619_v45 = vadd.f32 %v4238_v3, %v4047_v39 }
0x155b   :  { %10619 = vpow2.f32 %v8203_v27  ;;  %v4487_v36 = vadd.f32 %v9320_v59, %v12617_v11 }
0x155c   :  { %10621 = vpow2.f32 %v8202_v60  ;;  %v4486_v42 = vadd.f32 %v4431_v32, %v12619_v45  ;;  %v9297_v30 = vpop.f32.mrb[88].mxu1 }
0x155d   :  { %v10614_v47 = vpop.eup %10613  ;;  %v8205_v10 = vmul.f32 -1.442695, %v4487_v36  ;;  %v12623_v62 = vadd.f32 %v9297_v30, %v4062_v26  ;;  %v4248_v50 = vpop.f32.mrb[89].mxu1  ;;  %10623 = vpow2.f32 %v8200_v9 }
0x155e   :  { %v10616_v63 = vpop.eup %10615  ;;  %v4533_v2 = vadd.f32 1.0, %v10614_v47  ;;  %v8204_v54 = vmul.f32 -1.442695, %v4486_v42  ;;  %v12625_v21 = vadd.f32 %v4248_v50, %v4057_v29  ;;  %v4067_v26 = vpop.permute.xlu1 %4066 }
0x155f   :  { %v4532_v39 = vadd.f32 1.0, %v10616_v63  ;;  %10625 = vpow2.f32 %v8205_v10  ;;  %v4489_v59 = vadd.f32 %v12583_v33, %v12623_v62 }
0x1560   :  { %v4488_v32 = vadd.f32 %v12585_v24, %v12625_v21  ;;  %v9300_v6 = vpop.f32.mrb[90].mxu1  ;;  %10627 = vrcp.f32 %v4533_v2 }
0x1561   :  { %v10618_v40 = vpop.eup %10617  ;;  %v8207_v13 = vmul.f32 -1.442695, %v4489_v59  ;;  %v12631_v19 = vadd.f32 %v9300_v6, %v4072_v34  ;;  %v4258_v43 = vpop.f32.mrb[91].mxu1  ;;  %10629 = vpow2.f32 %v8204_v54 }
0x1562   :  { %v4535_v58 = vadd.f32 1.0, %v10618_v40  ;;  %v8206_v29 = vmul.f32 -1.442695, %v4488_v32  ;;  %v12633_v49 = vadd.f32 %v4258_v43, %v4067_v26  ;;  %10631 = vrcp.f32 %v4532_v39  ;;  %v4087_v54 = vpop.permute.xlu1 %4086 }
0x1563   :  { %v4491_v33 = vadd.f32 %v12587_v17, %v12631_v19  ;;  %10633 = vpow2.f32 %v8207_v13 }
0x1564   :  { %v4490_v24 = vadd.f32 %v12589_v15, %v12633_v49  ;;  %v9303_v48 = vpop.f32.mrb[92].mxu1  ;;  %10635 = vrcp.f32 %v4535_v58  ;;  %v4092_v15 = vpop.permute.xlu0 %4091 }
0x1565   :  { %v10620_v27 = vpop.eup %10619  ;;  %v8209_v3 = vmul.f32 -1.442695, %v4491_v33  ;;  %v12639_v9 = vadd.f32 %v9303_v48, %v4082_v20  ;;  %v4268_v60 = vpop.f32.mrb[93].mxu1  ;;  %10637 = vpow2.f32 %v8206_v29 }
0x1566   :  { %v10622_v36 = vpop.eup %10621  ;;  %v4537_v42 = vadd.f32 1.0, %v10620_v27  ;;  %v8208_v30 = vmul.f32 -1.442695, %v4490_v24  ;;  %v12641_v47 = vadd.f32 %v4268_v60, %v4077_v18 }
0x1567   :  { %13674 = vst [vmem:[#allocation34_spill] sm:$0xff] %v12639_v9  ;;  %v4536_v10 = vadd.f32 1.0, %v10622_v36  ;;  %10639 = vpow2.f32 %v8209_v3  ;;  %v4493_v17 = vadd.f32 %v12591_v4, %v12639_v9  ;;  %v10624_v50 = vpop.eup %10623 }
0x1568   :  { %13675 = vst [vmem:[#allocation35_spill] sm:$0xff] %v12641_v47  ;;  %10641 = vrcp.f32 %v4537_v42  ;;  %v9306_v63 = vpop.f32.mrb[94].mxu1  ;;  %v4492_v20 = vadd.f32 %v12593_v56, %v12641_v47  ;;  %v4534_v40 = vadd.f32 1.0, %v10624_v50 }
0x1569   :  { %v10626_v2 = vpop.eup %10625  ;;  %10643 = vrcp.f32 %v4536_v10  ;;  %v12647_v39 = vadd.f32 %v9306_v63, %v4092_v15  ;;  %v4278_v59 = vpop.f32.mrb[95].mxu1 }
0x156a   :  { %v4539_v18 = vadd.f32 1.0, %v10626_v2  ;;  %10645 = vpow2.f32 %v8208_v30  ;;  %v12649_v34 = vadd.f32 %v4278_v59, %v4087_v54  ;;  %v10628_v32 = vpop.eup %10627 }
0x156b   :  { %13676 = vst [vmem:[#allocation36_spill] sm:$0xff] %v12647_v39  ;;  %10647 = vtanh.f32 %v4493_v17  ;;  %v4495_v4 = vadd.f32 %v12595_v0, %v12647_v39  ;;  %v10630_v6 = vpop.eup %10629 }
0x156c   :  { %13677 = vst [vmem:[#allocation37_spill] sm:$0xff] %v12649_v34  ;;  %10649 = vrcp.f32 %v4539_v18  ;;  %v10632_v26 = vpop.eup %10631  ;;  %v4538_v13 = vadd.f32 1.0, %v10630_v6  ;;  %v4494_v56 = vadd.f32 %v12597_v7, %v12649_v34 }
0x156d   :  { %10651 = vtanh.f32 %v4492_v20  ;;  %v10634_v43 = vpop.eup %10633 }
0x156e   :  { %10653 = vtanh.f32 %v4495_v4  ;;  %v10636_v58 = vpop.eup %10635  ;;  %v4541_v60 = vadd.f32 1.0, %v10634_v43 }
0x156f   :  { %10655 = vrcp.f32 %v4538_v13  ;;  %v10638_v29 = vpop.eup %10637 }
0x1570   :  { %10657 = vrcp.f32 %v4534_v40  ;;  %v4540_v7 = vadd.f32 1.0, %v10638_v29 }
0x1571   :  { %v10640_v33 = vpop.eup %10639  ;;  %10659 = vtanh.f32 %v4494_v56 }
0x1572   :  { %v10642_v24 = vpop.eup %10641  ;;  %10661 = vrcp.f32 %v4541_v60  ;;  %v4543_v18 = vadd.f32 1.0, %v10640_v33 }
0x1573   :  { %v10644_v48 = vpop.eup %10643  ;;  %v4573_v27 = vmul.f32 0.0, %v10642_v24 }
0x1574   :  { %v10646_v0 = vpop.eup %10645  ;;  %v4572_v42 = vmul.f32 0.0, %v10644_v48 }
0x1575   :  { %v10648_v3 = vpop.eup %10647 }
0x1576   :  { %v10650_v36 = vpop.eup %10649  ;;  %v4577_v30 = vmul.f32 %v10648_v3, %v10628_v32  ;;  %v4542_v32 = vadd.f32 1.0, %v10646_v0 }
0x1577   :  { %v10652_v10 = vpop.eup %10651  ;;  %v4575_v17 = vmul.f32 0.0, %v10650_v36 }
0x1578   :  { %v10654_v50 = vpop.eup %10653  ;;  %v12655_v15 = vadd.f32 %v4577_v30, %v4573_v27  ;;  %v4576_v63 = vmul.f32 %v10652_v10, %v10632_v26 }
0x1579   :  { %v10656_v2 = vpop.eup %10655  ;;  %v4579_v54 = vmul.f32 %v10654_v50, %v10636_v58 }
0x157a   :  { %v10658_v20 = vpop.eup %10657  ;;  %v4574_v59 = vmul.f32 0.0, %v10656_v2  ;;  %10663 = vtanh.f32 %v12655_v15  ;;  %v12658_v4 = vadd.f32 %v4576_v63, %v4572_v42 }
0x157b   :  { %v10660_v6 = vpop.eup %10659  ;;  %10665 = vrcp.f32 %v4540_v7  ;;  %v12660_v40 = vadd.f32 %v4579_v54, %v4575_v17 }
0x157c   :  { %10667 = vtanh.f32 %v12658_v4  ;;  %v4578_v13 = vmul.f32 %v10660_v6, %v10658_v20  ;;  %v10662_v56 = vpop.eup %10661 }
0x157d   :  { %10669 = vtanh.f32 %v12660_v40 }
0x157e   :  { %10671 = vrcp.f32 %v4543_v18  ;;  %v12664_v26 = vadd.f32 %v4578_v13, %v4574_v59 }
0x157f   :  { %10673 = vrcp.f32 %v4542_v32 }
0x1580   :  { %10675 = vtanh.f32 %v12664_v26 }
0x1584   :  { %v10664_v43 = vpop.eup %10663 }
0x1585   :  { %v10666_v58 = vpop.eup %10665  ;;  %v12667_v29 = vmul.f32 %v10664_v43, %v10662_v56 }
0x1586   :  { %v10668_v33 = vpop.eup %10667 }
0x1587   :  { %v10670_v24 = vpop.eup %10669  ;;  %v12669_v48 = vmul.f32 %v10668_v33, %v10666_v58 }
0x1588   :  { %v10672_v0 = vpop.eup %10671 }
0x1589   :  { %v10674_v27 = vpop.eup %10673  ;;  %v9779_v3 = vpack.c.bf16 %v12667_v29, %v12669_v48  ;;  %v12673_v60 = vmul.f32 %v10672_v0, %v10670_v24 }
0x158a   :  { %v10676_v36 = vpop.eup %10675 }
0x158b   :  { %9780 = vmatprep.subr.bf16.mxu1 %v9779_v3  ;;  %v12675_v42 = vmul.f32 %v10676_v36, %v10674_v27 }
0x158c   :  { %9782 = vmatpush3.bf16.msra.mxu1 %v9779_v3 }
0x158d   :  { %v9783_v30 = vpack.c.bf16 %v12673_v60, %v12675_v42 }
0x158f   :  { %9784 = vmatprep.subr.bf16.mxu1 %v9783_v30 }
0x1590   :  { %9786 = vmatpush3.bf16.msra.mxu1 %v9783_v30 }
0x1593   :  { %9342 = vmatmul.mubr.msk.f32.vlgmr.msra.gmra.mrb[96].mxu1 %vm727_vm8, %v12445_v41 }
0x1594   :  { %9344 = vmatprep.mubr.msk.f32.mxu1 %vm727_vm8, %v12452_v52 }
0x1597   :  { %9345 = vmatmul.mubr.msk.f32.gmra.mrb[98].mxu1 %vm727_vm8, %v12457_v8 }
0x1598   :  { %9347 = vmatprep.mubr.msk.f32.mxu1 %vm727_vm8, %v12464_v22 }
0x159b   :  { %9348 = vmatmul.mubr.msk.f32.gmra.mrb[100].mxu1 %vm727_vm8, %v12469_v55 }
0x159c   :  { %9350 = vmatprep.mubr.msk.f32.mxu1 %vm727_vm8, %v12476_v53 }
0x159f   :  { %9351 = vmatmul.mubr.msk.f32.gmra.mrb[102].mxu1 %vm727_vm8, %v12481_v44 }
0x15a0   :  { %9353 = vmatprep.mubr.msk.f32.mxu1 %vm727_vm8, %v12486_v61 }
0x15a3   :  { %9354 = vmatmul.mubr.msk.f32.gmra.mrb[104].mxu1 %vm727_vm8, %v12491_v38 }
0x15a4   :  { %9356 = vmatprep.mubr.msk.f32.mxu1 %vm727_vm8, %v12496_v28 }
0x15a7   :  { %9357 = vmatmul.mubr.msk.f32.gmra.mrb[106].mxu1 %vm727_vm8, %v12501_v1 }
0x15a8   :  { %9359 = vmatprep.mubr.msk.f32.mxu1 %vm727_vm8, %v12506_v46 }
0x15ab   :  { %9360 = vmatmul.mubr.msk.f32.gmra.mrb[108].mxu1 %vm727_vm8, %v12511_v25 }
0x15ac   :  { %9362 = vmatprep.mubr.msk.f32.mxu1 %vm727_vm8, %v12516_v35 }
0x15af   :  { %9363 = vmatmul.mubr.msk.f32.gmra.mrb[110].mxu1 %vm727_vm8, %v12521_v23 }
0x15b0   :  { %9405 = vmatprep.mubr.msk.f32.mxu1 %vm727_vm8, %v12440_v37 }
0x1666   :  { %v9343_v41 = vpop.f32.mrb[96].mxu1 }
0x1667   :  { %4755 = vrot.lane.b32.xlu0 %v9343_v41, %s11236_s14  ;;  %v4658_v52 = vpop.f32.mrb[97].mxu1 }
0x1668   :  { %4753 = vrot.lane.b32.xlu1 %v4658_v52, %s11236_s14 }
0x166a   :  { %v9346_v8 = vpop.f32.mrb[98].mxu1 }
0x166b   :  { %4759 = vrot.lane.b32.xlu0 %v9346_v8, %s11236_s14  ;;  %v4668_v22 = vpop.f32.mrb[99].mxu1 }
0x166c   :  { %4757 = vrot.lane.b32.xlu1 %v4668_v22, %s11236_s14 }
0x166e   :  { %v9349_v55 = vpop.f32.mrb[100].mxu1 }
0x166f   :  { %4763 = vrot.lane.b32.xlu0 %v9349_v55, %s11236_s14  ;;  %v4678_v53 = vpop.f32.mrb[101].mxu1 }
0x1670   :  { %4761 = vrot.lane.b32.xlu1 %v4678_v53, %s11236_s14 }
0x1672   :  { %v9352_v44 = vpop.f32.mrb[102].mxu1 }
0x1673   :  { %4767 = vrot.lane.b32.xlu0 %v9352_v44, %s11236_s14  ;;  %v4688_v37 = vpop.f32.mrb[103].mxu1 }
0x1674   :  { %4765 = vrot.lane.b32.xlu1 %v4688_v37, %s11236_s14 }
0x1676   :  { %v9355_v61 = vpop.f32.mrb[104].mxu1 }
0x1677   :  { %4771 = vrot.lane.b32.xlu0 %v9355_v61, %s11236_s14  ;;  %v4698_v38 = vpop.f32.mrb[105].mxu1 }
0x1678   :  { %4769 = vrot.lane.b32.xlu1 %v4698_v38, %s11236_s14 }
0x167a   :  { %v9358_v28 = vpop.f32.mrb[106].mxu1 }
0x167b   :  { %4775 = vrot.lane.b32.xlu0 %v9358_v28, %s11236_s14  ;;  %v4708_v1 = vpop.f32.mrb[107].mxu1 }
0x167c   :  { %4773 = vrot.lane.b32.xlu1 %v4708_v1, %s11236_s14 }
0x167e   :  { %v9361_v46 = vpop.f32.mrb[108].mxu1 }
0x167f   :  { %4779 = vrot.lane.b32.xlu0 %v9361_v46, %s11236_s14  ;;  %v4718_v25 = vpop.f32.mrb[109].mxu1 }
0x1680   :  { %4777 = vrot.lane.b32.xlu1 %v4718_v25, %s11236_s14 }
0x1682   :  { %v9364_v35 = vpop.f32.mrb[110].mxu1 }
0x1683   :  { %4783 = vrot.lane.b32.xlu0 %v9364_v35, %s11236_s14  ;;  %v4728_v23 = vpop.f32.mrb[111].mxu1 }
0x1684   :  { %4781 = vrot.lane.b32.xlu1 %v4728_v23, %s11236_s14 }
0x1687   :  { %4899 = vrot.lane.b32.xlu0 %v12655_v15, %s11236_s14 }
0x1688   :  { %4897 = vrot.lane.b32.xlu1 %v12658_v4, %s11236_s14 }
0x168b   :  { %4903 = vrot.lane.b32.xlu0 %v12660_v40, %s11236_s14 }
0x168c   :  { %4901 = vrot.lane.b32.xlu1 %v12664_v26, %s11236_s14 }
0x16d9   :  { %v4756_v10 = vpop.permute.xlu0 %4755 }
0x16da   :  { %v4802_v17 = vadd.f32 %v4756_v10, %v12599_v57  ;;  %v4754_v7 = vpop.permute.xlu1 %4753 }
0x16db   :  { %v4801_v50 = vadd.f32 %v4754_v7, %v12601_v31 }
0x16dc   :  { %v8227_v63 = vmul.f32 -1.442695, %v4802_v17 }
0x16dd   :  { %v8226_v2 = vmul.f32 -1.442695, %v4801_v50  ;;  %v4760_v54 = vpop.permute.xlu0 %4759 }
0x16de   :  { %10677 = vpow2.f32 %v8227_v63  ;;  %v4804_v15 = vadd.f32 %v4760_v54, %v12605_v12  ;;  %v4758_v20 = vpop.permute.xlu1 %4757 }
0x16df   :  { %10679 = vpow2.f32 %v8226_v2  ;;  %v4803_v18 = vadd.f32 %v4758_v20, %v12607_v5 }
0x16e0   :  { %v8229_v59 = vmul.f32 -1.442695, %v4804_v15 }
0x16e1   :  { %v4764_v4 = vpop.permute.xlu0 %4763  ;;  %v8228_v26 = vmul.f32 -1.442695, %v4803_v18 }
0x16e2   :  { %10681 = vpow2.f32 %v8229_v59  ;;  %v4806_v6 = vadd.f32 %v4764_v4, %v12610_v51  ;;  %v4762_v32 = vpop.permute.xlu1 %4761 }
0x16e3   :  { %v4805_v40 = vadd.f32 %v4762_v32, %v12613_v14 }
0x16e4   :  { %v8231_v13 = vmul.f32 -1.442695, %v4806_v6 }
0x16e5   :  { %v8230_v56 = vmul.f32 -1.442695, %v4805_v40  ;;  %v4768_v43 = vpop.permute.xlu0 %4767 }
0x16e6   :  { %10683 = vpow2.f32 %v8231_v13  ;;  %v4808_v58 = vadd.f32 %v4768_v43, %v12617_v11  ;;  %v4766_v33 = vpop.permute.xlu1 %4765 }
0x16e7   :  { %10685 = vpow2.f32 %v8230_v56  ;;  %v4807_v24 = vadd.f32 %v4766_v33, %v12619_v45 }
0x16e8   :  { %v10678_v0 = vpop.eup %10677  ;;  %v8233_v27 = vmul.f32 -1.442695, %v4808_v58  ;;  %10687 = vpow2.f32 %v8228_v26 }
0x16e9   :  { %v10680_v3 = vpop.eup %10679  ;;  %v4854_v36 = vadd.f32 1.0, %v10678_v0  ;;  %v8232_v30 = vmul.f32 -1.442695, %v4807_v24  ;;  %v4772_v41 = vpop.permute.xlu0 %4771 }
0x16ea   :  { %v4853_v52 = vadd.f32 1.0, %v10680_v3  ;;  %10689 = vpow2.f32 %v8233_v27  ;;  %v4810_v8 = vadd.f32 %v4772_v41, %v12623_v62  ;;  %v4770_v22 = vpop.permute.xlu1 %4769 }
0x16eb   :  { %v4809_v55 = vadd.f32 %v4770_v22, %v12625_v21  ;;  %10691 = vrcp.f32 %v4854_v36 }
0x16ec   :  { %v10682_v53 = vpop.eup %10681  ;;  %v8235_v44 = vmul.f32 -1.442695, %v4810_v8  ;;  %10693 = vpow2.f32 %v8232_v30 }
0x16ed   :  { %v4856_v37 = vadd.f32 1.0, %v10682_v53  ;;  %v8234_v61 = vmul.f32 -1.442695, %v4809_v55  ;;  %v4776_v38 = vpop.permute.xlu0 %4775  ;;  %10695 = vrcp.f32 %v4853_v52 }
0x16ee   :  { %v4812_v28 = vadd.f32 %v4776_v38, %v12631_v19  ;;  %v4774_v1 = vpop.permute.xlu1 %4773  ;;  %10697 = vpow2.f32 %v8235_v44 }
0x16ef   :  { %v4811_v46 = vadd.f32 %v4774_v1, %v12633_v49  ;;  %10699 = vrcp.f32 %v4856_v37 }
0x16f0   :  { %v10684_v25 = vpop.eup %10683  ;;  %v8237_v35 = vmul.f32 -1.442695, %v4812_v28  ;;  %10701 = vpow2.f32 %v8234_v61 }
0x16f1   :  { %v10686_v23 = vpop.eup %10685  ;;  %v4858_v10 = vadd.f32 1.0, %v10684_v25  ;;  %v8236_v17 = vmul.f32 -1.442695, %v4811_v46  ;;  %v4780_v7 = vpop.permute.xlu0 %4779 }
0x16f2   :  { %v4857_v50 = vadd.f32 1.0, %v10686_v23  ;;  %10703 = vpow2.f32 %v8237_v35  ;;  %v4814_v63 = vadd.f32 %v4780_v7, %v12639_v9  ;;  %v4778_v2 = vpop.permute.xlu1 %4777  ;;  %v10688_v54 = vpop.eup %10687 }
0x16f3   :  { %10705 = vrcp.f32 %v4858_v10  ;;  %v4813_v20 = vadd.f32 %v4778_v2, %v12641_v47  ;;  %v4855_v13 = vadd.f32 1.0, %v10688_v54 }
0x16f4   :  { %v10690_v15 = vpop.eup %10689  ;;  %10707 = vrcp.f32 %v4857_v50 }
0x16f5   :  { %v4860_v59 = vadd.f32 1.0, %v10690_v15  ;;  %10709 = vpow2.f32 %v8236_v17  ;;  %v4784_v18 = vpop.permute.xlu0 %4783  ;;  %v10692_v4 = vpop.eup %10691 }
0x16f6   :  { %10711 = vtanh.f32 %v4814_v63  ;;  %v4816_v6 = vadd.f32 %v4784_v18, %v12647_v39  ;;  %v4782_v32 = vpop.permute.xlu1 %4781  ;;  %v10694_v40 = vpop.eup %10693 }
0x16f7   :  { %10713 = vrcp.f32 %v4860_v59  ;;  %v10696_v26 = vpop.eup %10695  ;;  %v4859_v56 = vadd.f32 1.0, %v10694_v40  ;;  %v4815_v43 = vadd.f32 %v4782_v32, %v12649_v34 }
0x16f8   :  { %10715 = vtanh.f32 %v4813_v20  ;;  %v10698_v58 = vpop.eup %10697 }
0x16f9   :  { %10717 = vtanh.f32 %v4816_v6  ;;  %v10700_v33 = vpop.eup %10699  ;;  %v4900_v0 = vpop.permute.xlu0 %4899  ;;  %v4862_v22 = vadd.f32 1.0, %v10698_v58 }
0x16fa   :  { %10719 = vrcp.f32 %v4859_v56  ;;  %v10702_v24 = vpop.eup %10701  ;;  %v4898_v30 = vpop.permute.xlu1 %4897 }
0x16fb   :  { %10721 = vrcp.f32 %v4855_v13  ;;  %v4861_v38 = vadd.f32 1.0, %v10702_v24 }
0x16fc   :  { %v10704_v27 = vpop.eup %10703  ;;  %10723 = vtanh.f32 %v4815_v43 }
0x16fd   :  { %v10706_v3 = vpop.eup %10705  ;;  %v4904_v37 = vpop.permute.xlu0 %4903  ;;  %10725 = vrcp.f32 %v4862_v22  ;;  %v4864_v7 = vadd.f32 1.0, %v10704_v27 }
0x16fe   :  { %v10708_v36 = vpop.eup %10707  ;;  %v4910_v52 = vmul.f32 %v10706_v3, %v4900_v0  ;;  %v4902_v10 = vpop.permute.xlu1 %4901 }
0x16ff   :  { %v10710_v41 = vpop.eup %10709  ;;  %v4909_v44 = vmul.f32 %v10708_v36, %v4898_v30 }
0x1700   :  { %v10712_v8 = vpop.eup %10711  ;;  %v4863_v54 = vadd.f32 1.0, %v10710_v41 }
0x1701   :  { %v10714_v55 = vpop.eup %10713  ;;  %v4914_v53 = vmul.f32 %v10712_v8, %v10692_v4 }
0x1702   :  { %v10716_v61 = vpop.eup %10715  ;;  %v4912_v28 = vmul.f32 %v10714_v55, %v4904_v37  ;;  %v12788_v37 = vld [vmem:[%s13673_s28 + $0x18] sm:$0xff] }
0x1703   :  { %v10718_v1 = vpop.eup %10717  ;;  %v12751_v46 = vadd.f32 %v4914_v53, %v4910_v52  ;;  %v4913_v25 = vmul.f32 %v10716_v61, %v10696_v26  ;;  %v12778_v53 = vld [vmem:[%s13673_s28 + $0x8] sm:$0xff]  ;;  %v12793_v61 = vld [vmem:[%s13673_s28 + $0x20] sm:$0xff] }
0x1704   :  { %v10720_v35 = vpop.eup %10719  ;;  %v4916_v23 = vmul.f32 %v10718_v1, %v10700_v33  ;;  %v12808_v1 = vld [vmem:[%s13673_s28 + $0x38] sm:$0xff] }
0x1705   :  { %v10722_v17 = vpop.eup %10721  ;;  %10727 = vtanh.f32 %v12751_v46  ;;  %v12754_v50 = vadd.f32 %v4913_v25, %v4909_v44  ;;  %v4911_v63 = vmul.f32 %v10720_v35, %v4902_v10  ;;  %v12783_v44 = vld [vmem:[%s13673_s28 + $0x10] sm:$0xff]  ;;  %v12813_v25 = vld [vmem:[%s13673_s28 + $0x40] sm:$0xff]  ;;  %v12818_v35 = vld [vmem:[%s13673_s28 + $0x48] sm:$0xff] }
0x1706   :  { %v10724_v2 = vpop.eup %10723  ;;  %10729 = vrcp.f32 %v4861_v38  ;;  %v12756_v15 = vadd.f32 %v4916_v23, %v4912_v28  ;;  %v12798_v38 = vld [vmem:[%s13673_s28 + $0x28] sm:$0xff]  ;;  %v12803_v28 = vld [vmem:[%s13673_s28 + $0x30] sm:$0xff]  ;;  %v12828_v10 = vld [vmem:[%s13673_s28 + $0x58] sm:$0xff] }
0x1707   :  { %10731 = vtanh.f32 %v12754_v50  ;;  %v4915_v20 = vmul.f32 %v10724_v2, %v10722_v17  ;;  %v10726_v18 = vpop.eup %10725  ;;  %v12823_v23 = vld [vmem:[%s13673_s28 + $0x50] sm:$0xff]  ;;  %v12833_v17 = vld [vmem:[%s13673_s28 + $0x60] sm:$0xff]  ;;  %v12848_v2 = vld [vmem:[%s13673_s28 + $0x78] sm:$0xff] }
0x1708   :  { %10733 = vtanh.f32 %v12756_v15 }
0x1709   :  { %10735 = vrcp.f32 %v4864_v7  ;;  %v12760_v59 = vadd.f32 %v4915_v20, %v4911_v63  ;;  %v12838_v7 = vld [vmem:[%s13673_s28 + $0x68] sm:$0xff]  ;;  %v12843_v63 = vld [vmem:[%s13673_s28 + $0x70] sm:$0xff] }
0x170a   :  { %10737 = vrcp.f32 %v4863_v54  ;;  %v12853_v54 = vld [vmem:[%s13673_s28] sm:$0xff] }
0x170b   :  { %10739 = vtanh.f32 %v12760_v59 }
0x170f   :  { %v10728_v4 = vpop.eup %10727 }
0x1710   :  { %v10730_v6 = vpop.eup %10729  ;;  %v12763_v32 = vmul.f32 %v10728_v4, %v10726_v18 }
0x1711   :  { %v10732_v40 = vpop.eup %10731 }
0x1712   :  { %v10734_v13 = vpop.eup %10733  ;;  %v12765_v26 = vmul.f32 %v10732_v40, %v10730_v6 }
0x1713   :  { %v10736_v56 = vpop.eup %10735 }
0x1714   :  { %v10738_v43 = vpop.eup %10737  ;;  %v10057_v58 = vpack.i.bf16 %v12763_v32, %v12765_v26  ;;  %v12769_v33 = vmul.f32 %v10736_v56, %v10734_v13 }
0x1715   :  { %v10740_v24 = vpop.eup %10739 }
0x1716   :  { %10058 = vrot.lane.b32.xlu1 %v10057_v58, %s11229_s5  ;;  %v12772_v0 = vmul.f32 %v10740_v24, %v10738_v43 }
0x1718   :  { %v10062_v27 = vpack.i.bf16 %v12769_v33, %v12772_v0 }
0x171a   :  { %10063 = vrot.lane.b32.xlu0 %v10062_v27, %s11229_s5  ;;  %s13707_s5 = sld [smem:[#allocation7_spill]] }
0x1788   :  { %v10059_v3 = vpop.permute.xlu1 %10058 }
0x1789   :  { %v10061_v36 = vunpack.i.h.bf16 %v10059_v3  ;;  %v10060_v30 = vunpack.i.l.bf16 %v10059_v3 }
0x178b   :  { %v9787_v41 = vpack.c.bf16 %v10061_v36, %v10060_v30 }
0x178c   :  { %v10064_v52 = vpop.permute.xlu0 %10063 }
0x178d   :  { %v10066_v8 = vunpack.i.h.bf16 %v10064_v52  ;;  %v10065_v22 = vunpack.i.l.bf16 %v10064_v52  ;;  %9788 = vmatprep.subr.bf16.mxu0 %v9787_v41 }
0x178e   :  { %9790 = vmatpush3.bf16.msra.mxu0 %v9787_v41 }
0x178f   :  { %v9791_v55 = vpack.c.bf16 %v10066_v8, %v10065_v22 }
0x1791   :  { %9792 = vmatprep.subr.bf16.mxu0 %v9791_v55 }
0x1792   :  { %9794 = vmatpush3.bf16.msra.mxu0 %v9791_v55 }
0x1795   :  { %9374 = vmatmul.mubr.msk.f32.vlgmr.msra.gmra.mrb[90].mxu0 %vm727_vm8, %v12778_v53 }
0x1796   :  { %9376 = vmatprep.mubr.msk.f32.mxu0 %vm727_vm8, %v12783_v44 }
0x1799   :  { %9377 = vmatmul.mubr.msk.f32.gmra.mrb[92].mxu0 %vm727_vm8, %v12788_v37 }
0x179a   :  { %9379 = vmatprep.mubr.msk.f32.mxu0 %vm727_vm8, %v12793_v61 }
0x179d   :  { %9380 = vmatmul.mubr.msk.f32.gmra.mrb[94].mxu0 %vm727_vm8, %v12798_v38 }
0x179e   :  { %9382 = vmatprep.mubr.msk.f32.mxu0 %vm727_vm8, %v12803_v28 }
0x17a1   :  { %9383 = vmatmul.mubr.msk.f32.gmra.mrb[96].mxu0 %vm727_vm8, %v12808_v1 }
0x17a2   :  { %9385 = vmatprep.mubr.msk.f32.mxu0 %vm727_vm8, %v12813_v25 }
0x17a5   :  { %9386 = vmatmul.mubr.msk.f32.gmra.mrb[98].mxu0 %vm727_vm8, %v12818_v35 }
0x17a6   :  { %9388 = vmatprep.mubr.msk.f32.mxu0 %vm727_vm8, %v12823_v23 }
0x17a9   :  { %9389 = vmatmul.mubr.msk.f32.gmra.mrb[100].mxu0 %vm727_vm8, %v12828_v10 }
0x17aa   :  { %9391 = vmatprep.mubr.msk.f32.mxu0 %vm727_vm8, %v12833_v17 }
0x17ad   :  { %9392 = vmatmul.mubr.msk.f32.gmra.mrb[102].mxu0 %vm727_vm8, %v12838_v7 }
0x17ae   :  { %9394 = vmatprep.mubr.msk.f32.mxu0 %vm727_vm8, %v12843_v63 }
0x17b1   :  { %9395 = vmatmul.mubr.msk.f32.gmra.mrb[104].mxu0 %vm727_vm8, %v12848_v2 }
0x17b2   :  { %9437 = vmatprep.mubr.msk.f32.mxu0 %vm727_vm8, %v12853_v54 }
0x1868   :  { %v9375_v20 = vpop.f32.mrb[90].mxu0 }
0x1869   :  { %5108 = vrot.lane.b32.xlu0 %v9375_v20, %s11237_s19  ;;  %v5011_v18 = vpop.f32.mrb[91].mxu0 }
0x186a   :  { %5106 = vrot.lane.b32.xlu1 %v5011_v18, %s11237_s19 }
0x186c   :  { %v9378_v4 = vpop.f32.mrb[92].mxu0 }
0x186d   :  { %5112 = vrot.lane.b32.xlu0 %v9378_v4, %s11237_s19  ;;  %v5021_v6 = vpop.f32.mrb[93].mxu0 }
0x186e   :  { %5110 = vrot.lane.b32.xlu1 %v5021_v6, %s11237_s19 }
0x1870   :  { %v9381_v40 = vpop.f32.mrb[94].mxu0 }
0x1871   :  { %5116 = vrot.lane.b32.xlu0 %v9381_v40, %s11237_s19  ;;  %v5031_v13 = vpop.f32.mrb[95].mxu0 }
0x1872   :  { %5114 = vrot.lane.b32.xlu1 %v5031_v13, %s11237_s19 }
0x1874   :  { %v9384_v56 = vpop.f32.mrb[96].mxu0 }
0x1875   :  { %5120 = vrot.lane.b32.xlu0 %v9384_v56, %s11237_s19  ;;  %v5041_v43 = vpop.f32.mrb[97].mxu0 }
0x1876   :  { %5118 = vrot.lane.b32.xlu1 %v5041_v43, %s11237_s19 }
0x1878   :  { %v9387_v58 = vpop.f32.mrb[98].mxu0 }
0x1879   :  { %5124 = vrot.lane.b32.xlu0 %v9387_v58, %s11237_s19  ;;  %v5051_v24 = vpop.f32.mrb[99].mxu0 }
0x187a   :  { %5122 = vrot.lane.b32.xlu1 %v5051_v24, %s11237_s19 }
0x187c   :  { %v9390_v27 = vpop.f32.mrb[100].mxu0 }
0x187d   :  { %5128 = vrot.lane.b32.xlu0 %v9390_v27, %s11237_s19  ;;  %v5061_v3 = vpop.f32.mrb[101].mxu0 }
0x187e   :  { %5126 = vrot.lane.b32.xlu1 %v5061_v3, %s11237_s19 }
0x1880   :  { %v9393_v36 = vpop.f32.mrb[102].mxu0 }
0x1881   :  { %5132 = vrot.lane.b32.xlu0 %v9393_v36, %s11237_s19  ;;  %v5071_v30 = vpop.f32.mrb[103].mxu0 }
0x1882   :  { %5130 = vrot.lane.b32.xlu1 %v5071_v30, %s11237_s19 }
0x1884   :  { %v9396_v41 = vpop.f32.mrb[104].mxu0 }
0x1885   :  { %5136 = vrot.lane.b32.xlu0 %v9396_v41, %s11237_s19  ;;  %v5081_v52 = vpop.f32.mrb[105].mxu0 }
0x1886   :  { %5134 = vrot.lane.b32.xlu1 %v5081_v52, %s11237_s19 }
0x1889   :  { %5252 = vrot.lane.b32.xlu0 %v12751_v46, %s11236_s14 }
0x188a   :  { %5250 = vrot.lane.b32.xlu1 %v12754_v50, %s11236_s14 }
0x188d   :  { %5256 = vrot.lane.b32.xlu0 %v12756_v15, %s11236_s14 }
0x188e   :  { %5254 = vrot.lane.b32.xlu1 %v12760_v59, %s11236_s14 }
0x18db   :  { %v5109_v8 = vpop.permute.xlu0 %5108 }
0x18dc   :  { %v5155_v22 = vadd.f32 %v5109_v8, %v12599_v57  ;;  %v5107_v55 = vpop.permute.xlu1 %5106 }
0x18dd   :  { %v5154_v20 = vadd.f32 %v5107_v55, %v12601_v31 }
0x18de   :  { %v8255_v18 = vmul.f32 -1.442695, %v5155_v22 }
0x18df   :  { %v8254_v4 = vmul.f32 -1.442695, %v5154_v20  ;;  %v5113_v6 = vpop.permute.xlu0 %5112 }
0x18e0   :  { %10741 = vpow2.f32 %v8255_v18  ;;  %v5157_v46 = vadd.f32 %v5113_v6, %v12605_v12  ;;  %v5111_v40 = vpop.permute.xlu1 %5110 }
0x18e1   :  { %10743 = vpow2.f32 %v8254_v4  ;;  %v5156_v15 = vadd.f32 %v5111_v40, %v12607_v5 }
0x18e2   :  { %v8257_v50 = vmul.f32 -1.442695, %v5157_v46 }
0x18e3   :  { %v5117_v13 = vpop.permute.xlu0 %5116  ;;  %v8256_v24 = vmul.f32 -1.442695, %v5156_v15 }
0x18e4   :  { %10745 = vpow2.f32 %v8257_v50  ;;  %v5159_v59 = vadd.f32 %v5117_v13, %v12610_v51  ;;  %v5115_v56 = vpop.permute.xlu1 %5114 }
0x18e5   :  { %v5158_v43 = vadd.f32 %v5115_v56, %v12613_v14 }
0x18e6   :  { %v8259_v58 = vmul.f32 -1.442695, %v5159_v59 }
0x18e7   :  { %v8258_v27 = vmul.f32 -1.442695, %v5158_v43  ;;  %v5121_v3 = vpop.permute.xlu0 %5120 }
0x18e8   :  { %10747 = vpow2.f32 %v8259_v58  ;;  %v5161_v36 = vadd.f32 %v5121_v3, %v12617_v11  ;;  %v5119_v30 = vpop.permute.xlu1 %5118 }
0x18e9   :  { %10749 = vpow2.f32 %v8258_v27  ;;  %v5160_v41 = vadd.f32 %v5119_v30, %v12619_v45 }
0x18ea   :  { %v10742_v52 = vpop.eup %10741  ;;  %v8261_v8 = vmul.f32 -1.442695, %v5161_v36  ;;  %10751 = vpow2.f32 %v8256_v24 }
0x18eb   :  { %v10744_v22 = vpop.eup %10743  ;;  %v5207_v55 = vadd.f32 1.0, %v10742_v52  ;;  %v8260_v20 = vmul.f32 -1.442695, %v5160_v41  ;;  %v5125_v18 = vpop.permute.xlu0 %5124 }
0x18ec   :  { %v5206_v4 = vadd.f32 1.0, %v10744_v22  ;;  %10753 = vpow2.f32 %v8261_v8  ;;  %v5163_v6 = vadd.f32 %v5125_v18, %v12623_v62  ;;  %v5123_v46 = vpop.permute.xlu1 %5122 }
0x18ed   :  { %v5162_v40 = vadd.f32 %v5123_v46, %v12625_v21  ;;  %10755 = vrcp.f32 %v5207_v55 }
0x18ee   :  { %v10746_v50 = vpop.eup %10745  ;;  %v8263_v15 = vmul.f32 -1.442695, %v5163_v6  ;;  %10757 = vpow2.f32 %v8260_v20 }
0x18ef   :  { %v5209_v13 = vadd.f32 1.0, %v10746_v50  ;;  %v8262_v59 = vmul.f32 -1.442695, %v5162_v40  ;;  %v5129_v56 = vpop.permute.xlu0 %5128  ;;  %10759 = vrcp.f32 %v5206_v4 }
0x18f0   :  { %v5165_v43 = vadd.f32 %v5129_v56, %v12631_v19  ;;  %v5127_v58 = vpop.permute.xlu1 %5126  ;;  %10761 = vpow2.f32 %v8263_v15 }
0x18f1   :  { %v5164_v24 = vadd.f32 %v5127_v58, %v12633_v49  ;;  %10763 = vrcp.f32 %v5209_v13 }
0x18f2   :  { %v10748_v27 = vpop.eup %10747  ;;  %v8265_v3 = vmul.f32 -1.442695, %v5165_v43  ;;  %10765 = vpow2.f32 %v8262_v59 }
0x18f3   :  { %v10750_v36 = vpop.eup %10749  ;;  %v5211_v30 = vadd.f32 1.0, %v10748_v27  ;;  %v8264_v41 = vmul.f32 -1.442695, %v5164_v24  ;;  %v5133_v52 = vpop.permute.xlu0 %5132 }
0x18f4   :  { %v5210_v8 = vadd.f32 1.0, %v10750_v36  ;;  %10767 = vpow2.f32 %v8265_v3  ;;  %v5167_v22 = vadd.f32 %v5133_v52, %v12639_v9  ;;  %v5131_v55 = vpop.permute.xlu1 %5130  ;;  %v10752_v20 = vpop.eup %10751 }
0x18f5   :  { %10769 = vrcp.f32 %v5211_v30  ;;  %v5166_v4 = vadd.f32 %v5131_v55, %v12641_v47  ;;  %v5208_v59 = vadd.f32 1.0, %v10752_v20 }
0x18f6   :  { %v10754_v18 = vpop.eup %10753  ;;  %10771 = vrcp.f32 %v5210_v8 }
0x18f7   :  { %v5213_v6 = vadd.f32 1.0, %v10754_v18  ;;  %10773 = vpow2.f32 %v8264_v41  ;;  %v5137_v46 = vpop.permute.xlu0 %5136  ;;  %v10756_v40 = vpop.eup %10755 }
0x18f8   :  { %10775 = vtanh.f32 %v5167_v22  ;;  %v5169_v50 = vadd.f32 %v5137_v46, %v12647_v39  ;;  %v5135_v15 = vpop.permute.xlu1 %5134  ;;  %v10758_v13 = vpop.eup %10757 }
0x18f9   :  { %10777 = vrcp.f32 %v5213_v6  ;;  %v10760_v56 = vpop.eup %10759  ;;  %v5212_v43 = vadd.f32 1.0, %v10758_v13  ;;  %v5168_v58 = vadd.f32 %v5135_v15, %v12649_v34 }
0x18fa   :  { %10779 = vtanh.f32 %v5166_v4  ;;  %v10762_v24 = vpop.eup %10761 }
0x18fb   :  { %10781 = vtanh.f32 %v5169_v50  ;;  %v10764_v27 = vpop.eup %10763  ;;  %v5253_v36 = vpop.permute.xlu0 %5252  ;;  %v5215_v55 = vadd.f32 1.0, %v10762_v24 }
0x18fc   :  { %10783 = vrcp.f32 %v5212_v43  ;;  %v10766_v3 = vpop.eup %10765  ;;  %v5251_v8 = vpop.permute.xlu1 %5250 }
0x18fd   :  { %10785 = vrcp.f32 %v5208_v59  ;;  %v5214_v6 = vadd.f32 1.0, %v10766_v3 }
0x18fe   :  { %v10768_v30 = vpop.eup %10767  ;;  %10787 = vtanh.f32 %v5168_v58 }
0x18ff   :  { %v10770_v41 = vpop.eup %10769  ;;  %v5257_v13 = vpop.permute.xlu0 %5256  ;;  %v5217_v16 = vadd.f32 1.0, %v10768_v30  ;;  %10789 = vrcp.f32 %v5215_v55 }
0x1900   :  { %v10772_v52 = vpop.eup %10771  ;;  %v5263_v20 = vmul.f32 %v10770_v41, %v5253_v36  ;;  %10791 = vrcp.f32 %v5214_v6  ;;  %v5255_v9 = vpop.permute.xlu1 %5254 }
0x1901   :  { %v10774_v22 = vpop.eup %10773  ;;  %v5262_v15 = vmul.f32 %v10772_v52, %v5251_v8 }
0x1902   :  { %v10776_v18 = vpop.eup %10775  ;;  %v5216_v41 = vadd.f32 1.0, %v10774_v22 }
0x1903   :  { %v10778_v4 = vpop.eup %10777  ;;  %v5267_v46 = vmul.f32 %v10776_v18, %v10756_v40  ;;  %v6694_v18 = vsel %vm3985_vm10, %v12669_v48, %v12765_v26  ;;  %v6696_v48 = vsel %vm3985_vm10, %v12675_v42, %v12772_v0 }
0x1904   :  { %v10780_v50 = vpop.eup %10779  ;;  %v5265_v43 = vmul.f32 %v10778_v4, %v5257_v13 }
0x1905   :  { %v10782_v34 = vpop.eup %10781  ;;  %v12897_v59 = vadd.f32 %v5267_v46, %v5263_v20  ;;  %v5266_v58 = vmul.f32 %v10780_v50, %v10760_v56  ;;  %v6697_v46 = vsel %vm3985_vm10, %v12673_v60, %v12769_v33 }
0x1906   :  { %v10784_v39 = vpop.eup %10783  ;;  %v5269_v47 = vmul.f32 %v10782_v34, %v10764_v27 }
0x1907   :  { %v10786_v24 = vpop.eup %10785  ;;  %10793 = vtanh.f32 %v12897_v59  ;;  %v12900_v3 = vadd.f32 %v5266_v58, %v5262_v15  ;;  %v5264_v40 = vmul.f32 %v10784_v39, %v5255_v9 }
0x1908   :  { %v10788_v36 = vpop.eup %10787  ;;  %10795 = vrcp.f32 %v5217_v16  ;;  %v12902_v30 = vadd.f32 %v5269_v47, %v5265_v43  ;;  %v6695_v16 = vsel %vm3985_vm10, %v12667_v29, %v12763_v32 }
0x1909   :  { %10797 = vtanh.f32 %v12900_v3  ;;  %v5268_v52 = vmul.f32 %v10788_v36, %v10786_v24  ;;  %v10790_v34 = vpop.eup %10789 }
0x190a   :  { %10799 = vtanh.f32 %v12902_v30  ;;  %v10792_v27 = vpop.eup %10791 }
0x190b   :  { %v12906_v56 = vadd.f32 %v5268_v52, %v5264_v40  ;;  %10801 = vrcp.f32 %v5216_v41 }
0x190d   :  { %10803 = vtanh.f32 %v12906_v56 }
0x1911   :  { %v10794_v8 = vpop.eup %10793 }
0x1912   :  { %v10796_v55 = vpop.eup %10795  ;;  %v5279_v9 = vmul.f32 %v10794_v8, %v10790_v34 }
0x1913   :  { %v10798_v39 = vpop.eup %10797 }
0x1914   :  { %v10800_v47 = vpop.eup %10799  ;;  %v5278_v22 = vmul.f32 %v10798_v39, %v10792_v27  ;;  %v12913_v20 = vsel %vm3990_vm11, %v6695_v16, %v5279_v9 }
0x1915   :  { %v5281_v6 = vmul.f32 %v10800_v47, %v10796_v55  ;;  %v10802_v4 = vpop.eup %10801 }
0x1916   :  { %v10067_v15 = vpack.i.bf16 %v5279_v9, %v5278_v22  ;;  %v12922_v13 = vsel %vm3990_vm11, %v6694_v18, %v5278_v22 }
0x1917   :  { %v10804_v29 = vpop.eup %10803  ;;  %v12925_v32 = vsel %vm3990_vm11, %v6697_v46, %v5281_v6 }
0x1918   :  { %10068 = vrot.lane.b32.xlu1 %v10067_v15, %s11238_s24  ;;  %v5280_v50 = vmul.f32 %v10804_v29, %v10802_v4 }
0x191a   :  { %v10072_v26 = vpack.i.bf16 %v5281_v6, %v5280_v50  ;;  %v12932_v43 = vsel %vm3990_vm11, %v6696_v48, %v5280_v50 }
0x191c   :  { %10073 = vrot.lane.b32.xlu0 %v10072_v26, %s11238_s24 }
0x198a   :  { %v10069_v60 = vpop.permute.xlu1 %10068 }
0x198b   :  { %v10071_v33 = vunpack.i.h.bf16 %v10069_v60  ;;  %v10070_v58 = vunpack.i.l.bf16 %v10069_v60 }
0x198d   :  { %v9795_v24 = vpack.c.bf16 %v10071_v33, %v10070_v58 }
0x198e   :  { %v10074_v40 = vpop.permute.xlu0 %10073 }
0x198f   :  { %v10076_v36 = vunpack.i.h.bf16 %v10074_v40  ;;  %v10075_v41 = vunpack.i.l.bf16 %v10074_v40  ;;  %9796 = vmatprep.subr.bf16.mxu1 %v9795_v24 }
0x1990   :  { %9798 = vmatpush3.bf16.msra.mxu1 %v9795_v24 }
0x1991   :  { %v9799_v52 = vpack.c.bf16 %v10076_v36, %v10075_v41 }
0x1993   :  { %9800 = vmatprep.subr.bf16.mxu1 %v9799_v52 }
0x1994   :  { %9802 = vmatpush3.bf16.msra.mxu1 %v9799_v52 }
0x1997   :  { %9406 = vmatmul.mubr.msk.f32.vlgmr.msra.gmra.mrb[112].mxu1 %vm727_vm8, %v12778_v53 }
0x1998   :  { %9408 = vmatprep.mubr.msk.f32.mxu1 %vm727_vm8, %v12783_v44 }
0x199b   :  { %9409 = vmatmul.mubr.msk.f32.gmra.mrb[114].mxu1 %vm727_vm8, %v12788_v37 }
0x199c   :  { %9411 = vmatprep.mubr.msk.f32.mxu1 %vm727_vm8, %v12793_v61 }
0x199f   :  { %9412 = vmatmul.mubr.msk.f32.gmra.mrb[116].mxu1 %vm727_vm8, %v12798_v38 }
0x19a0   :  { %9414 = vmatprep.mubr.msk.f32.mxu1 %vm727_vm8, %v12803_v28 }
0x19a3   :  { %9415 = vmatmul.mubr.msk.f32.gmra.mrb[118].mxu1 %vm727_vm8, %v12808_v1 }
0x19a4   :  { %9417 = vmatprep.mubr.msk.f32.mxu1 %vm727_vm8, %v12813_v25 }
0x19a7   :  { %9418 = vmatmul.mubr.msk.f32.gmra.mrb[120].mxu1 %vm727_vm8, %v12818_v35 }
0x19a8   :  { %9420 = vmatprep.mubr.msk.f32.mxu1 %vm727_vm8, %v12823_v23 }
0x19ab   :  { %9421 = vmatmul.mubr.msk.f32.gmra.mrb[122].mxu1 %vm727_vm8, %v12828_v10 }
0x19ac   :  { %9423 = vmatprep.mubr.msk.f32.mxu1 %vm727_vm8, %v12833_v17 }
0x19af   :  { %9424 = vmatmul.mubr.msk.f32.gmra.mrb[124].mxu1 %vm727_vm8, %v12838_v7 }
0x19b0   :  { %9426 = vmatprep.mubr.msk.f32.mxu1 %vm727_vm8, %v12843_v63 }
0x19b3   :  { %9427 = vmatmul.mubr.msk.f32.gmra.mrb[126].mxu1 %vm727_vm8, %v12848_v2 }
0x19b4   :  { %9469 = vmatprep.mubr.msk.f32.mxu1 %vm727_vm8, %v12853_v54 }
0x1a6a   :  { %v9407_v42 = vpop.f32.mrb[112].mxu1 }
0x1a6b   :  { %5461 = vrot.lane.b32.xlu0 %v9407_v42, %s11239_s30  ;;  %v5364_v0 = vpop.f32.mrb[113].mxu1 }
0x1a6c   :  { %5459 = vrot.lane.b32.xlu1 %v5364_v0, %s11239_s30 }
0x1a6e   :  { %v9410_v34 = vpop.f32.mrb[114].mxu1 }
0x1a6f   :  { %5465 = vrot.lane.b32.xlu0 %v9410_v34, %s11239_s30  ;;  %v5374_v27 = vpop.f32.mrb[115].mxu1 }
0x1a70   :  { %5463 = vrot.lane.b32.xlu1 %v5374_v27, %s11239_s30 }
0x1a72   :  { %v9413_v8 = vpop.f32.mrb[116].mxu1 }
0x1a73   :  { %5469 = vrot.lane.b32.xlu0 %v9413_v8, %s11239_s30  ;;  %v5384_v55 = vpop.f32.mrb[117].mxu1 }
0x1a74   :  { %5467 = vrot.lane.b32.xlu1 %v5384_v55, %s11239_s30 }
0x1a76   :  { %v9416_v9 = vpop.f32.mrb[118].mxu1 }
0x1a77   :  { %5473 = vrot.lane.b32.xlu0 %v9416_v9, %s11239_s30  ;;  %v5394_v39 = vpop.f32.mrb[119].mxu1 }
0x1a78   :  { %5471 = vrot.lane.b32.xlu1 %v5394_v39, %s11239_s30 }
0x1a7a   :  { %v9419_v16 = vpop.f32.mrb[120].mxu1 }
0x1a7b   :  { %5477 = vrot.lane.b32.xlu0 %v9419_v16, %s11239_s30  ;;  %v5404_v47 = vpop.f32.mrb[121].mxu1 }
0x1a7c   :  { %5475 = vrot.lane.b32.xlu1 %v5404_v47, %s11239_s30 }
0x1a7e   :  { %v9422_v22 = vpop.f32.mrb[122].mxu1 }
0x1a7f   :  { %5481 = vrot.lane.b32.xlu0 %v9422_v22, %s11239_s30  ;;  %v5414_v18 = vpop.f32.mrb[123].mxu1 }
0x1a80   :  { %5479 = vrot.lane.b32.xlu1 %v5414_v18, %s11239_s30 }
0x1a82   :  { %v9425_v6 = vpop.f32.mrb[124].mxu1 }
0x1a83   :  { %5485 = vrot.lane.b32.xlu0 %v9425_v6, %s11239_s30  ;;  %v5424_v4 = vpop.f32.mrb[125].mxu1 }
0x1a84   :  { %5483 = vrot.lane.b32.xlu1 %v5424_v4, %s11239_s30 }
0x1a86   :  { %v9428_v46 = vpop.f32.mrb[126].mxu1 }
0x1a87   :  { %5489 = vrot.lane.b32.xlu0 %v9428_v46, %s11239_s30  ;;  %v5434_v15 = vpop.f32.mrb[127].mxu1 }
0x1a88   :  { %5487 = vrot.lane.b32.xlu1 %v5434_v15, %s11239_s30 }
0x1a8b   :  { %5605 = vrot.lane.b32.xlu0 %v12897_v59, %s11236_s14 }
0x1a8c   :  { %5603 = vrot.lane.b32.xlu1 %v12900_v3, %s11236_s14 }
0x1a8f   :  { %5609 = vrot.lane.b32.xlu0 %v12902_v30, %s11236_s14 }
0x1a90   :  { %5607 = vrot.lane.b32.xlu1 %v12906_v56, %s11236_s14 }
0x1add   :  { %v5462_v29 = vpop.permute.xlu0 %5461 }
0x1ade   :  { %v5508_v50 = vadd.f32 %v5462_v29, %v12599_v57  ;;  %v5460_v48 = vpop.permute.xlu1 %5459 }
0x1adf   :  { %v5507_v26 = vadd.f32 %v5460_v48, %v12601_v31 }
0x1ae0   :  { %v8283_v60 = vmul.f32 -1.442695, %v5508_v50 }
0x1ae1   :  { %v8282_v33 = vmul.f32 -1.442695, %v5507_v26  ;;  %v5466_v58 = vpop.permute.xlu0 %5465 }
0x1ae2   :  { %10805 = vpow2.f32 %v8283_v60  ;;  %v5510_v59 = vadd.f32 %v5466_v58, %v12605_v12  ;;  %v5464_v24 = vpop.permute.xlu1 %5463 }
0x1ae3   :  { %10807 = vpow2.f32 %v8282_v33  ;;  %v5509_v30 = vadd.f32 %v5464_v24, %v12607_v5 }
0x1ae4   :  { %v8285_v3 = vmul.f32 -1.442695, %v5510_v59 }
0x1ae5   :  { %v5470_v40 = vpop.permute.xlu0 %5469  ;;  %v8284_v42 = vmul.f32 -1.442695, %v5509_v30 }
0x1ae6   :  { %10809 = vpow2.f32 %v8285_v3  ;;  %v5512_v56 = vadd.f32 %v5470_v40, %v12610_v51  ;;  %v5468_v36 = vpop.permute.xlu1 %5467 }
0x1ae7   :  { %v5511_v41 = vadd.f32 %v5468_v36, %v12613_v14 }
0x1ae8   :  { %v8287_v52 = vmul.f32 -1.442695, %v5512_v56 }
0x1ae9   :  { %v8286_v0 = vmul.f32 -1.442695, %v5511_v41  ;;  %v5474_v34 = vpop.permute.xlu0 %5473 }
0x1aea   :  { %10811 = vpow2.f32 %v8287_v52  ;;  %v5514_v27 = vadd.f32 %v5474_v34, %v12617_v11  ;;  %v5472_v8 = vpop.permute.xlu1 %5471  ;;  %v13678_v52 = vld [vmem:[#allocation34_spill] sm:$0xff] }
0x1aeb   :  { %10813 = vpow2.f32 %v8286_v0  ;;  %v5513_v55 = vadd.f32 %v5472_v8, %v12619_v45  ;;  %v13679_v8 = vld [vmem:[#allocation35_spill] sm:$0xff] }
0x1aec   :  { %v10806_v9 = vpop.eup %10805  ;;  %v8289_v39 = vmul.f32 -1.442695, %v5514_v27  ;;  %10815 = vpow2.f32 %v8284_v42 }
0x1aed   :  { %v10808_v16 = vpop.eup %10807  ;;  %v5560_v47 = vadd.f32 1.0, %v10806_v9  ;;  %v8288_v22 = vmul.f32 -1.442695, %v5513_v55  ;;  %v5478_v18 = vpop.permute.xlu0 %5477 }
0x1aee   :  { %v5559_v6 = vadd.f32 1.0, %v10808_v16  ;;  %10817 = vpow2.f32 %v8289_v39  ;;  %v5516_v4 = vadd.f32 %v5478_v18, %v12623_v62  ;;  %v5476_v46 = vpop.permute.xlu1 %5475 }
0x1aef   :  { %v5515_v15 = vadd.f32 %v5476_v46, %v12625_v21  ;;  %10819 = vrcp.f32 %v5560_v47  ;;  %v13680_v47 = vld [vmem:[#allocation36_spill] sm:$0xff] }
0x1af0   :  { %v10810_v29 = vpop.eup %10809  ;;  %v8291_v50 = vmul.f32 -1.442695, %v5516_v4  ;;  %10821 = vpow2.f32 %v8288_v22 }
0x1af1   :  { %v5562_v48 = vadd.f32 1.0, %v10810_v29  ;;  %v8290_v26 = vmul.f32 -1.442695, %v5515_v15  ;;  %v5482_v60 = vpop.permute.xlu0 %5481  ;;  %10823 = vrcp.f32 %v5559_v6  ;;  %v13681_v29 = vld [vmem:[#allocation37_spill] sm:$0xff] }
0x1af2   :  { %v5518_v33 = vadd.f32 %v5482_v60, %v12631_v19  ;;  %v5480_v58 = vpop.permute.xlu1 %5479  ;;  %10825 = vpow2.f32 %v8291_v50 }
0x1af3   :  { %v5517_v59 = vadd.f32 %v5480_v58, %v12633_v49  ;;  %10827 = vrcp.f32 %v5562_v48 }
0x1af4   :  { %v10812_v24 = vpop.eup %10811  ;;  %v8293_v3 = vmul.f32 -1.442695, %v5518_v33  ;;  %10829 = vpow2.f32 %v8290_v26 }
0x1af5   :  { %v10814_v30 = vpop.eup %10813  ;;  %v5564_v40 = vadd.f32 1.0, %v10812_v24  ;;  %v8292_v56 = vmul.f32 -1.442695, %v5517_v59  ;;  %v5486_v36 = vpop.permute.xlu0 %5485 }
0x1af6   :  { %v5563_v41 = vadd.f32 1.0, %v10814_v30  ;;  %10831 = vpow2.f32 %v8293_v3  ;;  %v5520_v42 = vadd.f32 %v5486_v36, %v13678_v52  ;;  %v5484_v0 = vpop.permute.xlu1 %5483  ;;  %v10816_v34 = vpop.eup %10815 }
0x1af7   :  { %10833 = vrcp.f32 %v5564_v40  ;;  %v5519_v55 = vadd.f32 %v5484_v0, %v13679_v8  ;;  %v5561_v4 = vadd.f32 1.0, %v10816_v34 }
0x1af8   :  { %v10818_v27 = vpop.eup %10817  ;;  %10835 = vrcp.f32 %v5563_v41 }
0x1af9   :  { %v5566_v9 = vadd.f32 1.0, %v10818_v27  ;;  %10837 = vpow2.f32 %v8292_v56  ;;  %v5490_v39 = vpop.permute.xlu0 %5489  ;;  %v10820_v16 = vpop.eup %10819 }
0x1afa   :  { %10839 = vtanh.f32 %v5520_v42  ;;  %v5522_v22 = vadd.f32 %v5490_v39, %v13680_v47  ;;  %v5488_v18 = vpop.permute.xlu1 %5487  ;;  %v10822_v6 = vpop.eup %10821 }
0x1afb   :  { %10841 = vrcp.f32 %v5566_v9  ;;  %v10824_v46 = vpop.eup %10823  ;;  %v5565_v15 = vadd.f32 1.0, %v10822_v6  ;;  %v5521_v50 = vadd.f32 %v5488_v18, %v13681_v29 }
0x1afc   :  { %10843 = vtanh.f32 %v5519_v55  ;;  %v10826_v48 = vpop.eup %10825 }
0x1afd   :  { %10845 = vtanh.f32 %v5522_v22  ;;  %v10828_v26 = vpop.eup %10827  ;;  %v5606_v33 = vpop.permute.xlu0 %5605  ;;  %v5568_v40 = vadd.f32 1.0, %v10826_v48 }
0x1afe   :  { %10847 = vrcp.f32 %v5565_v15  ;;  %v10830_v60 = vpop.eup %10829  ;;  %v5604_v3 = vpop.permute.xlu1 %5603 }
0x1aff   :  { %10849 = vrcp.f32 %v5561_v4  ;;  %v5567_v41 = vadd.f32 1.0, %v10830_v60 }
0x1b00   :  { %v10832_v58 = vpop.eup %10831  ;;  %10851 = vtanh.f32 %v5521_v50 }
0x1b01   :  { %v10834_v59 = vpop.eup %10833  ;;  %v5610_v27 = vpop.permute.xlu0 %5609  ;;  %v5570_v9 = vadd.f32 1.0, %v10832_v58  ;;  %10853 = vrcp.f32 %v5568_v40 }
0x1b02   :  { %v10836_v24 = vpop.eup %10835  ;;  %v5616_v56 = vmul.f32 %v10834_v59, %v5606_v33  ;;  %10855 = vrcp.f32 %v5567_v41  ;;  %v5608_v50 = vpop.permute.xlu1 %5607 }
0x1b03   :  { %v10838_v30 = vpop.eup %10837  ;;  %v5615_v34 = vmul.f32 %v10836_v24, %v5604_v3 }
0x1b04   :  { %v10840_v36 = vpop.eup %10839  ;;  %v5569_v59 = vadd.f32 1.0, %v10838_v30 }
0x1b05   :  { %v10842_v42 = vpop.eup %10841  ;;  %v5620_v0 = vmul.f32 %v10840_v36, %v10820_v16 }
0x1b06   :  { %v10844_v55 = vpop.eup %10843  ;;  %v5618_v39 = vmul.f32 %v10842_v42, %v5610_v27 }
0x1b07   :  { %v10846_v22 = vpop.eup %10845  ;;  %v13007_v18 = vadd.f32 %v5620_v0, %v5616_v56  ;;  %v5619_v6 = vmul.f32 %v10844_v55, %v10824_v46 }
0x1b08   :  { %v10848_v4 = vpop.eup %10847  ;;  %v5622_v15 = vmul.f32 %v10846_v22, %v10828_v26 }
0x1b09   :  { %v10850_v48 = vpop.eup %10849  ;;  %10857 = vtanh.f32 %v13007_v18  ;;  %v13010_v60 = vadd.f32 %v5619_v6, %v5615_v34  ;;  %v5617_v16 = vmul.f32 %v10848_v4, %v5608_v50 }
0x1b0a   :  { %v10852_v33 = vpop.eup %10851  ;;  %10859 = vrcp.f32 %v5570_v9  ;;  %v13012_v58 = vadd.f32 %v5622_v15, %v5618_v39 }
0x1b0b   :  { %10861 = vtanh.f32 %v13010_v60  ;;  %v5621_v24 = vmul.f32 %v10852_v33, %v10850_v48  ;;  %v10854_v26 = vpop.eup %10853 }
0x1b0c   :  { %10863 = vtanh.f32 %v13012_v58  ;;  %v10856_v3 = vpop.eup %10855 }
0x1b0d   :  { %v13016_v46 = vadd.f32 %v5621_v24, %v5617_v16  ;;  %10865 = vrcp.f32 %v5569_v59 }
0x1b0f   :  { %10867 = vtanh.f32 %v13016_v46 }
0x1b13   :  { %v10858_v40 = vpop.eup %10857 }
0x1b14   :  { %v10860_v56 = vpop.eup %10859  ;;  %v5632_v36 = vmul.f32 %v10858_v40, %v10854_v26 }
0x1b15   :  { %v10862_v41 = vpop.eup %10861 }
0x1b16   :  { %v10864_v42 = vpop.eup %10863  ;;  %v5631_v30 = vmul.f32 %v10862_v41, %v10856_v3  ;;  %v13021_v0 = vsel %vm3995_vm12, %v12913_v20, %v5632_v36 }
0x1b17   :  { %v5634_v34 = vmul.f32 %v10864_v42, %v10860_v56  ;;  %v10866_v27 = vpop.eup %10865 }
0x1b18   :  { %v10077_v55 = vpack.i.bf16 %v5632_v36, %v5631_v30  ;;  %v13025_v9 = vsel %vm3995_vm12, %v12922_v13, %v5631_v30 }
0x1b19   :  { %v10868_v39 = vpop.eup %10867  ;;  %v13029_v22 = vsel %vm3995_vm12, %v12925_v32, %v5634_v34 }
0x1b1a   :  { %10078 = vrot.lane.b32.xlu1 %v10077_v55, %s11240_s6  ;;  %v5633_v6 = vmul.f32 %v10868_v39, %v10866_v27 }
0x1b1c   :  { %v10082_v4 = vpack.i.bf16 %v5634_v34, %v5633_v6  ;;  %v13034_v20 = vsel %vm3995_vm12, %v12932_v43, %v5633_v6 }
0x1b1e   :  { %10083 = vrot.lane.b32.xlu0 %v10082_v4, %s11240_s6 }
0x1b8c   :  { %v10079_v15 = vpop.permute.xlu1 %10078 }
0x1b8d   :  { %v10081_v50 = vunpack.i.h.bf16 %v10079_v15  ;;  %v10080_v48 = vunpack.i.l.bf16 %v10079_v15 }
0x1b8f   :  { %v9803_v13 = vpack.c.bf16 %v10081_v50, %v10080_v48 }
0x1b90   :  { %v10084_v16 = vpop.permute.xlu0 %10083 }
0x1b91   :  { %v10086_v33 = vunpack.i.h.bf16 %v10084_v16  ;;  %v10085_v59 = vunpack.i.l.bf16 %v10084_v16  ;;  %9804 = vmatprep.subr.bf16.mxu0 %v9803_v13 }
0x1b92   :  { %9806 = vmatpush3.bf16.msra.mxu0 %v9803_v13 }
0x1b93   :  { %v9807_v32 = vpack.c.bf16 %v10086_v33, %v10085_v59 }
0x1b95   :  { %9808 = vmatprep.subr.bf16.mxu0 %v9807_v32 }
0x1b96   :  { %9810 = vmatpush3.bf16.msra.mxu0 %v9807_v32 }
0x1b99   :  { %9438 = vmatmul.mubr.msk.f32.vlgmr.msra.gmra.mrb[106].mxu0 %vm727_vm8, %v12778_v53 }
0x1b9a   :  { %9440 = vmatprep.mubr.msk.f32.mxu0 %vm727_vm8, %v12783_v44 }
0x1b9d   :  { %9441 = vmatmul.mubr.msk.f32.gmra.mrb[108].mxu0 %vm727_vm8, %v12788_v37 }
0x1b9e   :  { %9443 = vmatprep.mubr.msk.f32.mxu0 %vm727_vm8, %v12793_v61 }
0x1ba1   :  { %9444 = vmatmul.mubr.msk.f32.gmra.mrb[110].mxu0 %vm727_vm8, %v12798_v38 }
0x1ba2   :  { %9446 = vmatprep.mubr.msk.f32.mxu0 %vm727_vm8, %v12803_v28 }
0x1ba5   :  { %9447 = vmatmul.mubr.msk.f32.gmra.mrb[112].mxu0 %vm727_vm8, %v12808_v1 }
0x1ba6   :  { %9449 = vmatprep.mubr.msk.f32.mxu0 %vm727_vm8, %v12813_v25 }
0x1ba9   :  { %9450 = vmatmul.mubr.msk.f32.gmra.mrb[114].mxu0 %vm727_vm8, %v12818_v35 }
0x1baa   :  { %9452 = vmatprep.mubr.msk.f32.mxu0 %vm727_vm8, %v12823_v23 }
0x1bad   :  { %9453 = vmatmul.mubr.msk.f32.gmra.mrb[116].mxu0 %vm727_vm8, %v12828_v10 }
0x1bae   :  { %9455 = vmatprep.mubr.msk.f32.mxu0 %vm727_vm8, %v12833_v17 }
0x1bb1   :  { %9456 = vmatmul.mubr.msk.f32.gmra.mrb[118].mxu0 %vm727_vm8, %v12838_v7 }
0x1bb2   :  { %9458 = vmatprep.mubr.msk.f32.mxu0 %vm727_vm8, %v12843_v63 }
0x1bb5   :  { %9459 = vmatmul.mubr.msk.f32.gmra.mrb[120].mxu0 %vm727_vm8, %v12848_v2 }
0x1bb6   :  { %9501 = vmatprep.mubr.msk.f32.mxu0 %vm727_vm8, %v12853_v54 }
0x1c6c   :  { %v9439_v53 = vpop.f32.mrb[106].mxu0 }
0x1c6d   :  { %5814 = vrot.lane.b32.xlu0 %v9439_v53, %s11241_s12  ;;  %v5717_v44 = vpop.f32.mrb[107].mxu0 }
0x1c6e   :  { %5812 = vrot.lane.b32.xlu1 %v5717_v44, %s11241_s12 }
0x1c70   :  { %v9442_v37 = vpop.f32.mrb[108].mxu0 }
0x1c71   :  { %5818 = vrot.lane.b32.xlu0 %v9442_v37, %s11241_s12  ;;  %v5727_v61 = vpop.f32.mrb[109].mxu0 }
0x1c72   :  { %5816 = vrot.lane.b32.xlu1 %v5727_v61, %s11241_s12 }
0x1c74   :  { %v9445_v38 = vpop.f32.mrb[110].mxu0 }
0x1c75   :  { %5822 = vrot.lane.b32.xlu0 %v9445_v38, %s11241_s12  ;;  %v5737_v28 = vpop.f32.mrb[111].mxu0 }
0x1c76   :  { %5820 = vrot.lane.b32.xlu1 %v5737_v28, %s11241_s12 }
0x1c78   :  { %v9448_v1 = vpop.f32.mrb[112].mxu0 }
0x1c79   :  { %5826 = vrot.lane.b32.xlu0 %v9448_v1, %s11241_s12  ;;  %v5747_v25 = vpop.f32.mrb[113].mxu0 }
0x1c7a   :  { %5824 = vrot.lane.b32.xlu1 %v5747_v25, %s11241_s12 }
0x1c7c   :  { %v9451_v35 = vpop.f32.mrb[114].mxu0 }
0x1c7d   :  { %5830 = vrot.lane.b32.xlu0 %v9451_v35, %s11241_s12  ;;  %v5757_v23 = vpop.f32.mrb[115].mxu0 }
0x1c7e   :  { %5828 = vrot.lane.b32.xlu1 %v5757_v23, %s11241_s12 }
0x1c80   :  { %v9454_v10 = vpop.f32.mrb[116].mxu0 }
0x1c81   :  { %5834 = vrot.lane.b32.xlu0 %v9454_v10, %s11241_s12  ;;  %v5767_v17 = vpop.f32.mrb[117].mxu0 }
0x1c82   :  { %5832 = vrot.lane.b32.xlu1 %v5767_v17, %s11241_s12 }
0x1c84   :  { %v9457_v7 = vpop.f32.mrb[118].mxu0 }
0x1c85   :  { %5838 = vrot.lane.b32.xlu0 %v9457_v7, %s11241_s12  ;;  %v5777_v63 = vpop.f32.mrb[119].mxu0 }
0x1c86   :  { %5836 = vrot.lane.b32.xlu1 %v5777_v63, %s11241_s12 }
0x1c88   :  { %v9460_v2 = vpop.f32.mrb[120].mxu0 }
0x1c89   :  { %5842 = vrot.lane.b32.xlu0 %v9460_v2, %s11241_s12  ;;  %v5787_v54 = vpop.f32.mrb[121].mxu0 }
0x1c8a   :  { %5840 = vrot.lane.b32.xlu1 %v5787_v54, %s11241_s12 }
0x1c8d   :  { %5958 = vrot.lane.b32.xlu0 %v13007_v18, %s11236_s14 }
0x1c8e   :  { %5956 = vrot.lane.b32.xlu1 %v13010_v60, %s11236_s14 }
0x1c91   :  { %5962 = vrot.lane.b32.xlu0 %v13012_v58, %s11236_s14 }
0x1c92   :  { %5960 = vrot.lane.b32.xlu1 %v13016_v46, %s11236_s14 }
0x1cdf   :  { %v5815_v43 = vpop.permute.xlu0 %5814 }
0x1ce0   :  { %v5861_v24 = vadd.f32 %v5815_v43, %v12599_v57  ;;  %v5813_v26 = vpop.permute.xlu1 %5812 }
0x1ce1   :  { %v5860_v3 = vadd.f32 %v5813_v26, %v12601_v31 }
0x1ce2   :  { %v8311_v40 = vmul.f32 -1.442695, %v5861_v24 }
0x1ce3   :  { %v8310_v56 = vmul.f32 -1.442695, %v5860_v3  ;;  %v5819_v36 = vpop.permute.xlu0 %5818 }
0x1ce4   :  { %10869 = vpow2.f32 %v8311_v40  ;;  %v5863_v18 = vadd.f32 %v5819_v36, %v12605_v12  ;;  %v5817_v41 = vpop.permute.xlu1 %5816 }
0x1ce5   :  { %10871 = vpow2.f32 %v8310_v56  ;;  %v5862_v58 = vadd.f32 %v5817_v41, %v12607_v5 }
0x1ce6   :  { %v8313_v60 = vmul.f32 -1.442695, %v5863_v18 }
0x1ce7   :  { %v5823_v42 = vpop.permute.xlu0 %5822  ;;  %v8312_v55 = vmul.f32 -1.442695, %v5862_v58 }
0x1ce8   :  { %10873 = vpow2.f32 %v8313_v60  ;;  %v5865_v46 = vadd.f32 %v5823_v42, %v12610_v51  ;;  %v5821_v30 = vpop.permute.xlu1 %5820 }
0x1ce9   :  { %v5864_v34 = vadd.f32 %v5821_v30, %v12613_v14 }
0x1cea   :  { %v8315_v27 = vmul.f32 -1.442695, %v5865_v46 }
0x1ceb   :  { %v8314_v39 = vmul.f32 -1.442695, %v5864_v34  ;;  %v5827_v6 = vpop.permute.xlu0 %5826 }
0x1cec   :  { %10875 = vpow2.f32 %v8315_v27  ;;  %v5867_v4 = vadd.f32 %v5827_v6, %v12617_v11  ;;  %v5825_v15 = vpop.permute.xlu1 %5824 }
0x1ced   :  { %10877 = vpow2.f32 %v8314_v39  ;;  %v5866_v50 = vadd.f32 %v5825_v15, %v12619_v45 }
0x1cee   :  { %v10870_v48 = vpop.eup %10869  ;;  %v8317_v13 = vmul.f32 -1.442695, %v5867_v4  ;;  %10879 = vpow2.f32 %v8312_v55 }
0x1cef   :  { %v10872_v16 = vpop.eup %10871  ;;  %v5913_v33 = vadd.f32 1.0, %v10870_v48  ;;  %v8316_v59 = vmul.f32 -1.442695, %v5866_v50  ;;  %v5831_v32 = vpop.permute.xlu0 %5830 }
0x1cf0   :  { %v5912_v53 = vadd.f32 1.0, %v10872_v16  ;;  %10881 = vpow2.f32 %v8317_v13  ;;  %v5869_v44 = vadd.f32 %v5831_v32, %v12623_v62  ;;  %v5829_v37 = vpop.permute.xlu1 %5828 }
0x1cf1   :  { %v5868_v61 = vadd.f32 %v5829_v37, %v12625_v21  ;;  %10883 = vrcp.f32 %v5913_v33 }
0x1cf2   :  { %v10874_v38 = vpop.eup %10873  ;;  %v8319_v28 = vmul.f32 -1.442695, %v5869_v44  ;;  %10885 = vpow2.f32 %v8316_v59 }
0x1cf3   :  { %v5915_v1 = vadd.f32 1.0, %v10874_v38  ;;  %v8318_v25 = vmul.f32 -1.442695, %v5868_v61  ;;  %v5835_v35 = vpop.permute.xlu0 %5834  ;;  %10887 = vrcp.f32 %v5912_v53 }
0x1cf4   :  { %v5871_v23 = vadd.f32 %v5835_v35, %v12631_v19  ;;  %v5833_v10 = vpop.permute.xlu1 %5832  ;;  %10889 = vpow2.f32 %v8319_v28 }
0x1cf5   :  { %v5870_v17 = vadd.f32 %v5833_v10, %v12633_v49  ;;  %10891 = vrcp.f32 %v5915_v1 }
0x1cf6   :  { %v10876_v7 = vpop.eup %10875  ;;  %v8321_v63 = vmul.f32 -1.442695, %v5871_v23  ;;  %10893 = vpow2.f32 %v8318_v25 }
0x1cf7   :  { %v10878_v2 = vpop.eup %10877  ;;  %v5917_v54 = vadd.f32 1.0, %v10876_v7  ;;  %v8320_v43 = vmul.f32 -1.442695, %v5870_v17  ;;  %v5839_v24 = vpop.permute.xlu0 %5838 }
0x1cf8   :  { %v5916_v26 = vadd.f32 1.0, %v10878_v2  ;;  %10895 = vpow2.f32 %v8321_v63  ;;  %v5873_v3 = vadd.f32 %v5839_v24, %v13678_v52  ;;  %v5837_v40 = vpop.permute.xlu1 %5836  ;;  %v10880_v56 = vpop.eup %10879 }
0x1cf9   :  { %10897 = vrcp.f32 %v5917_v54  ;;  %v5872_v18 = vadd.f32 %v5837_v40, %v13679_v8  ;;  %v5914_v34 = vadd.f32 1.0, %v10880_v56 }
0x1cfa   :  { %v10882_v36 = vpop.eup %10881  ;;  %10899 = vrcp.f32 %v5916_v26 }
0x1cfb   :  { %v5919_v41 = vadd.f32 1.0, %v10882_v36  ;;  %10901 = vpow2.f32 %v8320_v43  ;;  %v5843_v60 = vpop.permute.xlu0 %5842  ;;  %v10884_v58 = vpop.eup %10883 }
0x1cfc   :  { %10903 = vtanh.f32 %v5873_v3  ;;  %v5875_v42 = vadd.f32 %v5843_v60, %v13680_v47  ;;  %v5841_v46 = vpop.permute.xlu1 %5840  ;;  %v10886_v30 = vpop.eup %10885 }
0x1cfd   :  { %10905 = vrcp.f32 %v5919_v41  ;;  %v10888_v27 = vpop.eup %10887  ;;  %v5918_v55 = vadd.f32 1.0, %v10886_v30  ;;  %v5874_v39 = vadd.f32 %v5841_v46, %v13681_v29 }
0x1cfe   :  { %10907 = vtanh.f32 %v5872_v18  ;;  %v10890_v6 = vpop.eup %10889 }
0x1cff   :  { %10909 = vtanh.f32 %v5875_v42  ;;  %v10892_v4 = vpop.eup %10891  ;;  %v5959_v50 = vpop.permute.xlu0 %5958  ;;  %v5921_v32 = vadd.f32 1.0, %v10890_v6 }
0x1d00   :  { %10911 = vrcp.f32 %v5918_v55  ;;  %v10894_v15 = vpop.eup %10893  ;;  %v5957_v33 = vpop.permute.xlu1 %5956 }
0x1d01   :  { %10913 = vrcp.f32 %v5914_v34  ;;  %v5920_v37 = vadd.f32 1.0, %v10894_v15 }
0x1d02   :  { %v10896_v48 = vpop.eup %10895  ;;  %10915 = vtanh.f32 %v5874_v39 }
0x1d03   :  { %v10898_v13 = vpop.eup %10897  ;;  %v5963_v1 = vpop.permute.xlu0 %5962  ;;  %v5923_v35 = vadd.f32 1.0, %v10896_v48  ;;  %10917 = vrcp.f32 %v5921_v32 }
0x1d04   :  { %v10900_v16 = vpop.eup %10899  ;;  %v5969_v53 = vmul.f32 %v10898_v13, %v5959_v50  ;;  %10919 = vrcp.f32 %v5920_v37  ;;  %v5961_v54 = vpop.permute.xlu1 %5960 }
0x1d05   :  { %v10902_v59 = vpop.eup %10901  ;;  %v5968_v28 = vmul.f32 %v10900_v16, %v5957_v33 }
0x1d06   :  { %v10904_v44 = vpop.eup %10903  ;;  %v5922_v40 = vadd.f32 1.0, %v10902_v59 }
0x1d07   :  { %v10906_v61 = vpop.eup %10905  ;;  %v5973_v38 = vmul.f32 %v10904_v44, %v10884_v58 }
0x1d08   :  { %v10908_v25 = vpop.eup %10907  ;;  %v5971_v23 = vmul.f32 %v10906_v61, %v5963_v1  ;;  %v13145_v61 = vld [vmem:[%s13673_s28 + $0x10] sm:$0xff]  ;;  %v13160_v1 = vld [vmem:[%s13673_s28 + $0x28] sm:$0xff] }
0x1d09   :  { %v10910_v10 = vpop.eup %10909  ;;  %v13109_v17 = vadd.f32 %v5973_v38, %v5969_v53  ;;  %v5972_v7 = vmul.f32 %v10908_v25, %v10888_v27  ;;  %v13150_v38 = vld [vmem:[%s13673_s28 + $0x18] sm:$0xff]  ;;  %v13165_v25 = vld [vmem:[%s13673_s28 + $0x30] sm:$0xff] }
0x1d0a   :  { %v10912_v63 = vpop.eup %10911  ;;  %v5975_v2 = vmul.f32 %v10910_v10, %v10892_v4  ;;  %v13180_v10 = vld [vmem:[%s13673_s28 + $0x48] sm:$0xff] }
0x1d0b   :  { %v10914_v43 = vpop.eup %10913  ;;  %10921 = vtanh.f32 %v13109_v17  ;;  %v13112_v24 = vadd.f32 %v5972_v7, %v5968_v28  ;;  %v5970_v26 = vmul.f32 %v10912_v63, %v5961_v54  ;;  %v13155_v28 = vld [vmem:[%s13673_s28 + $0x20] sm:$0xff]  ;;  %v13185_v7 = vld [vmem:[%s13673_s28 + $0x50] sm:$0xff]  ;;  %v13190_v63 = vld [vmem:[%s13673_s28 + $0x58] sm:$0xff] }
0x1d0c   :  { %v10916_v3 = vpop.eup %10915  ;;  %10923 = vrcp.f32 %v5923_v35  ;;  %v13114_v56 = vadd.f32 %v5975_v2, %v5971_v23  ;;  %v13170_v35 = vld [vmem:[%s13673_s28 + $0x38] sm:$0xff]  ;;  %v13175_v23 = vld [vmem:[%s13673_s28 + $0x40] sm:$0xff]  ;;  %v13200_v54 = vld [vmem:[%s13673_s28 + $0x68] sm:$0xff] }
0x1d0d   :  { %10925 = vtanh.f32 %v13112_v24  ;;  %v5974_v36 = vmul.f32 %v10916_v3, %v10914_v43  ;;  %v10918_v41 = vpop.eup %10917  ;;  %v13195_v2 = vld [vmem:[%s13673_s28 + $0x60] sm:$0xff]  ;;  %v13205_v43 = vld [vmem:[%s13673_s28 + $0x70] sm:$0xff] }
0x1d0e   :  { %10927 = vtanh.f32 %v13114_v56  ;;  %v10920_v60 = vpop.eup %10919 }
0x1d0f   :  { %v13118_v18 = vadd.f32 %v5974_v36, %v5970_v26  ;;  %10929 = vrcp.f32 %v5922_v40  ;;  %v13210_v26 = vld [vmem:[%s13673_s28 + $0x78] sm:$0xff] }
0x1d11   :  { %10931 = vtanh.f32 %v13118_v18 }
0x1d15   :  { %v10922_v58 = vpop.eup %10921 }
0x1d16   :  { %v10924_v42 = vpop.eup %10923  ;;  %v5985_v46 = vmul.f32 %v10922_v58, %v10918_v41 }
0x1d17   :  { %v10926_v30 = vpop.eup %10925 }
0x1d18   :  { %v10928_v34 = vpop.eup %10927  ;;  %v5984_v27 = vmul.f32 %v10926_v30, %v10920_v60  ;;  %v13123_v55 = vsel %vm433_vm3, %v13021_v0, %v5985_v46 }
0x1d19   :  { %v5987_v39 = vmul.f32 %v10928_v34, %v10924_v42  ;;  %v10930_v6 = vpop.eup %10929 }
0x1d1a   :  { %v10087_v4 = vpack.i.bf16 %v5985_v46, %v5984_v27  ;;  %v13127_v15 = vsel %vm433_vm3, %v13025_v9, %v5984_v27 }
0x1d1b   :  { %v10932_v50 = vpop.eup %10931  ;;  %v13131_v48 = vsel %vm433_vm3, %v13029_v22, %v5987_v39 }
0x1d1c   :  { %10088 = vrot.lane.b32.xlu1 %v10087_v4, %s11242_s27  ;;  %v5986_v13 = vmul.f32 %v10932_v50, %v10930_v6 }
0x1d1e   :  { %v10092_v16 = vpack.i.bf16 %v5987_v39, %v5986_v13  ;;  %v13136_v0 = vsel %vm433_vm3, %v13034_v20, %v5986_v13  ;;  %v13140_v20 = vld [vmem:[%s13673_s28 + $0x8] sm:$0xff]  ;;  %vm9848_vm3 = vmpackc.low %vm6919_vm2, %vm6919_vm2 }
0x1d20   :  { %10093 = vrot.lane.b32.xlu0 %v10092_v16, %s11242_s27 }
0x1d8e   :  { %v10089_v33 = vpop.permute.xlu1 %10088 }
0x1d8f   :  { %v10091_v9 = vunpack.i.h.bf16 %v10089_v33  ;;  %v10090_v59 = vunpack.i.l.bf16 %v10089_v33 }
0x1d91   :  { %v9811_v32 = vpack.c.bf16 %v10091_v9, %v10090_v59 }
0x1d92   :  { %v10094_v22 = vpop.permute.xlu0 %10093 }
0x1d93   :  { %v10096_v53 = vunpack.i.h.bf16 %v10094_v22  ;;  %v10095_v44 = vunpack.i.l.bf16 %v10094_v22  ;;  %9812 = vmatprep.subr.bf16.mxu1 %v9811_v32 }
0x1d94   :  { %9814 = vmatpush3.bf16.msra.mxu1 %v9811_v32 }
0x1d95   :  { %v9815_v37 = vpack.c.bf16 %v10096_v53, %v10095_v44 }
0x1d97   :  { %9816 = vmatprep.subr.bf16.mxu1 %v9815_v37 }
0x1d98   :  { %9818 = vmatpush3.bf16.msra.mxu1 %v9815_v37 }
0x1d9b   :  { %9470 = vmatmul.mubr.msk.f32.vlgmr.msra.gmra.mrb[128].mxu1 %vm727_vm8, %v13140_v20 }
0x1d9c   :  { %9472 = vmatprep.mubr.msk.f32.mxu1 %vm727_vm8, %v13145_v61 }
0x1d9f   :  { %9473 = vmatmul.mubr.msk.f32.gmra.mrb[130].mxu1 %vm727_vm8, %v13150_v38 }
0x1da0   :  { %9475 = vmatprep.mubr.msk.f32.mxu1 %vm727_vm8, %v13155_v28 }
0x1da3   :  { %9476 = vmatmul.mubr.msk.f32.gmra.mrb[132].mxu1 %vm727_vm8, %v13160_v1 }
0x1da4   :  { %9478 = vmatprep.mubr.msk.f32.mxu1 %vm727_vm8, %v13165_v25 }
0x1da7   :  { %9479 = vmatmul.mubr.msk.f32.gmra.mrb[134].mxu1 %vm727_vm8, %v13170_v35 }
0x1da8   :  { %9481 = vmatprep.mubr.msk.f32.mxu1 %vm727_vm8, %v13175_v23 }
0x1dab   :  { %9482 = vmatmul.mubr.msk.f32.gmra.mrb[136].mxu1 %vm727_vm8, %v13180_v10 }
0x1dac   :  { %9484 = vmatprep.mubr.msk.f32.mxu1 %vm727_vm8, %v13185_v7 }
0x1daf   :  { %9485 = vmatmul.mubr.msk.f32.gmra.mrb[138].mxu1 %vm727_vm8, %v13190_v63 }
0x1db0   :  { %9487 = vmatprep.mubr.msk.f32.mxu1 %vm727_vm8, %v13195_v2 }
0x1db3   :  { %9488 = vmatmul.mubr.msk.f32.gmra.mrb[140].mxu1 %vm727_vm8, %v13200_v54 }
0x1db4   :  { %9490 = vmatprep.mubr.msk.f32.mxu1 %vm727_vm8, %v13205_v43 }
0x1db7   :  { %9491 = vmatmul.mubr.msk.f32.gmra.mrb[142].mxu1 %vm727_vm8, %v13210_v26 }
0x1e6e   :  { %v9471_v3 = vpop.f32.mrb[128].mxu1 }
0x1e6f   :  { %6167 = vrot.lane.b32.xlu0 %v9471_v3, %s11243_s4  ;;  %v6070_v40 = vpop.f32.mrb[129].mxu1 }
0x1e70   :  { %6165 = vrot.lane.b32.xlu1 %v6070_v40, %s11243_s4 }
0x1e72   :  { %v9474_v36 = vpop.f32.mrb[130].mxu1 }
0x1e73   :  { %6171 = vrot.lane.b32.xlu0 %v9474_v36, %s11243_s4  ;;  %v6080_v41 = vpop.f32.mrb[131].mxu1 }
0x1e74   :  { %6169 = vrot.lane.b32.xlu1 %v6080_v41, %s11243_s4 }
0x1e76   :  { %v9477_v60 = vpop.f32.mrb[132].mxu1 }
0x1e77   :  { %6175 = vrot.lane.b32.xlu0 %v9477_v60, %s11243_s4  ;;  %v6090_v58 = vpop.f32.mrb[133].mxu1 }
0x1e78   :  { %6173 = vrot.lane.b32.xlu1 %v6090_v58, %s11243_s4 }
0x1e7a   :  { %v9480_v42 = vpop.f32.mrb[134].mxu1 }
0x1e7b   :  { %6179 = vrot.lane.b32.xlu0 %v9480_v42, %s11243_s4  ;;  %v6100_v46 = vpop.f32.mrb[135].mxu1 }
0x1e7c   :  { %6177 = vrot.lane.b32.xlu1 %v6100_v46, %s11243_s4 }
0x1e7e   :  { %v9483_v30 = vpop.f32.mrb[136].mxu1 }
0x1e7f   :  { %6183 = vrot.lane.b32.xlu0 %v9483_v30, %s11243_s4  ;;  %v6110_v34 = vpop.f32.mrb[137].mxu1 }
0x1e80   :  { %6181 = vrot.lane.b32.xlu1 %v6110_v34, %s11243_s4 }
0x1e82   :  { %v9486_v27 = vpop.f32.mrb[138].mxu1 }
0x1e83   :  { %6187 = vrot.lane.b32.xlu0 %v9486_v27, %s11243_s4  ;;  %v6120_v39 = vpop.f32.mrb[139].mxu1 }
0x1e84   :  { %6185 = vrot.lane.b32.xlu1 %v6120_v39, %s11243_s4 }
0x1e86   :  { %v9489_v6 = vpop.f32.mrb[140].mxu1 }
0x1e87   :  { %6191 = vrot.lane.b32.xlu0 %v9489_v6, %s11243_s4  ;;  %v6130_v4 = vpop.f32.mrb[141].mxu1 }
0x1e88   :  { %6189 = vrot.lane.b32.xlu1 %v6130_v4, %s11243_s4 }
0x1e8a   :  { %v9492_v50 = vpop.f32.mrb[142].mxu1 }
0x1e8b   :  { %6195 = vrot.lane.b32.xlu0 %v9492_v50, %s11243_s4  ;;  %v6140_v13 = vpop.f32.mrb[143].mxu1 }
0x1e8c   :  { %6193 = vrot.lane.b32.xlu1 %v6140_v13, %s11243_s4 }
0x1e8f   :  { %6311 = vrot.lane.b32.xlu0 %v13109_v17, %s11236_s14 }
0x1e90   :  { %6309 = vrot.lane.b32.xlu1 %v13112_v24, %s11236_s14 }
0x1e93   :  { %6315 = vrot.lane.b32.xlu0 %v13114_v56, %s11236_s14 }
0x1e94   :  { %6313 = vrot.lane.b32.xlu1 %v13118_v18, %s11236_s14 }
0x1ee1   :  { %v6168_v16 = vpop.permute.xlu0 %6167 }
0x1ee2   :  { %v6214_v33 = vadd.f32 %v6168_v16, %v12599_v57  ;;  %v6166_v9 = vpop.permute.xlu1 %6165 }
0x1ee3   :  { %v6213_v59 = vadd.f32 %v6166_v9, %v12601_v31 }
0x1ee4   :  { %v8339_v32 = vmul.f32 -1.442695, %v6214_v33 }
0x1ee5   :  { %v8338_v22 = vmul.f32 -1.442695, %v6213_v59  ;;  %v6172_v53 = vpop.permute.xlu0 %6171 }
0x1ee6   :  { %10933 = vpow2.f32 %v8339_v32  ;;  %v6216_v17 = vadd.f32 %v6172_v53, %v12605_v12  ;;  %v6170_v44 = vpop.permute.xlu1 %6169 }
0x1ee7   :  { %10935 = vpow2.f32 %v8338_v22  ;;  %v6215_v56 = vadd.f32 %v6170_v44, %v12607_v5 }
0x1ee8   :  { %v8341_v24 = vmul.f32 -1.442695, %v6216_v17 }
0x1ee9   :  { %v6176_v37 = vpop.permute.xlu0 %6175  ;;  %v8340_v41 = vmul.f32 -1.442695, %v6215_v56 }
0x1eea   :  { %10937 = vpow2.f32 %v8341_v24  ;;  %v6218_v18 = vadd.f32 %v6176_v37, %v12610_v51  ;;  %v6174_v3 = vpop.permute.xlu1 %6173 }
0x1eeb   :  { %v6217_v40 = vadd.f32 %v6174_v3, %v12613_v14 }
0x1eec   :  { %v8343_v36 = vmul.f32 -1.442695, %v6218_v18 }
0x1eed   :  { %v8342_v60 = vmul.f32 -1.442695, %v6217_v40  ;;  %v6180_v58 = vpop.permute.xlu0 %6179 }
0x1eee   :  { %10939 = vpow2.f32 %v8343_v36  ;;  %v6220_v42 = vadd.f32 %v6180_v58, %v12617_v11  ;;  %v6178_v46 = vpop.permute.xlu1 %6177 }
0x1eef   :  { %10941 = vpow2.f32 %v8342_v60  ;;  %v6219_v30 = vadd.f32 %v6178_v46, %v12619_v45 }
0x1ef0   :  { %v10934_v34 = vpop.eup %10933  ;;  %v8345_v27 = vmul.f32 -1.442695, %v6220_v42  ;;  %10943 = vpow2.f32 %v8340_v41 }
0x1ef1   :  { %v10936_v39 = vpop.eup %10935  ;;  %v6266_v6 = vadd.f32 1.0, %v10934_v34  ;;  %v8344_v4 = vmul.f32 -1.442695, %v6219_v30  ;;  %v6184_v50 = vpop.permute.xlu0 %6183 }
0x1ef2   :  { %v6265_v13 = vadd.f32 1.0, %v10936_v39  ;;  %10945 = vpow2.f32 %v8345_v27  ;;  %v6222_v16 = vadd.f32 %v6184_v50, %v12623_v62  ;;  %v6182_v33 = vpop.permute.xlu1 %6181 }
0x1ef3   :  { %v6221_v9 = vadd.f32 %v6182_v33, %v12625_v21  ;;  %10947 = vrcp.f32 %v6266_v6 }
0x1ef4   :  { %v10938_v59 = vpop.eup %10937  ;;  %v8347_v32 = vmul.f32 -1.442695, %v6222_v16  ;;  %10949 = vpow2.f32 %v8344_v4 }
0x1ef5   :  { %v6268_v22 = vadd.f32 1.0, %v10938_v59  ;;  %v8346_v53 = vmul.f32 -1.442695, %v6221_v9  ;;  %v6188_v17 = vpop.permute.xlu0 %6187  ;;  %10951 = vrcp.f32 %v6265_v13 }
0x1ef6   :  { %v6224_v44 = vadd.f32 %v6188_v17, %v12631_v19  ;;  %v6186_v24 = vpop.permute.xlu1 %6185  ;;  %10953 = vpow2.f32 %v8347_v32 }
0x1ef7   :  { %v6223_v56 = vadd.f32 %v6186_v24, %v12633_v49  ;;  %10955 = vrcp.f32 %v6268_v22 }
0x1ef8   :  { %v10940_v37 = vpop.eup %10939  ;;  %v8349_v18 = vmul.f32 -1.442695, %v6224_v44  ;;  %10957 = vpow2.f32 %v8346_v53 }
0x1ef9   :  { %v10942_v3 = vpop.eup %10941  ;;  %v6270_v40 = vadd.f32 1.0, %v10940_v37  ;;  %v8348_v36 = vmul.f32 -1.442695, %v6223_v56  ;;  %v6192_v41 = vpop.permute.xlu0 %6191 }
0x1efa   :  { %v6269_v60 = vadd.f32 1.0, %v10942_v3  ;;  %10959 = vpow2.f32 %v8349_v18  ;;  %v6226_v58 = vadd.f32 %v6192_v41, %v13678_v52  ;;  %v6190_v42 = vpop.permute.xlu1 %6189  ;;  %v10944_v46 = vpop.eup %10943 }
0x1efb   :  { %10961 = vrcp.f32 %v6270_v40  ;;  %v6225_v34 = vadd.f32 %v6190_v42, %v13679_v8  ;;  %v6267_v16 = vadd.f32 1.0, %v10944_v46 }
0x1efc   :  { %v10946_v30 = vpop.eup %10945  ;;  %10963 = vrcp.f32 %v6269_v60 }
0x1efd   :  { %v6272_v27 = vadd.f32 1.0, %v10946_v30  ;;  %10965 = vpow2.f32 %v8348_v36  ;;  %v6196_v39 = vpop.permute.xlu0 %6195  ;;  %v10948_v6 = vpop.eup %10947 }
0x1efe   :  { %10967 = vtanh.f32 %v6226_v58  ;;  %v6228_v4 = vadd.f32 %v6196_v39, %v13680_v47  ;;  %v6194_v50 = vpop.permute.xlu1 %6193  ;;  %v10950_v13 = vpop.eup %10949 }
0x1eff   :  { %10969 = vrcp.f32 %v6272_v27  ;;  %v10952_v33 = vpop.eup %10951  ;;  %v6271_v9 = vadd.f32 1.0, %v10950_v13  ;;  %v6227_v59 = vadd.f32 %v6194_v50, %v13681_v29 }
0x1f00   :  { %10971 = vtanh.f32 %v6225_v34  ;;  %v10954_v32 = vpop.eup %10953 }
0x1f01   :  { %10973 = vtanh.f32 %v6228_v4  ;;  %v10956_v22 = vpop.eup %10955  ;;  %v6312_v17 = vpop.permute.xlu0 %6311  ;;  %v6274_v3 = vadd.f32 1.0, %v10954_v32 }
0x1f02   :  { %10975 = vrcp.f32 %v6271_v9  ;;  %v10958_v53 = vpop.eup %10957  ;;  %v6310_v37 = vpop.permute.xlu1 %6309 }
0x1f03   :  { %10977 = vrcp.f32 %v6267_v16  ;;  %v6273_v41 = vadd.f32 1.0, %v10958_v53 }
0x1f04   :  { %v10960_v44 = vpop.eup %10959  ;;  %10979 = vtanh.f32 %v6227_v59 }
0x1f05   :  { %v10962_v24 = vpop.eup %10961  ;;  %v6316_v46 = vpop.permute.xlu0 %6315  ;;  %v6276_v34 = vadd.f32 1.0, %v10960_v44  ;;  %10981 = vrcp.f32 %v6274_v3 }
0x1f06   :  { %v10964_v56 = vpop.eup %10963  ;;  %v6322_v40 = vmul.f32 %v10962_v24, %v6312_v17  ;;  %10983 = vrcp.f32 %v6273_v41  ;;  %v6314_v9 = vpop.permute.xlu1 %6313 }
0x1f07   :  { %v10966_v18 = vpop.eup %10965  ;;  %v6321_v42 = vmul.f32 %v10964_v56, %v6310_v37 }
0x1f08   :  { %v10968_v36 = vpop.eup %10967  ;;  %v6275_v17 = vadd.f32 1.0, %v10966_v18 }
0x1f09   :  { %v10970_v60 = vpop.eup %10969  ;;  %v6326_v58 = vmul.f32 %v10968_v36, %v10948_v6 }
0x1f0a   :  { %v10972_v30 = vpop.eup %10971  ;;  %v6324_v27 = vmul.f32 %v10970_v60, %v6316_v46 }
0x1f0b   :  { %v10974_v39 = vpop.eup %10973  ;;  %v13254_v4 = vadd.f32 %v6326_v58, %v6322_v40  ;;  %v6325_v50 = vmul.f32 %v10972_v30, %v10952_v33 }
0x1f0c   :  { %v10976_v13 = vpop.eup %10975  ;;  %v6328_v16 = vmul.f32 %v10974_v39, %v10956_v22 }
0x1f0d   :  { %v10978_v59 = vpop.eup %10977  ;;  %10985 = vtanh.f32 %v13254_v4  ;;  %v13257_v32 = vadd.f32 %v6325_v50, %v6321_v42  ;;  %v6323_v6 = vmul.f32 %v10976_v13, %v6314_v9 }
0x1f0e   :  { %v10980_v53 = vpop.eup %10979  ;;  %10987 = vrcp.f32 %v6276_v34  ;;  %v13259_v44 = vadd.f32 %v6328_v16, %v6324_v27 }
0x1f0f   :  { %10989 = vtanh.f32 %v13257_v32  ;;  %v6327_v24 = vmul.f32 %v10980_v53, %v10978_v59  ;;  %v10982_v22 = vpop.eup %10981 }
0x1f10   :  { %10991 = vtanh.f32 %v13259_v44  ;;  %v10984_v56 = vpop.eup %10983 }
0x1f11   :  { %v13263_v33 = vadd.f32 %v6327_v24, %v6323_v6  ;;  %10993 = vrcp.f32 %v6275_v17  ;;  %v277_v17 = vld [vmem:[%s13682_s1 + $0x28] sm:$0xff]  ;;  %v276_v24 = vld [vmem:[%s13682_s1 + $0x20] sm:$0xff] }
0x1f13   :  { %10995 = vtanh.f32 %v13263_v33 }
0x1f17   :  { %v10986_v37 = vpop.eup %10985 }
0x1f18   :  { %v10988_v3 = vpop.eup %10987  ;;  %v6338_v40 = vmul.f32 %v10986_v37, %v10982_v22  ;;  %v279_v22 = vld [vmem:[%s13682_s1 + $0x38] sm:$0xff]  ;;  %v272_v37 = vld [vmem:[%s13682_s1] sm:$0xff] }
0x1f19   :  { %v10990_v36 = vpop.eup %10989 }
0x1f1a   :  { %v10992_v41 = vpop.eup %10991  ;;  %v6337_v18 = vmul.f32 %v10990_v36, %v10984_v56  ;;  %v13268_v60 = vsel %vm4004_vm13, %v13123_v55, %v6338_v40  ;;  %v278_v56 = vld [vmem:[%s13682_s1 + $0x30] sm:$0xff] }
0x1f1b   :  { %v6340_v58 = vmul.f32 %v10992_v41, %v10988_v3  ;;  %v10994_v42 = vpop.eup %10993  ;;  %v274_v3 = vld [vmem:[%s13682_s1 + $0x10] sm:$0xff] }
0x1f1c   :  { %v10097_v46 = vpack.i.bf16 %v6338_v40, %v6337_v18  ;;  %v13272_v30 = vsel %vm4004_vm13, %v13127_v15, %v6337_v18 }
0x1f1d   :  { %v10996_v34 = vpop.eup %10995  ;;  %v13276_v27 = vsel %vm4004_vm13, %v13131_v48, %v6340_v58 }
0x1f1e   :  { %10098 = vrot.lane.b32.xlu1 %v10097_v46, %s11244_s22  ;;  %v6339_v39 = vmul.f32 %v10996_v34, %v10994_v42 }
0x1f20   :  { %v10102_v50 = vpack.i.bf16 %v6340_v58, %v6339_v39  ;;  %v13281_v55 = vsel %vm4004_vm13, %v13136_v0, %v6339_v39 }
0x1f22   :  { %10103 = vrot.lane.b32.xlu0 %v10102_v50, %s11244_s22 }
0x1f90   :  { %v10099_v13 = vpop.permute.xlu1 %10098 }
0x1f91   :  { %v10101_v16 = vunpack.i.h.bf16 %v10099_v13  ;;  %v10100_v9 = vunpack.i.l.bf16 %v10099_v13 }
0x1f93   :  { %v9819_v15 = vpack.c.bf16 %v10101_v16, %v10100_v9 }
0x1f94   :  { %v10104_v59 = vpop.permute.xlu0 %10103 }
0x1f95   :  { %v10106_v6 = vunpack.i.h.bf16 %v10104_v59  ;;  %v10105_v53 = vunpack.i.l.bf16 %v10104_v59  ;;  %9820 = vmatprep.subr.bf16.mxu0 %v9819_v15 }
0x1f96   :  { %9822 = vmatpush3.bf16.msra.mxu0 %v9819_v15 }
0x1f97   :  { %v9823_v48 = vpack.c.bf16 %v10106_v6, %v10105_v53 }
0x1f99   :  { %9824 = vmatprep.subr.bf16.mxu0 %v9823_v48 }
0x1f9a   :  { %9826 = vmatpush3.bf16.msra.mxu0 %v9823_v48 }
0x1f9d   :  { %9502 = vmatmul.mubr.msk.f32.vlgmr.msra.gmra.mrb[122].mxu0 %vm727_vm8, %v13140_v20 }
0x1f9e   :  { %9504 = vmatprep.mubr.msk.f32.mxu0 %vm727_vm8, %v13145_v61 }
0x1fa1   :  { %9505 = vmatmul.mubr.msk.f32.gmra.mrb[124].mxu0 %vm727_vm8, %v13150_v38 }
0x1fa2   :  { %9507 = vmatprep.mubr.msk.f32.mxu0 %vm727_vm8, %v13155_v28 }
0x1fa5   :  { %9508 = vmatmul.mubr.msk.f32.gmra.mrb[126].mxu0 %vm727_vm8, %v13160_v1 }
0x1fa6   :  { %9510 = vmatprep.mubr.msk.f32.mxu0 %vm727_vm8, %v13165_v25 }
0x1fa9   :  { %9511 = vmatmul.mubr.msk.f32.gmra.mrb[128].mxu0 %vm727_vm8, %v13170_v35 }
0x1faa   :  { %9513 = vmatprep.mubr.msk.f32.mxu0 %vm727_vm8, %v13175_v23 }
0x1fad   :  { %9514 = vmatmul.mubr.msk.f32.gmra.mrb[130].mxu0 %vm727_vm8, %v13180_v10 }
0x1fae   :  { %9516 = vmatprep.mubr.msk.f32.mxu0 %vm727_vm8, %v13185_v7 }
0x1fb1   :  { %9517 = vmatmul.mubr.msk.f32.gmra.mrb[132].mxu0 %vm727_vm8, %v13190_v63 }
0x1fb2   :  { %9519 = vmatprep.mubr.msk.f32.mxu0 %vm727_vm8, %v13195_v2 }
0x1fb5   :  { %9520 = vmatmul.mubr.msk.f32.gmra.mrb[134].mxu0 %vm727_vm8, %v13200_v54 }
0x1fb6   :  { %9522 = vmatprep.mubr.msk.f32.mxu0 %vm727_vm8, %v13205_v43 }
0x1fb9   :  { %9523 = vmatmul.mubr.msk.f32.gmra.mrb[136].mxu0 %vm727_vm8, %v13210_v26 }
0x2070   :  { %v9503_v0 = vpop.f32.mrb[122].mxu0 }
0x2071   :  { %6520 = vrot.lane.b32.xlu0 %v9503_v0, %s11245_s23  ;;  %v6423_v20 = vpop.f32.mrb[123].mxu0 }
0x2072   :  { %6518 = vrot.lane.b32.xlu1 %v6423_v20, %s11245_s23 }
0x2074   :  { %v9506_v61 = vpop.f32.mrb[124].mxu0 }
0x2075   :  { %6524 = vrot.lane.b32.xlu0 %v9506_v61, %s11245_s23  ;;  %v6433_v38 = vpop.f32.mrb[125].mxu0 }
0x2076   :  { %6522 = vrot.lane.b32.xlu1 %v6433_v38, %s11245_s23 }
0x2078   :  { %v9509_v28 = vpop.f32.mrb[126].mxu0 }
0x2079   :  { %6528 = vrot.lane.b32.xlu0 %v9509_v28, %s11245_s23  ;;  %v6443_v1 = vpop.f32.mrb[127].mxu0 }
0x207a   :  { %6526 = vrot.lane.b32.xlu1 %v6443_v1, %s11245_s23 }
0x207c   :  { %v9512_v25 = vpop.f32.mrb[128].mxu0 }
0x207d   :  { %6532 = vrot.lane.b32.xlu0 %v9512_v25, %s11245_s23  ;;  %v6453_v35 = vpop.f32.mrb[129].mxu0 }
0x207e   :  { %6530 = vrot.lane.b32.xlu1 %v6453_v35, %s11245_s23 }
0x2080   :  { %v9515_v23 = vpop.f32.mrb[130].mxu0 }
0x2081   :  { %6536 = vrot.lane.b32.xlu0 %v9515_v23, %s11245_s23  ;;  %v6463_v10 = vpop.f32.mrb[131].mxu0 }
0x2082   :  { %6534 = vrot.lane.b32.xlu1 %v6463_v10, %s11245_s23 }
0x2084   :  { %v9518_v7 = vpop.f32.mrb[132].mxu0 }
0x2085   :  { %6540 = vrot.lane.b32.xlu0 %v9518_v7, %s11245_s23  ;;  %v6473_v63 = vpop.f32.mrb[133].mxu0 }
0x2086   :  { %6538 = vrot.lane.b32.xlu1 %v6473_v63, %s11245_s23 }
0x2088   :  { %v9521_v2 = vpop.f32.mrb[134].mxu0 }
0x2089   :  { %6544 = vrot.lane.b32.xlu0 %v9521_v2, %s11245_s23  ;;  %v6483_v54 = vpop.f32.mrb[135].mxu0 }
0x208a   :  { %6542 = vrot.lane.b32.xlu1 %v6483_v54, %s11245_s23 }
0x208c   :  { %v9524_v43 = vpop.f32.mrb[136].mxu0 }
0x208d   :  { %6548 = vrot.lane.b32.xlu0 %v9524_v43, %s11245_s23  ;;  %v6493_v26 = vpop.f32.mrb[137].mxu0 }
0x208e   :  { %6546 = vrot.lane.b32.xlu1 %v6493_v26, %s11245_s23 }
0x2091   :  { %6664 = vrot.lane.b32.xlu0 %v13254_v4, %s11236_s14  ;;  %v273_v4 = vld [vmem:[%s13682_s1 + $0x8] sm:$0xff] }
0x2092   :  { %6662 = vrot.lane.b32.xlu1 %v13257_v32, %s11236_s14  ;;  %v275_v32 = vld [vmem:[%s13682_s1 + $0x18] sm:$0xff] }
0x2095   :  { %6668 = vrot.lane.b32.xlu0 %v13259_v44, %s11236_s14  ;;  %v264_v44 = vld [vmem:[%s13683_s2] sm:$0xff] }
0x2096   :  { %6666 = vrot.lane.b32.xlu1 %v13263_v33, %s11236_s14  ;;  %9533 = vmatprep.mubr.msk.f32.mxu1 %vm727_vm8, %v264_v44 }
0x2099   :  { %6749 = vperm.xlu0 %9985, %v277_v17  }
0x209a   :  { %6744 = vperm.xlu1 %9986, %v276_v24  }
0x209d   :  { %6759 = vperm.xlu0 %9985, %v279_v22  }
0x209e   :  { %6754 = vperm.xlu1 %9986, %v278_v56  }
0x20a1   :  { %6729 = vperm.xlu0 %9985, %v273_v4  }
0x20a2   :  { %6724 = vperm.xlu1 %9986, %v272_v37  }
0x20a5   :  { %6739 = vperm.xlu0 %9985, %v275_v32  }
0x20a6   :  { %6734 = vperm.xlu1 %9986, %v274_v3  }
0x20e3   :  { %v6521_v33 = vpop.permute.xlu0 %6520 }
0x20e4   :  { %v6567_v40 = vadd.f32 %v6521_v33, %v12599_v57  ;;  %v6519_v36 = vpop.permute.xlu1 %6518 }
0x20e5   :  { %v6566_v41 = vadd.f32 %v6519_v36, %v12601_v31 }
0x20e6   :  { %v8367_v18 = vmul.f32 -1.442695, %v6567_v40 }
0x20e7   :  { %v8366_v58 = vmul.f32 -1.442695, %v6566_v41  ;;  %v6525_v42 = vpop.permute.xlu0 %6524 }
0x20e8   :  { %10997 = vpow2.f32 %v8367_v18  ;;  %v6569_v46 = vadd.f32 %v6525_v42, %v12605_v12  ;;  %v6523_v34 = vpop.permute.xlu1 %6522 }
0x20e9   :  { %10999 = vpow2.f32 %v8366_v58  ;;  %v6568_v50 = vadd.f32 %v6523_v34, %v12607_v5 }
0x20ea   :  { %v8369_v39 = vmul.f32 -1.442695, %v6569_v46 }
0x20eb   :  { %v6529_v13 = vpop.permute.xlu0 %6528  ;;  %v8368_v31 = vmul.f32 -1.442695, %v6568_v50 }
0x20ec   :  { %11001 = vpow2.f32 %v8369_v39  ;;  %v6571_v16 = vadd.f32 %v6529_v13, %v12610_v51  ;;  %v6527_v9 = vpop.permute.xlu1 %6526 }
0x20ed   :  { %v6570_v57 = vadd.f32 %v6527_v9, %v12613_v14 }
0x20ee   :  { %v8371_v15 = vmul.f32 -1.442695, %v6571_v16 }
0x20ef   :  { %v8370_v59 = vmul.f32 -1.442695, %v6570_v57  ;;  %v6533_v6 = vpop.permute.xlu0 %6532 }
0x20f0   :  { %11003 = vpow2.f32 %v8371_v15  ;;  %v6573_v53 = vadd.f32 %v6533_v6, %v12617_v11  ;;  %v6531_v12 = vpop.permute.xlu1 %6530 }
0x20f1   :  { %11005 = vpow2.f32 %v8370_v59  ;;  %v6572_v48 = vadd.f32 %v6531_v12, %v12619_v45 }
0x20f2   :  { %v10998_v0 = vpop.eup %10997  ;;  %v8373_v5 = vmul.f32 -1.442695, %v6573_v53  ;;  %11007 = vpow2.f32 %v8368_v31 }
0x20f3   :  { %v11000_v20 = vpop.eup %10999  ;;  %v6619_v61 = vadd.f32 1.0, %v10998_v0  ;;  %v8372_v51 = vmul.f32 -1.442695, %v6572_v48  ;;  %v6537_v38 = vpop.permute.xlu0 %6536 }
0x20f4   :  { %v6618_v28 = vadd.f32 1.0, %v11000_v20  ;;  %11009 = vpow2.f32 %v8373_v5  ;;  %v6575_v14 = vadd.f32 %v6537_v38, %v12623_v62  ;;  %v6535_v1 = vpop.permute.xlu1 %6534 }
0x20f5   :  { %v6574_v25 = vadd.f32 %v6535_v1, %v12625_v21  ;;  %11011 = vrcp.f32 %v6619_v61 }
0x20f6   :  { %v11002_v35 = vpop.eup %11001  ;;  %v8375_v11 = vmul.f32 -1.442695, %v6575_v14  ;;  %11013 = vpow2.f32 %v8372_v51 }
0x20f7   :  { %v6621_v23 = vadd.f32 1.0, %v11002_v35  ;;  %v8374_v45 = vmul.f32 -1.442695, %v6574_v25  ;;  %v6541_v10 = vpop.permute.xlu0 %6540  ;;  %11015 = vrcp.f32 %v6618_v28 }
0x20f8   :  { %v6577_v7 = vadd.f32 %v6541_v10, %v12631_v19  ;;  %v6539_v63 = vpop.permute.xlu1 %6538  ;;  %11017 = vpow2.f32 %v8375_v11 }
0x20f9   :  { %v6576_v2 = vadd.f32 %v6539_v63, %v12633_v49  ;;  %11019 = vrcp.f32 %v6621_v23 }
0x20fa   :  { %v11004_v54 = vpop.eup %11003  ;;  %v8377_v62 = vmul.f32 -1.442695, %v6577_v7  ;;  %11021 = vpow2.f32 %v8374_v45 }
0x20fb   :  { %v11006_v43 = vpop.eup %11005  ;;  %v6623_v26 = vadd.f32 1.0, %v11004_v54  ;;  %v8376_v21 = vmul.f32 -1.442695, %v6576_v2  ;;  %v6545_v17 = vpop.permute.xlu0 %6544 }
0x20fc   :  { %v6622_v24 = vadd.f32 1.0, %v11006_v43  ;;  %11023 = vpow2.f32 %v8377_v62  ;;  %v6579_v22 = vadd.f32 %v6545_v17, %v13678_v52  ;;  %v6543_v56 = vpop.permute.xlu1 %6542  ;;  %v11008_v4 = vpop.eup %11007  ;;  %v13684_v17 = vld [vmem:[#allocation30_spill] sm:$0xff] }
0x20fd   :  { %11025 = vrcp.f32 %v6623_v26  ;;  %v6578_v37 = vadd.f32 %v6543_v56, %v13679_v8  ;;  %v6620_v36 = vadd.f32 1.0, %v11008_v4 }
0x20fe   :  { %v11010_v19 = vpop.eup %11009  ;;  %11027 = vrcp.f32 %v6622_v24 }
0x20ff   :  { %v6625_v49 = vadd.f32 1.0, %v11010_v19  ;;  %11029 = vpow2.f32 %v8376_v21  ;;  %v6549_v32 = vpop.permute.xlu0 %6548  ;;  %v11012_v3 = vpop.eup %11011 }
0x2100   :  { %11031 = vtanh.f32 %v6579_v22  ;;  %v6581_v44 = vadd.f32 %v6549_v32, %v13680_v47  ;;  %v6547_v33 = vpop.permute.xlu1 %6546  ;;  %v11014_v40 = vpop.eup %11013 }
0x2101   :  { %11033 = vrcp.f32 %v6625_v49  ;;  %v11016_v41 = vpop.eup %11015  ;;  %v6624_v52 = vadd.f32 1.0, %v11014_v40  ;;  %v6580_v18 = vadd.f32 %v6547_v33, %v13681_v29 }
0x2102   :  { %11035 = vtanh.f32 %v6578_v37  ;;  %v11018_v58 = vpop.eup %11017  ;;  %v13685_v37 = vld [vmem:[#allocation31_spill] sm:$0xff] }
0x2103   :  { %11037 = vtanh.f32 %v6581_v44  ;;  %v11020_v42 = vpop.eup %11019  ;;  %v6665_v46 = vpop.permute.xlu0 %6664  ;;  %v6627_v16 = vadd.f32 1.0, %v11018_v58  ;;  %v268_v58 = vld [vmem:[%s13683_s2 + $0x20] sm:$0xff] }
0x2104   :  { %11039 = vrcp.f32 %v6624_v52  ;;  %v11022_v8 = vpop.eup %11021  ;;  %v6663_v50 = vpop.permute.xlu1 %6662  ;;  %v265_v52 = vld [vmem:[%s13683_s2 + $0x8] sm:$0xff] }
0x2105   :  { %11041 = vrcp.f32 %v6620_v36  ;;  %v6626_v15 = vadd.f32 1.0, %v11022_v8  ;;  %v13687_v36 = vld [vmem:[#allocation33_spill] sm:$0xff]  ;;  %v271_v8 = vld [vmem:[%s13683_s2 + $0x38] sm:$0xff] }
0x2106   :  { %v11024_v34 = vpop.eup %11023  ;;  %11043 = vtanh.f32 %v6580_v18  ;;  %v267_v18 = vld [vmem:[%s13683_s2 + $0x18] sm:$0xff] }
0x2107   :  { %v11026_v39 = vpop.eup %11025  ;;  %v6669_v6 = vpop.permute.xlu0 %6668  ;;  %v6629_v12 = vadd.f32 1.0, %v11024_v34  ;;  %11045 = vrcp.f32 %v6627_v16 }
0x2108   :  { %v11028_v47 = vpop.eup %11027  ;;  %v6675_v9 = vmul.f32 %v11026_v39, %v6665_v46  ;;  %11047 = vrcp.f32 %v6626_v15  ;;  %v6667_v38 = vpop.permute.xlu1 %6666 }
0x2109   :  { %v11030_v13 = vpop.eup %11029  ;;  %v6674_v29 = vmul.f32 %v11028_v47, %v6663_v50 }
0x210a   :  { %v11032_v57 = vpop.eup %11031  ;;  %v6628_v35 = vadd.f32 1.0, %v11030_v13 }
0x210b   :  { %v11034_v31 = vpop.eup %11033  ;;  %v6679_v59 = vmul.f32 %v11032_v57, %v11012_v3 }
0x210c   :  { %v11036_v53 = vpop.eup %11035  ;;  %v6677_v48 = vmul.f32 %v11034_v31, %v6669_v6 }
0x210d   :  { %v11038_v0 = vpop.eup %11037  ;;  %v6683_v5 = vadd.f32 %v6679_v59, %v6675_v9  ;;  %v6678_v20 = vmul.f32 %v11036_v53, %v11016_v41 }
0x210e   :  { %v11040_v61 = vpop.eup %11039  ;;  %v6681_v51 = vmul.f32 %v11038_v0, %v11020_v42  ;;  %v270_v42 = vld [vmem:[%s13683_s2 + $0x30] sm:$0xff] }
0x210f   :  { %v11042_v28 = vpop.eup %11041  ;;  %11049 = vtanh.f32 %v6683_v5  ;;  %v6682_v14 = vadd.f32 %v6678_v20, %v6674_v29  ;;  %v6676_v1 = vmul.f32 %v11040_v61, %v6667_v38 }
0x2110   :  { %v11044_v25 = vpop.eup %11043  ;;  %11051 = vrcp.f32 %v6629_v12  ;;  %v6685_v11 = vadd.f32 %v6681_v51, %v6677_v48 }
0x2111   :  { %11053 = vtanh.f32 %v6682_v14  ;;  %v6680_v23 = vmul.f32 %v11044_v25, %v11042_v28  ;;  %v11046_v10 = vpop.eup %11045 }
0x2112   :  { %11055 = vtanh.f32 %v6685_v11  ;;  %v11048_v7 = vpop.eup %11047 }
0x2113   :  { %v6684_v45 = vadd.f32 %v6680_v23, %v6676_v1  ;;  %11057 = vrcp.f32 %v6628_v35 }
0x2115   :  { %11059 = vtanh.f32 %v6684_v45 }
0x2118   :  { %v6750_v50 = vpop.permute.xlu0 %6749 }
0x2119   :  { %v11050_v63 = vpop.eup %11049  ;;  %v6745_v13 = vpop.permute.xlu1 %6744 }
0x211a   :  { %v11052_v2 = vpop.eup %11051  ;;  %v6691_v54 = vmul.f32 %v11050_v63, %v11046_v10 }
0x211b   :  { %v11054_v62 = vpop.eup %11053 }
0x211c   :  { %v11056_v43 = vpop.eup %11055  ;;  %v6690_v26 = vmul.f32 %v11054_v62, %v11048_v7  ;;  %v6715_v21 = vsel %vm4009_vm14, %v13268_v60, %v6691_v54  ;;  %v13686_v60 = vld [vmem:[#allocation32_spill] sm:$0xff]  ;;  %v6760_v59 = vpop.permute.xlu0 %6759 }
0x211d   :  { %v6719_v24 = vadd.f32 %v6715_v21, %v13684_v17  ;;  %v6693_v22 = vmul.f32 %v11056_v43, %v11052_v2  ;;  %v11058_v56 = vpop.eup %11057  ;;  %v6755_v53 = vpop.permute.xlu1 %6754  ;;  %v288_v21 = vld [vmem:[%s13688_s10] sm:$0xff] }
0x211e   :  { %v6714_v4 = vsel %vm4009_vm14, %v13272_v30, %v6690_v26  ;;  %9553 = vmatprep.mubr.msk.f32.mxu0 %vm727_vm8, %v288_v21 }
0x211f   :  { %v11060_v19 = vpop.eup %11059  ;;  %v6718_v49 = vadd.f32 %v6714_v4, %v13685_v37  ;;  %v6717_v32 = vsel %vm4009_vm14, %v13276_v27, %v6693_v22  ;;  %v266_v27 = vld [vmem:[%s13683_s2 + $0x10] sm:$0xff] }
0x2120   :  { %v6692_v3 = vmul.f32 %v11060_v19, %v11058_v56  ;;  %v6721_v33 = vadd.f32 %v6717_v32, %v13686_v60  ;;  %v6730_v11 = vpop.permute.xlu0 %6729  ;;  %v297_v60 = vld [vmem:[%s13689_s7 + $0x8] sm:$0xff] }
0x2121   :  { %v9827_v44 = vpack.c.bf16 %v6719_v24, %v6718_v49  ;;  %v6725_v23 = vpop.permute.xlu1 %6724  ;;  %v296_v49 = vld [vmem:[%s13689_s7] sm:$0xff] }
0x2122   :  { %v6716_v40 = vsel %vm4009_vm14, %v13281_v55, %v6692_v3  ;;  %v269_v55 = vld [vmem:[%s13683_s2 + $0x28] sm:$0xff] }
0x2123   :  { %9828 = vmatprep.subr.bf16.mxu1 %v9827_v44  ;;  %v6720_v30 = vadd.f32 %v6716_v40, %v13687_v36  ;;  %v299_v40 = vld [vmem:[%s13689_s7 + $0x18] sm:$0xff]  ;;  %v302_v36 = vld [vmem:[%s13689_s7 + $0x30] sm:$0xff] }
0x2124   :  { %9830 = vmatpush3.bf16.msra.mxu1 %v9827_v44  ;;  %v6740_v54 = vpop.permute.xlu0 %6739  ;;  %v298_v44 = vld [vmem:[%s13689_s7 + $0x10] sm:$0xff] }
0x2125   :  { %v9831_v41 = vpack.c.bf16 %v6721_v33, %v6720_v30  ;;  %v6735_v43 = vpop.permute.xlu1 %6734  ;;  %v300_v33 = vld [vmem:[%s13689_s7 + $0x20] sm:$0xff]  ;;  %v301_v30 = vld [vmem:[%s13689_s7 + $0x28] sm:$0xff] }
0x2127   :  { %9832 = vmatprep.subr.bf16.mxu1 %v9831_v41 }
0x2128   :  { %9834 = vmatpush3.bf16.msra.mxu1 %v9831_v41  ;;  %v328_v41 = vld [vmem:[%s13690_s11 + $0x40] sm:$0xff] }
0x212b   :  { %9534 = vmatmul.mubr.msk.f32.vlgmr.msra.gmra.mrb[144].mxu1 %vm727_vm8, %v265_v52  ;;  %v303_v52 = vld [vmem:[%s13689_s7 + $0x38] sm:$0xff] }
0x212c   :  { %9536 = vmatprep.mubr.msk.f32.mxu1 %vm727_vm8, %v266_v27  ;;  %v330_v27 = vld [vmem:[%s13690_s11 + $0x50] sm:$0xff] }
0x212f   :  { %9537 = vmatmul.mubr.msk.f32.gmra.mrb[146].mxu1 %vm727_vm8, %v267_v18  ;;  %v329_v18 = vld [vmem:[%s13690_s11 + $0x48] sm:$0xff] }
0x2130   :  { %9539 = vmatprep.mubr.msk.f32.mxu1 %vm727_vm8, %v268_v58  ;;  %v332_v58 = vld [vmem:[%s13690_s11 + $0x60] sm:$0xff] }
0x2133   :  { %9540 = vmatmul.mubr.msk.f32.gmra.mrb[148].mxu1 %vm727_vm8, %v269_v55  ;;  %v331_v55 = vld [vmem:[%s13690_s11 + $0x58] sm:$0xff] }
0x2134   :  { %9542 = vmatprep.mubr.msk.f32.mxu1 %vm727_vm8, %v270_v42  ;;  %v334_v42 = vld [vmem:[%s13690_s11 + $0x70] sm:$0xff] }
0x2137   :  { %9543 = vmatmul.mubr.msk.f32.gmra.mrb[150].mxu1 %vm727_vm8, %v271_v8  ;;  %v333_v8 = vld [vmem:[%s13690_s11 + $0x68] sm:$0xff] }
0x21fe   :  { %v9535_v46 = vpop.f32.mrb[144].mxu1 }
0x21ff   :  { %v6852_v34 = vpop.f32.mrb[145].mxu1  ;;  %v6858_v45 = vadd.f32 %v9535_v46, %v6730_v11  ;;  %v320_v46 = vld [vmem:[%s13690_s11] sm:$0xff]  ;;  %v283_v11 = vld [vmem:[%s13693_s16 + $0x18] sm:$0xff] }
0x2200   :  { %v6853_v7 = vadd.f32 %v6852_v34, %v6725_v23  ;;  %v335_v34 = vld [vmem:[%s13690_s11 + $0x78] sm:$0xff]  ;;  %v284_v23 = vld [vmem:[%s13693_s16 + $0x20] sm:$0xff] }
0x2202   :  { %v9538_v39 = vpop.f32.mrb[146].mxu1 }
0x2203   :  { %v6862_v47 = vpop.f32.mrb[147].mxu1  ;;  %v6868_v26 = vadd.f32 %v9538_v39, %v6740_v54  ;;  %v322_v39 = vld [vmem:[%s13690_s11 + $0x10] sm:$0xff] }
0x2204   :  { %v6863_v24 = vadd.f32 %v6862_v47, %v6735_v43  ;;  %v321_v47 = vld [vmem:[%s13690_s11 + $0x8] sm:$0xff] }
0x2206   :  { %v9541_v16 = vpop.f32.mrb[148].mxu1 }
0x2207   :  { %v6878_v9 = vadd.f32 %v9541_v16, %v6750_v50  ;;  %v6872_v57 = vpop.f32.mrb[149].mxu1  ;;  %v324_v50 = vld [vmem:[%s13690_s11 + $0x20] sm:$0xff]  ;;  %v326_v16 = vld [vmem:[%s13690_s11 + $0x30] sm:$0xff] }
0x2208   :  { %v6873_v15 = vadd.f32 %v6872_v57, %v6745_v13  ;;  %v323_v13 = vld [vmem:[%s13690_s11 + $0x18] sm:$0xff] }
0x2209   :  { %v8387_v31 = vmul.f32 -1.442695, %v6878_v9  ;;  %v325_v9 = vld [vmem:[%s13690_s11 + $0x28] sm:$0xff]  ;;  %v327_v57 = vld [vmem:[%s13690_s11 + $0x38] sm:$0xff] }
0x220a   :  { %v8386_v29 = vmul.f32 -1.442695, %v6873_v15  ;;  %v9544_v6 = vpop.f32.mrb[150].mxu1 }
0x220b   :  { %11061 = vpow2.f32 %v8387_v31  ;;  %v6888_v12 = vadd.f32 %v9544_v6, %v6760_v59  ;;  %v6882_v48 = vpop.f32.mrb[151].mxu1 }
0x220c   :  { %11063 = vpow2.f32 %v8386_v29  ;;  %v6883_v0 = vadd.f32 %v6882_v48, %v6755_v53 }
0x220d   :  { %v8389_v5 = vmul.f32 -1.442695, %v6888_v12 }
0x220e   :  { %v8388_v20 = vmul.f32 -1.442695, %v6883_v0 }
0x220f   :  { %11065 = vpow2.f32 %v8389_v5  ;;  %v289_v5 = vld [vmem:[%s13688_s10 + $0x8] sm:$0xff] }
0x2210   :  { %11067 = vpow2.f32 %v8388_v20  ;;  %v290_v20 = vld [vmem:[%s13688_s10 + $0x10] sm:$0xff] }
0x2215   :  { %v11062_v61 = vpop.eup %11061 }
0x2216   :  { %v11064_v51 = vpop.eup %11063  ;;  %v6904_v38 = vadd.f32 1.0, %v11062_v61  ;;  %v291_v61 = vld [vmem:[%s13688_s10 + $0x18] sm:$0xff] }
0x2217   :  { %v6903_v28 = vadd.f32 1.0, %v11064_v51  ;;  %v292_v51 = vld [vmem:[%s13688_s10 + $0x20] sm:$0xff] }
0x2218   :  { %11069 = vrcp.f32 %v6904_v38  ;;  %v293_v38 = vld [vmem:[%s13688_s10 + $0x28] sm:$0xff] }
0x2219   :  { %v11066_v14 = vpop.eup %11065  ;;  %11071 = vrcp.f32 %v6903_v28  ;;  %v294_v28 = vld [vmem:[%s13688_s10 + $0x30] sm:$0xff] }
0x221a   :  { %v11068_v1 = vpop.eup %11067  ;;  %v6906_v25 = vadd.f32 1.0, %v11066_v14  ;;  %v295_v14 = vld [vmem:[%s13688_s10 + $0x38] sm:$0xff] }
0x221b   :  { %v6905_v35 = vadd.f32 1.0, %v11068_v1  ;;  %v280_v1 = vld [vmem:[%s13693_s16] sm:$0xff] }
0x221c   :  { %11073 = vrcp.f32 %v6906_v25  ;;  %v281_v25 = vld [vmem:[%s13693_s16 + $0x8] sm:$0xff] }
0x221d   :  { %11075 = vrcp.f32 %v6905_v35  ;;  %v282_v35 = vld [vmem:[%s13693_s16 + $0x10] sm:$0xff] }
0x2222   :  { %v11070_v10 = vpop.eup %11069 }
0x2223   :  { %v11072_v63 = vpop.eup %11071  ;;  %v6916_v2 = vmul.f32 %v11070_v10, %v6858_v45  ;;  %v285_v45 = vld [vmem:[%s13693_s16 + $0x28] sm:$0xff]  ;;  %v286_v10 = vld [vmem:[%s13693_s16 + $0x30] sm:$0xff] }
0x2224   :  { %v6915_v62 = vmul.f32 %v11072_v63, %v6853_v7  ;;  %v287_v7 = vld [vmem:[%s13693_s16 + $0x38] sm:$0xff]  ;;  %v304_v63 = vld [vmem:[%s13694_s15] sm:$0xff] }
0x2225   :  { %9601 = vmatprep.mubr.msk.f32.mxu1 %vm7346_vm4, %v304_v63  ;;  %v315_v63 = vld [vmem:[%s13694_s15 + $0x58] sm:$0xff] }
0x2226   :  { %v11074_v17 = vpop.eup %11073  ;;  %v10107_v22 = vpack.i.bf16 %v6916_v2, %v6915_v62  ;;  %v13391_v56 = vpack.c.bf16 %v6916_v2, %v6915_v62 }
0x2227   :  { %v11076_v4 = vpop.eup %11075  ;;  %v6918_v19 = vmul.f32 %v11074_v17, %v6868_v26 }
0x2228   :  { %10108 = vrot.lane.b32.xlu1 %v10107_v22, %s11236_s14  ;;  %v6917_v37 = vmul.f32 %v11076_v4, %v6863_v24 }
0x222a   :  { %v10112_v32 = vpack.i.bf16 %v6918_v19, %v6917_v37  ;;  %v13396_v3 = vpack.c.bf16 %v6918_v19, %v6917_v37  ;;  %v13695_v19 = vld [vmem:[#allocation22_spill] sm:$0xff] }
0x222c   :  { %7204 = vperm.xlu1 %9986, %v296_v49   ;;  %10113 = vrot.lane.b32.xlu0 %v10112_v32, %s11236_s14 }
0x2230   :  { %7214 = vperm.xlu1 %9986, %v298_v44   ;;  %7209 = vperm.xlu0 %9985, %v297_v60   ;;  %v13696_v44 = vld [vmem:[#allocation23_spill] sm:$0xff] }
0x2234   :  { %7224 = vperm.xlu1 %9986, %v300_v33   ;;  %7219 = vperm.xlu0 %9985, %v299_v40  }
0x2238   :  { %7234 = vperm.xlu1 %9986, %v302_v36   ;;  %7229 = vperm.xlu0 %9985, %v301_v30  }
0x223c   :  { %7308 = vperm.xlu1 %9986, %v328_v41   ;;  %7239 = vperm.xlu0 %9985, %v303_v52  }
0x2240   :  { %7318 = vperm.xlu1 %9986, %v330_v27   ;;  %7313 = vperm.xlu0 %9985, %v329_v18   ;;  %v13697_v27 = vld [vmem:[#allocation24_spill] sm:$0xff] }
0x2244   :  { %7328 = vperm.xlu1 %9986, %v332_v58   ;;  %7323 = vperm.xlu0 %9985, %v331_v55  }
0x2248   :  { %7338 = vperm.xlu1 %9986, %v334_v42   ;;  %7333 = vperm.xlu0 %9985, %v333_v8   ;;  %v13698_v42 = vld [vmem:[#allocation25_spill] sm:$0xff] }
0x224c   :  { %7268 = vperm.xlu1 %9986, %v320_v46   ;;  %7343 = vperm.xlu0 %9985, %v335_v34  }
0x2250   :  { %7278 = vperm.xlu1 %9986, %v322_v39   ;;  %7273 = vperm.xlu0 %9985, %v321_v47  }
0x2254   :  { %7288 = vperm.xlu1 %9986, %v324_v50   ;;  %7283 = vperm.xlu0 %9985, %v323_v13  }
0x2258   :  { %7298 = vperm.xlu1 %9986, %v326_v16   ;;  %7293 = vperm.xlu0 %9985, %v325_v9   ;;  %v13699_v9 = vld [vmem:[#allocation26_spill] sm:$0xff] }
0x225c   :  { %7303 = vperm.xlu0 %9985, %v327_v57  }
0x229a   :  { %v10109_v15 = vpop.permute.xlu1 %10108 }
0x229b   :  { %v10111_v31 = vunpack.i.h.bf16 %v10109_v15  ;;  %v10110_v59 = vunpack.i.l.bf16 %v10109_v15 }
0x229d   :  { %v9835_v6 = vpack.c.bf16 %v10111_v31, %v10110_v59  ;;  %v13700_v59 = vld [vmem:[#allocation27_spill] sm:$0xff] }
0x229e   :  { %v10114_v53 = vpop.permute.xlu0 %10113 }
0x229f   :  { %v10116_v12 = vunpack.i.h.bf16 %v10114_v53  ;;  %v10115_v48 = vunpack.i.l.bf16 %v10114_v53  ;;  %9837 = vmatprep.subr.msk.bf16.mxu0 %vm13423_vm1, %v9835_v6 }
0x22a0   :  { %9840 = vmatpush3.bf16.msk.msra.mxu0 %vm13423_vm1, %v9835_v6 }
0x22a1   :  { %v9841_v0 = vpack.c.bf16 %v10116_v12, %v10115_v48 }
0x22a3   :  { %9843 = vmatprep.subr.msk.bf16.mxu0 %vm13423_vm1, %v9841_v0 }
0x22a4   :  { %9846 = vmatpush3.bf16.msk.msra.mxu0 %vm13423_vm1, %v9841_v0 }
0x22a5   :  { %9849 = vmatprep.subr.msk.bf16.mxu0 %vm9848_vm3, %v13391_v56 }
0x22a7   :  { %9554 = vmatmul.mubr.msk.f32.vlgmr.msra.gmra.mrb[138].mxu0 %vm727_vm8, %v289_v5  ;;  %v13701_v5 = vld [vmem:[#allocation28_spill] sm:$0xff] }
0x22a8   :  { %9852 = vmatpush3.bf16.msk.msra.mxu0 %vm9848_vm3, %v13391_v56  ;;  %9556 = vmatprep.mubr.msk.f32.mxu0 %vm727_vm8, %v290_v20 }
0x22a9   :  { %9855 = vmatprep.subr.msk.bf16.mxu0 %vm9848_vm3, %v13396_v3 }
0x22ab   :  { %9557 = vmatmul.mubr.msk.f32.gmra.mrb[140].mxu0 %vm727_vm8, %v291_v61  ;;  %v7205_v54 = vpop.permute.xlu1 %7204  ;;  %v13702_v61 = vld [vmem:[#allocation29_spill] sm:$0xff] }
0x22ac   :  { %9858 = vmatpush3.bf16.msk.msra.mxu0 %vm9848_vm3, %v13396_v3  ;;  %9559 = vmatprep.mubr.msk.f32.mxu0 %vm727_vm8, %v292_v51 }
0x22af   :  { %9560 = vmatmul.mubr.msk.f32.gmra.mrb[142].mxu0 %vm727_vm8, %v293_v38  ;;  %v7210_v2 = vpop.permute.xlu0 %7209  ;;  %v7215_v26 = vpop.permute.xlu1 %7214 }
0x22b0   :  { %9562 = vmatprep.mubr.msk.f32.mxu0 %vm727_vm8, %v294_v28  ;;  %v305_v28 = vld [vmem:[%s13694_s15 + $0x8] sm:$0xff] }
0x22b3   :  { %9563 = vmatmul.mubr.msk.f32.gmra.mrb[144].mxu0 %vm727_vm8, %v295_v14  ;;  %v7220_v62 = vpop.permute.xlu0 %7219  ;;  %v7225_v40 = vpop.permute.xlu1 %7224  ;;  %v306_v14 = vld [vmem:[%s13694_s15 + $0x10] sm:$0xff] }
0x22b4   :  { %9573 = vmatprep.mubr.msk.f32.mxu0 %vm727_vm8, %v280_v1  ;;  %v307_v1 = vld [vmem:[%s13694_s15 + $0x18] sm:$0xff] }
0x22b7   :  { %9574 = vmatmul.mubr.msk.f32.vlgmr.msra.gmra.mrb[138].mxu0 %vm727_vm8, %v281_v25  ;;  %v7230_v3 = vpop.permute.xlu0 %7229  ;;  %v7235_v16 = vpop.permute.xlu1 %7234  ;;  %v308_v25 = vld [vmem:[%s13694_s15 + $0x20] sm:$0xff] }
0x22b8   :  { %9576 = vmatprep.mubr.msk.f32.mxu0 %vm727_vm8, %v282_v35  ;;  %v309_v35 = vld [vmem:[%s13694_s15 + $0x28] sm:$0xff] }
0x22bb   :  { %9577 = vmatmul.mubr.msk.f32.gmra.mrb[140].mxu0 %vm727_vm8, %v283_v11  ;;  %v7240_v39 = vpop.permute.xlu0 %7239  ;;  %v310_v11 = vld [vmem:[%s13694_s15 + $0x30] sm:$0xff] }
0x22bc   :  { %9579 = vmatprep.mubr.msk.f32.mxu0 %vm727_vm8, %v284_v23  ;;  %v311_v23 = vld [vmem:[%s13694_s15 + $0x38] sm:$0xff] }
0x22bf   :  { %9580 = vmatmul.mubr.msk.f32.gmra.mrb[142].mxu0 %vm727_vm8, %v285_v45  ;;  %v312_v45 = vld [vmem:[%s13694_s15 + $0x40] sm:$0xff] }
0x22c0   :  { %9582 = vmatprep.mubr.msk.f32.mxu0 %vm727_vm8, %v286_v10  ;;  %v313_v10 = vld [vmem:[%s13694_s15 + $0x48] sm:$0xff] }
0x22c3   :  { %9583 = vmatmul.mubr.msk.f32.gmra.mrb[144].mxu0 %vm727_vm8, %v287_v7  ;;  %v314_v7 = vld [vmem:[%s13694_s15 + $0x50] sm:$0xff]  ;;  %vm7875_vm8 = vcmask 0  }
0x238a   :  { %v9575_v43 = vpop.f32.mrb[138].mxu0 }
0x238b   :  { %v7243_v21 = vadd.f32 %v9575_v43, %v7210_v2  ;;  %v7163_v17 = vpop.f32.mrb[139].mxu0  ;;  %v316_v2 = vld [vmem:[%s13694_s15 + $0x60] sm:$0xff]  ;;  %v319_v43 = vld [vmem:[%s13694_s15 + $0x78] sm:$0xff] }
0x238c   :  { %v7242_v24 = vadd.f32 %v7205_v54, %v7163_v17  ;;  %v317_v54 = vld [vmem:[%s13694_s15 + $0x68] sm:$0xff] }
0x238d   :  { %v7251_v22 = vmax.f32 %v7243_v21, 0.0 }
0x238e   :  { %v7250_v56 = vmax.f32 %v7242_v24, 0.0  ;;  %v9578_v4 = vpop.f32.mrb[140].mxu0 }
0x238f   :  { %v7259_v37 = vadd.f32 %v7251_v22, %v13695_v19  ;;  %v7245_v49 = vadd.f32 %v9578_v4, %v7220_v62  ;;  %v7173_v32 = vpop.f32.mrb[141].mxu0  ;;  %v318_v62 = vld [vmem:[%s13694_s15 + $0x70] sm:$0xff]  ;;  %v7314_v4 = vpop.permute.xlu0 %7313 }
0x2390   :  { %v7258_v60 = vadd.f32 %v7250_v56, %v13696_v44  ;;  %v7244_v33 = vadd.f32 %v7215_v26, %v7173_v32  ;;  %v7309_v19 = vpop.permute.xlu1 %7308 }
0x2391   :  { %v7253_v36 = vmax.f32 %v7245_v49, 0.0 }
0x2392   :  { %v7252_v30 = vmax.f32 %v7244_v33, 0.0  ;;  %v9581_v41 = vpop.f32.mrb[142].mxu0  ;;  %v9859_v52 = vpack.c.bf16 %v7259_v37, %v7258_v60 }
0x2393   :  { %v7261_v18 = vadd.f32 %v7253_v36, %v13697_v27  ;;  %v7247_v58 = vadd.f32 %v9581_v41, %v7230_v3  ;;  %v7183_v55 = vpop.f32.mrb[143].mxu0  ;;  %v7324_v32 = vpop.permute.xlu0 %7323 }
0x2394   :  { %v7260_v8 = vadd.f32 %v7252_v30, %v13698_v42  ;;  %v7246_v46 = vadd.f32 %v7225_v40, %v7183_v55  ;;  %9860 = vmatprep.subr.bf16.mxu1 %v9859_v52  ;;  %v7319_v44 = vpop.permute.xlu1 %7318 }
0x2395   :  { %v7255_v34 = vmax.f32 %v7247_v58, 0.0  ;;  %9862 = vmatpush3.bf16.msra.mxu1 %v9859_v52 }
0x2396   :  { %v7254_v47 = vmax.f32 %v7246_v46, 0.0  ;;  %v9584_v50 = vpop.f32.mrb[144].mxu0  ;;  %v9863_v13 = vpack.c.bf16 %v7261_v18, %v7260_v8 }
0x2397   :  { %v7263_v57 = vadd.f32 %v7255_v34, %v13699_v9  ;;  %v7249_v15 = vadd.f32 %v9584_v50, %v7240_v39  ;;  %v7193_v31 = vpop.f32.mrb[145].mxu0  ;;  %v7334_v18 = vpop.permute.xlu0 %7333 }
0x2398   :  { %v7262_v6 = vadd.f32 %v7254_v47, %v13700_v59  ;;  %v7248_v53 = vadd.f32 %v7235_v16, %v7193_v31  ;;  %9864 = vmatprep.subr.bf16.mxu1 %v9863_v13  ;;  %v7329_v55 = vpop.permute.xlu1 %7328 }
0x2399   :  { %v7257_v12 = vmax.f32 %v7249_v15, 0.0  ;;  %9866 = vmatpush3.bf16.msra.mxu1 %v9863_v13 }
0x239a   :  { %v7256_v48 = vmax.f32 %v7248_v53, 0.0  ;;  %v9867_v0 = vpack.c.bf16 %v7263_v57, %v7262_v6 }
0x239b   :  { %v7265_v20 = vadd.f32 %v7257_v12, %v13701_v5  ;;  %v7344_v13 = vpop.permute.xlu0 %7343 }
0x239c   :  { %v7264_v51 = vadd.f32 %v7256_v48, %v13702_v61  ;;  %9868 = vmatprep.subr.bf16.mxu1 %v9867_v0  ;;  %v7339_v57 = vpop.permute.xlu1 %7338 }
0x239d   :  { %9870 = vmatpush3.bf16.msra.mxu1 %v9867_v0 }
0x239e   :  { %v9871_v38 = vpack.c.bf16 %v7265_v20, %v7264_v51 }
0x239f   :  { %v7274_v51 = vpop.permute.xlu0 %7273 }
0x23a0   :  { %9872 = vmatprep.subr.bf16.mxu1 %v9871_v38 }
0x23a1   :  { %9874 = vmatpush3.bf16.msra.mxu1 %v9871_v38 }
0x23a4   :  { %9602 = vmatmul.mubr.msk.f32.vlgmr.msra.gmra.mrb[152].mxu1 %vm7346_vm4, %v305_v28 }
0x23a5   :  { %9604 = vmatprep.mubr.msk.f32.mxu1 %vm7346_vm4, %v306_v14 }
0x23a8   :  { %9605 = vmatmul.mubr.msk.f32.gmra.mrb[154].mxu1 %vm7346_vm4, %v307_v1  ;;  %v7269_v1 = vpop.permute.xlu1 %7268 }
0x23a9   :  { %9607 = vmatprep.mubr.msk.f32.mxu1 %vm7346_vm4, %v308_v25 }
0x23ac   :  { %9608 = vmatmul.mubr.msk.f32.gmra.mrb[156].mxu1 %vm7346_vm4, %v309_v35 }
0x23ad   :  { %9610 = vmatprep.mubr.msk.f32.mxu1 %vm7346_vm4, %v310_v11 }
0x23b0   :  { %9611 = vmatmul.mubr.msk.f32.gmra.mrb[158].mxu1 %vm7346_vm4, %v311_v23  ;;  %v7284_v23 = vpop.permute.xlu0 %7283 }
0x23b1   :  { %9613 = vmatprep.mubr.msk.f32.mxu1 %vm7346_vm4, %v312_v45 }
0x23b4   :  { %9614 = vmatmul.mubr.msk.f32.gmra.mrb[160].mxu1 %vm7346_vm4, %v313_v10 }
0x23b5   :  { %9616 = vmatprep.mubr.msk.f32.mxu1 %vm7346_vm4, %v314_v7 }
0x23b8   :  { %9617 = vmatmul.mubr.msk.f32.gmra.mrb[162].mxu1 %vm7346_vm4, %v315_v63 }
0x23b9   :  { %9619 = vmatprep.mubr.msk.f32.mxu1 %vm7346_vm4, %v316_v2 }
0x23bc   :  { %9620 = vmatmul.mubr.msk.f32.gmra.mrb[164].mxu1 %vm7346_vm4, %v317_v54 }
0x23bd   :  { %9622 = vmatprep.mubr.msk.f32.mxu1 %vm7346_vm4, %v318_v62  ;;  %v7279_v62 = vpop.permute.xlu1 %7278 }
0x23c0   :  { %9623 = vmatmul.mubr.msk.f32.gmra.mrb[166].mxu1 %vm7346_vm4, %v319_v43 }
0x2477   :  { %v13509_v26 = vpop.f32.mrb[152].mxu1 }
0x2478   :  { %v13511_v21 = vpop.f32.mrb[153].mxu1  ;;  %v7467_v10 = vadd.f32 %v13509_v26, %v7274_v51 }
0x2479   :  { %v7462_v63 = vadd.f32 %v13511_v21, %v7269_v1 }
0x247b   :  { %v13513_v17 = vpop.f32.mrb[154].mxu1 }
0x247c   :  { %v13515_v24 = vpop.f32.mrb[155].mxu1 }
0x247d   :  { %v7472_v21 = vadd.f32 %v13515_v24, %v7279_v62  ;;  %v8471_v62 = vld [vmem:[%s13706_s0] ss:$0 sm:$0xff] }
0x247f   :  { %v13517_v22 = vpop.f32.mrb[156].mxu1 }
0x2480   :  { %v13519_v56 = vpop.f32.mrb[157].mxu1 }
0x2483   :  { %v13521_v37 = vpop.f32.mrb[158].mxu1 }
0x2484   :  { %v13523_v49 = vpop.f32.mrb[159].mxu1 }
0x2487   :  { %v9615_v3 = vpop.f32.mrb[160].mxu1 }
0x2488   :  { %v7507_v60 = vadd.f32 %v9615_v3, %v7314_v4  ;;  %v7501_v33 = vpop.f32.mrb[161].mxu1 }
0x2489   :  { %v7502_v40 = vadd.f32 %v7501_v33, %v7309_v19 }
0x248a   :  { %v8435_v36 = vmul.f32 -1.442695, %v7507_v60  ;;  %v7294_v60 = vpop.permute.xlu0 %7293 }
0x248b   :  { %v8434_v30 = vmul.f32 -1.442695, %v7502_v40  ;;  %v9618_v41 = vpop.f32.mrb[162].mxu1 }
0x248c   :  { %11077 = vpow2.f32 %v8435_v36  ;;  %v7517_v52 = vadd.f32 %v9618_v41, %v7324_v32  ;;  %v7511_v27 = vpop.f32.mrb[163].mxu1  ;;  %v7477_v32 = vadd.f32 %v13513_v17, %v7284_v23  ;;  %v7289_v41 = vpop.permute.xlu1 %7288  ;;  %v339_v23 = vld [vmem:[%s11395_s17 + $0x8] sm:$0xff] }
0x248d   :  { %11079 = vpow2.f32 %v8434_v30  ;;  %v7512_v58 = vadd.f32 %v7511_v27, %v7319_v44  ;;  %v7482_v24 = vadd.f32 %v13519_v56, %v7289_v41  ;;  %v338_v56 = vld [vmem:[%s11395_s17] sm:$0xff]  ;;  %s11246_s17 = smov [#allocation3]  }
0x248e   :  { %v8437_v42 = vmul.f32 -1.442695, %v7517_v52  ;;  %v7487_v52 = vadd.f32 %v13517_v22, %v7294_v60  ;;  %9641 = vmatprep.mubr.msk.f32.mxu1 %vm7346_vm4, %v338_v56  ;;  %s7885_s25 = sshll.u32 %s11246_s17, 4  ;;  %s7886_s25 = int_to_ptr.vmem [resolvable:$true] %s7885_s25 }
0x248f   :  { %v8436_v8 = vmul.f32 -1.442695, %v7512_v58  ;;  %v9621_v46 = vpop.f32.mrb[164].mxu1  ;;  %s11175_s29 = scalar_lea.vmem %s7886_s25, 32  ;;  %p11176_p1 = scmp.lt.s32.totalorder %s7886_s25, %s7886_s25 }
0x2490   :  { %11081 = vpow2.f32 %v8437_v42  ;;  %v7527_v34 = vadd.f32 %v9621_v46, %v7334_v18  ;;  %v7521_v39 = vpop.f32.mrb[165].mxu1 }
0x2491   :  { %11083 = vpow2.f32 %v8436_v8  ;;  %v7522_v47 = vadd.f32 %v7521_v39, %v7329_v55  ;;  %v7304_v8 = vpop.permute.xlu0 %7303 }
0x2492   :  { %v8439_v50 = vmul.f32 -1.442695, %v7527_v34  ;;  %v7497_v22 = vadd.f32 %v13521_v37, %v7304_v8 }
0x2493   :  { %v8438_v16 = vmul.f32 -1.442695, %v7522_v47  ;;  %v9624_v9 = vpop.f32.mrb[166].mxu1 }
0x2494   :  { %11085 = vpow2.f32 %v8439_v50  ;;  %v7537_v15 = vadd.f32 %v9624_v9, %v7344_v13  ;;  %v7531_v31 = vpop.f32.mrb[167].mxu1  ;;  %v336_v50 = vld [vmem:[%s13705_s18] sm:$0xff]  ;;  %v7299_v13 = vpop.permute.xlu1 %7298 }
0x2495   :  { %11087 = vpow2.f32 %v8438_v16  ;;  %v7532_v59 = vadd.f32 %v7531_v31, %v7339_v57  ;;  %9660 = vmatprep.mubr.msk.f32.mxu0 %vm7346_vm4, %v336_v50  ;;  %v7492_v9 = vadd.f32 %v13523_v49, %v7299_v13  ;;  %v8470_v57 = vld [vmem:[#allocation2] ss:$0 sm:$0xff]  ;;  %v337_v49 = vld [vmem:[%s13705_s18 + $0x8] sm:$0xff] }
0x2496   :  { %v11078_v6 = vpop.eup %11077  ;;  %v8441_v53 = vmul.f32 -1.442695, %v7537_v15 }
0x2497   :  { %v11080_v12 = vpop.eup %11079  ;;  %v7565_v48 = vadd.f32 1.0, %v11078_v6  ;;  %v8440_v0 = vmul.f32 -1.442695, %v7532_v59 }
0x2498   :  { %v7564_v5 = vadd.f32 1.0, %v11080_v12  ;;  %11089 = vpow2.f32 %v8441_v53 }
0x2499   :  { %11091 = vrcp.f32 %v7565_v48 }
0x249a   :  { %v11082_v20 = vpop.eup %11081  ;;  %11093 = vrcp.f32 %v7564_v5 }
0x249b   :  { %v11084_v61 = vpop.eup %11083  ;;  %v7567_v38 = vadd.f32 1.0, %v11082_v20  ;;  %11095 = vpow2.f32 %v8440_v0 }
0x249c   :  { %v7566_v28 = vadd.f32 1.0, %v11084_v61 }
0x249d   :  { %11097 = vrcp.f32 %v7567_v38 }
0x249e   :  { %v11086_v14 = vpop.eup %11085  ;;  %11099 = vrcp.f32 %v7566_v28 }
0x249f   :  { %v11088_v25 = vpop.eup %11087  ;;  %v7569_v35 = vadd.f32 1.0, %v11086_v14 }
0x24a0   :  { %v7568_v11 = vadd.f32 1.0, %v11088_v25 }
0x24a1   :  { %11101 = vrcp.f32 %v7569_v35 }
0x24a2   :  { %v11090_v45 = vpop.eup %11089  ;;  %11103 = vrcp.f32 %v7568_v11 }
0x24a3   :  { %v11092_v7 = vpop.eup %11091  ;;  %v7571_v2 = vadd.f32 1.0, %v11090_v45 }
0x24a4   :  { %v11094_v54 = vpop.eup %11093  ;;  %v7589_v43 = vmul.f32 %v11092_v7, %v7467_v10  ;;  %v13708_v7 = vld [vmem:[#allocation20_spill] sm:$0xff] }
0x24a5   :  { %v11096_v4 = vpop.eup %11095  ;;  %11105 = vrcp.f32 %v7571_v2  ;;  %v7588_v19 = vmul.f32 %v11094_v54, %v7462_v63  ;;  %v7825_v63 = vadd.s32 8, %v13708_v7  ;;  %v7826_v54 = vcvt.s32.f32 %v13708_v7 }
0x24a6   :  { %v7570_v3 = vadd.f32 1.0, %v11096_v4  ;;  %v8472_v4 = vld [vmem:[%s13707_s5] ss:$0 sm:$0xff] }
0x24a7   :  { %v11098_v26 = vpop.eup %11097  ;;  %v10117_v33 = vpack.i.bf16 %v7589_v43, %v7588_v19  ;;  %v9899_v40 = vpack.c.bf16 %v7589_v43, %v7588_v19  ;;  %v7827_v2 = vcvt.s32.f32 %v7825_v63  ;;  %v7835_v19 = vadd.f32 %v8471_v62, %v7826_v54 }
0x24a8   :  { %v11100_v36 = vpop.eup %11099  ;;  %11107 = vrcp.f32 %v7570_v3  ;;  %v7591_v30 = vmul.f32 %v11098_v26, %v7477_v32 }
0x24a9   :  { %10118 = vrot.lane.b32.xlu1 %v10117_v33, %s11236_s14  ;;  %9901 = vmatprep.subr.msk.bf16.mxu0 %vm13530_vm5, %v9899_v40  ;;  %v7590_v17 = vmul.f32 %v11100_v36, %v7472_v21  ;;  %v7836_v43 = vadd.f32 %v8471_v62, %v7827_v2  ;;  %vm7844_vm7 = vcmp.lt.f32.partialorder %v7835_v19, %v8472_v4  ;;  %v13710_v33 = vmov 0.0   ;;  %v13711_v36 = vld [vmem:[#allocation21_spill] sm:$0xff] }
0x24aa   :  { %9904 = vmatpush3.bf16.msk.msra.mxu0 %vm13530_vm5, %v9899_v40 }
0x24ab   :  { %v11102_v27 = vpop.eup %11101  ;;  %v10122_v18 = vpack.i.bf16 %v7591_v30, %v7590_v17  ;;  %v9905_v58 = vpack.c.bf16 %v7591_v30, %v7590_v17  ;;  %vm7845_vm6 = vcmp.lt.f32.partialorder %v7836_v43, %v8472_v4  ;;  %v8473_v17 = vsel %vm7844_vm7, 1.0, %v13710_v33 }
0x24ac   :  { %v11104_v55 = vpop.eup %11103  ;;  %v7593_v42 = vmul.f32 %v11102_v27, %v7487_v52  ;;  %v8474_v40 = vsel %vm7845_vm6, 1.0, %v13710_v33  ;;  %v7855_v52 = vld [vmem:[%s13709_s21 + $0x8] sm:$0xff] }
0x24ad   :  { %10123 = vrot.lane.b32.xlu0 %v10122_v18, %s11236_s14  ;;  %9907 = vmatprep.subr.msk.bf16.mxu0 %vm13530_vm5, %v9905_v58  ;;  %v7592_v46 = vmul.f32 %v11104_v55, %v7482_v24  ;;  %v7854_v24 = vld [vmem:[%s13709_s21] sm:$0xff] }
0x24ae   :  { %9910 = vmatpush3.bf16.msk.msra.mxu0 %vm13530_vm5, %v9905_v58 }
0x24af   :  { %v11106_v34 = vpop.eup %11105  ;;  %v10127_v39 = vpack.i.bf16 %v7593_v42, %v7592_v46  ;;  %v9911_v47 = vpack.c.bf16 %v7593_v42, %v7592_v46 }
0x24b0   :  { %v7595_v16 = vmul.f32 %v11106_v34, %v7497_v22 }
0x24b1   :  { %10128 = vrot.lane.b32.xlu1 %v10127_v39, %s11236_s14  ;;  %9913 = vmatprep.subr.msk.bf16.mxu0 %vm13530_vm5, %v9911_v47 }
0x24b2   :  { %v11108_v37 = vpop.eup %11107  ;;  %9916 = vmatpush3.bf16.msk.msra.mxu0 %vm13530_vm5, %v9911_v47 }
0x24b3   :  { %v7594_v15 = vmul.f32 %v11108_v37, %v7492_v9 }
0x24b5   :  { %v10132_v31 = vpack.i.bf16 %v7595_v16, %v7594_v15  ;;  %7812 = vperm.xlu1 %9986, %v8470_v57   ;;  %v9917_v59 = vpack.c.bf16 %v7595_v16, %v7594_v15 }
0x24b7   :  { %10133 = vrot.lane.b32.xlu0 %v10132_v31, %s11236_s14  ;;  %9919 = vmatprep.subr.msk.bf16.mxu0 %vm13530_vm5, %v9917_v59 }
0x24b8   :  { %9922 = vmatpush3.bf16.msk.msra.mxu0 %vm13530_vm5, %v9917_v59 }
0x24bb   :  { %9661 = vmatmul.mubr.msk.f32.vlgmr.msra.gmra.mrb[146].mxu0 %vm7346_vm4, %v337_v49 }
0x251b   :  { %v10119_v6 = vpop.permute.xlu1 %10118 }
0x251c   :  { %v10121_v53 = vunpack.i.h.bf16 %v10119_v6  ;;  %v10120_v12 = vunpack.i.l.bf16 %v10119_v6 }
0x251e   :  { %v9875_v48 = vpack.c.bf16 %v10121_v53, %v10120_v12 }
0x251f   :  { %v10124_v0 = vpop.permute.xlu0 %10123 }
0x2520   :  { %v10126_v5 = vunpack.i.h.bf16 %v10124_v0  ;;  %v10125_v20 = vunpack.i.l.bf16 %v10124_v0  ;;  %9877 = vmatprep.subr.msk.bf16.mxu1 %vm13423_vm1, %v9875_v48 }
0x2521   :  { %9880 = vmatpush3.bf16.msk.msra.mxu1 %vm13423_vm1, %v9875_v48 }
0x2522   :  { %v9881_v61 = vpack.c.bf16 %v10126_v5, %v10125_v20 }
0x2523   :  { %v10129_v51 = vpop.permute.xlu1 %10128 }
0x2524   :  { %v10131_v38 = vunpack.i.h.bf16 %v10129_v51  ;;  %v10130_v28 = vunpack.i.l.bf16 %v10129_v51  ;;  %9883 = vmatprep.subr.msk.bf16.mxu1 %vm13423_vm1, %v9881_v61 }
0x2525   :  { %9886 = vmatpush3.bf16.msk.msra.mxu1 %vm13423_vm1, %v9881_v61 }
0x2526   :  { %v9887_v14 = vpack.c.bf16 %v10131_v38, %v10130_v28 }
0x2528   :  { %9889 = vmatprep.subr.msk.bf16.mxu1 %vm13423_vm1, %v9887_v14 }
0x2529   :  { %v10134_v1 = vpop.permute.xlu0 %10133  ;;  %9892 = vmatpush3.bf16.msk.msra.mxu1 %vm13423_vm1, %v9887_v14 }
0x252a   :  { %v10136_v25 = vunpack.i.h.bf16 %v10134_v1  ;;  %v10135_v35 = vunpack.i.l.bf16 %v10134_v1 }
0x252c   :  { %v9893_v11 = vpack.c.bf16 %v10136_v25, %v10135_v35 }
0x252e   :  { %9895 = vmatprep.subr.msk.bf16.mxu1 %vm13423_vm1, %v9893_v11 }
0x252f   :  { %9898 = vmatpush3.bf16.msk.msra.mxu1 %vm13423_vm1, %v9893_v11 }
0x2532   :  { %9642 = vmatmul.mubr.msk.f32.vlgmr.msra.gmra.mrb[168].mxu1 %vm7346_vm4, %v339_v23 }
0x2534   :  { %v7813_v44 = vpop.permute.xlu1 %7812 }
0x258e   :  { %v9662_v45 = vpop.f32.mrb[146].mxu0 }
0x258f   :  { %v7797_v10 = vpop.f32.mrb[147].mxu0 }
0x2605   :  { %v9643_v32 = vpop.f32.mrb[168].mxu1 }
0x2606   :  { %v7803_v3 = vadd.f32 %v9662_v45, %v9643_v32  ;;  %v7716_v29 = vpop.f32.mrb[169].mxu1 }
0x2607   :  { %v7798_v26 = vadd.f32 %v7797_v10, %v7716_v29 }
0x2608   :  { %v7816_v60 = vadd.f32 %v7813_v44, %v7803_v3 }
0x2609   :  { %v7815_v21 = vadd.f32 %v7813_v44, %v7798_v26 }
0x260a   :  { %v7822_v30 = vmul.f32 %v13711_v36, %v7816_v60 }
0x260b   :  { %v7821_v41 = vmul.f32 %v13711_v36, %v7815_v21 }
0x260c   :  { %v7851_v27 = vmul.f32 %v8474_v40, %v7822_v30 }
0x260d   :  { %v7850_v18 = vmul.f32 %v8473_v17, %v7821_v41 }
0x260e   :  { %v7857_v58 = vsub.f32 %v7851_v27, %v7855_v52  ;;  %7853 = vst.msk [vmem:[%s11403_s9 + $0x8] sm:$0xff] %vm347_vm0, %v7851_v27 }
0x260f   :  { %v7856_v55 = vsub.f32 %v7850_v18, %v7854_v24  ;;  %7852 = vst.msk [vmem:[%s11403_s9] sm:$0xff] %vm347_vm0, %v7850_v18  ;;  %s11171_s9 = scalar_lea.vmem %s7886_s25, 16 }
0x2610   :  { %v7859_v42 = vand.u32 2147483647, %v7857_v58  ;;  %p11172_p0 = scmp.ne.s32.totalorder %s7886_s25, %s11171_s9  ;;  %p11177_p2 = scmp.lt.s32.totalorder %s11175_s29, %s11171_s9 }
0x2611   :  { %v7858_v8 = vand.u32 2147483647, %v7856_v55 }
0x2612   :  { %v7863_v46 = vsel %vm347_vm0, %v7859_v42, 0.0  ;;  %p11178_p3 = por %p11177_p2, %p11176_p1 }
0x2613   :  { %7864 = vadd.xlane.f32.xlu1 %v7863_v46  ;;  %v7860_v22 = vsel %vm347_vm0, %v7858_v8, 0.0 }
0x2614   :  { %7861 = vadd.xlane.f32.xlu0 %v7860_v22  ;;  %p11179_p4 = pnand %p11178_p3, %p11172_p0 }
0x26a0   :  { %v7865_v34 = vpop.xlane.xlu1 %7864 }
0x26a1   :  { %v7862_v39 = vpop.xlane.xlu0 %7861 }
0x26a2   :  { %v7866_v47 = vadd.f32 %v7865_v34, %v7862_v39 }
0x26a4   :  { %v7867_v56 = vrot.slane %v7866_v47, 4 }
0x26a6   :  { %v7868_v50 = vadd.f32 %v7867_v56, %v7866_v47 }
0x26a8   :  { %v7869_v13 = vrot.slane %v7868_v50, 2 }
0x26aa   :  { %v7870_v16 = vadd.f32 %v7869_v13, %v7868_v50 }
0x26ac   :  { %v7871_v9 = vrot.slane %v7870_v16, 1 }
0x26ae   :  { %v7872_v37 = vadd.f32 %v7871_v9, %v7870_v16 }
0x26b0   :  { %v7874_v57 = vmul.f32 0.00390625, %v7872_v37 }
0x26b2   :  { %7876 = vst.msk [vmem:[#allocation3] sm:$0x1] %vm7875_vm8, %v7874_v57 }
0x26b3   :  { %11182 = shalt.err (!%p11179_p4)
}
0x26b4   :  { %s11183_s3 = scalar_lea.hbm %s11408_s13, 16 }
0x26b5   :  { %p11184_p5 = scmp.ne.s32.totalorder %s11408_s13, %s11183_s3  ;;  %p11187_p6 = scmp.lt.u32.totalorder %s11183_s3, %s11408_s13 }
0x26b7   :  { %p11189_p7 = pnand %p11187_p6, %p11184_p5 }
0x26b9   :  { %11192 = shalt.err (!%p11189_p7)
}
0x26ba   :  { %7888 = dma.vmem_to_hbm [thread:$0]  %s7886_s25, 16, %s11408_s13, [#allocation4]  }
0x26bb   :  { %11193 = dma.done.wait [#allocation4], 16  }
0x26bc   :  { %11194 = vsyncadd [#allocation4], 4294967280 }
0x26bd   :  { %7894 = vsyncpa [#allocation4], 1 }

</bundles_post_ra>
